<compile_context>
chip_gen: v6e
topology: v6e:2x2x1
jax: 0.10.0
libtpu: 0.0.40
codegen_flags: <defaults>
</compile_context>

<pallas_src>
import jax
import jax.numpy as jnp
from jax.experimental import pallas as pl
from jax.experimental.pallas import tpu as pltpu

KW1, KW2, KW3 = 5, 4, 3
C0, C1, C2, C3 = 2, 8, 32, 128
TAIL_PAD = (KW1 - 1) + (KW2 - 1) + (KW3 - 1)   # 9 extra zero rows per batch elem


# ---------------------------------------------------------------------------
# Kernel
# ---------------------------------------------------------------------------
def cnn_meth_fused_kernel(x_ref,
                          w1_ref, b1_ref,
                          w2_ref, b2_ref,
                          w3_ref, b3_ref,
                          wl_ref, bl_ref,
                          o_ref):
    """Fused Conv(1,5)+BN+ReLU -> Conv(1,4)+BN+ReLU -> Conv(1,3)+BN+ReLU
    -> Linear(77568, 1) for one batch element.  All image rows are batched into
    the matmul M dimension; the kw conv taps live in the matmul N dimension
    (weights pre-concatenated along output columns), so each layer is a single
    MXU matmul followed by kw static shifted-slice adds on the VPU/XLU."""

    def conv_bn_relu(h, wcat_ref, b_ref, kw, cout):
        m_out = h.shape[0] - (kw - 1)
        # One matmul per layer: (M, Cin) @ (Cin, kw*Cout); BN already folded in.
        z = jnp.dot(h, wcat_ref[...], preferred_element_type=jnp.float32)
        acc = z[0:m_out, 0:cout]
        for j in range(1, kw):                       # static tap-combine loop
            acc = acc + z[j:j + m_out, j * cout:(j + 1) * cout]
        return jnp.maximum(acc + b_ref[...], 0.0)    # folded bias/BN shift + ReLU

    x = x_ref[0]                                               # (M0, 2)
    h = conv_bn_relu(x, w1_ref, b1_ref, KW1, C1)               # (M0-4, 8)
    h = conv_bn_relu(h, w2_ref, b2_ref, KW2, C2)               # (M0-7, 32)
    h = conv_bn_relu(h, w3_ref, b3_ref, KW3, C3)               # (Hp*Wp, 128)

    # Fused Linear: wl_ref is pre-permuted to (Hp*Wp, 128) with zeros at the
    # junk (row-crossing / out-of-width) positions, so this is exactly
    # wl @ flatten(conv_out) in PyTorch's NCHW flatten order.
    cs = jnp.sum(h * wl_ref[...], axis=0, keepdims=True)       # (1, 128)
    o_ref[0] = jnp.sum(cs, axis=1, keepdims=True) + bl_ref[...]  # (1, 1)


# ---------------------------------------------------------------------------
# Parameters (deterministic synthetic init; shapes follow cnn_meth.__init__)
# ---------------------------------------------------------------------------
def init_params(key, H, W):
    Hp, Wp = H + 2, W + 2
    W3 = Wp - TAIL_PAD
    k_linear = C3 * Hp * W3
    ks = jax.random.split(key, 8)

    def conv_w(k, kw, cin, cout):
        scale = 1.0 / jnp.sqrt(jnp.float32(cin * kw))
        return jax.random.normal(k, (kw, cin, cout), jnp.float32) * scale

    def bn(c, eps=1e-5):
        # PyTorch BatchNorm2d eval defaults: gamma=1, beta=0, mean=0, var=1.
        gamma = jnp.ones((1, c), jnp.float32)
        beta = jnp.zeros((1, c), jnp.float32)
        mean = jnp.zeros((1, c), jnp.float32)
        var = jnp.ones((1, c), jnp.float32)
        s = gamma / jnp.sqrt(var + eps)
        t = beta - mean * s
        return s, t

    p = {}
    p["w1"] = conv_w(ks[0], KW1, C0, C1)
    p["b1"] = jax.random.normal(ks[1], (1, C1), jnp.float32) * 0.01
    p["s1"], p["t1"] = bn(C1)
    p["w2"] = conv_w(ks[2], KW2, C1, C2)
    p["b2"] = jax.random.normal(ks[3], (1, C2), jnp.float32) * 0.01
    p["s2"], p["t2"] = bn(C2)
    p["w3"] = conv_w(ks[4], KW3, C2, C3)
    p["b3"] = jax.random.normal(ks[5], (1, C3), jnp.float32) * 0.01
    p["s3"], p["t3"] = bn(C3)
    p["wl"] = jax.random.normal(ks[6], (1, k_linear), jnp.float32) / jnp.sqrt(
        jnp.float32(k_linear))
    p["bl"] = jax.random.normal(ks[7], (1, 1), jnp.float32) * 0.01
    return p


def prepare_inference_params(p, H, W):
    """One-time weight prep (outside the hot path): fold BatchNorm + conv bias
    into the conv weights, concatenate the kw tap matrices along output columns
    (tap fold into matmul N dim), and permute the Linear weight into conv-output
    (row, w, channel) order with zeros at junk positions."""
    Hp, Wp = H + 2, W + 2
    W3 = Wp - TAIL_PAD

    def fold_conv(w_kic, b, s, t):
        kw, cin, cout = w_kic.shape
        wf = w_kic * s.reshape(1, 1, cout)                           # BN scale
        wcat = jnp.transpose(wf, (1, 0, 2)).reshape(cin, kw * cout)  # (Cin, kw*Cout)
        bf = b * s + t                                               # BN shift + bias
        return wcat, bf

    w1c, b1f = fold_conv(p["w1"], p["b1"], p["s1"], p["t1"])   # (2, 40),  (1, 8)
    w2c, b2f = fold_conv(p["w2"], p["b2"], p["s2"], p["t2"])   # (8, 128), (1, 32)
    w3c, b3f = fold_conv(p["w3"], p["b3"], p["s3"], p["t3"])   # (32, 384),(1, 128)

    # Linear weight: torch flatten order is (C3, Hp, W3); permute to
    # (row, w, channel), zero-pad w from W3 to Wp (row-crossing junk positions
    # get weight 0), flatten rows -> (Hp*Wp, C3).
    wl = p["wl"].reshape(C3, Hp, W3)
    wl = jnp.transpose(wl, (1, 2, 0))                          # (Hp, W3, C3)
    wl = jnp.pad(wl, ((0, 0), (0, Wp - W3), (0, 0)))           # (Hp, Wp, C3)
    wl_block = wl.reshape(Hp * Wp, C3)

    return dict(w1=w1c, b1=b1f, w2=w2c, b2=b2f, w3=w3c, b3=b3f,
                wl=wl_block, bl=p["bl"])


# ---------------------------------------------------------------------------
# Forward wrapper
# ---------------------------------------------------------------------------
def cnn_meth_forward(x, prep):
    # x: (N, 2, H, W) NCHW float32; eval-mode forward.
    N, cin, H, W = x.shape
    assert cin == C0
    Hp, Wp = H + 2, W + 2                  # Conv1 padding=(1,1) pads H and W
    M0 = Hp * Wp + TAIL_PAD                # rows per batch element fed to kernel

    # NCHW -> per-batch channel-last flattened slab (row-major over (h, w)),
    # plus TAIL_PAD zero rows so every layer's output length lines up at Hp*Wp.
    xp = jnp.pad(x, ((0, 0), (0, 0), (1, 1), (1, 1)))
    xb = jnp.transpose(xp, (0, 2, 3, 1)).reshape(N, Hp * Wp, C0)
    xb = jnp.pad(xb, ((0, 0), (0, TAIL_PAD), (0, 0)))          # (N, M0, 2)

    def full_spec(arr):
        nd = arr.ndim
        return pl.BlockSpec(arr.shape, lambda n, _nd=nd: (0,) * _nd)

    in_specs = [pl.BlockSpec((1, M0, C0), lambda n: (n, 0, 0))] + [
        full_spec(prep[k])
        for k in ("w1", "b1", "w2", "b2", "w3", "b3", "wl", "bl")
    ]

    out = pl.pallas_call(
        cnn_meth_fused_kernel,
        out_shape=jax.ShapeDtypeStruct((N, 1, 1), jnp.float32),
        grid=(N,),
        in_specs=in_specs,
        out_specs=pl.BlockSpec((1, 1, 1), lambda n: (n, 0, 0)),
        compiler_params=pltpu.CompilerParams(
            dimension_semantics=("parallel",)),
    )(xb, prep["w1"], prep["b1"], prep["w2"], prep["b2"],
      prep["w3"], prep["b3"], prep["wl"], prep["bl"])

    # TODO(synk): Dropout(p=0.2) is identity in eval mode; training-mode RNG not modeled.
    return out.reshape(N, 1)


# ---------------------------------------------------------------------------
if __name__ == "__main__":
    key = jax.random.PRNGKey(0)
    kx, kp = jax.random.split(key)

    # Smallest input consistent with Linear(77568, 1):
    # (N, 2, 4, 108) -> conv stack -> (N, 128, 6, 101); 128*6*101 = 77568.
    N, H, W = 2, 4, 108
    x = jax.random.normal(kx, (N, C0, H, W), dtype=jnp.float32)

    params = init_params(kp, H, W)
    assert params["wl"].shape[1] == 77568
    prep = prepare_inference_params(params, H, W)

    y = cnn_meth_forward(x, prep)
    y = jax.block_until_ready(y)

    assert y.shape == (N, 1), y.shape
    assert bool(jnp.all(jnp.isfinite(y)))
    print("KERNEL_OK")
</pallas_src>

<mosaic_0001>
module attributes {stable_mosaic.version = 11 : i64} {
  func.func @cnn_meth_fused_kernel(%arg0: i32, %arg1: memref<1x669x2xf32, #tpu.memory_space<vmem>>, %arg2: memref<2x40xf32, #tpu.memory_space<vmem>>, %arg3: memref<1x8xf32, #tpu.memory_space<vmem>>, %arg4: memref<8x128xf32, #tpu.memory_space<vmem>>, %arg5: memref<1x32xf32, #tpu.memory_space<vmem>>, %arg6: memref<32x384xf32, #tpu.memory_space<vmem>>, %arg7: memref<1x128xf32, #tpu.memory_space<vmem>>, %arg8: memref<660x128xf32, #tpu.memory_space<vmem>>, %arg9: memref<1x1xf32, #tpu.memory_space<vmem>>, %arg10: memref<1x1x1xf32, #tpu.memory_space<vmem>>) attributes {dimension_semantics = [#tpu.dimension_semantics<parallel>], iteration_bounds = array<i64: 2>, scalar_prefetch = 0 : i64, scratch_operands = 0 : i64, tpu.core_type = #tpu.core_type<tc>, window_params = [{transform_indices = @transform_0, window_bounds = array<i64: 1, 669, 2>}, {pipeline_mode = #tpu.pipeline_mode<synchronous>, transform_indices = @transform_1, window_bounds = array<i64: 2, 40>}, {pipeline_mode = #tpu.pipeline_mode<synchronous>, transform_indices = @transform_2, window_bounds = array<i64: 1, 8>}, {pipeline_mode = #tpu.pipeline_mode<synchronous>, transform_indices = @transform_3, window_bounds = array<i64: 8, 128>}, {pipeline_mode = #tpu.pipeline_mode<synchronous>, transform_indices = @transform_4, window_bounds = array<i64: 1, 32>}, {pipeline_mode = #tpu.pipeline_mode<synchronous>, transform_indices = @transform_5, window_bounds = array<i64: 32, 384>}, {pipeline_mode = #tpu.pipeline_mode<synchronous>, transform_indices = @transform_6, window_bounds = array<i64: 1, 128>}, {pipeline_mode = #tpu.pipeline_mode<synchronous>, transform_indices = @transform_7, window_bounds = array<i64: 660, 128>}, {pipeline_mode = #tpu.pipeline_mode<synchronous>, transform_indices = @transform_8, window_bounds = array<i64: 1, 1>}, {transform_indices = @transform_9, window_bounds = array<i64: 1, 1, 1>}]} {
    %c0 = arith.constant 0 : index
    %c0_0 = arith.constant 0 : index
    %c0_1 = arith.constant 0 : index
    %0 = vector.load %arg1[%c0, %c0_0, %c0_1] : memref<1x669x2xf32, #tpu.memory_space<vmem>>, vector<1x669x2xf32>
    %1 = vector.shape_cast %0 : vector<1x669x2xf32> to vector<669x2xf32>
    %c0_2 = arith.constant 0 : index
    %c0_3 = arith.constant 0 : index
    %2 = vector.load %arg2[%c0_2, %c0_3] : memref<2x40xf32, #tpu.memory_space<vmem>>, vector<2x40xf32>
    %cst = arith.constant dense<0.000000e+00> : vector<669x40xf32>
    %3 = tpu.matmul %1, %2, %cst {dimension_numbers = #tpu.dot_dimension_numbers<[1], [0], [0], [1], [0, 0, 1, 1], [], []>} : vector<669x2xf32>, vector<2x40xf32>, vector<669x40xf32> -> vector<669x40xf32>
    %4 = vector.extract_strided_slice %3 {offsets = [0, 0], sizes = [665, 8], strides = [1, 1]} : vector<669x40xf32> to vector<665x8xf32>
    %5 = vector.extract_strided_slice %3 {offsets = [1, 8], sizes = [665, 8], strides = [1, 1]} : vector<669x40xf32> to vector<665x8xf32>
    %6 = arith.addf %4, %5 : vector<665x8xf32>
    %7 = vector.extract_strided_slice %3 {offsets = [2, 16], sizes = [665, 8], strides = [1, 1]} : vector<669x40xf32> to vector<665x8xf32>
    %8 = arith.addf %6, %7 : vector<665x8xf32>
    %9 = vector.extract_strided_slice %3 {offsets = [3, 24], sizes = [665, 8], strides = [1, 1]} : vector<669x40xf32> to vector<665x8xf32>
    %10 = arith.addf %8, %9 : vector<665x8xf32>
    %11 = vector.extract_strided_slice %3 {offsets = [4, 32], sizes = [665, 8], strides = [1, 1]} : vector<669x40xf32> to vector<665x8xf32>
    %12 = arith.addf %10, %11 : vector<665x8xf32>
    %c0_4 = arith.constant 0 : index
    %c0_5 = arith.constant 0 : index
    %13 = vector.load %arg3[%c0_4, %c0_5] : memref<1x8xf32, #tpu.memory_space<vmem>>, vector<1x8xf32>
    %14 = vector.broadcast %13 : vector<1x8xf32> to vector<665x8xf32>
    %15 = arith.addf %12, %14 : vector<665x8xf32>
    %cst_6 = arith.constant 0.000000e+00 : f32
    %16 = vector.broadcast %cst_6 : f32 to vector<665x8xf32>
    %17 = arith.maximumf %15, %16 : vector<665x8xf32>
    %c0_7 = arith.constant 0 : index
    %c0_8 = arith.constant 0 : index
    %18 = vector.load %arg4[%c0_7, %c0_8] : memref<8x128xf32, #tpu.memory_space<vmem>>, vector<8x128xf32>
    %cst_9 = arith.constant dense<0.000000e+00> : vector<665x128xf32>
    %19 = tpu.matmul %17, %18, %cst_9 {dimension_numbers = #tpu.dot_dimension_numbers<[1], [0], [0], [1], [0, 0, 1, 1], [], []>} : vector<665x8xf32>, vector<8x128xf32>, vector<665x128xf32> -> vector<665x128xf32>
    %20 = vector.extract_strided_slice %19 {offsets = [0, 0], sizes = [662, 32], strides = [1, 1]} : vector<665x128xf32> to vector<662x32xf32>
    %21 = vector.extract_strided_slice %19 {offsets = [1, 32], sizes = [662, 32], strides = [1, 1]} : vector<665x128xf32> to vector<662x32xf32>
    %22 = arith.addf %20, %21 : vector<662x32xf32>
    %23 = vector.extract_strided_slice %19 {offsets = [2, 64], sizes = [662, 32], strides = [1, 1]} : vector<665x128xf32> to vector<662x32xf32>
    %24 = arith.addf %22, %23 : vector<662x32xf32>
    %25 = vector.extract_strided_slice %19 {offsets = [3, 96], sizes = [662, 32], strides = [1, 1]} : vector<665x128xf32> to vector<662x32xf32>
    %26 = arith.addf %24, %25 : vector<662x32xf32>
    %c0_10 = arith.constant 0 : index
    %c0_11 = arith.constant 0 : index
    %27 = vector.load %arg5[%c0_10, %c0_11] : memref<1x32xf32, #tpu.memory_space<vmem>>, vector<1x32xf32>
    %28 = vector.broadcast %27 : vector<1x32xf32> to vector<662x32xf32>
    %29 = arith.addf %26, %28 : vector<662x32xf32>
    %cst_12 = arith.constant 0.000000e+00 : f32
    %30 = vector.broadcast %cst_12 : f32 to vector<662x32xf32>
    %31 = arith.maximumf %29, %30 : vector<662x32xf32>
    %c0_13 = arith.constant 0 : index
    %c0_14 = arith.constant 0 : index
    %32 = vector.load %arg6[%c0_13, %c0_14] : memref<32x384xf32, #tpu.memory_space<vmem>>, vector<32x384xf32>
    %cst_15 = arith.constant dense<0.000000e+00> : vector<662x384xf32>
    %33 = tpu.matmul %31, %32, %cst_15 {dimension_numbers = #tpu.dot_dimension_numbers<[1], [0], [0], [1], [0, 0, 1, 1], [], []>} : vector<662x32xf32>, vector<32x384xf32>, vector<662x384xf32> -> vector<662x384xf32>
    %34 = vector.extract_strided_slice %33 {offsets = [0, 0], sizes = [660, 128], strides = [1, 1]} : vector<662x384xf32> to vector<660x128xf32>
    %35 = vector.extract_strided_slice %33 {offsets = [1, 128], sizes = [660, 128], strides = [1, 1]} : vector<662x384xf32> to vector<660x128xf32>
    %36 = arith.addf %34, %35 : vector<660x128xf32>
    %37 = vector.extract_strided_slice %33 {offsets = [2, 256], sizes = [660, 128], strides = [1, 1]} : vector<662x384xf32> to vector<660x128xf32>
    %38 = arith.addf %36, %37 : vector<660x128xf32>
    %c0_16 = arith.constant 0 : index
    %c0_17 = arith.constant 0 : index
    %39 = vector.load %arg7[%c0_16, %c0_17] : memref<1x128xf32, #tpu.memory_space<vmem>>, vector<1x128xf32>
    %40 = vector.broadcast %39 : vector<1x128xf32> to vector<660x128xf32>
    %41 = arith.addf %38, %40 : vector<660x128xf32>
    %cst_18 = arith.constant 0.000000e+00 : f32
    %42 = vector.broadcast %cst_18 : f32 to vector<660x128xf32>
    %43 = arith.maximumf %41, %42 : vector<660x128xf32>
    %c0_19 = arith.constant 0 : index
    %c0_20 = arith.constant 0 : index
    %44 = vector.load %arg8[%c0_19, %c0_20] : memref<660x128xf32, #tpu.memory_space<vmem>>, vector<660x128xf32>
    %45 = arith.mulf %43, %44 : vector<660x128xf32>
    %cst_21 = arith.constant dense<0.000000e+00> : vector<128xf32>
    %46 = vector.multi_reduction <add>, %45, %cst_21 [0] : vector<660x128xf32> to vector<128xf32>
    %47 = vector.shape_cast %46 : vector<128xf32> to vector<1x128xf32>
    %cst_22 = arith.constant dense<0.000000e+00> : vector<1xf32>
    %48 = vector.multi_reduction <add>, %47, %cst_22 [1] : vector<1x128xf32> to vector<1xf32>
    %49 = vector.shape_cast %48 : vector<1xf32> to vector<1x1xf32>
    %c0_23 = arith.constant 0 : index
    %c0_24 = arith.constant 0 : index
    %50 = vector.load %arg9[%c0_23, %c0_24] : memref<1x1xf32, #tpu.memory_space<vmem>>, vector<1x1xf32>
    %51 = arith.addf %49, %50 : vector<1x1xf32>
    %c0_25 = arith.constant 0 : index
    %c0_26 = arith.constant 0 : index
    %c0_27 = arith.constant 0 : index
    %52 = vector.load %arg10[%c0_25, %c0_26, %c0_27] : memref<1x1x1xf32, #tpu.memory_space<vmem>>, vector<1x1x1xf32>
    %53 = vector.shape_cast %52 : vector<1x1x1xf32> to vector<1x1xf32>
    %54 = vector.shape_cast %51 : vector<1x1xf32> to vector<1x1x1xf32>
    tpu.vector_store %arg10[%c0_25, %c0_26, %c0_27], %54 {strides = array<i32>} : memref<1x1x1xf32, #tpu.memory_space<vmem>>, vector<1x1x1xf32>,
    return
  }
  func.func @transform_0(%arg0: i32) -> (i32, i32, i32) {
    %c0_i32 = arith.constant 0 : i32
    %c0_i32_0 = arith.constant 0 : i32
    %c0_i32_1 = arith.constant 0 : i32
    return %arg0, %c0_i32, %c0_i32_0 : i32, i32, i32
  }
  func.func @transform_1(%arg0: i32) -> (i32, i32) {
    %c0_i32 = arith.constant 0 : i32
    %c0_i32_0 = arith.constant 0 : i32
    %c0_i32_1 = arith.constant 0 : i32
    return %c0_i32, %c0_i32_0 : i32, i32
  }
  func.func @transform_2(%arg0: i32) -> (i32, i32) {
    %c0_i32 = arith.constant 0 : i32
    %c0_i32_0 = arith.constant 0 : i32
    %c0_i32_1 = arith.constant 0 : i32
    return %c0_i32, %c0_i32_0 : i32, i32
  }
  func.func @transform_3(%arg0: i32) -> (i32, i32) {
    %c0_i32 = arith.constant 0 : i32
    %c0_i32_0 = arith.constant 0 : i32
    %c0_i32_1 = arith.constant 0 : i32
    return %c0_i32, %c0_i32_0 : i32, i32
  }
  func.func @transform_4(%arg0: i32) -> (i32, i32) {
    %c0_i32 = arith.constant 0 : i32
    %c0_i32_0 = arith.constant 0 : i32
    %c0_i32_1 = arith.constant 0 : i32
    return %c0_i32, %c0_i32_0 : i32, i32
  }
  func.func @transform_5(%arg0: i32) -> (i32, i32) {
    %c0_i32 = arith.constant 0 : i32
    %c0_i32_0 = arith.constant 0 : i32
    %c0_i32_1 = arith.constant 0 : i32
    return %c0_i32, %c0_i32_0 : i32, i32
  }
  func.func @transform_6(%arg0: i32) -> (i32, i32) {
    %c0_i32 = arith.constant 0 : i32
    %c0_i32_0 = arith.constant 0 : i32
    %c0_i32_1 = arith.constant 0 : i32
    return %c0_i32, %c0_i32_0 : i32, i32
  }
  func.func @transform_7(%arg0: i32) -> (i32, i32) {
    %c0_i32 = arith.constant 0 : i32
    %c0_i32_0 = arith.constant 0 : i32
    %c0_i32_1 = arith.constant 0 : i32
    return %c0_i32, %c0_i32_0 : i32, i32
  }
  func.func @transform_8(%arg0: i32) -> (i32, i32) {
    %c0_i32 = arith.constant 0 : i32
    %c0_i32_0 = arith.constant 0 : i32
    %c0_i32_1 = arith.constant 0 : i32
    return %c0_i32, %c0_i32_0 : i32, i32
  }
  func.func @transform_9(%arg0: i32) -> (i32, i32, i32) {
    %c0_i32 = arith.constant 0 : i32
    %c0_i32_0 = arith.constant 0 : i32
    %c0_i32_1 = arith.constant 0 : i32
    return %arg0, %c0_i32, %c0_i32_0 : i32, i32, i32
  }
}

</mosaic_0001>

<bundles_post_ra>
// kernel: tpu_custom_call.1
= control target key start
LH: loop header
LB: loop body
LE: loop exit
PB: predicated region body
PF: predicated region fallthrough
CT: control target
= control target key end

     0   :  { %s9748_s11 = smov 0   ;;  %s13941_s0 = inlined_call_operand.vmem [shape: f32[2,669,2], index: 0, kind: input, shape index: {}]   ;;  %s13942_s1 = inlined_call_operand.vmem [shape: f32[2,40], index: 1, kind: input, shape index: {}]   ;;  %s13943_s2 = inlined_call_operand.vmem [shape: f32[1,8], index: 2, kind: input, shape index: {}]   ;;  %s13944_s3 = inlined_call_operand.vmem [shape: f32[8,128], index: 3, kind: input, shape index: {}]   ;;  %s13945_s4 = inlined_call_operand.vmem [shape: f32[1,32], index: 4, kind: input, shape index: {}]   ;;  %s13946_s5 = inlined_call_operand.vmem [shape: f32[32,384], index: 5, kind: input, shape index: {}]   ;;  %s13947_s6 = inlined_call_operand.vmem [shape: f32[1,128], index: 6, kind: input, shape index: {}]   ;;  %s13948_s7 = inlined_call_operand.vmem [shape: f32[660,128], index: 7, kind: input, shape index: {}]   ;;  %s13949_s8 = inlined_call_operand.<no memory space> [shape: f32[1,1], index: 8, kind: input, shape index: {}]   ;;  %s13950_s9 = inlined_call_operand.vmem [shape: f32[2,1,1], index: 9, kind: output, shape index: {}]  }
   0x1   :  { %v14_v0 = vstv %s13949_s8 }
   0x2   :  { %15 = vst [vmem:[#allocation2] sm:$0x1] %v14_v0 }
   0x3 LB: > { %s8536_s12 = sadd.s32 4294967295, %s9685_s11   ;;  %p8540_p0 = scmp.ge.s32.totalorder %s9685_s11, 1  ;;  %s9685_s11 = sphi %s9748_s11, %s21_s11  }
   0x4   : > { %p289_p1 = scmp.lt.s32.totalorder %s9685_s11, 3 }
   0x6   : > { %p290_p2 = pnand %p8540_p0, %p289_p1 }
   0x8   : > { %293 = sbr.rel (%p290_p2) target bundleno = 1874 (0x752), region = 56 }
   0xd   : > { %v415_v1 = vld [vmem:[%s13942_s1] sm:$0x3]  ;;  %vm669_vm0 = vcmask 1041408   ;;  %p323_p3 = scmp.lt.s32.totalorder %s8536_s12, 1  ;;  %vm416_vm1 = vcmask 15360   ;;  %vm2250_vm2 = vcmask 1044480  }
   0xe   : > { %9139 = vmatprep.subr.msk.mxu0 %vm669_vm0, %v415_v1  ;;  %vm1242_vm3 = vcmask 1046528   ;;  %s9687_s18 = smov 104   ;;  %s9688_s19 = smov 120   ;;  %vm2754_vm4 = vcmask 1043456   ;;  %vm1746_vm5 = vcmask 1045504   ;;  %vm3434_vm6 = vcmask 64512  }
   0xf   : > { %9140 = vmatpush3.msk.msra.mxu0 %vm669_vm0, %v415_v1  ;;  %s14183_s12 = smov (!%p323_p3, %s8536_s12), 1  ;;  %s9689_s20 = smov 96   ;;  %vm5934_vm7 = vcmask 261120   ;;  %vm9694_vm8 = vmmov 0   ;;  %vm8487_vm9 = vcmask 0  }
  0x10   : > { %s9652_s8 = smul.u32 672, %s14183_s12  ;;  %s9690_s21 = smov 112  }
  0x11   : > { %s9692_s28 = smov 64  }
  0x12   : > { %s9765_s17 = scalar_lea.vmem %s13941_s0, %s9652_s8 }
  0x13   : > { %v331_v2 = vld [vmem:[%s9765_s17] sm:$0xff]  ;;  %v332_v3 = vld [vmem:[%s9765_s17 + $0x8] sm:$0xff]  ;;  %v333_v4 = vld [vmem:[%s9765_s17 + $0x10] sm:$0xff] }
  0x14   : > { %9141 = vmatprep.mubr.msk.f32.mxu0 %vm416_vm1, %v331_v2  ;;  %v334_v5 = vld [vmem:[%s9765_s17 + $0x18] sm:$0xff]  ;;  %v335_v6 = vld [vmem:[%s9765_s17 + $0x20] sm:$0xff]  ;;  %v336_v7 = vld [vmem:[%s9765_s17 + $0x28] sm:$0xff] }
  0x15   : > { %9142 = vmatmul.mubr.msk.f32.vlgmr.msra.gmra.mxu0 %vm416_vm1, %v332_v3  ;;  %v337_v8 = vld [vmem:[%s9765_s17 + $0x30] sm:$0xff]  ;;  %v338_v9 = vld [vmem:[%s9765_s17 + $0x38] sm:$0xff]  ;;  %v339_v10 = vld [vmem:[%s9765_s17 + $0x40] sm:$0xff] }
  0x16   : > { %9144 = vmatprep.mubr.msk.f32.mxu0 %vm416_vm1, %v333_v4  ;;  %v340_v11 = vld [vmem:[%s9765_s17 + $0x48] sm:$0xff]  ;;  %v341_v12 = vld [vmem:[%s9765_s17 + $0x50] sm:$0xff]  ;;  %v342_v13 = vld [vmem:[%s9765_s17 + $0x58] sm:$0xff] }
  0x17   : > { %v343_v14 = vld [vmem:[%s9765_s17 + $0x60] sm:$0xff]  ;;  %v344_v15 = vld [vmem:[%s9765_s17 + $0x68] sm:$0xff]  ;;  %v345_v16 = vld [vmem:[%s9765_s17 + $0x70] sm:$0xff] }
  0x18   : > { %v346_v17 = vld [vmem:[%s9765_s17 + $0x78] sm:$0xff]  ;;  %v347_v18 = vld [vmem:[%s9765_s17 + $0x80] sm:$0xff]  ;;  %v348_v19 = vld [vmem:[%s9765_s17 + $0x88] sm:$0xff] }
  0x19   : > { %9145 = vmatmul.mubr.msk.f32.gmra.mxu0 %vm416_vm1, %v334_v5  ;;  %v349_v20 = vld [vmem:[%s9765_s17 + $0x90] sm:$0xff]  ;;  %v350_v21 = vld [vmem:[%s9765_s17 + $0x98] sm:$0xff]  ;;  %v351_v22 = vld [vmem:[%s9765_s17 + $0xa0] sm:$0xff] }
  0x1a   : > { %9147 = vmatprep.mubr.msk.f32.mxu0 %vm416_vm1, %v335_v6  ;;  %v352_v23 = vld [vmem:[%s9765_s17 + $0xa8] sm:$0xff]  ;;  %v353_v24 = vld [vmem:[%s9765_s17 + $0xb0] sm:$0xff]  ;;  %v354_v25 = vld [vmem:[%s9765_s17 + $0xb8] sm:$0xff] }
  0x1b   : > { %v355_v26 = vld [vmem:[%s9765_s17 + $0xc0] sm:$0xff]  ;;  %v356_v27 = vld [vmem:[%s9765_s17 + $0xc8] sm:$0xff]  ;;  %v357_v28 = vld [vmem:[%s9765_s17 + $0xd0] sm:$0xff] }
  0x1c   : > { %v358_v29 = vld [vmem:[%s9765_s17 + $0xd8] sm:$0xff]  ;;  %v359_v30 = vld [vmem:[%s9765_s17 + $0xe0] sm:$0xff]  ;;  %v360_v31 = vld [vmem:[%s9765_s17 + $0xe8] sm:$0xff] }
  0x1d   : > { %9148 = vmatmul.mubr.msk.f32.gmra.mxu0 %vm416_vm1, %v336_v7  ;;  %v361_v32 = vld [vmem:[%s9765_s17 + $0xf0] sm:$0xff]  ;;  %v362_v33 = vld [vmem:[%s9765_s17 + $0xf8] sm:$0xff]  ;;  %v363_v34 = vld [vmem:[%s9765_s17 + $0x100] sm:$0xff] }
  0x1e   : > { %9150 = vmatprep.mubr.msk.f32.mxu0 %vm416_vm1, %v337_v8  ;;  %v364_v35 = vld [vmem:[%s9765_s17 + $0x108] sm:$0xff]  ;;  %v365_v36 = vld [vmem:[%s9765_s17 + $0x110] sm:$0xff]  ;;  %v366_v37 = vld [vmem:[%s9765_s17 + $0x118] sm:$0xff] }
  0x1f   : > { %v367_v38 = vld [vmem:[%s9765_s17 + $0x120] sm:$0xff]  ;;  %v368_v39 = vld [vmem:[%s9765_s17 + $0x128] sm:$0xff]  ;;  %v369_v40 = vld [vmem:[%s9765_s17 + $0x130] sm:$0xff] }
  0x20   : > { %v370_v41 = vld [vmem:[%s9765_s17 + $0x138] sm:$0xff]  ;;  %v371_v42 = vld [vmem:[%s9765_s17 + $0x140] sm:$0xff]  ;;  %v372_v43 = vld [vmem:[%s9765_s17 + $0x148] sm:$0xff] }
  0x21   : > { %9151 = vmatmul.mubr.msk.f32.gmra.mxu0 %vm416_vm1, %v338_v9  ;;  %v373_v44 = vld [vmem:[%s9765_s17 + $0x150] sm:$0xff]  ;;  %v374_v45 = vld [vmem:[%s9765_s17 + $0x158] sm:$0xff]  ;;  %v375_v46 = vld [vmem:[%s9765_s17 + $0x160] sm:$0xff] }
  0x22   : > { %9153 = vmatprep.mubr.msk.f32.mxu0 %vm416_vm1, %v339_v10  ;;  %v376_v47 = vld [vmem:[%s9765_s17 + $0x168] sm:$0xff]  ;;  %v377_v48 = vld [vmem:[%s9765_s17 + $0x170] sm:$0xff]  ;;  %v378_v49 = vld [vmem:[%s9765_s17 + $0x178] sm:$0xff] }
  0x23   : > { %v379_v50 = vld [vmem:[%s9765_s17 + $0x180] sm:$0xff]  ;;  %v380_v51 = vld [vmem:[%s9765_s17 + $0x188] sm:$0xff]  ;;  %v381_v52 = vld [vmem:[%s9765_s17 + $0x190] sm:$0xff] }
  0x24   : > { %v382_v53 = vld [vmem:[%s9765_s17 + $0x198] sm:$0xff]  ;;  %v383_v54 = vld [vmem:[%s9765_s17 + $0x1a0] sm:$0xff]  ;;  %v384_v55 = vld [vmem:[%s9765_s17 + $0x1a8] sm:$0xff] }
  0x25   : > { %9154 = vmatmul.mubr.msk.f32.gmra.mxu0 %vm416_vm1, %v340_v11  ;;  %v385_v56 = vld [vmem:[%s9765_s17 + $0x1b0] sm:$0xff]  ;;  %v386_v57 = vld [vmem:[%s9765_s17 + $0x1b8] sm:$0xff]  ;;  %v387_v58 = vld [vmem:[%s9765_s17 + $0x1c0] sm:$0xff] }
  0x26   : > { %9156 = vmatprep.mubr.msk.f32.mxu0 %vm416_vm1, %v341_v12  ;;  %v388_v59 = vld [vmem:[%s9765_s17 + $0x1c8] sm:$0xff]  ;;  %v389_v60 = vld [vmem:[%s9765_s17 + $0x1d0] sm:$0xff]  ;;  %v390_v61 = vld [vmem:[%s9765_s17 + $0x1d8] sm:$0xff] }
  0x27   : > { %v391_v62 = vld [vmem:[%s9765_s17 + $0x1e0] sm:$0xff]  ;;  %v392_v63 = vld [vmem:[%s9765_s17 + $0x1e8] sm:$0xff]  ;;  %v393_v0 = vld [vmem:[%s9765_s17 + $0x1f0] sm:$0xff] }
  0x28   : > { %v394_v1 = vld [vmem:[%s9765_s17 + $0x1f8] sm:$0xff]  ;;  %v395_v4 = vld [vmem:[%s9765_s17 + $0x200] sm:$0xff]  ;;  %v396_v5 = vld [vmem:[%s9765_s17 + $0x208] sm:$0xff] }
  0x29   : > { %9157 = vmatmul.mubr.msk.f32.gmra.mxu0 %vm416_vm1, %v342_v13 }
  0x2a   : > { %9159 = vmatprep.mubr.msk.f32.mxu0 %vm416_vm1, %v343_v14 }
  0x2d   : > { %9160 = vmatmul.mubr.msk.f32.gmra.mxu0 %vm416_vm1, %v344_v15 }
  0x2e   : > { %9162 = vmatprep.mubr.msk.f32.mxu0 %vm416_vm1, %v345_v16  ;;  %v397_v16 = vld [vmem:[%s9765_s17 + $0x210] sm:$0xff] }
  0x31   : > { %9163 = vmatmul.mubr.msk.f32.gmra.mxu0 %vm416_vm1, %v346_v17 }
  0x32   : > { %9165 = vmatprep.mubr.msk.f32.mxu0 %vm416_vm1, %v347_v18 }
  0x35   : > { %9166 = vmatmul.mubr.msk.f32.gmra.mxu0 %vm416_vm1, %v348_v19  ;;  %v398_v19 = vld [vmem:[%s9765_s17 + $0x218] sm:$0xff] }
  0x36   : > { %9168 = vmatprep.mubr.msk.f32.mxu0 %vm416_vm1, %v349_v20 }
  0x39   : > { %9169 = vmatmul.mubr.msk.f32.gmra.mxu0 %vm416_vm1, %v350_v21 }
  0x3a   : > { %9171 = vmatprep.mubr.msk.f32.mxu0 %vm416_vm1, %v351_v22 }
  0x3d   : > { %9172 = vmatmul.mubr.msk.f32.gmra.mxu0 %vm416_vm1, %v352_v23 }
  0x3e   : > { %9174 = vmatprep.mubr.msk.f32.mxu0 %vm416_vm1, %v353_v24  ;;  %v399_v24 = vld [vmem:[%s9765_s17 + $0x220] sm:$0xff] }
  0x41   : > { %9175 = vmatmul.mubr.msk.f32.gmra.mxu0 %vm416_vm1, %v354_v25  ;;  %v400_v25 = vld [vmem:[%s9765_s17 + $0x228] sm:$0xff] }
  0x42   : > { %9177 = vmatprep.mubr.msk.f32.mxu0 %vm416_vm1, %v355_v26 }
  0x45   : > { %9178 = vmatmul.mubr.msk.f32.gmra.mxu0 %vm416_vm1, %v356_v27 }
  0x46   : > { %9180 = vmatprep.mubr.msk.f32.mxu0 %vm416_vm1, %v357_v28 }
  0x49   : > { %9181 = vmatmul.mubr.msk.f32.gmra.mxu0 %vm416_vm1, %v358_v29 }
  0x4a   : > { %9183 = vmatprep.mubr.msk.f32.mxu0 %vm416_vm1, %v359_v30  ;;  %v401_v30 = vld [vmem:[%s9765_s17 + $0x230] sm:$0xff] }
  0x4d   : > { %9184 = vmatmul.mubr.msk.f32.gmra.mxu0 %vm416_vm1, %v360_v31 }
  0x4e   : > { %9186 = vmatprep.mubr.msk.f32.mxu0 %vm416_vm1, %v361_v32 }
  0x51   : > { %9187 = vmatmul.mubr.msk.f32.gmra.mxu0 %vm416_vm1, %v362_v33 }
  0x52   : > { %9189 = vmatprep.mubr.msk.f32.mxu0 %vm416_vm1, %v363_v34 }
  0x55   : > { %9190 = vmatmul.mubr.msk.f32.gmra.mxu0 %vm416_vm1, %v364_v35  ;;  %v402_v35 = vld [vmem:[%s9765_s17 + $0x238] sm:$0xff] }
  0x56   : > { %9192 = vmatprep.mubr.msk.f32.mxu0 %vm416_vm1, %v365_v36  ;;  %v3433_v36 = vld [vmem:[%s13944_s3] sm:$0xff] }
  0x57   : > { %9267 = vmatprep.subr.mxu1 %v3433_v36 }
  0x58   : > { %9268 = vmatpush3.msra.mxu1 %v3433_v36 }
  0x59   : > { %9193 = vmatmul.mubr.msk.f32.gmra.mxu0 %vm416_vm1, %v366_v37 }
  0x5a   : > { %9195 = vmatprep.mubr.msk.f32.mxu0 %vm416_vm1, %v367_v38  ;;  %v403_v38 = vld [vmem:[%s9765_s17 + $0x240] sm:$0xff] }
  0x5d   : > { %9196 = vmatmul.mubr.msk.f32.gmra.mxu0 %vm416_vm1, %v368_v39  ;;  %v404_v39 = vld [vmem:[%s9765_s17 + $0x248] sm:$0xff] }
  0x5e   : > { %9198 = vmatprep.mubr.msk.f32.mxu0 %vm416_vm1, %v369_v40 }
  0x61   : > { %9199 = vmatmul.mubr.msk.f32.gmra.mxu0 %vm416_vm1, %v370_v41 }
  0x62   : > { %9201 = vmatprep.mubr.msk.f32.mxu0 %vm416_vm1, %v371_v42 }
  0x65   : > { %9202 = vmatmul.mubr.msk.f32.gmra.mxu0 %vm416_vm1, %v372_v43 }
  0x66   : > { %9204 = vmatprep.mubr.msk.f32.mxu0 %vm416_vm1, %v373_v44 }
  0x69   : > { %9205 = vmatmul.mubr.msk.f32.gmra.mxu0 %vm416_vm1, %v374_v45  ;;  %v405_v45 = vld [vmem:[%s9765_s17 + $0x250] sm:$0xff] }
  0x6a   : > { %9207 = vmatprep.mubr.msk.f32.mxu0 %vm416_vm1, %v375_v46  ;;  %v406_v46 = vld [vmem:[%s9765_s17 + $0x258] sm:$0xff] }
  0x6d   : > { %9208 = vmatmul.mubr.msk.f32.gmra.mxu0 %vm416_vm1, %v376_v47 }
  0x6e   : > { %9210 = vmatprep.mubr.msk.f32.mxu0 %vm416_vm1, %v377_v48 }
  0x71   : > { %9211 = vmatmul.mubr.msk.f32.gmra.mxu0 %vm416_vm1, %v378_v49 }
  0x72   : > { %9213 = vmatprep.mubr.msk.f32.mxu0 %vm416_vm1, %v379_v50 }
  0x75   : > { %9214 = vmatmul.mubr.msk.f32.gmra.mxu0 %vm416_vm1, %v380_v51  ;;  %v407_v51 = vld [vmem:[%s9765_s17 + $0x260] sm:$0xff] }
  0x76   : > { %9216 = vmatprep.mubr.msk.f32.mxu0 %vm416_vm1, %v381_v52  ;;  %v408_v52 = vld [vmem:[%s9765_s17 + $0x268] sm:$0xff] }
  0x79   : > { %9217 = vmatmul.mubr.msk.f32.gmra.mxu0 %vm416_vm1, %v382_v53 }
  0x7a   : > { %9219 = vmatprep.mubr.msk.f32.mxu0 %vm416_vm1, %v383_v54 }
  0x7d   : > { %9220 = vmatmul.mubr.msk.f32.gmra.mxu0 %vm416_vm1, %v384_v55 }
  0x7e   : > { %9222 = vmatprep.mubr.msk.f32.mxu0 %vm416_vm1, %v385_v56 }
  0x81   : > { %9223 = vmatmul.mubr.msk.f32.gmra.mxu0 %vm416_vm1, %v386_v57  ;;  %v409_v57 = vld [vmem:[%s9765_s17 + $0x270] sm:$0xff] }
  0x82   : > { %9225 = vmatprep.mubr.msk.f32.mxu0 %vm416_vm1, %v387_v58 }
  0x85   : > { %9226 = vmatmul.mubr.msk.f32.gmra.mxu0 %vm416_vm1, %v388_v59 }
  0x86   : > { %9228 = vmatprep.mubr.msk.f32.mxu0 %vm416_vm1, %v389_v60 }
  0x89   : > { %9229 = vmatmul.mubr.msk.f32.gmra.mxu0 %vm416_vm1, %v390_v61 }
  0x8a   : > { %9231 = vmatprep.mubr.msk.f32.mxu0 %vm416_vm1, %v391_v62  ;;  %v410_v62 = vld [vmem:[%s9765_s17 + $0x278] sm:$0xff] }
  0x8d   : > { %9232 = vmatmul.mubr.msk.f32.gmra.mxu0 %vm416_vm1, %v392_v63 }
  0x8e   : > { %9234 = vmatprep.mubr.msk.f32.mxu0 %vm416_vm1, %v393_v0  ;;  %v411_v0 = vld [vmem:[%s9765_s17 + $0x280] sm:$0xff] }
  0x91   : > { %9235 = vmatmul.mubr.msk.f32.gmra.mxu0 %vm416_vm1, %v394_v1  ;;  %v412_v1 = vld [vmem:[%s9765_s17 + $0x288] sm:$0xff] }
  0x92   : > { %9237 = vmatprep.mubr.msk.f32.mxu0 %vm416_vm1, %v395_v4 }
  0x95   : > { %9238 = vmatmul.mubr.msk.f32.gmra.mxu0 %vm416_vm1, %v396_v5 }
  0x96   : > { %9240 = vmatprep.mubr.msk.f32.mxu0 %vm416_vm1, %v397_v16 }
  0x99   : > { %9241 = vmatmul.mubr.msk.f32.gmra.mxu0 %vm416_vm1, %v398_v19 }
  0x9a   : > { %9243 = vmatprep.mubr.msk.f32.mxu0 %vm416_vm1, %v399_v24 }
  0x9d   : > { %9244 = vmatmul.mubr.msk.f32.gmra.mxu0 %vm416_vm1, %v400_v25 }
  0x9e   : > { %9246 = vmatprep.mubr.msk.f32.mxu0 %vm416_vm1, %v401_v30 }
  0xa1   : > { %9247 = vmatmul.mubr.msk.f32.gmra.mxu0 %vm416_vm1, %v402_v35 }
  0xa2   : > { %9249 = vmatprep.mubr.msk.f32.mxu0 %vm416_vm1, %v403_v38 }
  0xa5   : > { %9250 = vmatmul.mubr.msk.f32.gmra.mxu0 %vm416_vm1, %v404_v39 }
  0xa6   : > { %9252 = vmatprep.mubr.msk.f32.mxu0 %vm416_vm1, %v405_v45 }
  0xa9   : > { %9253 = vmatmul.mubr.msk.f32.gmra.mxu0 %vm416_vm1, %v406_v46 }
  0xaa   : > { %9255 = vmatprep.mubr.msk.f32.mxu0 %vm416_vm1, %v407_v51 }
  0xad   : > { %9256 = vmatmul.mubr.msk.f32.gmra.mxu0 %vm416_vm1, %v408_v52 }
  0xae   : > { %9258 = vmatprep.mubr.msk.f32.mxu0 %vm416_vm1, %v409_v57 }
  0xb1   : > { %9259 = vmatmul.mubr.msk.f32.gmra.mxu0 %vm416_vm1, %v410_v62 }
  0xb2   : > { %9261 = vmatprep.mubr.msk.f32.mxu0 %vm416_vm1, %v411_v0 }
  0xb5   : > { %9262 = vmatmul.mubr.msk.f32.gmra.mxu0 %vm416_vm1, %v412_v1 }
  0xd5   : > { %v9893_v2 = vpop.f32.mrf.mxu0 }
  0xd6   : > { %v2252_v7 = vrot.slane %v9893_v2, 3  ;;  %v1244_v9 = vrot.slane %v9893_v2, 1  ;;  %v2756_v17 = vrot.slane %v9893_v2, 4  ;;  %v1748_v18 = vrot.slane %v9893_v2, 2 }
  0xd7   : > { %v9897_v3 = vpop.f32.mrf.mxu0 }
  0xd8   : > { %v2251_v6 = vrot.slane %v9897_v3, 3  ;;  %v1243_v8 = vrot.slane %v9897_v3, 1  ;;  %v2755_v13 = vrot.slane %v9897_v3, 4  ;;  %v1747_v14 = vrot.slane %v9897_v3, 2 }
  0xd9   : > { %v9906_v10 = vpop.f32.mrf.mxu0 }
  0xda   : > { %v2253_v11 = vsel %vm2250_vm2, %v2251_v6, %v2252_v7  ;;  %v1245_v12 = vsel %vm1242_vm3, %v1243_v8, %v1244_v9  ;;  %v2757_v20 = vsel %vm2754_vm4, %v2755_v13, %v2756_v17  ;;  %v1749_v21 = vsel %vm1746_vm5, %v1747_v14, %v1748_v18 }
  0xdb   : > { %2418 = vrot.lane.b32.xlu1 %v2253_v11, %s9687_s18  ;;  %1410 = vrot.lane.b32.xlu0 %v1245_v12, %s9688_s19  ;;  %v9915_v15 = vpop.f32.mrf.mxu0  ;;  %v1248_v23 = vrot.slane %v9906_v10, 1  ;;  %v1752_v29 = vrot.slane %v9906_v10, 2  ;;  %v2256_v34 = vrot.slane %v9906_v10, 3  ;;  %v2760_v43 = vrot.slane %v9906_v10, 4  ;;  %v414_v11 = vld [vmem:[%s9765_s17 + $0x298] sm:$0x1f] }
  0xdc   : > { %v1246_v22 = vrot.slane %v9915_v15, 1  ;;  %v1750_v28 = vrot.slane %v9915_v15, 2  ;;  %v2254_v33 = vrot.slane %v9915_v15, 3  ;;  %v2758_v42 = vrot.slane %v9915_v15, 4 }
  0xdd   : > { %v9949_v37 = vpop.f32.mrf.mxu0 }
  0xde   : > { %v1249_v26 = vsel %vm1242_vm3, %v1246_v22, %v1248_v23  ;;  %v1247_v27 = vsel %vm1242_vm3, %v1244_v9, %v1246_v22  ;;  %v1751_v31 = vsel %vm1746_vm5, %v1748_v18, %v1750_v28  ;;  %v1753_v32 = vsel %vm1746_vm5, %v1750_v28, %v1752_v29  ;;  %v413_v9 = vld [vmem:[%s9765_s17 + $0x290] sm:$0xff] }
  0xdf   : > { %2922 = vrot.lane.b32.xlu1 %v2757_v20, %s9689_s20  ;;  %1914 = vrot.lane.b32.xlu0 %v1749_v21, %s9690_s21  ;;  %v2257_v40 = vsel %vm2250_vm2, %v2254_v33, %v2256_v34  ;;  %v2255_v41 = vsel %vm2250_vm2, %v2252_v7, %v2254_v33  ;;  %v9961_v44 = vpop.f32.mrf.mxu0  ;;  %v2761_v47 = vsel %vm2754_vm4, %v2758_v42, %v2760_v43  ;;  %v1252_v50 = vrot.slane %v9949_v37, 1 }
  0xe0   : > { %v2759_v48 = vsel %vm2754_vm4, %v2756_v17, %v2758_v42  ;;  %v1250_v49 = vrot.slane %v9961_v44, 1  ;;  %v1754_v55 = vrot.slane %v9961_v44, 2  ;;  %v1756_v56 = vrot.slane %v9949_v37, 2  ;;  %9264 = vmatprep.mubr.msk.f32.mxu0 %vm416_vm1, %v413_v9 }
  0xe1   : > { %v2258_v60 = vrot.slane %v9961_v44, 3  ;;  %v2260_v61 = vrot.slane %v9949_v37, 3  ;;  %v9993_v63 = vpop.f32.mrf.mxu0  ;;  %v2762_v6 = vrot.slane %v9961_v44, 4  ;;  %v2764_v7 = vrot.slane %v9949_v37, 4  ;;  %9265 = vmatmul.mubr.msk.f32.gmra.mxu0 %vm416_vm1, %v414_v11 }
  0xe2   : > { %v1253_v53 = vsel %vm1242_vm3, %v1250_v49, %v1252_v50  ;;  %v1251_v54 = vsel %vm1242_vm3, %v1248_v23, %v1250_v49  ;;  %v1757_v58 = vsel %vm1746_vm5, %v1754_v55, %v1756_v56  ;;  %v1755_v59 = vsel %vm1746_vm5, %v1752_v29, %v1754_v55 }
  0xe3   : > { %1414 = vrot.lane.b32.xlu1 %v1249_v26, %s9688_s19  ;;  %1412 = vrot.lane.b32.xlu0 %v1247_v27, %s9688_s19  ;;  %v2259_v4 = vsel %vm2250_vm2, %v2256_v34, %v2258_v60  ;;  %v2261_v5 = vsel %vm2250_vm2, %v2258_v60, %v2260_v61  ;;  %v10005_v8 = vpop.f32.mrf.mxu0  ;;  %v2763_v12 = vsel %vm2754_vm4, %v2760_v43, %v2762_v6  ;;  %v1256_v16 = vrot.slane %v9993_v63, 1 }
  0xe4   : > { %v2765_v13 = vsel %vm2754_vm4, %v2762_v6, %v2764_v7  ;;  %v1254_v14 = vrot.slane %v10005_v8, 1  ;;  %v1758_v19 = vrot.slane %v10005_v8, 2  ;;  %v1760_v20 = vrot.slane %v9993_v63, 2 }
  0xe5   : > { %v2262_v23 = vrot.slane %v10005_v8, 3  ;;  %v2264_v24 = vrot.slane %v9993_v63, 3  ;;  %v10030_v25 = vpop.f32.mrf.mxu0  ;;  %v2766_v28 = vrot.slane %v10005_v8, 4  ;;  %v2768_v29 = vrot.slane %v9993_v63, 4 }
  0xe6   : > { %v1257_v17 = vsel %vm1242_vm3, %v1254_v14, %v1256_v16  ;;  %v1255_v18 = vsel %vm1242_vm3, %v1252_v50, %v1254_v14  ;;  %v1761_v21 = vsel %vm1746_vm5, %v1758_v19, %v1760_v20  ;;  %v1759_v22 = vsel %vm1746_vm5, %v1756_v56, %v1758_v19 }
  0xe7   : > { %1916 = vrot.lane.b32.xlu1 %v1751_v31, %s9690_s21  ;;  %1918 = vrot.lane.b32.xlu0 %v1753_v32, %s9690_s21  ;;  %v2263_v26 = vsel %vm2250_vm2, %v2260_v61, %v2262_v23  ;;  %v2265_v27 = vsel %vm2250_vm2, %v2262_v23, %v2264_v24  ;;  %v10038_v30 = vpop.f32.mrf.mxu0  ;;  %v2767_v31 = vsel %vm2754_vm4, %v2764_v7, %v2766_v28  ;;  %v1260_v34 = vrot.slane %v10030_v25, 1 }
  0xe8   : > { %v2769_v32 = vsel %vm2754_vm4, %v2766_v28, %v2768_v29  ;;  %v1258_v33 = vrot.slane %v10038_v30, 1  ;;  %v1762_v38 = vrot.slane %v10038_v30, 2  ;;  %v1764_v39 = vrot.slane %v10030_v25, 2 }
  0xe9   : > { %v2266_v42 = vrot.slane %v10038_v30, 3  ;;  %v2268_v43 = vrot.slane %v10030_v25, 3  ;;  %v10058_v45 = vpop.f32.mrf.mxu0  ;;  %v2772_v49 = vrot.slane %v10030_v25, 4 }
  0xea   : > { %v1261_v35 = vsel %vm1242_vm3, %v1258_v33, %v1260_v34  ;;  %v1259_v36 = vsel %vm1242_vm3, %v1256_v16, %v1258_v33  ;;  %v2272_v62 = vrot.slane %v10058_v45, 3  ;;  %v2776_v6 = vrot.slane %v10058_v45, 4 }
  0xeb   : > { %2422 = vrot.lane.b32.xlu1 %v2257_v40, %s9687_s18  ;;  %2420 = vrot.lane.b32.xlu0 %v2255_v41, %s9687_s18  ;;  %v1765_v40 = vsel %vm1746_vm5, %v1762_v38, %v1764_v39  ;;  %v1763_v41 = vsel %vm1746_vm5, %v1760_v20, %v1762_v38  ;;  %v2267_v46 = vsel %vm2250_vm2, %v2264_v24, %v2266_v42  ;;  %v10066_v50 = vpop.f32.mrf.mxu0 }
  0xec   : > { %v1766_v57 = vrot.slane %v10066_v50, 2  ;;  %v2270_v61 = vrot.slane %v10066_v50, 3 }
  0xed   : > { %v10086_v0 = vpop.f32.mrf.mxu0 }
  0xee   : > { %v1767_v60 = vsel %vm1746_vm5, %v1764_v39, %v1766_v57  ;;  %v2271_v1 = vsel %vm2250_vm2, %v2268_v43, %v2270_v61  ;;  %v2780_v28 = vrot.slane %v10086_v0, 4 }
  0xef   : > { %2926 = vrot.lane.b32.xlu1 %v2761_v47, %s9689_s20  ;;  %2924 = vrot.lane.b32.xlu0 %v2759_v48, %s9689_s20  ;;  %v2269_v47 = vsel %vm2250_vm2, %v2266_v42, %v2268_v43  ;;  %v2770_v48 = vrot.slane %v10038_v30, 4  ;;  %v10094_v7 = vpop.f32.mrf.mxu0 }
  0xf1   : > { %v2771_v51 = vsel %vm2754_vm4, %v2768_v29, %v2770_v48  ;;  %v2773_v52 = vsel %vm2754_vm4, %v2770_v48, %v2772_v49  ;;  %v10114_v23 = vpop.f32.mrf.mxu0 }
  0xf2   : > { %v1776_v39 = vrot.slane %v10114_v23, 2  ;;  %v2280_v43 = vrot.slane %v10114_v23, 3 }
  0xf3   : > { %1418 = vrot.lane.b32.xlu0 %v1253_v53, %s9688_s19  ;;  %1416 = vrot.lane.b32.xlu1 %v1251_v54, %s9688_s19  ;;  %v1262_v53 = vrot.slane %v10066_v50, 1  ;;  %v1264_v54 = vrot.slane %v10058_v45, 1  ;;  %v10122_v29 = vpop.f32.mrf.mxu0 }
  0xf4   : > { %v1270_v33 = vrot.slane %v10122_v29, 1  ;;  %v1774_v38 = vrot.slane %v10122_v29, 2  ;;  %v2278_v42 = vrot.slane %v10122_v29, 3 }
  0xf5   : > { %v1265_v55 = vsel %vm1242_vm3, %v1262_v53, %v1264_v54  ;;  %v1263_v56 = vsel %vm1242_vm3, %v1260_v34, %v1262_v53  ;;  %v1272_v34 = vrot.slane %v10114_v23, 1 }
  0xf6   : > { %v2281_v48 = vsel %vm2250_vm2, %v2278_v42, %v2280_v43 }
  0xf7   : > { %1922 = vrot.lane.b32.xlu0 %v1757_v58, %s9690_s21  ;;  %1920 = vrot.lane.b32.xlu1 %v1755_v59, %s9690_s21  ;;  %v1768_v58 = vrot.slane %v10058_v45, 2 }
  0xf9   : > { %v1769_v59 = vsel %vm1746_vm5, %v1766_v57, %v1768_v58 }
  0xfb   : > { %2424 = vrot.lane.b32.xlu0 %v2259_v4, %s9687_s18  ;;  %2426 = vrot.lane.b32.xlu1 %v2261_v5, %s9687_s18  ;;  %v2273_v4 = vsel %vm2250_vm2, %v2270_v61, %v2272_v62  ;;  %v2774_v5 = vrot.slane %v10066_v50, 4 }
  0xfd   : > { %v2775_v9 = vsel %vm2754_vm4, %v2772_v49, %v2774_v5  ;;  %v2777_v11 = vsel %vm2754_vm4, %v2774_v5, %v2776_v6  ;;  %v2782_v49 = vrot.slane %v10122_v29, 4 }
  0xff   : > { %2928 = vrot.lane.b32.xlu0 %v2763_v12, %s9689_s20  ;;  %2930 = vrot.lane.b32.xlu1 %v2765_v13, %s9689_s20  ;;  %v1266_v12 = vrot.slane %v10094_v7, 1  ;;  %v1268_v13 = vrot.slane %v10086_v0, 1 }
 0x101   : > { %v1269_v14 = vsel %vm1242_vm3, %v1266_v12, %v1268_v13  ;;  %v1267_v16 = vsel %vm1242_vm3, %v1264_v54, %v1266_v12 }
 0x103   : > { %1422 = vrot.lane.b32.xlu0 %v1257_v17, %s9688_s19  ;;  %1420 = vrot.lane.b32.xlu1 %v1255_v18, %s9688_s19  ;;  %v1770_v17 = vrot.slane %v10094_v7, 2  ;;  %v1772_v18 = vrot.slane %v10086_v0, 2 }
 0x105   : > { %v1773_v19 = vsel %vm1746_vm5, %v1770_v17, %v1772_v18  ;;  %v1771_v20 = vsel %vm1746_vm5, %v1768_v58, %v1770_v17 }
 0x107   : > { %1926 = vrot.lane.b32.xlu0 %v1761_v21, %s9690_s21  ;;  %1924 = vrot.lane.b32.xlu1 %v1759_v22, %s9690_s21  ;;  %v2274_v21 = vrot.slane %v10094_v7, 3  ;;  %v2276_v22 = vrot.slane %v10086_v0, 3 }
 0x109   : > { %v2275_v24 = vsel %vm2250_vm2, %v2272_v62, %v2274_v21 }
 0x10b   : > { %2428 = vrot.lane.b32.xlu0 %v2263_v26, %s9687_s18  ;;  %2430 = vrot.lane.b32.xlu1 %v2265_v27, %s9687_s18  ;;  %v2277_v26 = vsel %vm2250_vm2, %v2274_v21, %v2276_v22  ;;  %v2778_v27 = vrot.slane %v10094_v7, 4 }
 0x10f   : > { %2932 = vrot.lane.b32.xlu0 %v2767_v31, %s9689_s20  ;;  %2934 = vrot.lane.b32.xlu1 %v2769_v32, %s9689_s20  ;;  %v2779_v31 = vsel %vm2754_vm4, %v2776_v6, %v2778_v27  ;;  %v2781_v32 = vsel %vm2754_vm4, %v2778_v27, %v2780_v28 }
 0x113   : > { %1426 = vrot.lane.b32.xlu0 %v1261_v35, %s9688_s19  ;;  %1424 = vrot.lane.b32.xlu1 %v1259_v36, %s9688_s19  ;;  %v1273_v35 = vsel %vm1242_vm3, %v1270_v33, %v1272_v34  ;;  %v1271_v36 = vsel %vm1242_vm3, %v1268_v13, %v1270_v33 }
 0x117   : > { %1930 = vrot.lane.b32.xlu0 %v1765_v40, %s9690_s21  ;;  %1928 = vrot.lane.b32.xlu1 %v1763_v41, %s9690_s21  ;;  %v1777_v40 = vsel %vm1746_vm5, %v1774_v38, %v1776_v39  ;;  %v1775_v41 = vsel %vm1746_vm5, %v1772_v18, %v1774_v38 }
 0x11b   : > { %2432 = vrot.lane.b32.xlu0 %v2267_v46, %s9687_s18  ;;  %2434 = vrot.lane.b32.xlu1 %v2269_v47, %s9687_s18  ;;  %v10142_v46 = vpop.f32.mrf.mxu0  ;;  %v2279_v47 = vsel %vm2250_vm2, %v2276_v22, %v2278_v42 }
 0x11c   : > { %v1276_v58 = vrot.slane %v10142_v46, 1  ;;  %v2788_v33 = vrot.slane %v10142_v46, 4 }
 0x11f   : > { %2936 = vrot.lane.b32.xlu0 %v2771_v51, %s9689_s20  ;;  %2938 = vrot.lane.b32.xlu1 %v2773_v52, %s9689_s20  ;;  %v2784_v51 = vrot.slane %v10114_v23, 4  ;;  %v10150_v52 = vpop.f32.mrf.mxu0 }
 0x120   : > { %v1274_v57 = vrot.slane %v10150_v52, 1  ;;  %v1778_v62 = vrot.slane %v10150_v52, 2  ;;  %v2282_v13 = vrot.slane %v10150_v52, 3  ;;  %v2786_v27 = vrot.slane %v10150_v52, 4 }
 0x122   : > { %v1277_v5 = vsel %vm1242_vm3, %v1274_v57, %v1276_v58  ;;  %v1275_v6 = vsel %vm1242_vm3, %v1272_v34, %v1274_v57  ;;  %v1779_v18 = vsel %vm1746_vm5, %v1776_v39, %v1778_v62 }
 0x123   : > { %1430 = vrot.lane.b32.xlu0 %v1265_v55, %s9688_s19  ;;  %1428 = vrot.lane.b32.xlu1 %v1263_v56, %s9688_s19  ;;  %v2783_v55 = vsel %vm2754_vm4, %v2780_v28, %v2782_v49  ;;  %v2785_v56 = vsel %vm2754_vm4, %v2782_v49, %v2784_v51  ;;  %v2283_v28 = vsel %vm2250_vm2, %v2280_v43, %v2282_v13 }
 0x127   : > { %1934 = vrot.lane.b32.xlu0 %v1769_v59, %s9690_s21  ;;  %1932 = vrot.lane.b32.xlu1 %v1767_v60, %s9690_s21 }
 0x12b   : > { %2436 = vrot.lane.b32.xlu0 %v2271_v1, %s9687_s18  ;;  %2438 = vrot.lane.b32.xlu1 %v2273_v4, %s9687_s18  ;;  %v10162_v1 = vpop.f32.mrf.mxu0 }
 0x12f   : > { %2940 = vrot.lane.b32.xlu0 %v2775_v9, %s9689_s20  ;;  %2942 = vrot.lane.b32.xlu1 %v2777_v11, %s9689_s20  ;;  %v1780_v9 = vrot.slane %v10142_v46, 2 }
 0x131   : > { %v1781_v17 = vsel %vm1746_vm5, %v1778_v62, %v1780_v9 }
 0x133   : > { %1434 = vrot.lane.b32.xlu0 %v1269_v14, %s9688_s19  ;;  %1432 = vrot.lane.b32.xlu1 %v1267_v16, %s9688_s19  ;;  %v10175_v14 = vld [vmem:[%s13943_s2] ss:$0 sm:$0xff]  ;;  %v10177_v16 = vpop.f32.mrf.mxu0 }
 0x135   : > { %v10186_v21 = vpop.f32.mrf.mxu0 }
 0x137   : > { %1938 = vrot.lane.b32.xlu0 %v1773_v19, %s9690_s21  ;;  %1936 = vrot.lane.b32.xlu1 %v1771_v20, %s9690_s21  ;;  %v2284_v19 = vrot.slane %v10142_v46, 3 }
 0x13b   : > { %2440 = vrot.lane.b32.xlu0 %v2275_v24, %s9687_s18  ;;  %2442 = vrot.lane.b32.xlu1 %v2277_v26, %s9687_s18 }
 0x13f   : > { %2944 = vrot.lane.b32.xlu0 %v2779_v31, %s9689_s20  ;;  %2946 = vrot.lane.b32.xlu1 %v2781_v32, %s9689_s20  ;;  %v2285_v31 = vsel %vm2250_vm2, %v2282_v13, %v2284_v19 }
 0x143   : > { %1438 = vrot.lane.b32.xlu0 %v1273_v35, %s9688_s19  ;;  %1436 = vrot.lane.b32.xlu1 %v1271_v36, %s9688_s19  ;;  %v10200_v36 = vpop.f32.mrf.mxu0 }
 0x145   : > { %v10206_v49 = vpop.f32.mrf.mxu0 }
 0x147   : > { %1942 = vrot.lane.b32.xlu0 %v1777_v40, %s9690_s21  ;;  %1940 = vrot.lane.b32.xlu1 %v1775_v41, %s9690_s21  ;;  %v2787_v40 = vsel %vm2754_vm4, %v2784_v51, %v2786_v27  ;;  %v1280_v41 = vrot.slane %v10162_v1, 1  ;;  %v1782_v51 = vrot.slane %v10177_v16, 2 }
 0x14b   : > { %2444 = vrot.lane.b32.xlu0 %v2279_v47, %s9687_s18  ;;  %2446 = vrot.lane.b32.xlu1 %v2281_v48, %s9687_s18  ;;  %v2789_v47 = vsel %vm2754_vm4, %v2786_v27, %v2788_v33  ;;  %v1278_v48 = vrot.slane %v10177_v16, 1 }
 0x14d   : > { %v2419_v53 = vpop.permute.xlu1 %2418  ;;  %v1411_v54 = vpop.permute.xlu0 %1410 }
 0x14e   : > { %v1662_v59 = vadd.f32 %v1411_v54, %v9897_v3 }
 0x14f   : > { %2948 = vrot.lane.b32.xlu0 %v2783_v55, %s9689_s20  ;;  %2950 = vrot.lane.b32.xlu1 %v2785_v56, %s9689_s20  ;;  %v1784_v55 = vrot.slane %v10162_v1, 2 }
 0x151   : > { %v2923_v60 = vpop.permute.xlu1 %2922  ;;  %v1915_v61 = vpop.permute.xlu0 %1914 }
 0x152   : > { %v2166_v4 = vadd.f32 %v1915_v61, %v1662_v59  ;;  %v1281_v59 = vsel %vm1242_vm3, %v1278_v48, %v1280_v41  ;;  %v10218_v61 = vpop.f32.mrf.mxu0 }
 0x153   : > { %1442 = vrot.lane.b32.xlu0 %v1277_v5, %s9688_s19  ;;  %1440 = vrot.lane.b32.xlu1 %v1275_v6, %s9688_s19 }
 0x154   : > { %v2670_v3 = vadd.f32 %v2419_v53, %v2166_v4  ;;  %v10224_v5 = vpop.f32.mrf.mxu0 }
 0x155   : > { %v1415_v11 = vpop.permute.xlu1 %1414  ;;  %v1413_v12 = vpop.permute.xlu0 %1412 }
 0x156   : > { %v3174_v20 = vadd.f32 %v2923_v60, %v2670_v3  ;;  %v1664_v34 = vadd.f32 %v1415_v11, %v9915_v15  ;;  %v1663_v35 = vadd.f32 %v9893_v2, %v1413_v12  ;;  %v1279_v60 = vsel %vm1242_vm3, %v1276_v58, %v1278_v48 }
 0x157   : > { %1946 = vrot.lane.b32.xlu0 %v1781_v17, %s9690_s21  ;;  %1944 = vrot.lane.b32.xlu1 %v1779_v18, %s9690_s21  ;;  %v2286_v11 = vrot.slane %v10177_v16, 3  ;;  %v2288_v12 = vrot.slane %v10162_v1, 3  ;;  %v1785_v17 = vsel %vm1746_vm5, %v1782_v51, %v1784_v55  ;;  %v1783_v18 = vsel %vm1746_vm5, %v1780_v9, %v1782_v51 }
 0x158   : > { %v3265_v22 = vadd.f32 %v10175_v14, %v3174_v20  ;;  %v10237_v20 = vpop.f32.mrf.mxu0 }
 0x159   : > { %v1917_v24 = vpop.permute.xlu1 %1916  ;;  %v1919_v26 = vpop.permute.xlu0 %1918  ;;  %v2287_v27 = vsel %vm2250_vm2, %v2284_v19, %v2286_v11  ;;  %v2289_v9 = vsel %vm2250_vm2, %v2286_v11, %v2288_v12  ;;  %v2290_v11 = vrot.slane %v10200_v36, 3 }
 0x15a   : > { %v3349_v32 = vmax.f32 %v3265_v22, 0.0  ;;  %v2167_v42 = vadd.f32 %v1917_v24, %v1663_v35  ;;  %v2168_v43 = vadd.f32 %v1919_v26, %v1664_v34  ;;  %v2790_v26 = vrot.slane %v10177_v16, 4 }
 0x15b   : > { %2448 = vrot.lane.b32.xlu0 %v2283_v28, %s9687_s18  ;;  %2450 = vrot.lane.b32.xlu1 %v2285_v31, %s9687_s18  ;;  %v2792_v28 = vrot.slane %v10162_v1, 4  ;;  %v10248_v31 = vpop.f32.mrf.mxu0 }
 0x15c   : > { %9269 = vmatprep.mubr.msk.f32.mxu1 %vm3434_vm6, %v3349_v32  ;;  %v2791_v19 = vsel %vm2754_vm4, %v2788_v33, %v2790_v26 }
 0x15d   : > { %v2423_v38 = vpop.permute.xlu1 %2422  ;;  %v2421_v39 = vpop.permute.xlu0 %2420 }
 0x15e   : > { %v2672_v2 = vadd.f32 %v2423_v38, %v2168_v43  ;;  %v2671_v15 = vadd.f32 %v2421_v39, %v2167_v42  ;;  %v1284_v39 = vrot.slane %v10186_v21, 1  ;;  %v2793_v43 = vsel %vm2754_vm4, %v2790_v26, %v2792_v28  ;;  %v10258_v48 = vpop.f32.mrf.mxu0 }
 0x15f   : > { %2952 = vrot.lane.b32.xlu0 %v2787_v40, %s9689_s20  ;;  %2954 = vrot.lane.b32.xlu1 %v2789_v47, %s9689_s20  ;;  %v1282_v47 = vrot.slane %v10200_v36, 1 }
 0x161   : > { %v2927_v53 = vpop.permute.xlu1 %2926  ;;  %v2925_v54 = vpop.permute.xlu0 %2924 }
 0x162   : > { %v3176_v56 = vadd.f32 %v2927_v53, %v2672_v2  ;;  %v3175_v57 = vadd.f32 %v2925_v54, %v2671_v15  ;;  %v10262_v2 = vpop.f32.mrf.mxu0  ;;  %v1786_v53 = vrot.slane %v10200_v36, 2  ;;  %v1788_v54 = vrot.slane %v10186_v21, 2 }
 0x163   : > { %1446 = vrot.lane.b32.xlu0 %v1281_v59, %s9688_s19  ;;  %1444 = vrot.lane.b32.xlu1 %v1279_v60, %s9688_s19  ;;  %v1283_v59 = vsel %vm1242_vm3, %v1280_v41, %v1282_v47 }
 0x164   : > { %v3267_v62 = vadd.f32 %v10175_v14, %v3176_v56  ;;  %v3266_v4 = vadd.f32 %v10175_v14, %v3175_v57  ;;  %v1285_v57 = vsel %vm1242_vm3, %v1282_v47, %v1284_v39  ;;  %v1789_v41 = vsel %vm1746_vm5, %v1786_v53, %v1788_v54 }
 0x165   : > { %v1419_v6 = vpop.permute.xlu0 %1418  ;;  %v1417_v3 = vpop.permute.xlu1 %1416 }
 0x166   : > { %v3351_v13 = vmax.f32 %v3267_v62, 0.0  ;;  %v3350_v58 = vmax.f32 %v3266_v4, 0.0  ;;  %v1666_v32 = vadd.f32 %v1419_v6, %v9961_v44  ;;  %v1665_v34 = vadd.f32 %v9906_v10, %v1417_v3  ;;  %v10276_v4 = vpop.f32.mrf.mxu0 }
 0x167   : > { %1950 = vrot.lane.b32.xlu0 %v1785_v17, %s9690_s21  ;;  %1948 = vrot.lane.b32.xlu1 %v1783_v18, %s9690_s21  ;;  %v1787_v18 = vsel %vm1746_vm5, %v1784_v55, %v1786_v53 }
 0x168   : > { %9270 = vmatmul.mubr.msk.f32.vlgmr.msra.gmra.mxu1 %vm3434_vm6, %v3350_v58 }
 0x169   : > { %9272 = vmatprep.mubr.msk.f32.mxu1 %vm3434_vm6, %v3351_v13  ;;  %v1923_v22 = vpop.permute.xlu0 %1922  ;;  %v1921_v24 = vpop.permute.xlu1 %1920  ;;  %v2292_v13 = vrot.slane %v10186_v21, 3 }
 0x16a   : > { %v2170_v40 = vadd.f32 %v1923_v22, %v1666_v32  ;;  %v2169_v42 = vadd.f32 %v1921_v24, %v1665_v34  ;;  %v10286_v22 = vpop.f32.mrf.mxu0  ;;  %v2796_v32 = vrot.slane %v10186_v21, 4 }
 0x16b   : > { %2452 = vrot.lane.b32.xlu0 %v2287_v27, %s9687_s18  ;;  %2454 = vrot.lane.b32.xlu1 %v2289_v9, %s9687_s18  ;;  %v2794_v27 = vrot.slane %v10200_v36, 4  ;;  %v2291_v9 = vsel %vm2250_vm2, %v2288_v12, %v2290_v11  ;;  %v2293_v55 = vsel %vm2250_vm2, %v2290_v11, %v2292_v13 }
 0x16c   : > { %v10300_v34 = vpop.f32.mrf.mxu0 }
 0x16d   : > { %v2425_v35 = vpop.permute.xlu0 %2424  ;;  %v2427_v38 = vpop.permute.xlu1 %2426 }
 0x16e   : > { %v2673_v44 = vadd.f32 %v2425_v35, %v2169_v42  ;;  %v2674_v10 = vadd.f32 %v2427_v38, %v2170_v40  ;;  %v2795_v42 = vsel %vm2754_vm4, %v2792_v28, %v2794_v27  ;;  %v1790_v28 = vrot.slane %v10218_v61, 2 }
 0x16f   : > { %2956 = vrot.lane.b32.xlu0 %v2791_v19, %s9689_s20  ;;  %2958 = vrot.lane.b32.xlu1 %v2793_v43, %s9689_s20  ;;  %v10306_v19 = vpop.f32.mrf.mxu0  ;;  %v1288_v43 = vrot.slane %v10206_v49, 1 }
 0x171   : > { %v2929_v15 = vpop.permute.xlu0 %2928  ;;  %v2931_v33 = vpop.permute.xlu1 %2930 }
 0x172   : > { %v3177_v51 = vadd.f32 %v2929_v15, %v2673_v44  ;;  %v3178_v56 = vadd.f32 %v2931_v33, %v2674_v10  ;;  %v2797_v10 = vsel %vm2754_vm4, %v2794_v27, %v2796_v32  ;;  %v1286_v15 = vrot.slane %v10218_v61, 1  ;;  %v10314_v33 = vpop.f32.mrf.mxu0 }
 0x173   : > { %1450 = vrot.lane.b32.xlu0 %v1285_v57, %s9688_s19  ;;  %1448 = vrot.lane.b32.xlu1 %v1283_v59, %s9688_s19  ;;  %v1791_v27 = vsel %vm1746_vm5, %v1788_v54, %v1790_v28 }
 0x174   : > { %v3268_v60 = vadd.f32 %v10175_v14, %v3177_v51  ;;  %v3269_v62 = vadd.f32 %v10175_v14, %v3178_v56  ;;  %v1792_v56 = vrot.slane %v10206_v49, 2 }
 0x175   : > { %v1423_v6 = vpop.permute.xlu0 %1422  ;;  %v1421_v3 = vpop.permute.xlu1 %1420 }
 0x176   : > { %v3352_v58 = vmax.f32 %v3268_v60, 0.0  ;;  %v3353_v17 = vmax.f32 %v3269_v62, 0.0  ;;  %v1668_v35 = vadd.f32 %v1423_v6, %v10005_v8  ;;  %v1667_v38 = vadd.f32 %v9949_v37, %v1421_v3  ;;  %v10324_v6 = vpop.f32.mrf.mxu0 }
 0x177   : > { %1954 = vrot.lane.b32.xlu0 %v1789_v41, %s9690_s21  ;;  %1952 = vrot.lane.b32.xlu1 %v1787_v18, %s9690_s21  ;;  %v1289_v60 = vsel %vm1242_vm3, %v1286_v15, %v1288_v43  ;;  %v1287_v62 = vsel %vm1242_vm3, %v1284_v39, %v1286_v15  ;;  %v2294_v41 = vrot.slane %v10218_v61, 3  ;;  %v2296_v18 = vrot.slane %v10206_v49, 3 }
 0x178   : > { %9273 = vmatmul.mubr.msk.f32.gmra.mxu1 %vm3434_vm6, %v3352_v58  ;;  %v1793_v39 = vsel %vm1746_vm5, %v1790_v28, %v1792_v56 }
 0x179   : > { %9275 = vmatprep.mubr.msk.f32.mxu1 %vm3434_vm6, %v3353_v17  ;;  %v1927_v24 = vpop.permute.xlu0 %1926  ;;  %v1925_v26 = vpop.permute.xlu1 %1924  ;;  %v2295_v54 = vsel %vm2250_vm2, %v2292_v13, %v2294_v41 }
 0x17a   : > { %v2172_v47 = vadd.f32 %v1927_v24, %v1668_v35  ;;  %v2171_v44 = vadd.f32 %v1925_v26, %v1667_v38 }
 0x17b   : > { %2456 = vrot.lane.b32.xlu0 %v2291_v9, %s9687_s18  ;;  %2458 = vrot.lane.b32.xlu1 %v2293_v55, %s9687_s18  ;;  %v10338_v9 = vpop.f32.mrf.mxu0 }
 0x17d   : > { %v2429_v40 = vpop.permute.xlu0 %2428  ;;  %v2431_v12 = vpop.permute.xlu1 %2430 }
 0x17e   : > { %v2675_v8 = vadd.f32 %v2429_v40, %v2171_v44  ;;  %v2676_v37 = vadd.f32 %v2431_v12, %v2172_v47  ;;  %v10343_v55 = vpop.f32.mrf.mxu0  ;;  %v2798_v40 = vrot.slane %v10218_v61, 4  ;;  %v2297_v12 = vsel %vm2250_vm2, %v2294_v41, %v2296_v18 }
 0x17f   : > { %2960 = vrot.lane.b32.xlu0 %v2795_v42, %s9689_s20  ;;  %2962 = vrot.lane.b32.xlu1 %v2797_v10, %s9689_s20  ;;  %v2800_v42 = vrot.slane %v10206_v49, 4  ;;  %v1796_v41 = vrot.slane %v10224_v5, 2 }
 0x180   : > { %v10358_v10 = vpop.f32.mrf.mxu0  ;;  %v2799_v13 = vsel %vm2754_vm4, %v2796_v32, %v2798_v40 }
 0x181   : > { %v2933_v53 = vpop.permute.xlu0 %2932  ;;  %v2935_v51 = vpop.permute.xlu1 %2934  ;;  %v2801_v28 = vsel %vm2754_vm4, %v2798_v40, %v2800_v42 }
 0x182   : > { %v3179_v57 = vadd.f32 %v2933_v53, %v2675_v8  ;;  %v3180_v59 = vadd.f32 %v2935_v51, %v2676_v37  ;;  %v1290_v37 = vrot.slane %v10237_v20, 1 }
 0x183   : > { %1454 = vrot.lane.b32.xlu0 %v1289_v60, %s9688_s19  ;;  %1452 = vrot.lane.b32.xlu1 %v1287_v62, %s9688_s19 }
 0x184   : > { %v3270_v3 = vadd.f32 %v10175_v14, %v3179_v57  ;;  %v3271_v11 = vadd.f32 %v10175_v14, %v3180_v59  ;;  %v1292_v57 = vrot.slane %v10224_v5, 1  ;;  %v10364_v59 = vpop.f32.mrf.mxu0  ;;  %v1291_v32 = vsel %vm1242_vm3, %v1288_v43, %v1290_v37 }
 0x185   : > { %v1427_v58 = vpop.permute.xlu0 %1426  ;;  %v1425_v17 = vpop.permute.xlu1 %1424 }
 0x186   : > { %v3354_v24 = vmax.f32 %v3270_v3, 0.0  ;;  %v3355_v26 = vmax.f32 %v3271_v11, 0.0  ;;  %v1670_v47 = vadd.f32 %v1427_v58, %v10038_v30  ;;  %v1669_v44 = vadd.f32 %v9993_v63, %v1425_v17 }
 0x187   : > { %1958 = vrot.lane.b32.xlu0 %v1793_v39, %s9690_s21  ;;  %1956 = vrot.lane.b32.xlu1 %v1791_v27, %s9690_s21  ;;  %v1794_v3 = vrot.slane %v10237_v20, 2  ;;  %v1293_v17 = vsel %vm1242_vm3, %v1290_v37, %v1292_v57 }
 0x188   : > { %9276 = vmatmul.mubr.msk.f32.gmra.mxu1 %vm3434_vm6, %v3354_v24  ;;  %v10374_v24 = vpop.f32.mrf.mxu0 }
 0x189   : > { %9278 = vmatprep.mubr.msk.f32.mxu1 %vm3434_vm6, %v3355_v26  ;;  %v1931_v35 = vpop.permute.xlu0 %1930  ;;  %v1929_v38 = vpop.permute.xlu1 %1928 }
 0x18a   : > { %v2174_v53 = vadd.f32 %v1931_v35, %v1670_v47  ;;  %v2173_v51 = vadd.f32 %v1929_v38, %v1669_v44  ;;  %v1795_v35 = vsel %vm1746_vm5, %v1792_v56, %v1794_v3  ;;  %v2298_v38 = vrot.slane %v10237_v20, 3  ;;  %v10386_v44 = vpop.f32.mrf.mxu0 }
 0x18b   : > { %2460 = vrot.lane.b32.xlu0 %v2295_v54, %s9687_s18  ;;  %2462 = vrot.lane.b32.xlu1 %v2297_v12, %s9687_s18  ;;  %v1797_v12 = vsel %vm1746_vm5, %v1794_v3, %v1796_v41  ;;  %v2300_v47 = vrot.slane %v10224_v5, 3 }
 0x18d   : > { %v2433_v15 = vpop.permute.xlu0 %2432  ;;  %v2435_v8 = vpop.permute.xlu1 %2434  ;;  %v2301_v37 = vsel %vm2250_vm2, %v2298_v38, %v2300_v47 }
 0x18e   : > { %v2677_v63 = vadd.f32 %v2433_v15, %v2173_v51  ;;  %v2678_v30 = vadd.f32 %v2435_v8, %v2174_v53  ;;  %v2802_v8 = vrot.slane %v10237_v20, 4  ;;  %v2804_v53 = vrot.slane %v10224_v5, 4  ;;  %v10398_v51 = vpop.f32.mrf.mxu0 }
 0x18f   : > { %2964 = vrot.lane.b32.xlu0 %v2799_v13, %s9689_s20  ;;  %2966 = vrot.lane.b32.xlu1 %v2801_v28, %s9689_s20  ;;  %v2299_v13 = vsel %vm2250_vm2, %v2296_v18, %v2298_v38  ;;  %v1294_v18 = vrot.slane %v10258_v48, 1 }
 0x191   : > { %v2937_v60 = vpop.permute.xlu0 %2936  ;;  %v2939_v62 = vpop.permute.xlu1 %2938 }
 0x192   : > { %v3181_v11 = vadd.f32 %v2937_v60, %v2677_v63  ;;  %v3182_v58 = vadd.f32 %v2939_v62, %v2678_v30  ;;  %v2803_v62 = vsel %vm2754_vm4, %v2800_v42, %v2802_v8  ;;  %v1295_v42 = vsel %vm1242_vm3, %v1292_v57, %v1294_v18 }
 0x193   : > { %1458 = vrot.lane.b32.xlu0 %v1293_v17, %s9688_s19  ;;  %1456 = vrot.lane.b32.xlu1 %v1291_v32, %s9688_s19  ;;  %v10408_v17 = vpop.f32.mrf.mxu0 }
 0x194   : > { %v3272_v26 = vadd.f32 %v10175_v14, %v3181_v11  ;;  %v3273_v39 = vadd.f32 %v10175_v14, %v3182_v58  ;;  %v2805_v11 = vsel %vm2754_vm4, %v2802_v8, %v2804_v53  ;;  %v1296_v58 = vrot.slane %v10248_v31, 1 }
 0x195   : > { %v1431_v27 = vpop.permute.xlu0 %1430  ;;  %v1429_v43 = vpop.permute.xlu1 %1428 }
 0x196   : > { %v3356_v40 = vmax.f32 %v3272_v26, 0.0  ;;  %v3357_v54 = vmax.f32 %v3273_v39, 0.0  ;;  %v1672_v28 = vadd.f32 %v1431_v27, %v10066_v50  ;;  %v1671_v63 = vadd.f32 %v10030_v25, %v1429_v43 }
 0x197   : > { %1962 = vrot.lane.b32.xlu0 %v1797_v12, %s9690_s21  ;;  %1960 = vrot.lane.b32.xlu1 %v1795_v35, %s9690_s21  ;;  %v1798_v27 = vrot.slane %v10258_v48, 2  ;;  %v1297_v38 = vsel %vm1242_vm3, %v1294_v18, %v1296_v58  ;;  %v2806_v18 = vrot.slane %v10258_v48, 4 }
 0x198   : > { %9279 = vmatmul.mubr.msk.f32.gmra.mxu1 %vm3434_vm6, %v3356_v40  ;;  %v1800_v40 = vrot.slane %v10248_v31, 2 }
 0x199   : > { %9281 = vmatprep.mubr.msk.f32.mxu1 %vm3434_vm6, %v3357_v54  ;;  %v1935_v15 = vpop.permute.xlu0 %1934  ;;  %v1933_v56 = vpop.permute.xlu1 %1932  ;;  %v1799_v8 = vsel %vm1746_vm5, %v1796_v41, %v1798_v27 }
 0x19a   : > { %v2176_v32 = vadd.f32 %v1935_v15, %v1672_v28  ;;  %v2175_v3 = vadd.f32 %v1933_v56, %v1671_v63  ;;  %v10416_v54 = vpop.f32.mrf.mxu0  ;;  %v1801_v63 = vsel %vm1746_vm5, %v1798_v27, %v1800_v40  ;;  %v2807_v27 = vsel %vm2754_vm4, %v2804_v53, %v2806_v18 }
 0x19b   : > { %2464 = vrot.lane.b32.xlu0 %v2299_v13, %s9687_s18  ;;  %2466 = vrot.lane.b32.xlu1 %v2301_v37, %s9687_s18  ;;  %v2302_v13 = vrot.slane %v10258_v48, 3 }
 0x19d   : > { %v2437_v30 = vpop.permute.xlu0 %2436  ;;  %v2439_v60 = vpop.permute.xlu1 %2438 }
 0x19e   : > { %v2679_v50 = vadd.f32 %v2437_v30, %v2175_v3  ;;  %v2680_v25 = vadd.f32 %v2439_v60, %v2176_v32  ;;  %v2304_v30 = vrot.slane %v10248_v31, 3  ;;  %v10426_v60 = vpop.f32.mrf.mxu0  ;;  %v2303_v32 = vsel %vm2250_vm2, %v2300_v47, %v2302_v13 }
 0x19f   : > { %2968 = vrot.lane.b32.xlu0 %v2803_v62, %s9689_s20  ;;  %2970 = vrot.lane.b32.xlu1 %v2805_v11, %s9689_s20  ;;  %v2808_v11 = vrot.slane %v10248_v31, 4  ;;  %v1298_v47 = vrot.slane %v10276_v4, 1 }
 0x1a0   : > { %v2305_v3 = vsel %vm2250_vm2, %v2302_v13, %v2304_v30 }
 0x1a1   : > { %v2941_v26 = vpop.permute.xlu0 %2940  ;;  %v2943_v39 = vpop.permute.xlu1 %2942  ;;  %v1299_v53 = vsel %vm1242_vm3, %v1296_v58, %v1298_v47 }
 0x1a2   : > { %v3183_v43 = vadd.f32 %v2941_v26, %v2679_v50  ;;  %v3184_v35 = vadd.f32 %v2943_v39, %v2680_v25  ;;  %v10436_v50 = vpop.f32.mrf.mxu0 }
 0x1a3   : > { %1462 = vrot.lane.b32.xlu0 %v1297_v38, %s9688_s19  ;;  %1460 = vrot.lane.b32.xlu1 %v1295_v42, %s9688_s19  ;;  %v2809_v38 = vsel %vm2754_vm4, %v2806_v18, %v2808_v11 }
 0x1a4   : > { %v3274_v12 = vadd.f32 %v10175_v14, %v3183_v43  ;;  %v3275_v15 = vadd.f32 %v10175_v14, %v3184_v35 }
 0x1a5   : > { %v1435_v56 = vpop.permute.xlu0 %1434  ;;  %v1433_v57 = vpop.permute.xlu1 %1432 }
 0x1a6   : > { %v3358_v37 = vmax.f32 %v3274_v12, 0.0  ;;  %v3359_v28 = vmax.f32 %v3275_v15, 0.0  ;;  %v1674_v25 = vadd.f32 %v1435_v56, %v10094_v7  ;;  %v1673_v26 = vadd.f32 %v10058_v45, %v1433_v57  ;;  %v10446_v15 = vpop.f32.mrf.mxu0 }
 0x1a7   : > { %1966 = vrot.lane.b32.xlu0 %v1801_v63, %s9690_s21  ;;  %1964 = vrot.lane.b32.xlu1 %v1799_v8, %s9690_s21  ;;  %v1300_v12 = vrot.slane %v10262_v2, 1  ;;  %v1802_v8 = vrot.slane %v10276_v4, 2  ;;  %v1804_v63 = vrot.slane %v10262_v2, 2 }
 0x1a8   : > { %9282 = vmatmul.mubr.msk.f32.gmra.mxu1 %vm3434_vm6, %v3358_v37 }
 0x1a9   : > { %9284 = vmatprep.mubr.msk.f32.mxu1 %vm3434_vm6, %v3359_v28  ;;  %v1939_v62 = vpop.permute.xlu0 %1938  ;;  %v1937_v41 = vpop.permute.xlu1 %1936  ;;  %v1301_v28 = vsel %vm1242_vm3, %v1298_v47, %v1300_v12 }
 0x1aa   : > { %v2178_v43 = vadd.f32 %v1939_v62, %v1674_v25  ;;  %v2177_v35 = vadd.f32 %v1937_v41, %v1673_v26  ;;  %v10454_v62 = vpop.f32.mrf.mxu0  ;;  %v2306_v25 = vrot.slane %v10276_v4, 3 }
 0x1ab   : > { %2468 = vrot.lane.b32.xlu0 %v2303_v32, %s9687_s18  ;;  %2470 = vrot.lane.b32.xlu1 %v2305_v3, %s9687_s18  ;;  %14022 = vst [vmem:[#allocation3_spill] sm:$0xff] %v10454_v62  ;;  %v1803_v3 = vsel %vm1746_vm5, %v1800_v40, %v1802_v8 }
 0x1ac   : > { %v10464_v47 = vpop.f32.mrf.mxu0 }
 0x1ad   : > { %v2441_v39 = vpop.permute.xlu0 %2440  ;;  %v2443_v42 = vpop.permute.xlu1 %2442  ;;  %14023 = vst [vmem:[#allocation4_spill] sm:$0xff] %v10464_v47 }
 0x1ae   : > { %v2681_v7 = vadd.f32 %v2441_v39, %v2177_v35  ;;  %v2682_v45 = vadd.f32 %v2443_v42, %v2178_v43  ;;  %v1805_v42 = vsel %vm1746_vm5, %v1802_v8, %v1804_v63  ;;  %v2810_v35 = vrot.slane %v10276_v4, 4 }
 0x1af   : > { %2972 = vrot.lane.b32.xlu0 %v2807_v27, %s9689_s20  ;;  %2974 = vrot.lane.b32.xlu1 %v2809_v38, %s9689_s20  ;;  %v2308_v27 = vrot.slane %v10262_v2, 3  ;;  %v2307_v38 = vsel %vm2250_vm2, %v2304_v30, %v2306_v25  ;;  %v1302_v30 = vrot.slane %v10300_v34, 1 }
 0x1b1   : > { %v2945_v56 = vpop.permute.xlu0 %2944  ;;  %v2947_v57 = vpop.permute.xlu1 %2946 }
 0x1b2   : > { %v3185_v13 = vadd.f32 %v2945_v56, %v2681_v7  ;;  %v3186_v37 = vadd.f32 %v2947_v57, %v2682_v45  ;;  %v2309_v7 = vsel %vm2250_vm2, %v2306_v25, %v2308_v27  ;;  %v2812_v45 = vrot.slane %v10262_v2, 4  ;;  %v10474_v56 = vpop.f32.mrf.mxu0 }
 0x1b3   : > { %1466 = vrot.lane.b32.xlu0 %v1301_v28, %s9688_s19  ;;  %1464 = vrot.lane.b32.xlu1 %v1299_v53, %s9688_s19 }
 0x1b4   : > { %v3276_v41 = vadd.f32 %v10175_v14, %v3185_v13  ;;  %v3277_v18 = vadd.f32 %v10175_v14, %v3186_v37  ;;  %v2811_v37 = vsel %vm2754_vm4, %v2808_v11, %v2810_v35  ;;  %v10484_v25 = vpop.f32.mrf.mxu0  ;;  %v1303_v11 = vsel %vm1242_vm3, %v1300_v12, %v1302_v30 }
 0x1b5   : > { %v1439_v32 = vpop.permute.xlu0 %1438  ;;  %v1437_v58 = vpop.permute.xlu1 %1436  ;;  %14024 = vst [vmem:[#allocation5_spill] sm:$0xff] %v10484_v25 }
 0x1b6   : > { %v3360_v26 = vmax.f32 %v3276_v41, 0.0  ;;  %v3361_v39 = vmax.f32 %v3277_v18, 0.0  ;;  %v1676_v57 = vadd.f32 %v1439_v32, %v10122_v29  ;;  %v1675_v53 = vadd.f32 %v10086_v0, %v1437_v58 }
 0x1b7   : > { %1970 = vrot.lane.b32.xlu0 %v1805_v42, %s9690_s21  ;;  %1968 = vrot.lane.b32.xlu1 %v1803_v3, %s9690_s21  ;;  %v2813_v18 = vsel %vm2754_vm4, %v2810_v35, %v2812_v45  ;;  %v1304_v3 = vrot.slane %v10286_v22, 1  ;;  %v10492_v35 = vpop.f32.mrf.mxu0 }
 0x1b8   : > { %9285 = vmatmul.mubr.msk.f32.gmra.mxu1 %vm3434_vm6, %v3360_v26  ;;  %v1806_v26 = vrot.slane %v10300_v34, 2  ;;  %14025 = vst [vmem:[#allocation6_spill] sm:$0xff] %v10492_v35 }
 0x1b9   : > { %9287 = vmatprep.mubr.msk.f32.mxu1 %vm3434_vm6, %v3361_v39  ;;  %v1943_v43 = vpop.permute.xlu0 %1942  ;;  %v1941_v40 = vpop.permute.xlu1 %1940 }
 0x1ba   : > { %v2180_v28 = vadd.f32 %v1943_v43, %v1676_v57  ;;  %v2179_v41 = vadd.f32 %v1941_v40, %v1675_v53  ;;  %v1305_v43 = vsel %vm1242_vm3, %v1302_v30, %v1304_v3  ;;  %v1808_v40 = vrot.slane %v10286_v22, 2 }
 0x1bb   : > { %2472 = vrot.lane.b32.xlu0 %v2307_v38, %s9687_s18  ;;  %2474 = vrot.lane.b32.xlu1 %v2309_v7, %s9687_s18  ;;  %v1807_v53 = vsel %vm1746_vm5, %v1804_v63, %v1806_v26 }
 0x1bc   : > { %v1809_v30 = vsel %vm1746_vm5, %v1806_v26, %v1808_v40 }
 0x1bd   : > { %v2445_v8 = vpop.permute.xlu0 %2444  ;;  %v2447_v13 = vpop.permute.xlu1 %2446 }
 0x1be   : > { %v2683_v29 = vadd.f32 %v2445_v8, %v2179_v41  ;;  %v2684_v0 = vadd.f32 %v2447_v13, %v2180_v28  ;;  %v2310_v8 = vrot.slane %v10300_v34, 3  ;;  %v1306_v28 = vrot.slane %v10314_v33, 1  ;;  %v10502_v41 = vpop.f32.mrf.mxu0 }
 0x1bf   : > { %2976 = vrot.lane.b32.xlu0 %v2811_v37, %s9689_s20  ;;  %2978 = vrot.lane.b32.xlu1 %v2813_v18, %s9689_s20  ;;  %14026 = vst [vmem:[#allocation7_spill] sm:$0xff] %v10502_v41 }
 0x1c1   : > { %v2949_v32 = vpop.permute.xlu0 %2948  ;;  %v2951_v58 = vpop.permute.xlu1 %2950 }
 0x1c2   : > { %v3187_v39 = vadd.f32 %v2949_v32, %v2683_v29  ;;  %v3188_v42 = vadd.f32 %v2951_v58, %v2684_v0  ;;  %v2814_v29 = vrot.slane %v10300_v34, 4  ;;  %v2311_v0 = vsel %vm2250_vm2, %v2308_v27, %v2310_v8 }
 0x1c3   : > { %1470 = vrot.lane.b32.xlu0 %v1305_v43, %s9688_s19  ;;  %1468 = vrot.lane.b32.xlu1 %v1303_v11, %s9688_s19  ;;  %v1307_v32 = vsel %vm1242_vm3, %v1304_v3, %v1306_v28  ;;  %v1810_v58 = vrot.slane %v10314_v33, 2  ;;  %v10512_v11 = vpop.f32.mrf.mxu0  ;;  %v2312_v27 = vrot.slane %v10286_v22, 3 }
 0x1c4   : > { %v3278_v38 = vadd.f32 %v10175_v14, %v3187_v39  ;;  %v3279_v7 = vadd.f32 %v10175_v14, %v3188_v42  ;;  %14027 = vst [vmem:[#allocation8_spill] sm:$0xff] %v10512_v11 }
 0x1c5   : > { %v1443_v57 = vpop.permute.xlu0 %1442  ;;  %v1441_v12 = vpop.permute.xlu1 %1440 }
 0x1c6   : > { %v3362_v13 = vmax.f32 %v3278_v38, 0.0  ;;  %v3363_v37 = vmax.f32 %v3279_v7, 0.0  ;;  %v1678_v26 = vadd.f32 %v1443_v57, %v10150_v52  ;;  %v1677_v39 = vadd.f32 %v10114_v23, %v1441_v12 }
 0x1c7   : > { %1974 = vrot.lane.b32.xlu0 %v1809_v30, %s9690_s21  ;;  %1972 = vrot.lane.b32.xlu1 %v1807_v53, %s9690_s21  ;;  %v2815_v38 = vsel %vm2754_vm4, %v2812_v45, %v2814_v29  ;;  %v1811_v53 = vsel %vm1746_vm5, %v1808_v40, %v1810_v58  ;;  %v2816_v12 = vrot.slane %v10286_v22, 4  ;;  %v2818_v30 = vrot.slane %v10314_v33, 4 }
 0x1c8   : > { %9288 = vmatmul.mubr.msk.f32.gmra.mxu1 %vm3434_vm6, %v3362_v13  ;;  %v2314_v13 = vrot.slane %v10314_v33, 3  ;;  %v2313_v40 = vsel %vm2250_vm2, %v2310_v8, %v2312_v27 }
 0x1c9   : > { %9290 = vmatprep.mubr.msk.f32.mxu1 %vm3434_vm6, %v3363_v37  ;;  %v1947_v18 = vpop.permute.xlu0 %1946  ;;  %v1945_v63 = vpop.permute.xlu1 %1944  ;;  %v2819_v8 = vsel %vm2754_vm4, %v2816_v12, %v2818_v30 }
 0x1ca   : > { %v2182_v7 = vadd.f32 %v1947_v18, %v1678_v26  ;;  %v2181_v3 = vadd.f32 %v1945_v63, %v1677_v39  ;;  %v10524_v37 = vpop.f32.mrf.mxu0 }
 0x1cb   : > { %2476 = vrot.lane.b32.xlu0 %v2311_v0, %s9687_s18  ;;  %1472 = vrot.lane.b32.xlu1 %v1307_v32, %s9688_s19  ;;  %v2315_v0 = vsel %vm2250_vm2, %v2312_v27, %v2314_v13 }
 0x1cc   : > { %v10534_v32 = vpop.f32.mrf.mxu0 }
 0x1cd   : > { %v2449_v42 = vpop.permute.xlu0 %2448  ;;  %v2451_v43 = vpop.permute.xlu1 %2450  ;;  %14028 = vst [vmem:[#allocation9_spill] sm:$0xff] %v10534_v32 }
 0x1ce   : > { %v2685_v23 = vadd.f32 %v2449_v42, %v2181_v3  ;;  %v2686_v52 = vadd.f32 %v2451_v43, %v2182_v7  ;;  %v1308_v3 = vrot.slane %v10306_v19, 1 }
 0x1cf   : > { %2980 = vrot.lane.b32.xlu0 %v2815_v38, %s9689_s20  ;;  %1976 = vrot.lane.b32.xlu1 %v1811_v53, %s9690_s21  ;;  %v2817_v38 = vsel %vm2754_vm4, %v2814_v29, %v2816_v12  ;;  %v1310_v53 = vrot.slane %v10338_v9, 1  ;;  %v1812_v12 = vrot.slane %v10306_v19, 2 }
 0x1d1   : > { %v2953_v57 = vpop.permute.xlu0 %2952  ;;  %v2955_v45 = vpop.permute.xlu1 %2954 }
 0x1d2   : > { %v3189_v18 = vadd.f32 %v2953_v57, %v2685_v23  ;;  %v3190_v63 = vadd.f32 %v2955_v45, %v2686_v52  ;;  %v10546_v23 = vpop.f32.mrf.mxu0  ;;  %v1309_v57 = vsel %vm1242_vm3, %v1306_v28, %v1308_v3  ;;  %v1311_v45 = vsel %vm1242_vm3, %v1308_v3, %v1310_v53 }
 0x1d3   : > { %2478 = vrot.lane.b32.xlu0 %v2313_v40, %s9687_s18  ;;  %2480 = vrot.lane.b32.xlu1 %v2315_v0, %s9687_s18  ;;  %v2316_v28 = vrot.slane %v10306_v19, 3 }
 0x1d4   : > { %v3280_v26 = vadd.f32 %v10175_v14, %v3189_v18  ;;  %v3281_v39 = vadd.f32 %v10175_v14, %v3190_v63  ;;  %v13953_v18 = vrot.slane %v10338_v9, 2  ;;  %v10556_v63 = vpop.f32.mrf.mxu0 }
 0x1d5   : > { %v1447_v42 = vpop.permute.xlu0 %1446  ;;  %v1445_v43 = vpop.permute.xlu1 %1444 }
 0x1d6   : > { %v3364_v7 = vmax.f32 %v3280_v26, 0.0  ;;  %v3365_v27 = vmax.f32 %v3281_v39, 0.0  ;;  %v1680_v40 = vadd.f32 %v1447_v42, %v10177_v16  ;;  %v1679_v0 = vadd.f32 %v10142_v46, %v1445_v43 }
 0x1d7   : > { %2982 = vrot.lane.b32.xlu0 %v2817_v38, %s9689_s20  ;;  %2984 = vrot.lane.b32.xlu1 %v2819_v8, %s9689_s20  ;;  %v13952_v38 = vrot.slane %v10338_v9, 3  ;;  %v1815_v3 = vsel %vm1746_vm5, %v1812_v12, %v13953_v18 }
 0x1d8   : > { %9291 = vmatmul.mubr.msk.f32.gmra.mxu1 %vm3434_vm6, %v3364_v7 }
 0x1d9   : > { %9293 = vmatprep.mubr.msk.f32.mxu1 %vm3434_vm6, %v3365_v27  ;;  %v1951_v29 = vpop.permute.xlu0 %1950  ;;  %v1949_v52 = vpop.permute.xlu1 %1948  ;;  %v1813_v27 = vsel %vm1746_vm5, %v1810_v58, %v1812_v12  ;;  %v2317_v12 = vsel %vm2250_vm2, %v2314_v13, %v2316_v28 }
 0x1da   : > { %v2184_v8 = vadd.f32 %v1951_v29, %v1680_v40  ;;  %v2183_v7 = vadd.f32 %v1949_v52, %v1679_v0  ;;  %v2820_v29 = vrot.slane %v10306_v19, 4  ;;  %v13951_v52 = vrot.slane %v10338_v9, 4 }
 0x1db   : > { %1474 = vrot.lane.b32.xlu0 %v1309_v57, %s9688_s19  ;;  %1476 = vrot.lane.b32.xlu1 %v1311_v45, %s9688_s19  ;;  %v10570_v57 = vpop.f32.mrf.mxu0  ;;  %v2319_v40 = vsel %vm2250_vm2, %v2316_v28, %v13952_v38  ;;  %v1322_v38 = vrot.slane %v10398_v51, 1 }
 0x1dc   : > { %v2821_v13 = vsel %vm2754_vm4, %v2818_v30, %v2820_v29  ;;  %v2823_v28 = vsel %vm2754_vm4, %v2820_v29, %v13951_v52  ;;  %v1316_v29 = vrot.slane %v10343_v55, 1 }
 0x1dd   : > { %v2453_v26 = vpop.permute.xlu0 %2452  ;;  %v2455_v39 = vpop.permute.xlu1 %2454 }
 0x1de   : > { %v2687_v46 = vadd.f32 %v2453_v26, %v2183_v7  ;;  %v2688_v16 = vadd.f32 %v2455_v39, %v2184_v8  ;;  %v10582_v0 = vpop.f32.mrf.mxu0 }
 0x1df   : > { %1978 = vrot.lane.b32.xlu0 %v1813_v27, %s9690_s21  ;;  %1980 = vrot.lane.b32.xlu1 %v1815_v3, %s9690_s21 }
 0x1e1   : > { %v2957_v42 = vpop.permute.xlu0 %2956  ;;  %v2959_v43 = vpop.permute.xlu1 %2958 }
 0x1e2   : > { %v3191_v45 = vadd.f32 %v2957_v42, %v2687_v46  ;;  %v3192_v58 = vadd.f32 %v2959_v43, %v2688_v16  ;;  %v1312_v46 = vrot.slane %v10324_v6, 1  ;;  %v1314_v16 = vrot.slane %v10358_v10, 1  ;;  %v10596_v42 = vpop.f32.mrf.mxu0 }
 0x1e3   : > { %2482 = vrot.lane.b32.xlu0 %v2317_v12, %s9687_s18  ;;  %2484 = vrot.lane.b32.xlu1 %v2319_v40, %s9687_s18  ;;  %14029 = vst [vmem:[#allocation10_spill] sm:$0xff] %v10596_v42 }
 0x1e4   : > { %v3282_v26 = vadd.f32 %v10175_v14, %v3191_v45  ;;  %v3283_v39 = vadd.f32 %v10175_v14, %v3192_v58  ;;  %v1318_v45 = vrot.slane %v10374_v24, 1  ;;  %v1313_v58 = vsel %vm1242_vm3, %v1310_v53, %v1312_v46  ;;  %v10606_v40 = vpop.f32.mrf.mxu0 }
 0x1e5   : > { %v1451_v8 = vpop.permute.xlu0 %1450  ;;  %v1449_v7 = vpop.permute.xlu1 %1448  ;;  %v1315_v12 = vsel %vm1242_vm3, %v1312_v46, %v1314_v16  ;;  %v1320_v46 = vrot.slane %v10364_v59, 1 }
 0x1e6   : > { %v3366_v27 = vmax.f32 %v3282_v26, 0.0  ;;  %v3367_v3 = vmax.f32 %v3283_v39, 0.0  ;;  %v1682_v26 = vadd.f32 %v1451_v8, %v10200_v36  ;;  %v1681_v39 = vadd.f32 %v10162_v1, %v1449_v7  ;;  %v10616_v18 = vpop.f32.mrf.mxu0 }
 0x1e7   : > { %2986 = vrot.lane.b32.xlu0 %v2821_v13, %s9689_s20  ;;  %2988 = vrot.lane.b32.xlu1 %v2823_v28, %s9689_s20 }
 0x1e8   : > { %9294 = vmatmul.mubr.msk.f32.gmra.mxu1 %vm3434_vm6, %v3366_v27  ;;  %v1317_v27 = vsel %vm1242_vm3, %v1314_v16, %v1316_v29  ;;  %v1324_v16 = vrot.slane %v10386_v44, 1 }
 0x1e9   : > { %9296 = vmatprep.mubr.msk.f32.mxu1 %vm3434_vm6, %v3367_v3  ;;  %v1955_v30 = vpop.permute.xlu0 %1954  ;;  %v1953_v43 = vpop.permute.xlu1 %1952  ;;  %v1319_v3 = vsel %vm1242_vm3, %v1316_v29, %v1318_v45  ;;  %v1326_v29 = vrot.slane %v10416_v54, 1 }
 0x1ea   : > { %v2186_v52 = vadd.f32 %v1955_v30, %v1682_v26  ;;  %v2185_v53 = vadd.f32 %v1953_v43, %v1681_v39  ;;  %v10624_v26 = vpop.f32.mrf.mxu0 }
 0x1eb   : > { %1478 = vrot.lane.b32.xlu0 %v1313_v58, %s9688_s19  ;;  %1480 = vrot.lane.b32.xlu1 %v1315_v12, %s9688_s19  ;;  %v1321_v58 = vsel %vm1242_vm3, %v1318_v45, %v1320_v46  ;;  %v1323_v12 = vsel %vm1242_vm3, %v1320_v46, %v1322_v38  ;;  %14030 = vst [vmem:[#allocation11_spill] sm:$0xff] %v10624_v26  ;;  %v1328_v46 = vrot.slane %v10408_v17, 1 }
 0x1ed   : > { %v2457_v13 = vpop.permute.xlu0 %2456  ;;  %v2459_v28 = vpop.permute.xlu1 %2458 }
 0x1ee   : > { %v2689_v36 = vadd.f32 %v2457_v13, %v2185_v53  ;;  %v2690_v1 = vadd.f32 %v2459_v28, %v2186_v52 }
 0x1ef   : > { %1482 = vrot.lane.b32.xlu0 %v1317_v27, %s9688_s19  ;;  %1484 = vrot.lane.b32.xlu1 %v1319_v3, %s9688_s19  ;;  %v1325_v27 = vsel %vm1242_vm3, %v1322_v38, %v1324_v16  ;;  %v1327_v3 = vsel %vm1242_vm3, %v1324_v16, %v1326_v29  ;;  %v1329_v16 = vsel %vm1242_vm3, %v1326_v29, %v1328_v46 }
 0x1f1   : > { %v2961_v8 = vpop.permute.xlu0 %2960  ;;  %v2963_v7 = vpop.permute.xlu1 %2962 }
 0x1f2   : > { %v3193_v30 = vadd.f32 %v2961_v8, %v2689_v36  ;;  %v3194_v43 = vadd.f32 %v2963_v7, %v2690_v1  ;;  %v1330_v36 = vrot.slane %v10436_v50, 1  ;;  %v10634_v1 = vpop.f32.mrf.mxu0  ;;  %v1332_v8 = vrot.slane %v10426_v60, 1 }
 0x1f3   : > { %1486 = vrot.lane.b32.xlu0 %v1321_v58, %s9688_s19  ;;  %1488 = vrot.lane.b32.xlu1 %v1323_v12, %s9688_s19  ;;  %v1334_v7 = vrot.slane %v10454_v62, 1 }
 0x1f4   : > { %v3284_v52 = vadd.f32 %v10175_v14, %v3193_v30  ;;  %v3285_v39 = vadd.f32 %v10175_v14, %v3194_v43  ;;  %v1331_v30 = vsel %vm1242_vm3, %v1328_v46, %v1330_v36  ;;  %v10644_v43 = vpop.f32.mrf.mxu0  ;;  %v1338_v46 = vrot.slane %v10474_v56, 1 }
 0x1f5   : > { %v1455_v13 = vpop.permute.xlu0 %1454  ;;  %v1453_v28 = vpop.permute.xlu1 %1452 }
 0x1f6   : > { %v3368_v53 = vmax.f32 %v3284_v52, 0.0  ;;  %v3369_v45 = vmax.f32 %v3285_v39, 0.0  ;;  %v1684_v58 = vadd.f32 %v1455_v13, %v10218_v61  ;;  %v1683_v12 = vadd.f32 %v10186_v21, %v1453_v28  ;;  %v10654_v62 = vpop.f32.mrf.mxu0 }
 0x1f7   : > { %1490 = vrot.lane.b32.xlu0 %v1325_v27, %s9688_s19  ;;  %1492 = vrot.lane.b32.xlu1 %v1327_v3, %s9688_s19  ;;  %v1333_v27 = vsel %vm1242_vm3, %v1330_v36, %v1332_v8  ;;  %v1335_v3 = vsel %vm1242_vm3, %v1332_v8, %v1334_v7  ;;  %v1340_v36 = vrot.slane %v10464_v47, 1  ;;  %v1342_v8 = vrot.slane %v10492_v35, 1 }
 0x1f8   : > { %9297 = vmatmul.mubr.msk.f32.gmra.mxu1 %vm3434_vm6, %v3368_v53 }
 0x1f9   : > { %9299 = vmatprep.mubr.msk.f32.mxu1 %vm3434_vm6, %v3369_v45  ;;  %v1959_v14 = vpop.permute.xlu0 %1958  ;;  %v1957_v38 = vpop.permute.xlu1 %1956  ;;  %v1336_v45 = vrot.slane %v10446_v15, 1 }
 0x1fa   : > { %v2188_v53 = vadd.f32 %v1959_v14, %v1684_v58  ;;  %v2187_v29 = vadd.f32 %v1957_v38, %v1683_v12  ;;  %v10662_v58 = vpop.f32.mrf.mxu0  ;;  %v10669_v12 = vld [vmem:[%s13943_s2] ss:$0 sm:$0xff] }
 0x1fb   : > { %1494 = vrot.lane.b32.xlu0 %v1329_v16, %s9688_s19  ;;  %1496 = vrot.lane.b32.xlu1 %v1331_v30, %s9688_s19  ;;  %v1337_v16 = vsel %vm1242_vm3, %v1334_v7, %v1336_v45  ;;  %v1339_v30 = vsel %vm1242_vm3, %v1336_v45, %v1338_v46  ;;  %v1341_v7 = vsel %vm1242_vm3, %v1338_v46, %v1340_v36 }
 0x1fd   : > { %v2461_v52 = vpop.permute.xlu0 %2460  ;;  %v2463_v39 = vpop.permute.xlu1 %2462 }
 0x1fe   : > { %v2691_v61 = vadd.f32 %v2461_v52, %v2187_v29  ;;  %v2692_v21 = vadd.f32 %v2463_v39, %v2188_v53  ;;  %v1343_v53 = vsel %vm1242_vm3, %v1340_v36, %v1342_v8  ;;  %v1348_v36 = vrot.slane %v10502_v41, 1 }
 0x1ff   : > { %1498 = vrot.lane.b32.xlu0 %v1333_v27, %s9688_s19  ;;  %1500 = vrot.lane.b32.xlu1 %v1335_v3, %s9688_s19  ;;  %v1354_v41 = vrot.slane %v10556_v63, 1 }
 0x201   : > { %v2965_v13 = vpop.permute.xlu0 %2964  ;;  %v2967_v28 = vpop.permute.xlu1 %2966 }
 0x202   : > { %v3195_v14 = vadd.f32 %v2965_v13, %v2691_v61  ;;  %v3196_v38 = vadd.f32 %v2967_v28, %v2692_v21  ;;  %v1344_v61 = vrot.slane %v10484_v25, 1  ;;  %v1346_v21 = vrot.slane %v10512_v11, 1  ;;  %v10677_v13 = vpop.f32.mrf.mxu0 }
 0x203   : > { %1502 = vrot.lane.b32.xlu0 %v1337_v16, %s9688_s19  ;;  %1504 = vrot.lane.b32.xlu1 %v1339_v30, %s9688_s19  ;;  %14031 = vst [vmem:[#allocation12_spill] sm:$0xff] %v10677_v13 }
 0x204   : > { %v3286_v52 = vadd.f32 %v10669_v12, %v3195_v14  ;;  %v3287_v39 = vadd.f32 %v10669_v12, %v3196_v38  ;;  %v1350_v14 = vrot.slane %v10534_v32, 1  ;;  %v1345_v38 = vsel %vm1242_vm3, %v1342_v8, %v1344_v61  ;;  %v10687_v30 = vpop.f32.mrf.mxu0 }
 0x205   : > { %v1459_v27 = vpop.permute.xlu0 %1458  ;;  %v1457_v3 = vpop.permute.xlu1 %1456  ;;  %v1347_v16 = vsel %vm1242_vm3, %v1344_v61, %v1346_v21  ;;  %v1352_v61 = vrot.slane %v10524_v37, 1 }
 0x206   : > { %v3370_v29 = vmax.f32 %v3286_v52, 0.0  ;;  %v3371_v45 = vmax.f32 %v3287_v39, 0.0  ;;  %v1686_v52 = vadd.f32 %v1459_v27, %v10237_v20  ;;  %v1685_v39 = vadd.f32 %v10206_v49, %v1457_v3  ;;  %v10697_v11 = vpop.f32.mrf.mxu0 }
 0x207   : > { %1506 = vrot.lane.b32.xlu0 %v1341_v7, %s9688_s19  ;;  %1508 = vrot.lane.b32.xlu1 %v1343_v53, %s9688_s19  ;;  %14032 = vst [vmem:[#allocation13_spill] sm:$0xff] %v10697_v11 }
 0x208   : > { %9300 = vmatmul.mubr.msk.f32.gmra.mxu1 %vm3434_vm6, %v3370_v29  ;;  %v1349_v29 = vsel %vm1242_vm3, %v1346_v21, %v1348_v36  ;;  %v1356_v21 = vrot.slane %v10546_v23, 1 }
 0x209   : > { %9302 = vmatprep.mubr.msk.f32.mxu1 %vm3434_vm6, %v3371_v45  ;;  %v1963_v28 = vpop.permute.xlu0 %1962  ;;  %v1961_v46 = vpop.permute.xlu1 %1960  ;;  %v1351_v45 = vsel %vm1242_vm3, %v1348_v36, %v1350_v14  ;;  %v1358_v36 = vrot.slane %v10582_v0, 1 }
 0x20a   : > { %v2190_v32 = vadd.f32 %v1963_v28, %v1686_v52  ;;  %v2189_v8 = vadd.f32 %v1961_v46, %v1685_v39  ;;  %v10705_v52 = vpop.f32.mrf.mxu0 }
 0x20b   : > { %1510 = vrot.lane.b32.xlu0 %v1345_v38, %s9688_s19  ;;  %1512 = vrot.lane.b32.xlu1 %v1347_v16, %s9688_s19  ;;  %v1353_v38 = vsel %vm1242_vm3, %v1350_v14, %v1352_v61  ;;  %v1355_v16 = vsel %vm1242_vm3, %v1352_v61, %v1354_v41  ;;  %14033 = vst [vmem:[#allocation14_spill] sm:$0xff] %v10705_v52  ;;  %v1360_v61 = vrot.slane %v10570_v57, 1 }
 0x20d   : > { %v2465_v7 = vpop.permute.xlu0 %2464  ;;  %v2467_v53 = vpop.permute.xlu1 %2466 }
 0x20e   : > { %v2693_v20 = vadd.f32 %v2465_v7, %v2189_v8  ;;  %v2694_v49 = vadd.f32 %v2467_v53, %v2190_v32 }
 0x20f   : > { %1514 = vrot.lane.b32.xlu0 %v1349_v29, %s9688_s19  ;;  %1516 = vrot.lane.b32.xlu1 %v1351_v45, %s9688_s19  ;;  %v1357_v29 = vsel %vm1242_vm3, %v1354_v41, %v1356_v21  ;;  %v1359_v45 = vsel %vm1242_vm3, %v1356_v21, %v1358_v36  ;;  %v1366_v21 = vrot.slane %v10624_v26, 1  ;;  %v1370_v26 = vrot.slane %v10644_v43, 1 }
 0x211   : > { %v2969_v27 = vpop.permute.xlu0 %2968  ;;  %v2971_v3 = vpop.permute.xlu1 %2970 }
 0x212   : > { %v3197_v28 = vadd.f32 %v2969_v27, %v2693_v20  ;;  %v3198_v46 = vadd.f32 %v2971_v3, %v2694_v49  ;;  %v1362_v20 = vrot.slane %v10606_v40, 1  ;;  %v10715_v49 = vpop.f32.mrf.mxu0  ;;  %v1364_v3 = vrot.slane %v10596_v42, 1 }
 0x213   : > { %1518 = vrot.lane.b32.xlu0 %v1353_v38, %s9688_s19  ;;  %1520 = vrot.lane.b32.xlu1 %v1355_v16, %s9688_s19  ;;  %14034 = vst [vmem:[#allocation15_spill] sm:$0xff] %v10715_v49 }
 0x214   : > { %v3288_v32 = vadd.f32 %v10669_v12, %v3197_v28  ;;  %v3289_v39 = vadd.f32 %v10669_v12, %v3198_v46  ;;  %v1361_v28 = vsel %vm1242_vm3, %v1358_v36, %v1360_v61  ;;  %v1363_v46 = vsel %vm1242_vm3, %v1360_v61, %v1362_v20  ;;  %v10725_v38 = vpop.f32.mrf.mxu0 }
 0x215   : > { %v1463_v7 = vpop.permute.xlu0 %1462  ;;  %v1461_v53 = vpop.permute.xlu1 %1460  ;;  %14035 = vst [vmem:[#allocation16_spill] sm:$0xff] %v10725_v38  ;;  %v1368_v61 = vrot.slane %v10616_v18, 1 }
 0x216   : > { %v3372_v8 = vmax.f32 %v3288_v32, 0.0  ;;  %v3373_v14 = vmax.f32 %v3289_v39, 0.0  ;;  %v1688_v16 = vadd.f32 %v1463_v7, %v10258_v48  ;;  %v1687_v32 = vadd.f32 %v10224_v5, %v1461_v53  ;;  %v10735_v42 = vpop.f32.mrf.mxu0 }
 0x217   : > { %1522 = vrot.lane.b32.xlu0 %v1357_v29, %s9688_s19  ;;  %1524 = vrot.lane.b32.xlu1 %v1359_v45, %s9688_s19  ;;  %v1365_v45 = vsel %vm1242_vm3, %v1362_v20, %v1364_v3  ;;  %14036 = vst [vmem:[#allocation17_spill] sm:$0xff] %v10735_v42  ;;  %v1372_v20 = vrot.slane %v10634_v1, 1 }
 0x218   : > { %9303 = vmatmul.mubr.msk.f32.gmra.mxu1 %vm3434_vm6, %v3372_v8  ;;  %v1367_v8 = vsel %vm1242_vm3, %v1364_v3, %v1366_v21  ;;  %v1374_v3 = vrot.slane %v10662_v58, 1 }
 0x219   : > { %9305 = vmatprep.mubr.msk.f32.mxu1 %vm3434_vm6, %v3373_v14  ;;  %v1967_v27 = vpop.permute.xlu0 %1966  ;;  %v1965_v41 = vpop.permute.xlu1 %1964 }
 0x21a   : > { %v2192_v14 = vadd.f32 %v1967_v27, %v1688_v16  ;;  %v2191_v36 = vadd.f32 %v1965_v41, %v1687_v32  ;;  %v10743_v16 = vpop.f32.mrf.mxu0 }
 0x21b   : > { %1526 = vrot.lane.b32.xlu0 %v1361_v28, %s9688_s19  ;;  %1528 = vrot.lane.b32.xlu1 %v1363_v46, %s9688_s19  ;;  %v1369_v28 = vsel %vm1242_vm3, %v1366_v21, %v1368_v61  ;;  %v1371_v46 = vsel %vm1242_vm3, %v1368_v61, %v1370_v26  ;;  %14037 = vst [vmem:[#allocation18_spill] sm:$0xff] %v10743_v16  ;;  %v1376_v61 = vrot.slane %v10654_v62, 1 }
 0x21d   : > { %v2469_v39 = vpop.permute.xlu0 %2468  ;;  %v2471_v29 = vpop.permute.xlu1 %2470 }
 0x21e   : > { %v2695_v48 = vadd.f32 %v2469_v39, %v2191_v36  ;;  %v2696_v5 = vadd.f32 %v2471_v29, %v2192_v14  ;;  %v1375_v14 = vsel %vm1242_vm3, %v1372_v20, %v1374_v3 }
 0x21f   : > { %1530 = vrot.lane.b32.xlu0 %v1365_v45, %s9688_s19  ;;  %1532 = vrot.lane.b32.xlu1 %v1367_v8, %s9688_s19  ;;  %v1373_v8 = vsel %vm1242_vm3, %v1370_v26, %v1372_v20  ;;  %v1382_v20 = vrot.slane %v10705_v52, 1  ;;  %v1386_v52 = vrot.slane %v10725_v38, 1 }
 0x221   : > { %v2973_v7 = vpop.permute.xlu0 %2972  ;;  %v2975_v53 = vpop.permute.xlu1 %2974 }
 0x222   : > { %v3199_v27 = vadd.f32 %v2973_v7, %v2695_v48  ;;  %v3200_v41 = vadd.f32 %v2975_v53, %v2696_v5  ;;  %v1378_v48 = vrot.slane %v10687_v30, 1  ;;  %v10753_v5 = vpop.f32.mrf.mxu0  ;;  %v1380_v53 = vrot.slane %v10677_v13, 1 }
 0x223   : > { %1534 = vrot.lane.b32.xlu0 %v1369_v28, %s9688_s19  ;;  %1536 = vrot.lane.b32.xlu1 %v1371_v46, %s9688_s19  ;;  %14038 = vst [vmem:[#allocation19_spill] sm:$0xff] %v10753_v5 }
 0x224   : > { %v3290_v32 = vadd.f32 %v10669_v12, %v3199_v27  ;;  %v3291_v39 = vadd.f32 %v10669_v12, %v3200_v41  ;;  %v1377_v27 = vsel %vm1242_vm3, %v1374_v3, %v1376_v61  ;;  %v1379_v41 = vsel %vm1242_vm3, %v1376_v61, %v1378_v48  ;;  %v10763_v28 = vpop.f32.mrf.mxu0 }
 0x225   : > { %v1467_v29 = vpop.permute.xlu0 %1466  ;;  %v1465_v45 = vpop.permute.xlu1 %1464  ;;  %14039 = vst [vmem:[#allocation20_spill] sm:$0xff] %v10763_v28  ;;  %v1384_v61 = vrot.slane %v10697_v11, 1 }
 0x226   : > { %v3374_v36 = vmax.f32 %v3290_v32, 0.0  ;;  %v3375_v21 = vmax.f32 %v3291_v39, 0.0  ;;  %v1690_v46 = vadd.f32 %v1467_v29, %v10276_v4  ;;  %v1689_v32 = vadd.f32 %v10248_v31, %v1465_v45  ;;  %v10773_v13 = vpop.f32.mrf.mxu0 }
 0x227   : > { %1538 = vrot.lane.b32.xlu0 %v1373_v8, %s9688_s19  ;;  %1540 = vrot.lane.b32.xlu1 %v1375_v14, %s9688_s19  ;;  %v1381_v14 = vsel %vm1242_vm3, %v1378_v48, %v1380_v53  ;;  %14040 = vst [vmem:[#allocation21_spill] sm:$0xff] %v10773_v13  ;;  %v1388_v48 = vrot.slane %v10715_v49, 1 }
 0x228   : > { %9306 = vmatmul.mubr.msk.f32.gmra.mxu1 %vm3434_vm6, %v3374_v36  ;;  %v1383_v36 = vsel %vm1242_vm3, %v1380_v53, %v1382_v20  ;;  %v1390_v53 = vrot.slane %v10743_v16, 1 }
 0x229   : > { %9308 = vmatprep.mubr.msk.f32.mxu1 %vm3434_vm6, %v3375_v21  ;;  %v1971_v7 = vpop.permute.xlu0 %1970  ;;  %v1969_v26 = vpop.permute.xlu1 %1968 }
 0x22a   : > { %v2194_v21 = vadd.f32 %v1971_v7, %v1690_v46  ;;  %v2193_v3 = vadd.f32 %v1969_v26, %v1689_v32  ;;  %v10781_v46 = vpop.f32.mrf.mxu0 }
 0x22b   : > { %1542 = vrot.lane.b32.xlu0 %v1377_v27, %s9688_s19  ;;  %1544 = vrot.lane.b32.xlu1 %v1379_v41, %s9688_s19  ;;  %v1385_v27 = vsel %vm1242_vm3, %v1382_v20, %v1384_v61  ;;  %v1387_v41 = vsel %vm1242_vm3, %v1384_v61, %v1386_v52  ;;  %14041 = vst [vmem:[#allocation22_spill] sm:$0xff] %v10781_v46  ;;  %v1392_v61 = vrot.slane %v10735_v42, 1 }
 0x22d   : > { %v2473_v39 = vpop.permute.xlu0 %2472  ;;  %v2475_v8 = vpop.permute.xlu1 %2474 }
 0x22e   : > { %v2697_v4 = vadd.f32 %v2473_v39, %v2193_v3  ;;  %v2698_v31 = vadd.f32 %v2475_v8, %v2194_v21  ;;  %v1391_v21 = vsel %vm1242_vm3, %v1388_v48, %v1390_v53 }
 0x22f   : > { %1546 = vrot.lane.b32.xlu0 %v1381_v14, %s9688_s19  ;;  %1548 = vrot.lane.b32.xlu1 %v1383_v36, %s9688_s19  ;;  %v1389_v36 = vsel %vm1242_vm3, %v1386_v52, %v1388_v48  ;;  %v1393_v48 = vsel %vm1242_vm3, %v1390_v53, %v1392_v61 }
 0x231   : > { %v2977_v29 = vpop.permute.xlu0 %2976  ;;  %v2979_v45 = vpop.permute.xlu1 %2978 }
 0x232   : > { %v3201_v7 = vadd.f32 %v2977_v29, %v2697_v4  ;;  %v3202_v26 = vadd.f32 %v2979_v45, %v2698_v31  ;;  %v10789_v4 = vpop.f32.mrf.mxu0  ;;  %v1394_v31 = vrot.slane %v10763_v28, 1  ;;  %v1396_v45 = vrot.slane %v10753_v5, 1 }
 0x233   : > { %1550 = vrot.lane.b32.xlu0 %v1385_v27, %s9688_s19  ;;  %1552 = vrot.lane.b32.xlu1 %v1387_v41, %s9688_s19  ;;  %14042 = vst [vmem:[#allocation23_spill] sm:$0xff] %v10789_v4  ;;  %v1398_v27 = vrot.slane %v10781_v46, 1 }
 0x234   : > { %v3292_v32 = vadd.f32 %v10669_v12, %v3201_v7  ;;  %v3293_v39 = vadd.f32 %v10669_v12, %v3202_v26  ;;  %v1395_v7 = vsel %vm1242_vm3, %v1392_v61, %v1394_v31  ;;  %v10800_v26 = vpop.f32.mrf.mxu0 }
 0x235   : > { %v1471_v8 = vpop.permute.xlu0 %1470  ;;  %v1469_v14 = vpop.permute.xlu1 %1468  ;;  %14043 = vst [vmem:[#allocation24_spill] sm:$0xff] %v10800_v26  ;;  %v1399_v53 = vsel %vm1242_vm3, %v1396_v45, %v1398_v27  ;;  %v1402_v61 = vrot.slane %v10800_v26, 1 }
 0x236   : > { %v3376_v3 = vmax.f32 %v3292_v32, 0.0  ;;  %v3377_v20 = vmax.f32 %v3293_v39, 0.0  ;;  %v1691_v41 = vadd.f32 %v10262_v2, %v1469_v14 }
 0x237   : > { %1554 = vrot.lane.b32.xlu0 %v1389_v36, %s9688_s19  ;;  %1556 = vrot.lane.b32.xlu1 %v1391_v21, %s9688_s19  ;;  %v1397_v36 = vsel %vm1242_vm3, %v1394_v31, %v1396_v45  ;;  %v1404_v45 = vrot.slane %v10789_v4, 1 }
 0x238   : > { %9309 = vmatmul.mubr.msk.f32.gmra.mxu1 %vm3434_vm6, %v3376_v3  ;;  %v10807_v3 = vpop.f32.mrf.mxu0 }
 0x239   : > { %9311 = vmatprep.mubr.msk.f32.mxu1 %vm3434_vm6, %v3377_v20  ;;  %v1975_v29 = vpop.permute.xlu0 %1974  ;;  %v1973_v52 = vpop.permute.xlu1 %1972  ;;  %14044 = vst [vmem:[#allocation25_spill] sm:$0xff] %v10807_v3  ;;  %v1400_v20 = vrot.slane %v10773_v13, 1  ;;  %v1405_v4 = vsel %vm1242_vm3, %v1402_v61, %v1404_v45 }
 0x23a   : > { %v2195_v21 = vadd.f32 %v1973_v52, %v1691_v41  ;;  %v10814_v14 = vpop.f32.mrf.mxu0  ;;  %v1408_v41 = vrot.slane %v10807_v3, 1 }
 0x23b   : > { %1558 = vrot.lane.b32.xlu0 %v1393_v48, %s9688_s19  ;;  %1560 = vrot.lane.b32.xlu1 %v1395_v7, %s9688_s19  ;;  %14045 = vst [vmem:[#allocation26_spill] sm:$0xff] %v10814_v14  ;;  %v1401_v31 = vsel %vm1242_vm3, %v1398_v27, %v1400_v20  ;;  %v1403_v52 = vsel %vm1242_vm3, %v1400_v20, %v1402_v61  ;;  %v1406_v27 = vrot.slane %v10814_v14, 1 }
 0x23d   : > { %v2477_v32 = vpop.permute.xlu0 %2476  ;;  %v1473_v39 = vpop.permute.xlu1 %1472  ;;  %v1407_v61 = vsel %vm1242_vm3, %v1404_v45, %v1406_v27 }
 0x23e   : > { %v2699_v48 = vadd.f32 %v2477_v32, %v2195_v21  ;;  %v1693_v32 = vadd.f32 %v10286_v22, %v1473_v39 }
 0x23f   : > { %1562 = vrot.lane.b32.xlu0 %v1397_v36, %s9688_s19  ;;  %1564 = vrot.lane.b32.xlu1 %v1399_v53, %s9688_s19  ;;  %v1692_v36 = vadd.f32 %v1471_v8, %v10300_v34  ;;  %v1818_v8 = vrot.slane %v10358_v10, 2 }
 0x241   : > { %v2981_v7 = vpop.permute.xlu0 %2980  ;;  %v1977_v2 = vpop.permute.xlu1 %1976 }
 0x242   : > { %v3203_v46 = vadd.f32 %v2981_v7, %v2699_v48  ;;  %v2196_v7 = vadd.f32 %v1975_v29, %v1692_v36  ;;  %v2197_v26 = vadd.f32 %v1977_v2, %v1693_v32  ;;  %v1409_v2 = vsel %vm1242_vm3, %v1406_v27, %v1408_v41 }
 0x243   : > { %1566 = vrot.lane.b32.xlu0 %v1401_v31, %s9688_s19  ;;  %1568 = vrot.lane.b32.xlu1 %v1403_v52, %s9688_s19 }
 0x244   : > { %v3294_v21 = vadd.f32 %v10669_v12, %v3203_v46  ;;  %v1816_v46 = vrot.slane %v10324_v6, 2 }
 0x245   : > { %v2479_v53 = vpop.permute.xlu0 %2478  ;;  %v2481_v48 = vpop.permute.xlu1 %2480 }
 0x246   : > { %v3378_v20 = vmax.f32 %v3294_v21, 0.0  ;;  %v2700_v31 = vadd.f32 %v2479_v53, %v2196_v7  ;;  %v2701_v52 = vadd.f32 %v2481_v48, %v2197_v26  ;;  %v2320_v21 = vrot.slane %v10324_v6, 3 }
 0x247   : > { %1570 = vrot.lane.b32.xlu0 %v1405_v4, %s9688_s19  ;;  %1576 = vrot.lane.b32.xlu1 %v1408_v41, %s9688_s19  ;;  %v2322_v53 = vrot.slane %v10358_v10, 3  ;;  %v14046_v41 = vrot.slane %v10338_v9, 2  ;;  %v1819_v27 = vsel %vm1746_vm5, %v1816_v46, %v1818_v8 }
 0x248   : > { %9312 = vmatmul.mubr.msk.f32.gmra.mxu1 %vm3434_vm6, %v3378_v20 }
 0x249   : > { %v2983_v22 = vpop.permute.xlu0 %2982  ;;  %v2985_v34 = vpop.permute.xlu1 %2984  ;;  %v1817_v45 = vsel %vm1746_vm5, %v14046_v41, %v1816_v46  ;;  %v2323_v46 = vsel %vm2250_vm2, %v2320_v21, %v2322_v53 }
 0x24a   : > { %v3204_v39 = vadd.f32 %v2983_v22, %v2700_v31  ;;  %v3205_v29 = vadd.f32 %v2985_v34, %v2701_v52  ;;  %v2824_v52 = vrot.slane %v10324_v6, 4  ;;  %v2826_v22 = vrot.slane %v10358_v10, 4 }
 0x24b   : > { %1574 = vrot.lane.b32.xlu0 %v1409_v2, %s9688_s19  ;;  %1572 = vrot.lane.b32.xlu1 %v1407_v61, %s9688_s19  ;;  %v14047_v34 = vrot.slane %v10338_v9, 3  ;;  %s9693_s19 = smov 32  }
 0x24c   : > { %v3295_v4 = vadd.f32 %v10669_v12, %v3204_v39  ;;  %v3296_v26 = vadd.f32 %v10669_v12, %v3205_v29 }
 0x24d   : > { %v1475_v36 = vpop.permute.xlu0 %1474  ;;  %v1477_v32 = vpop.permute.xlu1 %1476  ;;  %v2321_v39 = vsel %vm2250_vm2, %v14047_v34, %v2320_v21  ;;  %v1820_v21 = vrot.slane %v10343_v55, 2  ;;  %v2324_v34 = vrot.slane %v10343_v55, 3 }
 0x24e   : > { %v3379_v48 = vmax.f32 %v3295_v4, 0.0  ;;  %v3380_v7 = vmax.f32 %v3296_v26, 0.0  ;;  %v1694_v29 = vadd.f32 %v1475_v36, %v10314_v33  ;;  %v1695_v2 = vadd.f32 %v10306_v19, %v1477_v32 }
 0x24f   : > { %1982 = vrot.lane.b32.xlu0 %v1817_v45, %s9690_s21  ;;  %1984 = vrot.lane.b32.xlu1 %v1819_v27, %s9690_s21  ;;  %v14048_v26 = vrot.slane %v10338_v9, 4  ;;  %v1822_v27 = vrot.slane %v10374_v24, 2 }
 0x250   : > { %9314 = vmatprep.mubr.msk.f32.mxu1 %vm3434_vm6, %v3379_v48 }
 0x251   : > { %v1979_v20 = vpop.permute.xlu0 %1978  ;;  %9315 = vmatmul.mubr.msk.f32.gmra.mxu1 %vm3434_vm6, %v3380_v7  ;;  %v1981_v31 = vpop.permute.xlu1 %1980  ;;  %v2825_v48 = vsel %vm2754_vm4, %v14048_v26, %v2824_v52  ;;  %v2827_v7 = vsel %vm2754_vm4, %v2824_v52, %v2826_v22  ;;  %v2828_v26 = vrot.slane %v10343_v55, 4 }
 0x252   : > { %v2198_v41 = vadd.f32 %v1979_v20, %v1694_v29  ;;  %v2199_v45 = vadd.f32 %v1981_v31, %v1695_v2  ;;  %v1821_v20 = vsel %vm1746_vm5, %v1818_v8, %v1820_v21  ;;  %v1823_v31 = vsel %vm1746_vm5, %v1820_v21, %v1822_v27 }
 0x253   : > { %2486 = vrot.lane.b32.xlu0 %v2321_v39, %s9687_s18  ;;  %2488 = vrot.lane.b32.xlu1 %v2323_v46, %s9687_s18  ;;  %v2326_v39 = vrot.slane %v10374_v24, 3 }
 0x255   : > { %v2483_v61 = vpop.permute.xlu0 %2482  ;;  %v2485_v4 = vpop.permute.xlu1 %2484 }
 0x256   : > { %v2702_v33 = vadd.f32 %v2483_v61, %v2198_v41  ;;  %v2703_v19 = vadd.f32 %v2485_v4, %v2199_v45  ;;  %v2325_v41 = vsel %vm2250_vm2, %v2322_v53, %v2324_v34  ;;  %v2327_v45 = vsel %vm2250_vm2, %v2324_v34, %v2326_v39 }
 0x257   : > { %2990 = vrot.lane.b32.xlu0 %v2825_v48, %s9689_s20  ;;  %2992 = vrot.lane.b32.xlu1 %v2827_v7, %s9689_s20  ;;  %v2830_v48 = vrot.slane %v10374_v24, 4  ;;  %v1824_v53 = vrot.slane %v10364_v59, 2 }
 0x259   : > { %v2987_v36 = vpop.permute.xlu0 %2986  ;;  %v2989_v32 = vpop.permute.xlu1 %2988 }
 0x25a   : > { %v3206_v46 = vadd.f32 %v2987_v36, %v2702_v33  ;;  %v3207_v52 = vadd.f32 %v2989_v32, %v2703_v19  ;;  %v2829_v19 = vsel %vm2754_vm4, %v2826_v22, %v2828_v26  ;;  %v2831_v36 = vsel %vm2754_vm4, %v2828_v26, %v2830_v48 }
 0x25b   : > { %1986 = vrot.lane.b32.xlu0 %v1821_v20, %s9690_s21  ;;  %1988 = vrot.lane.b32.xlu1 %v1823_v31, %s9690_s21  ;;  %v1826_v32 = vrot.slane %v10398_v51, 2  ;;  %v2328_v22 = vrot.slane %v10364_v59, 3  ;;  %v2330_v31 = vrot.slane %v10398_v51, 3 }
 0x25c   : > { %v3297_v29 = vadd.f32 %v10669_v12, %v3206_v46  ;;  %v3298_v2 = vadd.f32 %v10669_v12, %v3207_v52  ;;  %v1825_v52 = vsel %vm1746_vm5, %v1822_v27, %v1824_v53  ;;  %v2832_v27 = vrot.slane %v10364_v59, 4 }
 0x25d   : > { %v10874_v61 = vpop.permute.xlu0 %1478  ;;  %v10876_v4 = vpop.permute.xlu1 %1480  ;;  %v1827_v20 = vsel %vm1746_vm5, %v1824_v53, %v1826_v32  ;;  %v2329_v26 = vsel %vm2250_vm2, %v2326_v39, %v2328_v22  ;;  %v1828_v39 = vrot.slane %v10386_v44, 2  ;;  %v1830_v53 = vrot.slane %v10416_v54, 2 }
 0x25e   : > { %v3381_v7 = vmax.f32 %v3297_v29, 0.0  ;;  %v3382_v8 = vmax.f32 %v3298_v2, 0.0 }
 0x25f   : > { %2490 = vrot.lane.b32.xlu0 %v2325_v41, %s9687_s18  ;;  %2492 = vrot.lane.b32.xlu1 %v2327_v45, %s9687_s18 }
 0x260   : > { %9317 = vmatprep.mubr.msk.f32.mxu1 %vm3434_vm6, %v3381_v7  ;;  %v2331_v7 = vsel %vm2250_vm2, %v2328_v22, %v2330_v31  ;;  %v1829_v22 = vsel %vm1746_vm5, %v1826_v32, %v1828_v39  ;;  %v2836_v32 = vrot.slane %v10386_v44, 4 }
 0x261   : > { %9318 = vmatmul.mubr.msk.f32.gmra.mxu1 %vm3434_vm6, %v3382_v8  ;;  %v10886_v21 = vpop.permute.xlu0 %1482  ;;  %v10888_v33 = vpop.permute.xlu1 %1484  ;;  %v2834_v8 = vrot.slane %v10398_v51, 4 }
 0x263   : > { %2994 = vrot.lane.b32.xlu0 %v2829_v19, %s9689_s20  ;;  %2996 = vrot.lane.b32.xlu1 %v2831_v36, %s9689_s20  ;;  %v2833_v19 = vsel %vm2754_vm4, %v2830_v48, %v2832_v27  ;;  %v2835_v36 = vsel %vm2754_vm4, %v2832_v27, %v2834_v8  ;;  %v2332_v48 = vrot.slane %v10386_v44, 3 }
 0x265   : > { %v10896_v34 = vpop.permute.xlu0 %1486  ;;  %v10898_v46 = vpop.permute.xlu1 %1488 }
 0x267   : > { %1990 = vrot.lane.b32.xlu0 %v1825_v52, %s9690_s21  ;;  %1992 = vrot.lane.b32.xlu1 %v1827_v20, %s9690_s21 }
 0x269   : > { %v10906_v29 = vpop.permute.xlu0 %1490  ;;  %v10908_v2 = vpop.permute.xlu1 %1492 }
 0x26b   : > { %2494 = vrot.lane.b32.xlu0 %v2329_v26, %s9687_s18  ;;  %2496 = vrot.lane.b32.xlu1 %v2331_v7, %s9687_s18  ;;  %v1831_v26 = vsel %vm1746_vm5, %v1828_v39, %v1830_v53  ;;  %v2334_v7 = vrot.slane %v10416_v54, 3  ;;  %v2838_v39 = vrot.slane %v10416_v54, 4 }
 0x26d   : > { %v10916_v41 = vpop.permute.xlu0 %1494  ;;  %v10918_v45 = vpop.permute.xlu1 %1496  ;;  %v2335_v3 = vsel %vm2250_vm2, %v2332_v48, %v2334_v7  ;;  %v2839_v13 = vsel %vm2754_vm4, %v2836_v32, %v2838_v39 }
 0x26f   : > { %2998 = vrot.lane.b32.xlu0 %v2833_v19, %s9689_s20  ;;  %3000 = vrot.lane.b32.xlu1 %v2835_v36, %s9689_s20  ;;  %v2333_v36 = vsel %vm2250_vm2, %v2330_v31, %v2332_v48  ;;  %v1832_v31 = vrot.slane %v10408_v17, 2  ;;  %v1834_v48 = vrot.slane %v10436_v50, 2 }
 0x271   : > { %v10926_v52 = vpop.permute.xlu0 %1498  ;;  %v10928_v20 = vpop.permute.xlu1 %1500  ;;  %v1835_v28 = vsel %vm1746_vm5, %v1832_v31, %v1834_v48 }
 0x273   : > { %1994 = vrot.lane.b32.xlu0 %v1829_v22, %s9690_s21  ;;  %1996 = vrot.lane.b32.xlu1 %v1831_v26, %s9690_s21  ;;  %v2837_v26 = vsel %vm2754_vm4, %v2834_v8, %v2836_v32  ;;  %v2336_v8 = vrot.slane %v10408_v17, 3  ;;  %v2338_v32 = vrot.slane %v10436_v50, 3 }
 0x275   : > { %v10936_v27 = vpop.permute.xlu0 %1502  ;;  %v10938_v19 = vpop.permute.xlu1 %1504  ;;  %v2339_v16 = vsel %vm2250_vm2, %v2336_v8, %v2338_v32 }
 0x277   : > { %2498 = vrot.lane.b32.xlu0 %v2333_v36, %s9687_s18  ;;  %2500 = vrot.lane.b32.xlu1 %v2335_v3, %s9687_s18  ;;  %v1833_v3 = vsel %vm1746_vm5, %v1830_v53, %v1832_v31  ;;  %v2840_v53 = vrot.slane %v10408_v17, 4  ;;  %v2842_v31 = vrot.slane %v10436_v50, 4 }
 0x279   : > { %v10946_v14 = vpop.permute.xlu0 %1506  ;;  %v10948_v22 = vpop.permute.xlu1 %1508 }
 0x27b   : > { %3002 = vrot.lane.b32.xlu0 %v2837_v26, %s9689_s20  ;;  %3004 = vrot.lane.b32.xlu1 %v2839_v13, %s9689_s20  ;;  %v2337_v13 = vsel %vm2250_vm2, %v2334_v7, %v2336_v8  ;;  %v1836_v7 = vrot.slane %v10426_v60, 2 }
 0x27d   : > { %v10956_v5 = vpop.permute.xlu0 %1510  ;;  %v10958_v36 = vpop.permute.xlu1 %1512 }
 0x27e   : > { %14049 = vst [vmem:[#allocation27_spill] sm:$0xff] %v10956_v5  ;;  %14050 = vst [vmem:[#allocation28_spill] sm:$0xff] %v10958_v36 }
 0x27f   : > { %1998 = vrot.lane.b32.xlu0 %v1833_v3, %s9690_s21  ;;  %2000 = vrot.lane.b32.xlu1 %v1835_v28, %s9690_s21  ;;  %v2841_v28 = vsel %vm2754_vm4, %v2838_v39, %v2840_v53  ;;  %v2340_v39 = vrot.slane %v10426_v60, 3 }
 0x281   : > { %v10966_v42 = vpop.permute.xlu0 %1514  ;;  %v10968_v26 = vpop.permute.xlu1 %1516 }
 0x282   : > { %14051 = vst [vmem:[#allocation29_spill] sm:$0xff] %v10966_v42  ;;  %14052 = vst [vmem:[#allocation30_spill] sm:$0xff] %v10968_v26  ;;  %v2843_v26 = vsel %vm2754_vm4, %v2840_v53, %v2842_v31  ;;  %v14055_v42 = vld [vmem:[#allocation3_spill] sm:$0xff] }
 0x283   : > { %2502 = vrot.lane.b32.xlu0 %v2337_v13, %s9687_s18  ;;  %2504 = vrot.lane.b32.xlu1 %v2339_v16, %s9687_s18  ;;  %v1838_v8 = vrot.slane %v14055_v42, 2  ;;  %v1837_v16 = vsel %vm1746_vm5, %v1834_v48, %v1836_v7  ;;  %v2342_v53 = vrot.slane %v14055_v42, 3  ;;  %v2844_v48 = vrot.slane %v10426_v60, 4 }
 0x285   : > { %v10976_v49 = vpop.permute.xlu0 %1518  ;;  %v10978_v3 = vpop.permute.xlu1 %1520 }
 0x286   : > { %14053 = vst [vmem:[#allocation31_spill] sm:$0xff] %v10976_v49  ;;  %14054 = vst [vmem:[#allocation32_spill] sm:$0xff] %v10978_v3  ;;  %v1839_v3 = vsel %vm1746_vm5, %v1836_v7, %v1838_v8  ;;  %v2846_v7 = vrot.slane %v14055_v42, 4 }
 0x287   : > { %3006 = vrot.lane.b32.xlu0 %v2841_v28, %s9689_s20  ;;  %3008 = vrot.lane.b32.xlu1 %v2843_v26, %s9689_s20  ;;  %v2341_v26 = vsel %vm2250_vm2, %v2338_v32, %v2340_v39  ;;  %v1840_v32 = vrot.slane %v10446_v15, 2 }
 0x289   : > { %v10986_v36 = vpop.permute.xlu0 %1522  ;;  %v10988_v13 = vpop.permute.xlu1 %1524 }
 0x28a   : > { %14056 = vst [vmem:[#allocation3_spill] sm:$0xff] %v10986_v36  ;;  %14057 = vst [vmem:[#allocation33_spill] sm:$0xff] %v10988_v13  ;;  %v2343_v13 = vsel %vm2250_vm2, %v2340_v39, %v2342_v53  ;;  %v1842_v39 = vrot.slane %v10474_v56, 2 }
 0x28b   : > { %2002 = vrot.lane.b32.xlu0 %v1837_v16, %s9690_s21  ;;  %2004 = vrot.lane.b32.xlu1 %v1839_v3, %s9690_s21  ;;  %v2845_v3 = vsel %vm2754_vm4, %v2842_v31, %v2844_v48  ;;  %v2344_v31 = vrot.slane %v10446_v15, 3 }
 0x28d   : > { %v10996_v49 = vpop.permute.xlu0 %1526  ;;  %v10998_v28 = vpop.permute.xlu1 %1528 }
 0x28e   : > { %14058 = vst [vmem:[#allocation34_spill] sm:$0xff] %v10996_v49  ;;  %14059 = vst [vmem:[#allocation35_spill] sm:$0xff] %v10998_v28  ;;  %v2847_v28 = vsel %vm2754_vm4, %v2844_v48, %v2846_v7  ;;  %v2346_v48 = vrot.slane %v10474_v56, 3 }
 0x28f   : > { %2506 = vrot.lane.b32.xlu0 %v2341_v26, %s9687_s18  ;;  %2508 = vrot.lane.b32.xlu1 %v2343_v13, %s9687_s18  ;;  %v1841_v13 = vsel %vm1746_vm5, %v1838_v8, %v1840_v32  ;;  %v2848_v8 = vrot.slane %v10446_v15, 4 }
 0x291   : > { %v11006_v36 = vpop.permute.xlu0 %1530  ;;  %v11008_v16 = vpop.permute.xlu1 %1532 }
 0x292   : > { %14060 = vst [vmem:[#allocation36_spill] sm:$0xff] %v11006_v36  ;;  %14061 = vst [vmem:[#allocation37_spill] sm:$0xff] %v11008_v16  ;;  %v1843_v16 = vsel %vm1746_vm5, %v1840_v32, %v1842_v39  ;;  %v2850_v32 = vrot.slane %v10474_v56, 4 }
 0x293   : > { %3010 = vrot.lane.b32.xlu0 %v2845_v3, %s9689_s20  ;;  %3012 = vrot.lane.b32.xlu1 %v2847_v28, %s9689_s20  ;;  %v2345_v28 = vsel %vm2250_vm2, %v2342_v53, %v2344_v31  ;;  %v1844_v53 = vrot.slane %v10464_v47, 2 }
 0x295   : > { %v11016_v49 = vpop.permute.xlu0 %1534  ;;  %v11018_v26 = vpop.permute.xlu1 %1536 }
 0x296   : > { %14062 = vst [vmem:[#allocation38_spill] sm:$0xff] %v11016_v49  ;;  %14063 = vst [vmem:[#allocation39_spill] sm:$0xff] %v11018_v26  ;;  %v2347_v26 = vsel %vm2250_vm2, %v2344_v31, %v2346_v48  ;;  %v1846_v31 = vrot.slane %v10492_v35, 2 }
 0x297   : > { %2006 = vrot.lane.b32.xlu0 %v1841_v13, %s9690_s21  ;;  %2008 = vrot.lane.b32.xlu1 %v1843_v16, %s9690_s21  ;;  %v2849_v16 = vsel %vm2754_vm4, %v2846_v7, %v2848_v8  ;;  %v2348_v7 = vrot.slane %v10464_v47, 3 }
 0x299   : > { %v11026_v36 = vpop.permute.xlu0 %1538  ;;  %v11028_v3 = vpop.permute.xlu1 %1540 }
 0x29a   : > { %14064 = vst [vmem:[#allocation40_spill] sm:$0xff] %v11026_v36  ;;  %14065 = vst [vmem:[#allocation41_spill] sm:$0xff] %v11028_v3  ;;  %v2851_v3 = vsel %vm2754_vm4, %v2848_v8, %v2850_v32  ;;  %v2350_v8 = vrot.slane %v10492_v35, 3 }
 0x29b   : > { %2510 = vrot.lane.b32.xlu0 %v2345_v28, %s9687_s18  ;;  %2512 = vrot.lane.b32.xlu1 %v2347_v26, %s9687_s18  ;;  %v1845_v26 = vsel %vm1746_vm5, %v1842_v39, %v1844_v53  ;;  %v2852_v39 = vrot.slane %v10464_v47, 4 }
 0x29d   : > { %v11036_v49 = vpop.permute.xlu0 %1542  ;;  %v11038_v13 = vpop.permute.xlu1 %1544 }
 0x29e   : > { %14066 = vst [vmem:[#allocation42_spill] sm:$0xff] %v11036_v49  ;;  %14067 = vst [vmem:[#allocation43_spill] sm:$0xff] %v11038_v13  ;;  %v1847_v13 = vsel %vm1746_vm5, %v1844_v53, %v1846_v31  ;;  %v2854_v53 = vrot.slane %v10492_v35, 4  ;;  %v14082_v35 = vld [vmem:[#allocation9_spill] sm:$0xff] }
 0x29f   : > { %3014 = vrot.lane.b32.xlu0 %v2849_v16, %s9689_s20  ;;  %3016 = vrot.lane.b32.xlu1 %v2851_v3, %s9689_s20  ;;  %v2349_v3 = vsel %vm2250_vm2, %v2346_v48, %v2348_v7  ;;  %v1848_v48 = vrot.slane %v10484_v25, 2 }
 0x2a1   : > { %v11046_v36 = vpop.permute.xlu0 %1546  ;;  %v11048_v28 = vpop.permute.xlu1 %1548 }
 0x2a2   : > { %14068 = vst [vmem:[#allocation44_spill] sm:$0xff] %v11046_v36  ;;  %14069 = vst [vmem:[#allocation45_spill] sm:$0xff] %v11048_v28  ;;  %v2351_v28 = vsel %vm2250_vm2, %v2348_v7, %v2350_v8 }
 0x2a3   : > { %2010 = vrot.lane.b32.xlu0 %v1845_v26, %s9690_s21  ;;  %2012 = vrot.lane.b32.xlu1 %v1847_v13, %s9690_s21  ;;  %v2853_v13 = vsel %vm2754_vm4, %v2850_v32, %v2852_v39  ;;  %v2352_v32 = vrot.slane %v10484_v25, 3 }
 0x2a5   : > { %v11056_v49 = vpop.permute.xlu0 %1550  ;;  %v11058_v16 = vpop.permute.xlu1 %1552 }
 0x2a6   : > { %14070 = vst [vmem:[#allocation46_spill] sm:$0xff] %v11056_v49  ;;  %14071 = vst [vmem:[#allocation47_spill] sm:$0xff] %v11058_v16  ;;  %v2855_v16 = vsel %vm2754_vm4, %v2852_v39, %v2854_v53  ;;  %v14074_v49 = vld [vmem:[#allocation8_spill] sm:$0xff] }
 0x2a7   : > { %2514 = vrot.lane.b32.xlu0 %v2349_v3, %s9687_s18  ;;  %2516 = vrot.lane.b32.xlu1 %v2351_v28, %s9687_s18  ;;  %v1850_v7 = vrot.slane %v14074_v49, 2  ;;  %v1849_v28 = vsel %vm1746_vm5, %v1846_v31, %v1848_v48  ;;  %v2354_v39 = vrot.slane %v14074_v49, 3  ;;  %v2856_v31 = vrot.slane %v10484_v25, 4 }
 0x2a9   : > { %v11066_v36 = vpop.permute.xlu0 %1554  ;;  %v11068_v26 = vpop.permute.xlu1 %1556 }
 0x2aa   : > { %14072 = vst [vmem:[#allocation48_spill] sm:$0xff] %v11066_v36  ;;  %14073 = vst [vmem:[#allocation49_spill] sm:$0xff] %v11068_v26  ;;  %v1851_v26 = vsel %vm1746_vm5, %v1848_v48, %v1850_v7  ;;  %v2858_v48 = vrot.slane %v14074_v49, 4 }
 0x2ab   : > { %3018 = vrot.lane.b32.xlu0 %v2853_v13, %s9689_s20  ;;  %3020 = vrot.lane.b32.xlu1 %v2855_v16, %s9689_s20  ;;  %v2353_v16 = vsel %vm2250_vm2, %v2350_v8, %v2352_v32 }
 0x2ad   : > { %v11076_v5 = vpop.permute.xlu0 %1558  ;;  %v11078_v3 = vpop.permute.xlu1 %1560 }
 0x2ae   : > { %14075 = vst [vmem:[#allocation50_spill] sm:$0xff] %v11076_v5  ;;  %14076 = vst [vmem:[#allocation51_spill] sm:$0xff] %v11078_v3  ;;  %v2355_v3 = vsel %vm2250_vm2, %v2352_v32, %v2354_v39  ;;  %v1854_v32 = vrot.slane %v14082_v35, 2 }
 0x2af   : > { %2014 = vrot.lane.b32.xlu0 %v1849_v28, %s9690_s21  ;;  %2016 = vrot.lane.b32.xlu1 %v1851_v26, %s9690_s21  ;;  %v2857_v26 = vsel %vm2754_vm4, %v2854_v53, %v2856_v31 }
 0x2b1   : > { %v11086_v36 = vpop.permute.xlu0 %1562  ;;  %v11088_v13 = vpop.permute.xlu1 %1564 }
 0x2b2   : > { %14077 = vst [vmem:[#allocation52_spill] sm:$0xff] %v11086_v36  ;;  %14078 = vst [vmem:[#allocation53_spill] sm:$0xff] %v11088_v13  ;;  %v2859_v13 = vsel %vm2754_vm4, %v2856_v31, %v2858_v48  ;;  %v14081_v36 = vld [vmem:[#allocation7_spill] sm:$0xff]  ;;  %v2358_v31 = vrot.slane %v14082_v35, 3 }
 0x2b3   : > { %2518 = vrot.lane.b32.xlu0 %v2353_v16, %s9687_s18  ;;  %2520 = vrot.lane.b32.xlu1 %v2355_v3, %s9687_s18  ;;  %v1852_v8 = vrot.slane %v14081_v36, 2  ;;  %v2356_v53 = vrot.slane %v14081_v36, 3 }
 0x2b5   : > { %v11096_v5 = vpop.permute.xlu0 %1566  ;;  %v11098_v28 = vpop.permute.xlu1 %1568  ;;  %v1853_v3 = vsel %vm1746_vm5, %v1850_v7, %v1852_v8  ;;  %v2860_v7 = vrot.slane %v14081_v36, 4 }
 0x2b6   : > { %14079 = vst [vmem:[#allocation54_spill] sm:$0xff] %v11096_v5  ;;  %14080 = vst [vmem:[#allocation55_spill] sm:$0xff] %v11098_v28  ;;  %v1855_v28 = vsel %vm1746_vm5, %v1852_v8, %v1854_v32  ;;  %v2862_v8 = vrot.slane %v14082_v35, 4 }
 0x2b7   : > { %3022 = vrot.lane.b32.xlu0 %v2857_v26, %s9689_s20  ;;  %3024 = vrot.lane.b32.xlu1 %v2859_v13, %s9689_s20  ;;  %v2357_v13 = vsel %vm2250_vm2, %v2354_v39, %v2356_v53  ;;  %v1858_v39 = vrot.slane %v10556_v63, 2 }
 0x2b9   : > { %v11106_v49 = vpop.permute.xlu0 %1570  ;;  %v11108_v16 = vpop.permute.xlu1 %1576 }
 0x2ba   : > { %14083 = vst [vmem:[#allocation56_spill] sm:$0xff] %v11106_v49  ;;  %14084 = vst [vmem:[#allocation57_spill] sm:$0xff] %v11108_v16  ;;  %v2359_v16 = vsel %vm2250_vm2, %v2356_v53, %v2358_v31  ;;  %v1696_v53 = vadd.f32 %v10874_v61, %v10338_v9 }
 0x2bb   : > { %2018 = vrot.lane.b32.xlu0 %v1853_v3, %s9690_s21  ;;  %2020 = vrot.lane.b32.xlu1 %v1855_v28, %s9690_s21  ;;  %v1856_v28 = vrot.slane %v10524_v37, 2 }
 0x2bd   : > { %v11116_v5 = vpop.permute.xlu0 %1574  ;;  %v11118_v26 = vpop.permute.xlu1 %1572  ;;  %v1857_v36 = vsel %vm1746_vm5, %v1854_v32, %v1856_v28  ;;  %v1859_v38 = vsel %vm1746_vm5, %v1856_v28, %v1858_v39  ;;  %v1860_v32 = vrot.slane %v10546_v23, 2  ;;  %v1862_v28 = vrot.slane %v10582_v0, 2 }
 0x2be   : > { %14085 = vst [vmem:[#allocation58_spill] sm:$0xff] %v11116_v5  ;;  %14086 = vst [vmem:[#allocation59_spill] sm:$0xff] %v11118_v26  ;;  %v2861_v5 = vsel %vm2754_vm4, %v2858_v48, %v2860_v7  ;;  %v2863_v26 = vsel %vm2754_vm4, %v2860_v7, %v2862_v8  ;;  %v2360_v48 = vrot.slane %v10524_v37, 3 }
 0x2bf   : > { %2522 = vrot.lane.b32.xlu0 %v2357_v13, %s9687_s18  ;;  %2524 = vrot.lane.b32.xlu1 %v2359_v16, %s9687_s18  ;;  %v1697_v16 = vadd.f32 %v10324_v6, %v10876_v4 }
 0x2c0   : > { %v2361_v4 = vsel %vm2250_vm2, %v2358_v31, %v2360_v48  ;;  %v1861_v31 = vsel %vm1746_vm5, %v1858_v39, %v1860_v32 }
 0x2c1   : > { %v1983_v49 = vpop.permute.xlu0 %1982  ;;  %v1985_v3 = vpop.permute.xlu1 %1984 }
 0x2c2   : > { %v2200_v25 = vadd.f32 %v1983_v49, %v1696_v53  ;;  %v2201_v7 = vadd.f32 %v1985_v3, %v1697_v16  ;;  %v2864_v3 = vrot.slane %v10524_v37, 4 }
 0x2c3   : > { %3026 = vrot.lane.b32.xlu0 %v2861_v5, %s9689_s20  ;;  %3028 = vrot.lane.b32.xlu1 %v2863_v26, %s9689_s20  ;;  %v2362_v5 = vrot.slane %v10556_v63, 3 }
 0x2c5   : > { %v2487_v13 = vpop.permute.xlu0 %2486  ;;  %v2489_v35 = vpop.permute.xlu1 %2488  ;;  %v2363_v49 = vsel %vm2250_vm2, %v2360_v48, %v2362_v5  ;;  %v2866_v48 = vrot.slane %v10556_v63, 4 }
 0x2c6   : > { %v2704_v9 = vadd.f32 %v2487_v13, %v2200_v25  ;;  %v2705_v61 = vadd.f32 %v2489_v35, %v2201_v7  ;;  %v2865_v13 = vsel %vm2754_vm4, %v2862_v8, %v2864_v3  ;;  %v1863_v8 = vsel %vm1746_vm5, %v1860_v32, %v1862_v28 }
 0x2c7   : > { %2022 = vrot.lane.b32.xlu0 %v1857_v36, %s9690_s21  ;;  %2024 = vrot.lane.b32.xlu1 %v1859_v38, %s9690_s21  ;;  %v2364_v7 = vrot.slane %v10546_v23, 3  ;;  %v2868_v32 = vrot.slane %v10546_v23, 4 }
 0x2c9   : > { %v2991_v26 = vpop.permute.xlu0 %2990  ;;  %v2993_v6 = vpop.permute.xlu1 %2992 }
 0x2ca   : > { %v3208_v11 = vadd.f32 %v2991_v26, %v2704_v9  ;;  %v3209_v47 = vadd.f32 %v2993_v6, %v2705_v61  ;;  %v2867_v26 = vsel %vm2754_vm4, %v2864_v3, %v2866_v48  ;;  %v2366_v6 = vrot.slane %v10582_v0, 3 }
 0x2cb   : > { %2526 = vrot.lane.b32.xlu0 %v2361_v4, %s9687_s18  ;;  %2528 = vrot.lane.b32.xlu1 %v2363_v49, %s9687_s18  ;;  %v1864_v4 = vrot.slane %v10570_v57, 2 }
 0x2cc   : > { %v3299_v38 = vadd.f32 %v10669_v12, %v3208_v11  ;;  %v3300_v25 = vadd.f32 %v10669_v12, %v3209_v47  ;;  %v1698_v11 = vadd.f32 %v10886_v21, %v10358_v10  ;;  %v1699_v47 = vadd.f32 %v10343_v55, %v10888_v33 }
 0x2cd   : > { %v1987_v35 = vpop.permute.xlu0 %1986  ;;  %v1989_v36 = vpop.permute.xlu1 %1988  ;;  %v2367_v3 = vsel %vm2250_vm2, %v2364_v7, %v2366_v6 }
 0x2ce   : > { %v3383_v53 = vmax.f32 %v3299_v38, 0.0  ;;  %v3384_v16 = vmax.f32 %v3300_v25, 0.0  ;;  %v2202_v9 = vadd.f32 %v1987_v35, %v1698_v11  ;;  %v2203_v61 = vadd.f32 %v1989_v36, %v1699_v47  ;;  %v11177_v35 = vld [vmem:[%s13943_s2] ss:$0 sm:$0xff] }
 0x2cf   : > { %2026 = vrot.lane.b32.xlu0 %v1861_v31, %s9690_s21  ;;  %3030 = vrot.lane.b32.xlu1 %v2865_v13, %s9689_s20  ;;  %v2365_v25 = vsel %vm2250_vm2, %v2362_v5, %v2364_v7  ;;  %v1865_v13 = vsel %vm1746_vm5, %v1862_v28, %v1864_v4  ;;  %v1866_v5 = vrot.slane %v10606_v40, 2  ;;  %v1701_v7 = vadd.f32 %v10364_v59, %v10898_v46 }
 0x2d0   : > { %9320 = vmatprep.mubr.msk.f32.mxu1 %vm3434_vm6, %v3383_v53 }
 0x2d1   : > { %v2491_v12 = vpop.permute.xlu0 %2490  ;;  %9321 = vmatmul.mubr.msk.f32.gmra.mxu1 %vm3434_vm6, %v3384_v16  ;;  %v2493_v39 = vpop.permute.xlu1 %2492 }
 0x2d2   : > { %v2706_v55 = vadd.f32 %v2491_v12, %v2202_v9  ;;  %v2707_v10 = vadd.f32 %v2493_v39, %v2203_v61  ;;  %v2869_v12 = vsel %vm2754_vm4, %v2866_v48, %v2868_v32  ;;  %v2870_v39 = vrot.slane %v10582_v0, 4 }
 0x2d3   : > { %2028 = vrot.lane.b32.xlu0 %v1863_v8, %s9690_s21  ;;  %3032 = vrot.lane.b32.xlu1 %v2867_v26, %s9689_s20  ;;  %v1700_v8 = vadd.f32 %v10896_v34, %v10374_v24  ;;  %v1867_v48 = vsel %vm1746_vm5, %v1864_v4, %v1866_v5  ;;  %v2368_v61 = vrot.slane %v10570_v57, 3 }
 0x2d5   : > { %v2995_v21 = vpop.permute.xlu0 %2994  ;;  %v2997_v33 = vpop.permute.xlu1 %2996 }
 0x2d6   : > { %v3210_v49 = vadd.f32 %v2995_v21, %v2706_v55  ;;  %v3211_v38 = vadd.f32 %v2997_v33, %v2707_v10  ;;  %v2871_v10 = vsel %vm2754_vm4, %v2868_v32, %v2870_v39  ;;  %v2370_v21 = vrot.slane %v10606_v40, 3 }
 0x2d7   : > { %2530 = vrot.lane.b32.xlu0 %v2365_v25, %s9687_s18  ;;  %2532 = vrot.lane.b32.xlu1 %v2367_v3, %s9687_s18  ;;  %v2369_v33 = vsel %vm2250_vm2, %v2366_v6, %v2368_v61  ;;  %v2872_v32 = vrot.slane %v10570_v57, 4 }
 0x2d8   : > { %v3301_v36 = vadd.f32 %v11177_v35, %v3210_v49  ;;  %v3302_v31 = vadd.f32 %v11177_v35, %v3211_v38  ;;  %v14087_v49 = vld [vmem:[#allocation10_spill] sm:$0xff]  ;;  %v2371_v3 = vsel %vm2250_vm2, %v2368_v61, %v2370_v21 }
 0x2d9   : > { %v1991_v53 = vpop.permute.xlu0 %1990  ;;  %v1993_v16 = vpop.permute.xlu1 %1992  ;;  %v1868_v4 = vrot.slane %v14087_v49, 2 }
 0x2da   : > { %v3385_v11 = vmax.f32 %v3301_v36, 0.0  ;;  %v3386_v47 = vmax.f32 %v3302_v31, 0.0  ;;  %v2204_v26 = vadd.f32 %v1991_v53, %v1700_v8  ;;  %v2205_v55 = vadd.f32 %v1993_v16, %v1701_v7 }
 0x2db   : > { %2030 = vrot.lane.b32.xlu0 %v1865_v13, %s9690_s21  ;;  %3034 = vrot.lane.b32.xlu1 %v2869_v12, %s9689_s20  ;;  %v14088_v13 = vld [vmem:[#allocation11_spill] sm:$0xff]  ;;  %v1869_v8 = vsel %vm1746_vm5, %v1866_v5, %v1868_v4  ;;  %v2873_v7 = vsel %vm2754_vm4, %v2870_v39, %v2872_v32  ;;  %v2372_v39 = vrot.slane %v14087_v49, 3 }
 0x2dc   : > { %9323 = vmatprep.mubr.msk.f32.mxu1 %vm3434_vm6, %v3385_v11  ;;  %v1870_v6 = vrot.slane %v14088_v13, 2  ;;  %v2874_v11 = vrot.slane %v10606_v40, 4 }
 0x2dd   : > { %v2495_v28 = vpop.permute.xlu0 %2494  ;;  %9324 = vmatmul.mubr.msk.f32.gmra.mxu1 %vm3434_vm6, %v3386_v47  ;;  %v2497_v9 = vpop.permute.xlu1 %2496 }
 0x2de   : > { %v2708_v59 = vadd.f32 %v2495_v28, %v2204_v26  ;;  %v2709_v24 = vadd.f32 %v2497_v9, %v2205_v55  ;;  %v1702_v28 = vadd.f32 %v10906_v29, %v10398_v51  ;;  %v1703_v9 = vadd.f32 %v10386_v44, %v10908_v2 }
 0x2df   : > { %2032 = vrot.lane.b32.xlu0 %v1867_v48, %s9690_s21  ;;  %3036 = vrot.lane.b32.xlu1 %v2871_v10, %s9689_s20  ;;  %v1871_v5 = vsel %vm1746_vm5, %v1868_v4, %v1870_v6  ;;  %v2875_v10 = vsel %vm2754_vm4, %v2872_v32, %v2874_v11 }
 0x2e1   : > { %v2999_v34 = vpop.permute.xlu0 %2998  ;;  %v3001_v46 = vpop.permute.xlu1 %3000 }
 0x2e2   : > { %v3212_v38 = vadd.f32 %v2999_v34, %v2708_v59  ;;  %v3213_v25 = vadd.f32 %v3001_v46, %v2709_v24  ;;  %v2374_v59 = vrot.slane %v14088_v13, 3  ;;  %v2373_v24 = vsel %vm2250_vm2, %v2370_v21, %v2372_v39 }
 0x2e3   : > { %2534 = vrot.lane.b32.xlu0 %v2369_v33, %s9687_s18  ;;  %2536 = vrot.lane.b32.xlu1 %v2371_v3, %s9687_s18  ;;  %v1872_v34 = vrot.slane %v10616_v18, 2 }
 0x2e4   : > { %v3303_v36 = vadd.f32 %v11177_v35, %v3212_v38  ;;  %v3304_v31 = vadd.f32 %v11177_v35, %v3213_v25  ;;  %v2375_v4 = vsel %vm2250_vm2, %v2372_v39, %v2374_v59  ;;  %v2876_v38 = vrot.slane %v14087_v49, 4 }
 0x2e5   : > { %v1995_v53 = vpop.permute.xlu0 %1994  ;;  %v1997_v16 = vpop.permute.xlu1 %1996  ;;  %v1873_v21 = vsel %vm1746_vm5, %v1870_v6, %v1872_v34  ;;  %v2378_v39 = vrot.slane %v10644_v43, 3 }
 0x2e6   : > { %v3387_v47 = vmax.f32 %v3303_v36, 0.0  ;;  %v3388_v12 = vmax.f32 %v3304_v31, 0.0  ;;  %v2206_v26 = vadd.f32 %v1995_v53, %v1702_v28  ;;  %v2207_v55 = vadd.f32 %v1997_v16, %v1703_v9 }
 0x2e7   : > { %2034 = vrot.lane.b32.xlu0 %v1869_v8, %s9690_s21  ;;  %3038 = vrot.lane.b32.xlu1 %v2873_v7, %s9689_s20  ;;  %v1874_v31 = vrot.slane %v10644_v43, 2  ;;  %v1704_v8 = vadd.f32 %v10916_v41, %v10416_v54  ;;  %v1705_v7 = vadd.f32 %v10408_v17, %v10918_v45  ;;  %v2376_v9 = vrot.slane %v10616_v18, 3 }
 0x2e8   : > { %9326 = vmatprep.mubr.msk.f32.mxu1 %vm3434_vm6, %v3387_v47  ;;  %v2877_v47 = vsel %vm2754_vm4, %v2874_v11, %v2876_v38 }
 0x2e9   : > { %v2499_v48 = vpop.permute.xlu0 %2498  ;;  %9327 = vmatmul.mubr.msk.f32.gmra.mxu1 %vm3434_vm6, %v3388_v12  ;;  %v2501_v61 = vpop.permute.xlu1 %2500  ;;  %v2878_v12 = vrot.slane %v14088_v13, 4  ;;  %v1875_v11 = vsel %vm1746_vm5, %v1872_v34, %v1874_v31 }
 0x2ea   : > { %v2710_v44 = vadd.f32 %v2499_v48, %v2206_v26  ;;  %v2711_v51 = vadd.f32 %v2501_v61, %v2207_v55  ;;  %v1876_v26 = vrot.slane %v10634_v1, 2  ;;  %v2880_v55 = vrot.slane %v10616_v18, 4 }
 0x2eb   : > { %2036 = vrot.lane.b32.xlu0 %v1871_v5, %s9690_s21  ;;  %3040 = vrot.lane.b32.xlu1 %v2875_v10, %s9689_s20  ;;  %v2879_v5 = vsel %vm2754_vm4, %v2876_v38, %v2878_v12 }
 0x2ed   : > { %v3003_v29 = vpop.permute.xlu0 %3002  ;;  %v3005_v2 = vpop.permute.xlu1 %3004 }
 0x2ee   : > { %v3214_v46 = vadd.f32 %v3003_v29, %v2710_v44  ;;  %v3215_v33 = vadd.f32 %v3005_v2, %v2711_v51  ;;  %v2377_v51 = vsel %vm2250_vm2, %v2374_v59, %v2376_v9  ;;  %v2379_v29 = vsel %vm2250_vm2, %v2376_v9, %v2378_v39 }
 0x2ef   : > { %2538 = vrot.lane.b32.xlu0 %v2373_v24, %s9687_s18  ;;  %2540 = vrot.lane.b32.xlu1 %v2375_v4, %s9687_s18  ;;  %v1878_v4 = vrot.slane %v10662_v58, 2  ;;  %v2881_v59 = vsel %vm2754_vm4, %v2878_v12, %v2880_v55 }
 0x2f0   : > { %v3305_v25 = vadd.f32 %v11177_v35, %v3214_v46  ;;  %v3306_v3 = vadd.f32 %v11177_v35, %v3215_v33  ;;  %v1877_v33 = vsel %vm1746_vm5, %v1874_v31, %v1876_v26 }
 0x2f1   : > { %v1999_v32 = vpop.permute.xlu0 %1998  ;;  %v2001_v36 = vpop.permute.xlu1 %2000 }
 0x2f2   : > { %v3389_v53 = vmax.f32 %v3305_v25, 0.0  ;;  %v3390_v16 = vmax.f32 %v3306_v3, 0.0  ;;  %v2208_v48 = vadd.f32 %v1999_v32, %v1704_v8  ;;  %v2209_v61 = vadd.f32 %v2001_v36, %v1705_v7 }
 0x2f3   : > { %2038 = vrot.lane.b32.xlu0 %v1873_v21, %s9690_s21  ;;  %3042 = vrot.lane.b32.xlu1 %v2877_v47, %s9689_s20  ;;  %v2882_v3 = vrot.slane %v10644_v43, 4  ;;  %v1706_v32 = vadd.f32 %v10926_v52, %v10436_v50  ;;  %v1707_v36 = vadd.f32 %v10426_v60, %v10928_v20  ;;  %v2382_v7 = vrot.slane %v10662_v58, 3 }
 0x2f4   : > { %9329 = vmatprep.mubr.msk.f32.mxu1 %vm3434_vm6, %v3389_v53  ;;  %v1879_v53 = vsel %vm1746_vm5, %v1876_v26, %v1878_v4 }
 0x2f5   : > { %v2503_v6 = vpop.permute.xlu0 %2502  ;;  %9330 = vmatmul.mubr.msk.f32.gmra.mxu1 %vm3434_vm6, %v3390_v16  ;;  %v2505_v28 = vpop.permute.xlu1 %2504  ;;  %v2380_v16 = vrot.slane %v10634_v1, 3  ;;  %v2883_v8 = vsel %vm2754_vm4, %v2880_v55, %v2882_v3 }
 0x2f6   : > { %v2712_v17 = vadd.f32 %v2503_v6, %v2208_v48  ;;  %v2713_v54 = vadd.f32 %v2505_v28, %v2209_v61  ;;  %v1880_v28 = vrot.slane %v10654_v62, 2  ;;  %v2884_v61 = vrot.slane %v10634_v1, 4 }
 0x2f7   : > { %2040 = vrot.lane.b32.xlu0 %v1875_v11, %s9690_s21  ;;  %3044 = vrot.lane.b32.xlu1 %v2879_v5, %s9689_s20  ;;  %v2381_v6 = vsel %vm2250_vm2, %v2378_v39, %v2380_v16  ;;  %v2383_v48 = vsel %vm2250_vm2, %v2380_v16, %v2382_v7  ;;  %v1882_v39 = vrot.slane %v10687_v30, 2 }
 0x2f9   : > { %v3007_v41 = vpop.permute.xlu0 %3006  ;;  %v3009_v45 = vpop.permute.xlu1 %3008 }
 0x2fa   : > { %v3216_v10 = vadd.f32 %v3007_v41, %v2712_v17  ;;  %v3217_v44 = vadd.f32 %v3009_v45, %v2713_v54  ;;  %v2886_v45 = vrot.slane %v10662_v58, 4 }
 0x2fb   : > { %2542 = vrot.lane.b32.xlu0 %v2377_v51, %s9687_s18  ;;  %2544 = vrot.lane.b32.xlu1 %v2379_v29, %s9687_s18  ;;  %v1708_v51 = vadd.f32 %v10936_v27, %v14055_v42  ;;  %v1709_v29 = vadd.f32 %v10446_v15, %v10938_v19 }
 0x2fc   : > { %v3307_v2 = vadd.f32 %v11177_v35, %v3216_v10  ;;  %v3308_v24 = vadd.f32 %v11177_v35, %v3217_v44  ;;  %v1881_v10 = vsel %vm1746_vm5, %v1878_v4, %v1880_v28  ;;  %v2885_v44 = vsel %vm2754_vm4, %v2882_v3, %v2884_v61 }
 0x2fd   : > { %v2003_v34 = vpop.permute.xlu0 %2002  ;;  %v2005_v46 = vpop.permute.xlu1 %2004  ;;  %v2887_v4 = vsel %vm2754_vm4, %v2884_v61, %v2886_v45 }
 0x2fe   : > { %v3391_v38 = vmax.f32 %v3307_v2, 0.0  ;;  %v3392_v25 = vmax.f32 %v3308_v24, 0.0  ;;  %v2210_v47 = vadd.f32 %v2003_v34, %v1706_v32  ;;  %v2211_v12 = vadd.f32 %v2005_v46, %v1707_v36  ;;  %v14089_v36 = vld [vmem:[#allocation12_spill] sm:$0xff] }
 0x2ff   : > { %2042 = vrot.lane.b32.xlu0 %v1877_v33, %s9690_s21  ;;  %3046 = vrot.lane.b32.xlu1 %v2881_v59, %s9689_s20  ;;  %v2384_v34 = vrot.slane %v10654_v62, 3  ;;  %v1883_v33 = vsel %vm1746_vm5, %v1880_v28, %v1882_v39 }
 0x300   : > { %9332 = vmatprep.mubr.msk.f32.mxu1 %vm3434_vm6, %v3391_v38  ;;  %v2386_v38 = vrot.slane %v10687_v30, 3 }
 0x301   : > { %v2507_v21 = vpop.permute.xlu0 %2506  ;;  %9333 = vmatmul.mubr.msk.f32.gmra.mxu1 %vm3434_vm6, %v3392_v25  ;;  %v2509_v31 = vpop.permute.xlu1 %2508  ;;  %v2385_v19 = vsel %vm2250_vm2, %v2382_v7, %v2384_v34 }
 0x302   : > { %v2714_v60 = vadd.f32 %v2507_v21, %v2210_v47  ;;  %v2715_v50 = vadd.f32 %v2509_v31, %v2211_v12  ;;  %v2387_v32 = vsel %vm2250_vm2, %v2384_v34, %v2386_v38  ;;  %v1884_v21 = vrot.slane %v14089_v36, 2 }
 0x303   : > { %2044 = vrot.lane.b32.xlu0 %v1879_v53, %s9690_s21  ;;  %3048 = vrot.lane.b32.xlu1 %v2883_v8, %s9689_s20  ;;  %v2888_v31 = vrot.slane %v10654_v62, 4  ;;  %v14090_v8 = vld [vmem:[#allocation14_spill] sm:$0xff] }
 0x304   : > { %v1886_v7 = vrot.slane %v14090_v8, 2 }
 0x305   : > { %v3011_v52 = vpop.permute.xlu0 %3010  ;;  %v3013_v20 = vpop.permute.xlu1 %3012 }
 0x306   : > { %v3218_v11 = vadd.f32 %v3011_v52, %v2714_v60  ;;  %v3219_v9 = vadd.f32 %v3013_v20, %v2715_v50  ;;  %v1885_v52 = vsel %vm1746_vm5, %v1882_v39, %v1884_v21  ;;  %v2889_v20 = vsel %vm2754_vm4, %v2886_v45, %v2888_v31 }
 0x307   : > { %2546 = vrot.lane.b32.xlu0 %v2381_v6, %s9687_s18  ;;  %2548 = vrot.lane.b32.xlu1 %v2383_v48, %s9687_s18  ;;  %v2890_v6 = vrot.slane %v10687_v30, 4  ;;  %v2388_v39 = vrot.slane %v14089_v36, 3  ;;  %v2390_v45 = vrot.slane %v14090_v8, 3 }
 0x308   : > { %v3309_v5 = vadd.f32 %v11177_v35, %v3218_v11  ;;  %v3310_v17 = vadd.f32 %v11177_v35, %v3219_v9  ;;  %v1710_v11 = vadd.f32 %v10946_v14, %v10474_v56  ;;  %v14091_v9 = vld [vmem:[#allocation4_spill] sm:$0xff] }
 0x309   : > { %v2007_v54 = vpop.permute.xlu0 %2006  ;;  %v2009_v41 = vpop.permute.xlu1 %2008  ;;  %v1711_v48 = vadd.f32 %v14091_v9, %v10948_v22 }
 0x30a   : > { %v3393_v26 = vmax.f32 %v3309_v5, 0.0  ;;  %v3394_v55 = vmax.f32 %v3310_v17, 0.0  ;;  %v2212_v46 = vadd.f32 %v2007_v54, %v1708_v51  ;;  %v2213_v25 = vadd.f32 %v2009_v41, %v1709_v29 }
 0x30b   : > { %2046 = vrot.lane.b32.xlu0 %v1881_v10, %s9690_s21  ;;  %3050 = vrot.lane.b32.xlu1 %v2885_v44, %s9689_s20  ;;  %v1887_v5 = vsel %vm1746_vm5, %v1884_v21, %v1886_v7  ;;  %v2891_v41 = vsel %vm2754_vm4, %v2888_v31, %v2890_v6  ;;  %v2389_v29 = vsel %vm2250_vm2, %v2386_v38, %v2388_v39  ;;  %v14095_v21 = vld [vmem:[#allocation27_spill] sm:$0xff] }
 0x30c   : > { %9335 = vmatprep.mubr.msk.f32.mxu1 %vm3434_vm6, %v3393_v26 }
 0x30d   : > { %v2511_v2 = vpop.permute.xlu0 %2510  ;;  %9336 = vmatmul.mubr.msk.f32.gmra.mxu1 %vm3434_vm6, %v3394_v55  ;;  %v2513_v24 = vpop.permute.xlu1 %2512  ;;  %v14092_v55 = vld [vmem:[#allocation13_spill] sm:$0xff] }
 0x30e   : > { %v2716_v42 = vadd.f32 %v2511_v2, %v2212_v46  ;;  %v2717_v15 = vadd.f32 %v2513_v24, %v2213_v25  ;;  %v1888_v10 = vrot.slane %v14092_v55, 2  ;;  %v2391_v2 = vsel %vm2250_vm2, %v2388_v39, %v2390_v45  ;;  %v14093_v25 = vld [vmem:[#allocation16_spill] sm:$0xff] }
 0x30f   : > { %2048 = vrot.lane.b32.xlu0 %v1883_v33, %s9690_s21  ;;  %3052 = vrot.lane.b32.xlu1 %v2887_v4, %s9689_s20  ;;  %v2892_v24 = vrot.slane %v14089_v36, 4 }
 0x310   : > { %v1889_v38 = vsel %vm1746_vm5, %v1886_v7, %v1888_v10  ;;  %v2392_v7 = vrot.slane %v14092_v55, 3 }
 0x311   : > { %v3015_v27 = vpop.permute.xlu0 %3014  ;;  %v3017_v3 = vpop.permute.xlu1 %3016 }
 0x312   : > { %v3220_v59 = vadd.f32 %v3015_v27, %v2716_v42  ;;  %v3221_v53 = vadd.f32 %v3017_v3, %v2717_v15  ;;  %v1890_v42 = vrot.slane %v14093_v25, 2 }
 0x313   : > { %2550 = vrot.lane.b32.xlu0 %v2385_v19, %s9687_s18  ;;  %2552 = vrot.lane.b32.xlu1 %v2387_v32, %s9687_s18  ;;  %v2893_v19 = vsel %vm2754_vm4, %v2890_v6, %v2892_v24  ;;  %v14094_v32 = vld [vmem:[#allocation6_spill] sm:$0xff]  ;;  %v2394_v6 = vrot.slane %v14093_v25, 3 }
 0x314   : > { %v3311_v16 = vadd.f32 %v11177_v35, %v3220_v59  ;;  %v3312_v47 = vadd.f32 %v11177_v35, %v3221_v53  ;;  %v2894_v59 = vrot.slane %v14090_v8, 4  ;;  %v1712_v31 = vadd.f32 %v14095_v21, %v14094_v32  ;;  %v14096_v53 = vld [vmem:[#allocation28_spill] sm:$0xff] }
 0x315   : > { %v2011_v12 = vpop.permute.xlu0 %2010  ;;  %v2013_v50 = vpop.permute.xlu1 %2012 }
 0x316   : > { %v3395_v60 = vmax.f32 %v3311_v16, 0.0  ;;  %v3396_v28 = vmax.f32 %v3312_v47, 0.0  ;;  %v2214_v17 = vadd.f32 %v2011_v12, %v1710_v11  ;;  %v2215_v26 = vadd.f32 %v2013_v50, %v1711_v48  ;;  %v14097_v16 = vld [vmem:[#allocation5_spill] sm:$0xff] }
 0x317   : > { %2050 = vrot.lane.b32.xlu0 %v1885_v52, %s9690_s21  ;;  %3054 = vrot.lane.b32.xlu1 %v2889_v20, %s9689_s20  ;;  %v1713_v47 = vadd.f32 %v14097_v16, %v14096_v53  ;;  %v1891_v52 = vsel %vm1746_vm5, %v1888_v10, %v1890_v42  ;;  %v2895_v20 = vsel %vm2754_vm4, %v2892_v24, %v2894_v59 }
 0x318   : > { %9338 = vmatprep.mubr.msk.f32.mxu1 %vm3434_vm6, %v3395_v60 }
 0x319   : > { %v2515_v61 = vpop.permute.xlu0 %2514  ;;  %9339 = vmatmul.mubr.msk.f32.gmra.mxu1 %vm3434_vm6, %v3396_v28  ;;  %v2517_v54 = vpop.permute.xlu1 %2516 }
 0x31a   : > { %v2718_v56 = vadd.f32 %v2515_v61, %v2214_v17  ;;  %v2719_v14 = vadd.f32 %v2517_v54, %v2215_v26  ;;  %v2393_v61 = vsel %vm2250_vm2, %v2390_v45, %v2392_v7  ;;  %v2395_v54 = vsel %vm2250_vm2, %v2392_v7, %v2394_v6 }
 0x31b   : > { %2052 = vrot.lane.b32.xlu0 %v1887_v5, %s9690_s21  ;;  %3056 = vrot.lane.b32.xlu1 %v2891_v41, %s9689_s20  ;;  %v14098_v41 = vld [vmem:[#allocation15_spill] sm:$0xff]  ;;  %v2896_v26 = vrot.slane %v14092_v55, 4 }
 0x31c   : > { %v1892_v39 = vrot.slane %v14098_v41, 2 }
 0x31d   : > { %v3019_v22 = vpop.permute.xlu0 %3018  ;;  %v3021_v51 = vpop.permute.xlu1 %3020  ;;  %v2897_v24 = vsel %vm2754_vm4, %v2894_v59, %v2896_v26 }
 0x31e   : > { %v3222_v44 = vadd.f32 %v3019_v22, %v2718_v56  ;;  %v3223_v34 = vadd.f32 %v3021_v51, %v2719_v14 }
 0x31f   : > { %2554 = vrot.lane.b32.xlu0 %v2389_v29, %s9687_s18  ;;  %2556 = vrot.lane.b32.xlu1 %v2391_v2, %s9687_s18  ;;  %v1893_v2 = vsel %vm1746_vm5, %v1890_v42, %v1892_v39  ;;  %v2396_v42 = vrot.slane %v14098_v41, 3 }
 0x320   : > { %v3313_v46 = vadd.f32 %v11177_v35, %v3222_v44  ;;  %v3314_v33 = vadd.f32 %v11177_v35, %v3223_v34  ;;  %v14099_v44 = vld [vmem:[#allocation18_spill] sm:$0xff]  ;;  %v2898_v34 = vrot.slane %v14093_v25, 4 }
 0x321   : > { %v2015_v4 = vpop.permute.xlu0 %2014  ;;  %v2017_v27 = vpop.permute.xlu1 %2016  ;;  %v1894_v45 = vrot.slane %v14099_v44, 2  ;;  %v2398_v53 = vrot.slane %v14099_v44, 3 }
 0x322   : > { %v3397_v15 = vmax.f32 %v3313_v46, 0.0  ;;  %v3398_v3 = vmax.f32 %v3314_v33, 0.0  ;;  %v2216_v60 = vadd.f32 %v2015_v4, %v1712_v31  ;;  %v2217_v28 = vadd.f32 %v2017_v27, %v1713_v47  ;;  %v14100_v33 = vld [vmem:[#allocation8_spill] sm:$0xff]  ;;  %v14101_v4 = vld [vmem:[#allocation29_spill] sm:$0xff]  ;;  %v14102_v27 = vld [vmem:[#allocation30_spill] sm:$0xff] }
 0x323   : > { %2054 = vrot.lane.b32.xlu0 %v1889_v38, %s9690_s21  ;;  %3058 = vrot.lane.b32.xlu1 %v2893_v19, %s9689_s20  ;;  %v14103_v38 = vld [vmem:[#allocation7_spill] sm:$0xff]  ;;  %v1895_v21 = vsel %vm1746_vm5, %v1892_v39, %v1894_v45  ;;  %v2899_v31 = vsel %vm2754_vm4, %v2896_v26, %v2898_v34 }
 0x324   : > { %9341 = vmatprep.mubr.msk.f32.mxu1 %vm3434_vm6, %v3397_v15  ;;  %v1714_v15 = vadd.f32 %v14101_v4, %v14100_v33  ;;  %v1715_v19 = vadd.f32 %v14103_v38, %v14102_v27  ;;  %v14108_v27 = vld [vmem:[#allocation32_spill] sm:$0xff] }
 0x325   : > { %v2519_v12 = vpop.permute.xlu0 %2518  ;;  %9342 = vmatmul.mubr.msk.f32.gmra.mxu1 %vm3434_vm6, %v3398_v3  ;;  %v2521_v50 = vpop.permute.xlu1 %2520  ;;  %v1717_v38 = vadd.f32 %v10524_v37, %v14108_v27 }
 0x326   : > { %v2720_v11 = vadd.f32 %v2519_v12, %v2216_v60  ;;  %v2721_v9 = vadd.f32 %v2521_v50, %v2217_v28  ;;  %v14104_v60 = vld [vmem:[#allocation17_spill] sm:$0xff]  ;;  %v2397_v28 = vsel %vm2250_vm2, %v2394_v6, %v2396_v42 }
 0x327   : > { %2056 = vrot.lane.b32.xlu0 %v1891_v52, %s9690_s21  ;;  %3060 = vrot.lane.b32.xlu1 %v2895_v20, %s9689_s20  ;;  %v1896_v50 = vrot.slane %v14104_v60, 2  ;;  %v2400_v33 = vrot.slane %v14104_v60, 3 }
 0x329   : > { %v3023_v48 = vpop.permute.xlu0 %3022  ;;  %v3025_v17 = vpop.permute.xlu1 %3024 }
 0x32a   : > { %v3224_v5 = vadd.f32 %v3023_v48, %v2720_v11  ;;  %v3225_v56 = vadd.f32 %v3025_v17, %v2721_v9  ;;  %v2399_v11 = vsel %vm2250_vm2, %v2396_v42, %v2398_v53  ;;  %v2900_v9 = vrot.slane %v14098_v41, 4 }
 0x32b   : > { %2558 = vrot.lane.b32.xlu0 %v2393_v61, %s9687_s18  ;;  %2560 = vrot.lane.b32.xlu1 %v2395_v54, %s9687_s18  ;;  %v1897_v54 = vsel %vm1746_vm5, %v1894_v45, %v1896_v50 }
 0x32c   : > { %v3315_v14 = vadd.f32 %v11177_v35, %v3224_v5  ;;  %v3316_v22 = vadd.f32 %v11177_v35, %v3225_v56  ;;  %v2901_v6 = vsel %vm2754_vm4, %v2898_v34, %v2900_v9  ;;  %v14105_v56 = vld [vmem:[#allocation20_spill] sm:$0xff] }
 0x32d   : > { %v2019_v10 = vpop.permute.xlu0 %2018  ;;  %v2021_v29 = vpop.permute.xlu1 %2020  ;;  %v2402_v4 = vrot.slane %v14105_v56, 3 }
 0x32e   : > { %v3399_v51 = vmax.f32 %v3315_v14, 0.0  ;;  %v3400_v46 = vmax.f32 %v3316_v22, 0.0  ;;  %v2218_v59 = vadd.f32 %v2019_v10, %v1714_v15  ;;  %v2219_v16 = vadd.f32 %v2021_v29, %v1715_v19  ;;  %v14107_v29 = vld [vmem:[#allocation31_spill] sm:$0xff] }
 0x32f   : > { %2058 = vrot.lane.b32.xlu0 %v1893_v2, %s9690_s21  ;;  %3062 = vrot.lane.b32.xlu1 %v2897_v24, %s9689_s20  ;;  %v1898_v14 = vrot.slane %v14105_v56, 2  ;;  %v2902_v22 = vrot.slane %v14099_v44, 4 }
 0x330   : > { %9344 = vmatprep.mubr.msk.f32.mxu1 %vm3434_vm6, %v3399_v51  ;;  %v14106_v51 = vld [vmem:[#allocation9_spill] sm:$0xff] }
 0x331   : > { %v2523_v3 = vpop.permute.xlu0 %2522  ;;  %9345 = vmatmul.mubr.msk.f32.gmra.mxu1 %vm3434_vm6, %v3400_v46  ;;  %v2525_v32 = vpop.permute.xlu1 %2524  ;;  %v1716_v2 = vadd.f32 %v14107_v29, %v14106_v51  ;;  %v1899_v34 = vsel %vm1746_vm5, %v1896_v50, %v1898_v14  ;;  %v2903_v46 = vsel %vm2754_vm4, %v2900_v9, %v2902_v22  ;;  %v2906_v9 = vrot.slane %v14105_v56, 4 }
 0x332   : > { %v2722_v47 = vadd.f32 %v2523_v3, %v2218_v59  ;;  %v2723_v12 = vadd.f32 %v2525_v32, %v2219_v16  ;;  %v2401_v59 = vsel %vm2250_vm2, %v2398_v53, %v2400_v33  ;;  %v2403_v32 = vsel %vm2250_vm2, %v2400_v33, %v2402_v4 }
 0x333   : > { %2060 = vrot.lane.b32.xlu0 %v1895_v21, %s9690_s21  ;;  %3064 = vrot.lane.b32.xlu1 %v2899_v31, %s9689_s20  ;;  %v14109_v21 = vld [vmem:[#allocation19_spill] sm:$0xff]  ;;  %v2904_v16 = vrot.slane %v14104_v60, 4 }
 0x334   : > { %v1900_v31 = vrot.slane %v14109_v21, 2 }
 0x335   : > { %v3027_v7 = vpop.permute.xlu0 %3026  ;;  %v3029_v20 = vpop.permute.xlu1 %3028  ;;  %v2905_v53 = vsel %vm2754_vm4, %v2902_v22, %v2904_v16  ;;  %v2404_v22 = vrot.slane %v14109_v21, 3 }
 0x336   : > { %v3226_v52 = vadd.f32 %v3027_v7, %v2722_v47  ;;  %v3227_v48 = vadd.f32 %v3029_v20, %v2723_v12  ;;  %v1901_v20 = vsel %vm1746_vm5, %v1898_v14, %v1900_v31  ;;  %v2907_v14 = vsel %vm2754_vm4, %v2904_v16, %v2906_v9  ;;  %v14114_v16 = vld [vmem:[#allocation24_spill] sm:$0xff] }
 0x337   : > { %2562 = vrot.lane.b32.xlu0 %v2397_v28, %s9687_s18  ;;  %2564 = vrot.lane.b32.xlu1 %v2399_v11, %s9687_s18  ;;  %v14110_v28 = vld [vmem:[#allocation22_spill] sm:$0xff] }
 0x338   : > { %v3317_v61 = vadd.f32 %v11177_v35, %v3226_v52  ;;  %v3318_v5 = vadd.f32 %v11177_v35, %v3227_v48  ;;  %v1902_v11 = vrot.slane %v14110_v28, 2 }
 0x339   : > { %v2023_v17 = vpop.permute.xlu0 %2022  ;;  %v2025_v26 = vpop.permute.xlu1 %2024 }
 0x33a   : > { %v3401_v39 = vmax.f32 %v3317_v61, 0.0  ;;  %v3402_v10 = vmax.f32 %v3318_v5, 0.0  ;;  %v2220_v15 = vadd.f32 %v2023_v17, %v1716_v2  ;;  %v2221_v47 = vadd.f32 %v2025_v26, %v1717_v38  ;;  %v14111_v5 = vld [vmem:[#allocation3_spill] sm:$0xff] }
 0x33b   : > { %2062 = vrot.lane.b32.xlu0 %v1897_v54, %s9690_s21  ;;  %3066 = vrot.lane.b32.xlu1 %v2901_v6, %s9689_s20  ;;  %v1718_v17 = vadd.f32 %v14111_v5, %v10556_v63  ;;  %v1903_v6 = vsel %vm1746_vm5, %v1900_v31, %v1902_v11  ;;  %v14112_v63 = vld [vmem:[#allocation33_spill] sm:$0xff]  ;;  %v2908_v38 = vrot.slane %v14109_v21, 4  ;;  %v2410_v5 = vrot.slane %v14114_v16, 3 }
 0x33c   : > { %9347 = vmatprep.mubr.msk.f32.mxu1 %vm3434_vm6, %v3401_v39  ;;  %v1719_v2 = vadd.f32 %v10546_v23, %v14112_v63 }
 0x33d   : > { %v2527_v24 = vpop.permute.xlu0 %2526  ;;  %9348 = vmatmul.mubr.msk.f32.gmra.mxu1 %vm3434_vm6, %v3402_v10  ;;  %v2529_v45 = vpop.permute.xlu1 %2528  ;;  %v2406_v10 = vrot.slane %v14110_v28, 3 }
 0x33e   : > { %v2724_v19 = vadd.f32 %v2527_v24, %v2220_v15  ;;  %v2725_v7 = vadd.f32 %v2529_v45, %v2221_v47  ;;  %v14113_v15 = vld [vmem:[#allocation21_spill] sm:$0xff]  ;;  %v1906_v47 = vrot.slane %v14114_v16, 2 }
 0x33f   : > { %2064 = vrot.lane.b32.xlu0 %v1899_v34, %s9690_s21  ;;  %3068 = vrot.lane.b32.xlu1 %v2903_v46, %s9689_s20  ;;  %v2405_v46 = vsel %vm2250_vm2, %v2402_v4, %v2404_v22  ;;  %v2407_v33 = vsel %vm2250_vm2, %v2404_v22, %v2406_v10  ;;  %v1904_v27 = vrot.slane %v14113_v15, 2  ;;  %v2909_v4 = vsel %vm2754_vm4, %v2906_v9, %v2908_v38 }
 0x341   : > { %v2027_v3 = vpop.permute.xlu0 %2026  ;;  %v3031_v42 = vpop.permute.xlu1 %3030  ;;  %v1905_v31 = vsel %vm1746_vm5, %v1902_v11, %v1904_v27  ;;  %v1907_v9 = vsel %vm1746_vm5, %v1904_v27, %v1906_v47 }
 0x342   : > { %v3228_v12 = vadd.f32 %v3031_v42, %v2724_v19  ;;  %v2222_v51 = vadd.f32 %v2027_v3, %v1718_v17 }
 0x343   : > { %2566 = vrot.lane.b32.xlu0 %v2401_v59, %s9687_s18  ;;  %2568 = vrot.lane.b32.xlu1 %v2403_v32, %s9687_s18 }
 0x344   : > { %v3319_v37 = vadd.f32 %v11177_v35, %v3228_v12  ;;  %v2910_v12 = vrot.slane %v14110_v28, 4 }
 0x345   : > { %v2029_v50 = vpop.permute.xlu0 %2028  ;;  %v3033_v52 = vpop.permute.xlu1 %3032 }
 0x346   : > { %v3403_v48 = vmax.f32 %v3319_v37, 0.0  ;;  %v3229_v61 = vadd.f32 %v3033_v52, %v2725_v7  ;;  %v2223_v19 = vadd.f32 %v2029_v50, %v1719_v2  ;;  %v14115_v50 = vld [vmem:[#allocation34_spill] sm:$0xff]  ;;  %v2912_v2 = vrot.slane %v14113_v15, 4 }
 0x347   : > { %2066 = vrot.lane.b32.xlu0 %v1901_v20, %s9690_s21  ;;  %3070 = vrot.lane.b32.xlu1 %v2905_v53, %s9689_s20  ;;  %v1720_v52 = vadd.f32 %v14115_v50, %v10582_v0  ;;  %v14116_v0 = vld [vmem:[#allocation35_spill] sm:$0xff] }
 0x348   : > { %v3320_v54 = vadd.f32 %v11177_v35, %v3229_v61  ;;  %9350 = vmatprep.mubr.msk.f32.mxu1 %vm3434_vm6, %v3403_v48  ;;  %v2911_v48 = vsel %vm2754_vm4, %v2908_v38, %v2910_v12  ;;  %v2408_v61 = vrot.slane %v14113_v15, 3  ;;  %v14118_v38 = vld [vmem:[#allocation26_spill] sm:$0xff] }
 0x349   : > { %v2531_v39 = vpop.permute.xlu0 %2530  ;;  %v2533_v26 = vpop.permute.xlu1 %2532  ;;  %v2414_v50 = vrot.slane %v14118_v38, 3 }
 0x34a   : > { %v3404_v29 = vmax.f32 %v3320_v54, 0.0  ;;  %v2726_v24 = vadd.f32 %v2531_v39, %v2222_v51  ;;  %v2727_v23 = vadd.f32 %v2533_v26, %v2223_v19  ;;  %v1721_v39 = vadd.f32 %v10570_v57, %v14116_v0 }
 0x34b   : > { %2068 = vrot.lane.b32.xlu0 %v1903_v6, %s9690_s21  ;;  %3072 = vrot.lane.b32.xlu1 %v2907_v14, %s9689_s20  ;;  %v2409_v22 = vsel %vm2250_vm2, %v2406_v10, %v2408_v61  ;;  %v2411_v51 = vsel %vm2250_vm2, %v2408_v61, %v2410_v5  ;;  %v2913_v10 = vsel %vm2754_vm4, %v2910_v12, %v2912_v2  ;;  %v1910_v19 = vrot.slane %v14118_v38, 2 }
 0x34c   : > { %9351 = vmatmul.mubr.msk.f32.gmra.mxu1 %vm3434_vm6, %v3404_v29  ;;  %v14117_v29 = vld [vmem:[#allocation23_spill] sm:$0xff] }
 0x34d   : > { %v2031_v45 = vpop.permute.xlu0 %2030  ;;  %v3035_v34 = vpop.permute.xlu1 %3034  ;;  %v1908_v63 = vrot.slane %v14117_v29, 2 }
 0x34e   : > { %v3230_v3 = vadd.f32 %v3035_v34, %v2726_v24  ;;  %v2224_v17 = vadd.f32 %v2031_v45, %v1720_v52 }
 0x34f   : > { %2570 = vrot.lane.b32.xlu0 %v2405_v46, %s9687_s18  ;;  %2572 = vrot.lane.b32.xlu1 %v2407_v33, %s9687_s18  ;;  %v1909_v27 = vsel %vm1746_vm5, %v1906_v47, %v1908_v63  ;;  %v1911_v12 = vsel %vm1746_vm5, %v1908_v63, %v1910_v19 }
 0x350   : > { %v3321_v42 = vadd.f32 %v11177_v35, %v3230_v3  ;;  %v2914_v3 = vrot.slane %v14114_v16, 4 }
 0x351   : > { %v2033_v59 = vpop.permute.xlu0 %2032  ;;  %v3037_v32 = vpop.permute.xlu1 %3036 }
 0x352   : > { %v3405_v7 = vmax.f32 %v3321_v42, 0.0  ;;  %v3231_v37 = vadd.f32 %v3037_v32, %v2727_v23  ;;  %v2225_v24 = vadd.f32 %v2033_v59, %v1721_v39  ;;  %v14119_v59 = vld [vmem:[#allocation36_spill] sm:$0xff]  ;;  %v2916_v39 = vrot.slane %v14117_v29, 4 }
 0x353   : > { %2070 = vrot.lane.b32.xlu0 %v1905_v31, %s9690_s21  ;;  %3074 = vrot.lane.b32.xlu1 %v2909_v4, %s9689_s20  ;;  %v1722_v32 = vadd.f32 %v14119_v59, %v10606_v40  ;;  %v14120_v40 = vld [vmem:[#allocation37_spill] sm:$0xff] }
 0x354   : > { %v3322_v20 = vadd.f32 %v11177_v35, %v3231_v37  ;;  %9353 = vmatprep.mubr.msk.f32.mxu1 %vm3434_vm6, %v3405_v7  ;;  %v2915_v7 = vsel %vm2754_vm4, %v2912_v2, %v2914_v3  ;;  %v2412_v37 = vrot.slane %v14117_v29, 3  ;;  %v2917_v2 = vsel %vm2754_vm4, %v2914_v3, %v2916_v39 }
 0x355   : > { %v2535_v53 = vpop.permute.xlu0 %2534  ;;  %v2537_v11 = vpop.permute.xlu1 %2536 }
 0x356   : > { %v3406_v54 = vmax.f32 %v3322_v20, 0.0  ;;  %v2728_v26 = vadd.f32 %v2535_v53, %v2224_v17  ;;  %v2729_v57 = vadd.f32 %v2537_v11, %v2225_v24  ;;  %v1723_v53 = vadd.f32 %v14087_v49, %v14120_v40 }
 0x357   : > { %2072 = vrot.lane.b32.xlu0 %v1907_v9, %s9690_s21  ;;  %3076 = vrot.lane.b32.xlu1 %v2911_v48, %s9689_s20  ;;  %v2413_v61 = vsel %vm2250_vm2, %v2410_v5, %v2412_v37  ;;  %v2415_v17 = vsel %vm2250_vm2, %v2412_v37, %v2414_v50  ;;  %v2918_v24 = vrot.slane %v14118_v38, 4 }
 0x358   : > { %9354 = vmatmul.mubr.msk.f32.gmra.mxu1 %vm3434_vm6, %v3406_v54  ;;  %v14121_v54 = vld [vmem:[#allocation25_spill] sm:$0xff] }
 0x359   : > { %v2035_v6 = vpop.permute.xlu0 %2034  ;;  %v3039_v14 = vpop.permute.xlu1 %3038  ;;  %v1912_v0 = vrot.slane %v14121_v54, 2  ;;  %v2919_v3 = vsel %vm2754_vm4, %v2916_v39, %v2918_v24 }
 0x35a   : > { %v3232_v45 = vadd.f32 %v3039_v14, %v2728_v26  ;;  %v2226_v52 = vadd.f32 %v2035_v6, %v1722_v32  ;;  %v11489_v26 = vpop.f32.mrf.mxu1 }
 0x35b   : > { %2574 = vrot.lane.b32.xlu0 %v2409_v22, %s9687_s18  ;;  %2576 = vrot.lane.b32.xlu1 %v2411_v51, %s9687_s18  ;;  %v1913_v5 = vsel %vm1746_vm5, %v1910_v19, %v1912_v0 }
 0x35c   : > { %v3323_v34 = vadd.f32 %v11177_v35, %v3232_v45  ;;  %v11497_v45 = vpop.f32.mrf.mxu1 }
 0x35d   : > { %v2037_v46 = vpop.permute.xlu0 %2036  ;;  %v3041_v33 = vpop.permute.xlu1 %3040  ;;  %v4752_v40 = vrot.slane %v11497_v45, 2 }
 0x35e   : > { %v3407_v23 = vmax.f32 %v3323_v34, 0.0  ;;  %v3233_v42 = vadd.f32 %v3041_v33, %v2729_v57  ;;  %v2227_v6 = vadd.f32 %v2037_v46, %v1723_v53  ;;  %v14122_v46 = vld [vmem:[#allocation38_spill] sm:$0xff]  ;;  %v11527_v53 = vpop.f32.mrf.mxu1 }
 0x35f   : > { %2074 = vrot.lane.b32.xlu0 %v1909_v27, %s9690_s21  ;;  %3078 = vrot.lane.b32.xlu1 %v2913_v10, %s9689_s20  ;;  %v1724_v33 = vadd.f32 %v14122_v46, %v14088_v13  ;;  %v4256_v13 = vrot.slane %v11489_v26, 1  ;;  %v5923_v46 = vld [vmem:[%s13946_s5 + $0x8] sm:$0xff] }
 0x360   : > { %v3324_v31 = vadd.f32 %v11177_v35, %v3233_v42  ;;  %9356 = vmatprep.mubr.msk.f32.mxu1 %vm3434_vm6, %v3407_v23  ;;  %v4255_v23 = vrot.slane %v11497_v45, 1  ;;  %v2416_v42 = vrot.slane %v14121_v54, 3 }
 0x361   : > { %v2539_v4 = vpop.permute.xlu0 %2538  ;;  %v2541_v47 = vpop.permute.xlu1 %2540 }
 0x362   : > { %v3408_v20 = vmax.f32 %v3324_v31, 0.0  ;;  %v2730_v11 = vadd.f32 %v2539_v4, %v2226_v52  ;;  %v2731_v49 = vadd.f32 %v2541_v47, %v2227_v6  ;;  %v14123_v31 = vld [vmem:[#allocation39_spill] sm:$0xff]  ;;  %v4257_v52 = vsel %vm1242_vm3, %v4255_v23, %v4256_v13 }
 0x363   : > { %2076 = vrot.lane.b32.xlu0 %v1911_v12, %s9690_s21  ;;  %3080 = vrot.lane.b32.xlu1 %v2915_v7, %s9689_s20  ;;  %v1725_v4 = vadd.f32 %v10616_v18, %v14123_v31  ;;  %v5932_v7 = vld [vmem:[%s13946_s5 + $0x50] sm:$0xff]  ;;  %v5931_v18 = vld [vmem:[%s13946_s5 + $0x48] sm:$0xff]  ;;  %v5250_v31 = vrot.slane %v11497_v45, 3 }
 0x364   : > { %9357 = vmatmul.mubr.msk.f32.gmra.mxu1 %vm3434_vm6, %v3408_v20  ;;  %v2417_v20 = vsel %vm2250_vm2, %v2414_v50, %v2416_v42  ;;  %6208 = vmatprep.subr.mxu0 %v5932_v7  ;;  %v4753_v50 = vrot.slane %v11489_v26, 2  ;;  %v5927_v23 = vld [vmem:[%s13946_s5 + $0x28] sm:$0xff]  ;;  %v5251_v7 = vrot.slane %v11489_v26, 3 }
 0x365   : > { %v2039_v9 = vpop.permute.xlu0 %2038  ;;  %v3043_v48 = vpop.permute.xlu1 %3042  ;;  %6209 = vmatpush1.msra.mxu0 %v5931_v18 }
 0x366   : > { %v3234_v14 = vadd.f32 %v3043_v48, %v2730_v11  ;;  %v2228_v59 = vadd.f32 %v2039_v9, %v1724_v33  ;;  %v5929_v48 = vld [vmem:[%s13946_s5 + $0x38] sm:$0xff]  ;;  %v14124_v33 = vld [vmem:[#allocation40_spill] sm:$0xff] }
 0x367   : > { %2578 = vrot.lane.b32.xlu0 %v2413_v61, %s9687_s18  ;;  %2580 = vrot.lane.b32.xlu1 %v2415_v17, %s9687_s18  ;;  %v14002_v61 = vmov 0.0   ;;  %v5933_v17 = vld [vmem:[%s13946_s5 + $0x58] sm:$0xff] }
 0x368   : > { %v3325_v22 = vadd.f32 %v11177_v35, %v3234_v14  ;;  %9395 = vmatprep.subr.mxu1 %v14002_v61  ;;  %6210 = vmatprep.subr.mxu0 %v5929_v48 }
 0x369   : > { %v2041_v51 = vpop.permute.xlu0 %2040  ;;  %v3045_v63 = vpop.permute.xlu1 %3044  ;;  %9396 = vmatpush3.msra.mxu1 %v5933_v17  ;;  %6248 = vmatprep.mubr.f32.mxu0 %v14002_v61 }
 0x36a   : > { %v3409_v57 = vmax.f32 %v3325_v22, 0.0  ;;  %v3235_v34 = vadd.f32 %v3045_v63, %v2731_v49  ;;  %v2229_v11 = vadd.f32 %v2041_v51, %v1725_v4  ;;  %v5926_v49 = vld [vmem:[%s13946_s5 + $0x20] sm:$0xff]  ;;  %v4754_v63 = vsel %vm1746_vm5, %v4752_v40, %v4753_v50  ;;  %9397 = vmatprep.subr.mxu1 %v14002_v61 }
 0x36b   : > { %2078 = vrot.lane.b32.xlu0 %v1913_v5, %s9690_s21  ;;  %3082 = vrot.lane.b32.xlu1 %v2917_v2, %s9689_s20  ;;  %v5930_v22 = vld [vmem:[%s13946_s5 + $0x40] sm:$0xff]  ;;  %v2920_v5 = vrot.slane %v14121_v54, 4  ;;  %v11557_v2 = vpop.f32.mrf.mxu1 }
 0x36c   : > { %v3326_v27 = vadd.f32 %v11177_v35, %v3235_v34  ;;  %9359 = vmatprep.mubr.msk.f32.mxu1 %vm3434_vm6, %v3409_v57  ;;  %9398 = vmatpush3.msra.mxu1 %v5930_v22 }
 0x36d   : > { %v2543_v10 = vpop.permute.xlu0 %2542  ;;  %v2545_v19 = vpop.permute.xlu1 %2544  ;;  %9399 = vmatprep.subr.mxu1 %v14002_v61 }
 0x36e   : > { %v3410_v32 = vmax.f32 %v3326_v27, 0.0  ;;  %v2732_v47 = vadd.f32 %v2543_v10, %v2228_v59  ;;  %v2733_v39 = vadd.f32 %v2545_v19, %v2229_v11  ;;  %v1726_v27 = vadd.f32 %v14124_v33, %v10644_v43  ;;  %v11569_v10 = vld [vmem:[%s13943_s2] ss:$0 sm:$0xff]  ;;  %9400 = vmatpush3.msra.mxu1 %v5927_v23 }
 0x36f   : > { %2080 = vrot.lane.b32.xlu0 %v1912_v0, %s9690_s21  ;;  %3084 = vrot.lane.b32.xlu1 %v2919_v3, %s9689_s20  ;;  %v5928_v0 = vld [vmem:[%s13946_s5 + $0x30] sm:$0xff]  ;;  %v2921_v59 = vsel %vm2754_vm4, %v2918_v24, %v2920_v5  ;;  %v5252_v11 = vsel %vm2250_vm2, %v5250_v31, %v5251_v7 }
 0x370   : > { %9360 = vmatmul.mubr.msk.f32.gmra.mxu1 %vm3434_vm6, %v3410_v32  ;;  %6211 = vmatpush1.msra.mxu0 %v5928_v0  ;;  %v4258_v32 = vrot.slane %v11557_v2, 1  ;;  %v4260_v0 = vrot.slane %v11527_v53, 1 }
 0x371   : > { %v2043_v12 = vpop.permute.xlu0 %2042  ;;  %v3047_v37 = vpop.permute.xlu1 %3046  ;;  %6212 = vmatprep.subr.mxu0 %v5926_v49  ;;  %9401 = vmatprep.subr.mxu1 %v14002_v61 }
 0x372   : > { %v3236_v9 = vadd.f32 %v3047_v37, %v2732_v47  ;;  %v2230_v4 = vadd.f32 %v2043_v12, %v1726_v27  ;;  %v14125_v37 = vld [vmem:[#allocation41_spill] sm:$0xff]  ;;  %v4259_v18 = vsel %vm1242_vm3, %v4256_v13, %v4258_v32 }
 0x373   : > { %4420 = vrot.lane.b32.xlu0 %v4257_v52, %s9689_s20  ;;  %2582 = vrot.lane.b32.xlu1 %v2417_v20, %s9687_s18  ;;  %v1727_v24 = vadd.f32 %v10634_v1, %v14125_v37  ;;  %v5924_v12 = vld [vmem:[%s13946_s5 + $0x10] sm:$0xff]  ;;  %v11601_v1 = vpop.f32.mrf.mxu1 }
 0x374   : > { %v3327_v6 = vadd.f32 %v11177_v35, %v3236_v9  ;;  %v5925_v35 = vld [vmem:[%s13946_s5 + $0x18] sm:$0xff]  ;;  %v4755_v9 = vrot.slane %v11557_v2, 2  ;;  %9402 = vmatpush3.msra.mxu1 %v5924_v12 }
 0x375   : > { %v2045_v14 = vpop.permute.xlu0 %2044  ;;  %v3049_v51 = vpop.permute.xlu1 %3048  ;;  %6213 = vmatpush1.msra.mxu0 %v5925_v35 }
 0x376   : > { %v3411_v57 = vmax.f32 %v3327_v6, 0.0  ;;  %v3237_v34 = vadd.f32 %v3049_v51, %v2733_v39  ;;  %6214 = vmatprep.subr.mxu0 %v5923_v46  ;;  %v2231_v48 = vadd.f32 %v2045_v14, %v1727_v24  ;;  %v4756_v22 = vsel %vm1746_vm5, %v4753_v50, %v4755_v9 }
 0x377   : > { %2584 = vrot.lane.b32.xlu0 %v2416_v42, %s9687_s18  ;;  %4917 = vrot.lane.b32.xlu1 %v4754_v63, %s9692_s28  ;;  %v5922_v42 = vld [vmem:[%s13946_s5] sm:$0xff]  ;;  %v4261_v14 = vsel %vm1242_vm3, %v4258_v32, %v4260_v0  ;;  %v5253_v51 = vrot.slane %v11557_v2, 3  ;;  %v11612_v63 = vpop.f32.mrf.mxu1 }
 0x378   : > { %v3328_v19 = vadd.f32 %v11569_v10, %v3237_v34  ;;  %9362 = vmatprep.mubr.msk.f32.mxu1 %vm3434_vm6, %v3411_v57  ;;  %6215 = vmatpush1.msra.mxu0 %v5922_v42  ;;  %v4757_v57 = vrot.slane %v11527_v53, 2  ;;  %v14126_v34 = vld [vmem:[#allocation42_spill] sm:$0xff]  ;;  %v4262_v23 = vrot.slane %v11612_v63, 1  ;;  %v4759_v24 = vrot.slane %v11612_v63, 2 }
 0x379   : > { %v2547_v3 = vpop.permute.xlu0 %2546  ;;  %v2549_v43 = vpop.permute.xlu1 %2548  ;;  %v1728_v46 = vadd.f32 %v14126_v34, %v10662_v58  ;;  %v5255_v58 = vrot.slane %v11527_v53, 3 }
 0x37a   : > { %v3412_v47 = vmax.f32 %v3328_v19, 0.0  ;;  %v2734_v52 = vadd.f32 %v2547_v3, %v2230_v4  ;;  %v2735_v39 = vadd.f32 %v2549_v43, %v2231_v48  ;;  %v5254_v19 = vsel %vm2250_vm2, %v5251_v7, %v5253_v51 }
 0x37b   : > { %3086 = vrot.lane.b32.xlu0 %v2921_v59, %s9689_s20  ;;  %3088 = vrot.lane.b32.xlu1 %v2920_v5, %s9689_s20  ;;  %v4758_v3 = vsel %vm1746_vm5, %v4755_v9, %v4757_v57  ;;  %v14127_v59 = vld [vmem:[#allocation43_spill] sm:$0xff]  ;;  %v4263_v7 = vsel %vm1242_vm3, %v4260_v0, %v4262_v23  ;;  %v5256_v37 = vsel %vm2250_vm2, %v5253_v51, %v5255_v58  ;;  %v5257_v0 = vrot.slane %v11612_v63, 3 }
 0x37c   : > { %9363 = vmatmul.mubr.msk.f32.gmra.mxu1 %vm3434_vm6, %v3412_v47  ;;  %v1729_v32 = vadd.f32 %v10654_v62, %v14127_v59  ;;  %v4264_v62 = vrot.slane %v11601_v1, 1  ;;  %v4760_v48 = vsel %vm1746_vm5, %v4757_v57, %v4759_v24 }
 0x37d   : > { %v2047_v20 = vpop.permute.xlu0 %2046  ;;  %v3051_v40 = vpop.permute.xlu1 %3050  ;;  %v5258_v57 = vsel %vm2250_vm2, %v5255_v58, %v5257_v0 }
 0x37e   : > { %v3238_v17 = vadd.f32 %v3051_v40, %v2734_v52  ;;  %v2232_v42 = vadd.f32 %v2047_v20, %v1728_v46  ;;  %v11633_v52 = vpop.f32.mrf.mxu1 }
 0x37f   : > { %4422 = vrot.lane.b32.xlu0 %v4259_v18, %s9689_s20  ;;  %5417 = vrot.lane.b32.xlu1 %v5252_v11, %s9693_s19 }
 0x380   : > { %v3329_v13 = vadd.f32 %v11569_v10, %v3238_v17  ;;  %v4265_v17 = vsel %vm1242_vm3, %v4262_v23, %v4264_v62 }
 0x381   : > { %v2049_v6 = vpop.permute.xlu0 %2048  ;;  %v3053_v49 = vpop.permute.xlu1 %3052 }
 0x382   : > { %v3413_v5 = vmax.f32 %v3329_v13, 0.0  ;;  %v3239_v35 = vadd.f32 %v3053_v49, %v2735_v39  ;;  %v2233_v20 = vadd.f32 %v2049_v6, %v1729_v32  ;;  %v11642_v39 = vpop.f32.mrf.mxu1  ;;  %v4761_v49 = vrot.slane %v11601_v1, 2 }
 0x383   : > { %4919 = vrot.lane.b32.xlu0 %v4756_v22, %s9692_s28  ;;  %4424 = vrot.lane.b32.xlu1 %v4261_v14, %s9689_s20  ;;  %v14128_v22 = vld [vmem:[#allocation44_spill] sm:$0xff]  ;;  %v4266_v46 = vrot.slane %v11642_v39, 1  ;;  %v4763_v59 = vrot.slane %v11642_v39, 2 }
 0x384   : > { %v3330_v33 = vadd.f32 %v11569_v10, %v3239_v35  ;;  %9365 = vmatprep.mubr.msk.f32.mxu1 %vm3434_vm6, %v3413_v5  ;;  %v1730_v14 = vadd.f32 %v14128_v22, %v10687_v30  ;;  %v4762_v34 = vsel %vm1746_vm5, %v4759_v24, %v4761_v49  ;;  %v5259_v30 = vrot.slane %v11601_v1, 3  ;;  %v11663_v32 = vpop.f32.mrf.mxu1 }
 0x385   : > { %v2551_v50 = vpop.permute.xlu0 %2550  ;;  %v2553_v27 = vpop.permute.xlu1 %2552 }
 0x386   : > { %v3414_v43 = vmax.f32 %v3330_v33, 0.0  ;;  %v2736_v31 = vadd.f32 %v2551_v50, %v2232_v42  ;;  %v2737_v40 = vadd.f32 %v2553_v27, %v2233_v20  ;;  %v14129_v27 = vld [vmem:[#allocation45_spill] sm:$0xff]  ;;  %v5260_v58 = vsel %vm2250_vm2, %v5257_v0, %v5259_v30 }
 0x387   : > { %5419 = vrot.lane.b32.xlu0 %v5254_v19, %s9693_s19  ;;  %4921 = vrot.lane.b32.xlu1 %v4758_v3, %s9692_s28  ;;  %v1731_v19 = vadd.f32 %v14089_v36, %v14129_v27  ;;  %v4268_v36 = vrot.slane %v11633_v52, 1  ;;  %v4764_v20 = vsel %vm1746_vm5, %v4761_v49, %v4763_v59 }
 0x388   : > { %9366 = vmatmul.mubr.msk.f32.gmra.mxu1 %vm3434_vm6, %v3414_v43  ;;  %v4267_v43 = vsel %vm1242_vm3, %v4264_v62, %v4266_v46  ;;  %v5261_v62 = vrot.slane %v11642_v39, 3 }
 0x389   : > { %v2051_v4 = vpop.permute.xlu0 %2050  ;;  %v3055_v47 = vpop.permute.xlu1 %3054 }
 0x38a   : > { %v3240_v12 = vadd.f32 %v3055_v47, %v2736_v31  ;;  %v2234_v33 = vadd.f32 %v2051_v4, %v1730_v14  ;;  %v5262_v49 = vsel %vm2250_vm2, %v5259_v30, %v5261_v62 }
 0x38b   : > { %4426 = vrot.lane.b32.xlu0 %v4263_v7, %s9689_s20  ;;  %5421 = vrot.lane.b32.xlu1 %v5256_v37, %s9693_s19 }
 0x38c   : > { %v3331_v18 = vadd.f32 %v11569_v10, %v3240_v12  ;;  %v4269_v12 = vsel %vm1242_vm3, %v4266_v46, %v4268_v36 }
 0x38d   : > { %v2053_v11 = vpop.permute.xlu0 %2052  ;;  %v3057_v9 = vpop.permute.xlu1 %3056 }
 0x38e   : > { %v3415_v13 = vmax.f32 %v3331_v18, 0.0  ;;  %v3241_v6 = vadd.f32 %v3057_v9, %v2737_v40  ;;  %v2235_v31 = vadd.f32 %v2053_v11, %v1731_v19  ;;  %v11672_v40 = vpop.f32.mrf.mxu1  ;;  %v4765_v9 = vrot.slane %v11633_v52, 2 }
 0x38f   : > { %4923 = vrot.lane.b32.xlu0 %v4760_v48, %s9692_s28  ;;  %4428 = vrot.lane.b32.xlu1 %v4265_v17, %s9689_s20  ;;  %v14130_v48 = vld [vmem:[#allocation46_spill] sm:$0xff]  ;;  %v4270_v14 = vrot.slane %v11672_v40, 1  ;;  %v4767_v27 = vrot.slane %v11672_v40, 2 }
 0x390   : > { %v3332_v51 = vadd.f32 %v11569_v10, %v3241_v6  ;;  %9368 = vmatprep.mubr.msk.f32.mxu1 %vm3434_vm6, %v3415_v13  ;;  %v1732_v17 = vadd.f32 %v14130_v48, %v14090_v8  ;;  %v4766_v22 = vsel %vm1746_vm5, %v4763_v59, %v4765_v9  ;;  %v5263_v8 = vrot.slane %v11633_v52, 3  ;;  %v11693_v19 = vpop.f32.mrf.mxu1 }
 0x391   : > { %v2555_v5 = vpop.permute.xlu0 %2554  ;;  %v2557_v35 = vpop.permute.xlu1 %2556 }
 0x392   : > { %v3416_v50 = vmax.f32 %v3332_v51, 0.0  ;;  %v2738_v3 = vadd.f32 %v2555_v5, %v2234_v33  ;;  %v2739_v47 = vadd.f32 %v2557_v35, %v2235_v31  ;;  %v14131_v35 = vld [vmem:[#allocation47_spill] sm:$0xff]  ;;  %v5264_v30 = vsel %vm2250_vm2, %v5261_v62, %v5263_v8 }
 0x393   : > { %5423 = vrot.lane.b32.xlu0 %v5258_v57, %s9693_s19  ;;  %4925 = vrot.lane.b32.xlu1 %v4762_v34, %s9692_s28  ;;  %v1733_v57 = vadd.f32 %v14092_v55, %v14131_v35  ;;  %v4272_v55 = vrot.slane %v11663_v32, 1  ;;  %v4768_v31 = vsel %vm1746_vm5, %v4765_v9, %v4767_v27 }
 0x394   : > { %9369 = vmatmul.mubr.msk.f32.gmra.mxu1 %vm3434_vm6, %v3416_v50  ;;  %v4271_v50 = vsel %vm1242_vm3, %v4268_v36, %v4270_v14  ;;  %v5265_v36 = vrot.slane %v11672_v40, 3 }
 0x395   : > { %v2055_v23 = vpop.permute.xlu0 %2054  ;;  %v3059_v42 = vpop.permute.xlu1 %3058 }
 0x396   : > { %v3242_v4 = vadd.f32 %v3059_v42, %v2738_v3  ;;  %v2236_v51 = vadd.f32 %v2055_v23, %v1732_v17  ;;  %v5266_v9 = vsel %vm2250_vm2, %v5263_v8, %v5265_v36 }
 0x397   : > { %4430 = vrot.lane.b32.xlu0 %v4267_v43, %s9689_s20  ;;  %5425 = vrot.lane.b32.xlu1 %v5260_v58, %s9693_s19 }
 0x398   : > { %v3333_v7 = vadd.f32 %v11569_v10, %v3242_v4  ;;  %v4273_v4 = vsel %vm1242_vm3, %v4270_v14, %v4272_v55 }
 0x399   : > { %v2057_v37 = vpop.permute.xlu0 %2056  ;;  %v3061_v24 = vpop.permute.xlu1 %3060 }
 0x39a   : > { %v3417_v18 = vmax.f32 %v3333_v7, 0.0  ;;  %v3243_v11 = vadd.f32 %v3061_v24, %v2739_v47  ;;  %v2237_v3 = vadd.f32 %v2057_v37, %v1733_v57  ;;  %v11702_v47 = vpop.f32.mrf.mxu1  ;;  %v4769_v24 = vrot.slane %v11663_v32, 2 }
 0x39b   : > { %4927 = vrot.lane.b32.xlu0 %v4764_v20, %s9692_s28  ;;  %4432 = vrot.lane.b32.xlu1 %v4269_v12, %s9689_s20  ;;  %v14132_v20 = vld [vmem:[#allocation48_spill] sm:$0xff]  ;;  %v4274_v17 = vrot.slane %v11702_v47, 1  ;;  %v4771_v35 = vrot.slane %v11702_v47, 2 }
 0x39c   : > { %v3334_v0 = vadd.f32 %v11569_v10, %v3243_v11  ;;  %9371 = vmatprep.mubr.msk.f32.mxu1 %vm3434_vm6, %v3417_v18  ;;  %v1734_v12 = vadd.f32 %v14132_v20, %v14093_v25  ;;  %v4770_v48 = vsel %vm1746_vm5, %v4767_v27, %v4769_v24  ;;  %v5267_v25 = vrot.slane %v11663_v32, 3  ;;  %v11723_v57 = vpop.f32.mrf.mxu1 }
 0x39d   : > { %v2559_v13 = vpop.permute.xlu0 %2558  ;;  %v2561_v6 = vpop.permute.xlu1 %2560 }
 0x39e   : > { %v3418_v5 = vmax.f32 %v3334_v0, 0.0  ;;  %v2740_v34 = vadd.f32 %v2559_v13, %v2236_v51  ;;  %v2741_v42 = vadd.f32 %v2561_v6, %v2237_v3  ;;  %v14133_v6 = vld [vmem:[#allocation49_spill] sm:$0xff]  ;;  %v5268_v8 = vsel %vm2250_vm2, %v5265_v36, %v5267_v25 }
 0x39f   : > { %5427 = vrot.lane.b32.xlu0 %v5262_v49, %s9693_s19  ;;  %4929 = vrot.lane.b32.xlu1 %v4766_v22, %s9692_s28  ;;  %v1735_v49 = vadd.f32 %v14098_v41, %v14133_v6  ;;  %v4276_v41 = vrot.slane %v11693_v19, 1  ;;  %v4772_v3 = vsel %vm1746_vm5, %v4769_v24, %v4771_v35 }
 0x3a0   : > { %9372 = vmatmul.mubr.msk.f32.gmra.mxu1 %vm3434_vm6, %v3418_v5  ;;  %v4275_v5 = vsel %vm1242_vm3, %v4272_v55, %v4274_v17  ;;  %v5269_v55 = vrot.slane %v11702_v47, 3 }
 0x3a1   : > { %v2059_v46 = vpop.permute.xlu0 %2058  ;;  %v3063_v33 = vpop.permute.xlu1 %3062 }
 0x3a2   : > { %v3244_v23 = vadd.f32 %v3063_v33, %v2740_v34  ;;  %v2238_v0 = vadd.f32 %v2059_v46, %v1734_v12  ;;  %v5270_v24 = vsel %vm2250_vm2, %v5267_v25, %v5269_v55 }
 0x3a3   : > { %4434 = vrot.lane.b32.xlu0 %v4271_v50, %s9689_s20  ;;  %5429 = vrot.lane.b32.xlu1 %v5264_v30, %s9693_s19 }
 0x3a4   : > { %v3335_v43 = vadd.f32 %v11569_v10, %v3244_v23  ;;  %v4277_v23 = vsel %vm1242_vm3, %v4274_v17, %v4276_v41 }
 0x3a5   : > { %v2061_v58 = vpop.permute.xlu0 %2060  ;;  %v3065_v59 = vpop.permute.xlu1 %3064 }
 0x3a6   : > { %v3419_v7 = vmax.f32 %v3335_v43, 0.0  ;;  %v3245_v37 = vadd.f32 %v3065_v59, %v2741_v42  ;;  %v2239_v34 = vadd.f32 %v2061_v58, %v1735_v49  ;;  %v11732_v42 = vpop.f32.mrf.mxu1  ;;  %v4773_v59 = vrot.slane %v11693_v19, 2 }
 0x3a7   : > { %4931 = vrot.lane.b32.xlu0 %v4768_v31, %s9692_s28  ;;  %4436 = vrot.lane.b32.xlu1 %v4273_v4, %s9689_s20  ;;  %v14134_v31 = vld [vmem:[#allocation50_spill] sm:$0xff]  ;;  %v4278_v12 = vrot.slane %v11732_v42, 1  ;;  %v4775_v6 = vrot.slane %v11732_v42, 2 }
 0x3a8   : > { %v3336_v62 = vadd.f32 %v11569_v10, %v3245_v37  ;;  %9374 = vmatprep.mubr.msk.f32.mxu1 %vm3434_vm6, %v3419_v7  ;;  %v1736_v4 = vadd.f32 %v14134_v31, %v14099_v44  ;;  %v4774_v20 = vsel %vm1746_vm5, %v4771_v35, %v4773_v59  ;;  %v5271_v44 = vrot.slane %v11693_v19, 3  ;;  %v11753_v49 = vpop.f32.mrf.mxu1 }
 0x3a9   : > { %v2563_v18 = vpop.permute.xlu0 %2562  ;;  %v2565_v11 = vpop.permute.xlu1 %2564 }
 0x3aa   : > { %v3420_v13 = vmax.f32 %v3336_v62, 0.0  ;;  %v2742_v22 = vadd.f32 %v2563_v18, %v2238_v0  ;;  %v2743_v33 = vadd.f32 %v2565_v11, %v2239_v34  ;;  %v14135_v11 = vld [vmem:[#allocation51_spill] sm:$0xff]  ;;  %v5272_v25 = vsel %vm2250_vm2, %v5269_v55, %v5271_v44 }
 0x3ab   : > { %5431 = vrot.lane.b32.xlu0 %v5266_v9, %s9693_s19  ;;  %4933 = vrot.lane.b32.xlu1 %v4770_v48, %s9692_s28  ;;  %v1737_v9 = vadd.f32 %v14104_v60, %v14135_v11  ;;  %v4280_v60 = vrot.slane %v11723_v57, 1  ;;  %v4776_v34 = vsel %vm1746_vm5, %v4773_v59, %v4775_v6 }
 0x3ac   : > { %9375 = vmatmul.mubr.msk.f32.gmra.mxu1 %vm3434_vm6, %v3420_v13  ;;  %v4279_v13 = vsel %vm1242_vm3, %v4276_v41, %v4278_v12  ;;  %v5273_v41 = vrot.slane %v11732_v42, 3 }
 0x3ad   : > { %v2063_v14 = vpop.permute.xlu0 %2062  ;;  %v3067_v51 = vpop.permute.xlu1 %3066 }
 0x3ae   : > { %v3246_v46 = vadd.f32 %v3067_v51, %v2742_v22  ;;  %v2240_v62 = vadd.f32 %v2063_v14, %v1736_v4  ;;  %v5274_v59 = vsel %vm2250_vm2, %v5271_v44, %v5273_v41 }
 0x3af   : > { %4438 = vrot.lane.b32.xlu0 %v4275_v5, %s9689_s20  ;;  %5433 = vrot.lane.b32.xlu1 %v5268_v8, %s9693_s19 }
 0x3b0   : > { %v3337_v50 = vadd.f32 %v11569_v10, %v3246_v46  ;;  %v4281_v46 = vsel %vm1242_vm3, %v4278_v12, %v4280_v60 }
 0x3b1   : > { %v2065_v30 = vpop.permute.xlu0 %2064  ;;  %v3069_v27 = vpop.permute.xlu1 %3068 }
 0x3b2   : > { %v3421_v43 = vmax.f32 %v3337_v50, 0.0  ;;  %v3247_v58 = vadd.f32 %v3069_v27, %v2743_v33  ;;  %v2241_v22 = vadd.f32 %v2065_v30, %v1737_v9  ;;  %v11762_v33 = vpop.f32.mrf.mxu1  ;;  %v4777_v27 = vrot.slane %v11723_v57, 2 }
 0x3b3   : > { %4935 = vrot.lane.b32.xlu0 %v4772_v3, %s9692_s28  ;;  %4440 = vrot.lane.b32.xlu1 %v4277_v23, %s9689_s20  ;;  %v14136_v3 = vld [vmem:[#allocation52_spill] sm:$0xff]  ;;  %v4282_v4 = vrot.slane %v11762_v33, 1  ;;  %v4779_v11 = vrot.slane %v11762_v33, 2 }
 0x3b4   : > { %v3338_v36 = vadd.f32 %v11569_v10, %v3247_v58  ;;  %9377 = vmatprep.mubr.msk.f32.mxu1 %vm3434_vm6, %v3421_v43  ;;  %v1738_v23 = vadd.f32 %v14136_v3, %v14105_v56  ;;  %v4778_v31 = vsel %vm1746_vm5, %v4775_v6, %v4777_v27  ;;  %v5275_v56 = vrot.slane %v11723_v57, 3  ;;  %v11783_v9 = vpop.f32.mrf.mxu1 }
 0x3b5   : > { %v2567_v7 = vpop.permute.xlu0 %2566  ;;  %v2569_v37 = vpop.permute.xlu1 %2568 }
 0x3b6   : > { %v3422_v18 = vmax.f32 %v3338_v36, 0.0  ;;  %v2744_v48 = vadd.f32 %v2567_v7, %v2240_v62  ;;  %v2745_v51 = vadd.f32 %v2569_v37, %v2241_v22  ;;  %v14137_v37 = vld [vmem:[#allocation53_spill] sm:$0xff]  ;;  %v5276_v44 = vsel %vm2250_vm2, %v5273_v41, %v5275_v56 }
 0x3b7   : > { %5435 = vrot.lane.b32.xlu0 %v5270_v24, %s9693_s19  ;;  %4937 = vrot.lane.b32.xlu1 %v4774_v20, %s9692_s28  ;;  %v1739_v24 = vadd.f32 %v14109_v21, %v14137_v37  ;;  %v4284_v21 = vrot.slane %v11753_v49, 1  ;;  %v4780_v22 = vsel %vm1746_vm5, %v4777_v27, %v4779_v11 }
 0x3b8   : > { %9378 = vmatmul.mubr.msk.f32.gmra.mxu1 %vm3434_vm6, %v3422_v18  ;;  %v4283_v18 = vsel %vm1242_vm3, %v4280_v60, %v4282_v4  ;;  %v5277_v60 = vrot.slane %v11762_v33, 3 }
 0x3b9   : > { %v2067_v17 = vpop.permute.xlu0 %2066  ;;  %v3071_v0 = vpop.permute.xlu1 %3070 }
 0x3ba   : > { %v3248_v14 = vadd.f32 %v3071_v0, %v2744_v48  ;;  %v2242_v36 = vadd.f32 %v2067_v17, %v1738_v23  ;;  %v5278_v27 = vsel %vm2250_vm2, %v5275_v56, %v5277_v60 }
 0x3bb   : > { %4442 = vrot.lane.b32.xlu0 %v4279_v13, %s9689_s20  ;;  %5437 = vrot.lane.b32.xlu1 %v5272_v25, %s9693_s19 }
 0x3bc   : > { %v3339_v5 = vadd.f32 %v11569_v10, %v3248_v14  ;;  %v4285_v14 = vsel %vm1242_vm3, %v4282_v4, %v4284_v21 }
 0x3bd   : > { %v2069_v8 = vpop.permute.xlu0 %2068  ;;  %v3073_v35 = vpop.permute.xlu1 %3072 }
 0x3be   : > { %v3423_v50 = vmax.f32 %v3339_v5, 0.0  ;;  %v3249_v30 = vadd.f32 %v3073_v35, %v2745_v51  ;;  %v2243_v48 = vadd.f32 %v2069_v8, %v1739_v24  ;;  %v11792_v51 = vpop.f32.mrf.mxu1  ;;  %v4781_v35 = vrot.slane %v11753_v49, 2 }
 0x3bf   : > { %4939 = vrot.lane.b32.xlu0 %v4776_v34, %s9692_s28  ;;  %4444 = vrot.lane.b32.xlu1 %v4281_v46, %s9689_s20  ;;  %v14138_v34 = vld [vmem:[#allocation54_spill] sm:$0xff]  ;;  %v4286_v23 = vrot.slane %v11792_v51, 1  ;;  %v4783_v37 = vrot.slane %v11792_v51, 2 }
 0x3c0   : > { %v3340_v55 = vadd.f32 %v11569_v10, %v3249_v30  ;;  %9380 = vmatprep.mubr.msk.f32.mxu1 %vm3434_vm6, %v3423_v50  ;;  %v1740_v46 = vadd.f32 %v14138_v34, %v14110_v28  ;;  %v4782_v3 = vsel %vm1746_vm5, %v4779_v11, %v4781_v35  ;;  %v5279_v28 = vrot.slane %v11753_v49, 3  ;;  %v11813_v24 = vpop.f32.mrf.mxu1 }
 0x3c1   : > { %v2571_v43 = vpop.permute.xlu0 %2570  ;;  %v2573_v58 = vpop.permute.xlu1 %2572 }
 0x3c2   : > { %v3424_v7 = vmax.f32 %v3340_v55, 0.0  ;;  %v2746_v20 = vadd.f32 %v2571_v43, %v2242_v36  ;;  %v2747_v0 = vadd.f32 %v2573_v58, %v2243_v48  ;;  %v14139_v58 = vld [vmem:[#allocation55_spill] sm:$0xff]  ;;  %v5280_v56 = vsel %vm2250_vm2, %v5277_v60, %v5279_v28 }
 0x3c3   : > { %5439 = vrot.lane.b32.xlu0 %v5274_v59, %s9693_s19  ;;  %4941 = vrot.lane.b32.xlu1 %v4778_v31, %s9692_s28  ;;  %v1741_v59 = vadd.f32 %v14113_v15, %v14139_v58  ;;  %v4288_v15 = vrot.slane %v11783_v9, 1  ;;  %v4784_v48 = vsel %vm1746_vm5, %v4781_v35, %v4783_v37 }
 0x3c4   : > { %9381 = vmatmul.mubr.msk.f32.gmra.mxu1 %vm3434_vm6, %v3424_v7  ;;  %v4287_v7 = vsel %vm1242_vm3, %v4284_v21, %v4286_v23  ;;  %v5281_v21 = vrot.slane %v11792_v51, 3 }
 0x3c5   : > { %v2071_v12 = vpop.permute.xlu0 %2070  ;;  %v3075_v62 = vpop.permute.xlu1 %3074 }
 0x3c6   : > { %v3250_v17 = vadd.f32 %v3075_v62, %v2746_v20  ;;  %v2244_v55 = vadd.f32 %v2071_v12, %v1740_v46  ;;  %v5282_v35 = vsel %vm2250_vm2, %v5279_v28, %v5281_v21 }
 0x3c7   : > { %4446 = vrot.lane.b32.xlu0 %v4283_v18, %s9689_s20  ;;  %5441 = vrot.lane.b32.xlu1 %v5276_v44, %s9693_s19 }
 0x3c8   : > { %v3341_v13 = vadd.f32 %v11569_v10, %v3250_v17  ;;  %v4289_v17 = vsel %vm1242_vm3, %v4286_v23, %v4288_v15 }
 0x3c9   : > { %v2073_v25 = vpop.permute.xlu0 %2072  ;;  %v3077_v6 = vpop.permute.xlu1 %3076 }
 0x3ca   : > { %v3425_v5 = vmax.f32 %v3341_v13, 0.0  ;;  %v3251_v8 = vadd.f32 %v3077_v6, %v2747_v0  ;;  %v2245_v20 = vadd.f32 %v2073_v25, %v1741_v59  ;;  %v11822_v0 = vpop.f32.mrf.mxu1  ;;  %v4785_v6 = vrot.slane %v11783_v9, 2 }
 0x3cb   : > { %4943 = vrot.lane.b32.xlu0 %v4780_v22, %s9692_s28  ;;  %4448 = vrot.lane.b32.xlu1 %v4285_v14, %s9689_s20  ;;  %v14140_v22 = vld [vmem:[#allocation56_spill] sm:$0xff]  ;;  %v4290_v46 = vrot.slane %v11822_v0, 1  ;;  %v4787_v58 = vrot.slane %v11822_v0, 2 }
 0x3cc   : > { %v3342_v41 = vadd.f32 %v11569_v10, %v3251_v8  ;;  %9383 = vmatprep.mubr.msk.f32.mxu1 %vm3434_vm6, %v3425_v5  ;;  %v1742_v14 = vadd.f32 %v14140_v22, %v14114_v16  ;;  %v4786_v34 = vsel %vm1746_vm5, %v4783_v37, %v4785_v6  ;;  %v5283_v16 = vrot.slane %v11783_v9, 3  ;;  %v11843_v59 = vpop.f32.mrf.mxu1 }
 0x3cd   : > { %v2575_v50 = vpop.permute.xlu0 %2574  ;;  %v2577_v30 = vpop.permute.xlu1 %2576 }
 0x3ce   : > { %v3426_v43 = vmax.f32 %v3342_v41, 0.0  ;;  %v2748_v31 = vadd.f32 %v2575_v50, %v2244_v55  ;;  %v2749_v62 = vadd.f32 %v2577_v30, %v2245_v20  ;;  %v14141_v30 = vld [vmem:[#allocation59_spill] sm:$0xff]  ;;  %v5284_v28 = vsel %vm2250_vm2, %v5281_v21, %v5283_v16 }
 0x3cf   : > { %5443 = vrot.lane.b32.xlu0 %v5278_v27, %s9693_s19  ;;  %4945 = vrot.lane.b32.xlu1 %v4782_v3, %s9692_s28  ;;  %v1743_v27 = vadd.f32 %v14117_v29, %v14141_v30  ;;  %v4292_v29 = vrot.slane %v11813_v24, 1  ;;  %v4788_v20 = vsel %vm1746_vm5, %v4785_v6, %v4787_v58 }
 0x3d0   : > { %9384 = vmatmul.mubr.msk.f32.gmra.mxu1 %vm3434_vm6, %v3426_v43  ;;  %v4291_v43 = vsel %vm1242_vm3, %v4288_v15, %v4290_v46  ;;  %v5285_v15 = vrot.slane %v11822_v0, 3 }
 0x3d1   : > { %v2075_v4 = vpop.permute.xlu0 %2074  ;;  %v3079_v36 = vpop.permute.xlu1 %3078 }
 0x3d2   : > { %v3252_v12 = vadd.f32 %v3079_v36, %v2748_v31  ;;  %v2246_v41 = vadd.f32 %v2075_v4, %v1742_v14  ;;  %v5287_v14 = vrot.slane %v11813_v24, 3 }
 0x3d3   : > { %4450 = vrot.lane.b32.xlu0 %v4287_v7, %s9689_s20  ;;  %5445 = vrot.lane.b32.xlu1 %v5280_v56, %s9693_s19 }
 0x3d4   : > { %v3343_v18 = vadd.f32 %v11569_v10, %v3252_v12  ;;  %v4293_v12 = vsel %vm1242_vm3, %v4290_v46, %v4292_v29 }
 0x3d5   : > { %v2077_v44 = vpop.permute.xlu0 %2076  ;;  %v3081_v11 = vpop.permute.xlu1 %3080 }
 0x3d6   : > { %v3427_v13 = vmax.f32 %v3343_v18, 0.0  ;;  %v3253_v25 = vadd.f32 %v3081_v11, %v2749_v62  ;;  %v2247_v31 = vadd.f32 %v2077_v44, %v1743_v27  ;;  %v11852_v62 = vpop.f32.mrf.mxu1  ;;  %v4789_v11 = vrot.slane %v11813_v24, 2 }
 0x3d7   : > { %4947 = vrot.lane.b32.xlu0 %v4784_v48, %s9692_s28  ;;  %4452 = vrot.lane.b32.xlu1 %v4289_v17, %s9689_s20  ;;  %v4294_v6 = vrot.slane %v11852_v62, 1  ;;  %v4791_v30 = vrot.slane %v11852_v62, 2 }
 0x3d8   : > { %v3344_v60 = vadd.f32 %v11569_v10, %v3253_v25  ;;  %9386 = vmatprep.mubr.msk.f32.mxu1 %vm3434_vm6, %v3427_v13  ;;  %v5286_v13 = vsel %vm2250_vm2, %v5283_v16, %v5285_v15  ;;  %v4790_v25 = vsel %vm1746_vm5, %v4787_v58, %v4789_v11  ;;  %v5288_v16 = vsel %vm2250_vm2, %v5285_v15, %v5287_v14  ;;  %v11873_v27 = vpop.f32.mrf.mxu1 }
 0x3d9   : > { %v2579_v5 = vpop.permute.xlu0 %2578  ;;  %v2581_v8 = vpop.permute.xlu1 %2580  ;;  %v4792_v58 = vsel %vm1746_vm5, %v4789_v11, %v4791_v30 }
 0x3da   : > { %v3428_v50 = vmax.f32 %v3344_v60, 0.0  ;;  %v2750_v3 = vadd.f32 %v2579_v5, %v2246_v41  ;;  %v2751_v36 = vadd.f32 %v2581_v8, %v2247_v31  ;;  %v14142_v60 = vld [vmem:[#allocation58_spill] sm:$0xff]  ;;  %v14143_v8 = vld [vmem:[#allocation57_spill] sm:$0xff] }
 0x3db   : > { %5447 = vrot.lane.b32.xlu0 %v5282_v35, %s9693_s19  ;;  %4949 = vrot.lane.b32.xlu1 %v4786_v34, %s9692_s28  ;;  %v1744_v5 = vadd.f32 %v14142_v60, %v14118_v38  ;;  %v1745_v35 = vadd.f32 %v14121_v54, %v14143_v8  ;;  %v4296_v38 = vrot.slane %v11843_v59, 1 }
 0x3dc   : > { %9387 = vmatmul.mubr.msk.f32.gmra.mxu1 %vm3434_vm6, %v3428_v50  ;;  %v4295_v50 = vsel %vm1242_vm3, %v4292_v29, %v4294_v6  ;;  %v11881_v29 = vpop.f32.mrf.mxu1 }
 0x3dd   : > { %v2079_v23 = vpop.permute.xlu0 %2078  ;;  %v3083_v55 = vpop.permute.xlu1 %3082  ;;  %v4297_v31 = vsel %vm1242_vm3, %v4294_v6, %v4296_v38  ;;  %v4795_v8 = vrot.slane %v11881_v29, 2 }
 0x3de   : > { %v3254_v4 = vadd.f32 %v3083_v55, %v2750_v3  ;;  %v2248_v46 = vadd.f32 %v2079_v23, %v1744_v5 }
 0x3df   : > { %4454 = vrot.lane.b32.xlu0 %v4291_v43, %s9689_s20  ;;  %5449 = vrot.lane.b32.xlu1 %v5284_v28, %s9693_s19 }
 0x3e0   : > { %v3345_v7 = vadd.f32 %v11569_v10, %v3254_v4  ;;  %v5289_v4 = vrot.slane %v11852_v62, 3 }
 0x3e1   : > { %v2081_v56 = vpop.permute.xlu0 %2080  ;;  %v3085_v37 = vpop.permute.xlu1 %3084 }
 0x3e2   : > { %v3429_v18 = vmax.f32 %v3345_v7, 0.0  ;;  %v3255_v44 = vadd.f32 %v3085_v37, %v2751_v36  ;;  %v2249_v3 = vadd.f32 %v2081_v56, %v1745_v35  ;;  %v4793_v56 = vrot.slane %v11843_v59, 2  ;;  %v11909_v35 = vpop.f32.mrf.mxu1 }
 0x3e3   : > { %4951 = vrot.lane.b32.xlu0 %v4788_v20, %s9692_s28  ;;  %4456 = vrot.lane.b32.xlu1 %v4293_v12, %s9689_s20  ;;  %v5290_v11 = vsel %vm2250_vm2, %v5287_v14, %v5289_v4 }
 0x3e4   : > { %v3346_v48 = vadd.f32 %v11569_v10, %v3255_v44  ;;  %9389 = vmatprep.mubr.msk.f32.mxu1 %vm3434_vm6, %v3429_v18  ;;  %v11892_v44 = vld [vmem:[%s13945_s4] ss:$0 sm:$0xff] }
 0x3e5   : > { %v4421_v17 = vpop.permute.xlu0 %4420  ;;  %v2583_v21 = vpop.permute.xlu1 %2582 }
 0x3e6   : > { %v3430_v22 = vmax.f32 %v3346_v48, 0.0  ;;  %v2752_v54 = vadd.f32 %v2583_v21, %v2248_v46  ;;  %v4669_v36 = vadd.f32 %v4421_v17, %v11497_v45  ;;  %v4794_v48 = vsel %vm1746_vm5, %v4791_v30, %v4793_v56 }
 0x3e7   : > { %5451 = vrot.lane.b32.xlu0 %v5286_v13, %s9693_s19  ;;  %4953 = vrot.lane.b32.xlu1 %v4790_v25, %s9692_s28  ;;  %v4298_v17 = vrot.slane %v11881_v29, 1  ;;  %v5291_v21 = vrot.slane %v11843_v59, 3  ;;  %v4300_v46 = vrot.slane %v11873_v27, 1  ;;  %v4796_v30 = vsel %vm1746_vm5, %v4793_v56, %v4795_v8 }
 0x3e8   : > { %9390 = vmatmul.mubr.msk.f32.gmra.mxu1 %vm3434_vm6, %v3430_v22 }
 0x3e9   : > { %v2585_v34 = vpop.permute.xlu0 %2584  ;;  %v4918_v41 = vpop.permute.xlu1 %4917  ;;  %v5292_v22 = vsel %vm2250_vm2, %v5289_v4, %v5291_v21  ;;  %v4299_v5 = vsel %vm1242_vm3, %v4296_v38, %v4298_v17  ;;  %v5293_v38 = vrot.slane %v11881_v29, 3 }
 0x3ea   : > { %v2753_v55 = vadd.f32 %v2585_v34, %v2249_v3  ;;  %v5166_v20 = vadd.f32 %v4918_v41, %v4669_v36  ;;  %v4301_v3 = vsel %vm1242_vm3, %v4298_v17, %v4300_v46 }
 0x3eb   : > { %4458 = vrot.lane.b32.xlu0 %v4295_v50, %s9689_s20  ;;  %5453 = vrot.lane.b32.xlu1 %v5288_v16, %s9693_s19  ;;  %v5294_v36 = vsel %vm2250_vm2, %v5291_v21, %v5293_v38 }
 0x3ed   : > { %v3087_v43 = vpop.permute.xlu0 %3086  ;;  %v3089_v28 = vpop.permute.xlu1 %3088 }
 0x3ee   : > { %v3256_v23 = vadd.f32 %v3087_v43, %v2752_v54  ;;  %v3257_v7 = vadd.f32 %v3089_v28, %v2753_v55  ;;  %v11922_v54 = vpop.f32.mrf.mxu1  ;;  %v4797_v43 = vrot.slane %v11873_v27, 2 }
 0x3ef   : > { %4955 = vrot.lane.b32.xlu0 %v4792_v58, %s9692_s28  ;;  %4460 = vrot.lane.b32.xlu1 %v4297_v31, %s9689_s20  ;;  %v4302_v56 = vrot.slane %v11922_v54, 1 }
 0x3f0   : > { %v3347_v37 = vadd.f32 %v11569_v10, %v3256_v23  ;;  %v3348_v12 = vadd.f32 %v11569_v10, %v3257_v7  ;;  %v4798_v7 = vsel %vm1746_vm5, %v4795_v8, %v4797_v43  ;;  %v11945_v17 = vpop.f32.mrf.mxu1 }
 0x3f1   : > { %v4423_v15 = vpop.permute.xlu0 %4422  ;;  %v5418_v45 = vpop.permute.xlu1 %5417 }
 0x3f2   : > { %v3431_v18 = vmax.f32 %v3347_v37, 0.0  ;;  %v3432_v13 = vmax.f32 %v3348_v12, 0.0  ;;  %v5666_v25 = vadd.f32 %v5418_v45, %v5166_v20  ;;  %v4670_v14 = vadd.f32 %v11489_v26, %v4423_v15 }
 0x3f3   : > { %5455 = vrot.lane.b32.xlu0 %v5290_v11, %s9693_s19  ;;  %4957 = vrot.lane.b32.xlu1 %v4794_v48, %s9692_s28  ;;  %v4303_v45 = vsel %vm1242_vm3, %v4300_v46, %v4302_v56  ;;  %v4799_v48 = vrot.slane %v11922_v54, 2 }
 0x3f4   : > { %9392 = vmatprep.mubr.msk.f32.mxu1 %vm3434_vm6, %v3431_v18  ;;  %v5756_v10 = vadd.f32 %v11892_v44, %v5666_v25 }
 0x3f5   : > { %v4920_v6 = vpop.permute.xlu0 %4919  ;;  %9393 = vmatmul.mubr.msk.f32.gmra.mxu1 %vm3434_vm6, %v3432_v13  ;;  %v4425_v60 = vpop.permute.xlu1 %4424  ;;  %v4304_v13 = vrot.slane %v11909_v35, 1 }
 0x3f6   : > { %9403 = vmatprep.mubr.msk.f32.mxu1 %vm9694_vm8, %v14002_v61  ;;  %v5839_v34 = vmax.f32 %v5756_v10, 0.0  ;;  %v5167_v26 = vadd.f32 %v4920_v6, %v4670_v14  ;;  %v4671_v55 = vadd.f32 %v4425_v60, %v11557_v2  ;;  %v5295_v2 = vrot.slane %v11873_v27, 3 }
 0x3f7   : > { %4462 = vrot.lane.b32.xlu0 %v4299_v5, %s9689_s20  ;;  %5457 = vrot.lane.b32.xlu1 %v5292_v22, %s9693_s19  ;;  %v4800_v22 = vsel %vm1746_vm5, %v4797_v43, %v4799_v48  ;;  %v4305_v14 = vsel %vm1242_vm3, %v4302_v56, %v4304_v13  ;;  %v5297_v60 = vrot.slane %v11922_v54, 3  ;;  %v11958_v5 = vpop.f32.mrf.mxu1 }
 0x3f8   : > { %8713 = vmatmul.mubr.msk.f32.vlgmr.msra.gmra.mxu0 %vm5934_vm7, %v5839_v34  ;;  %v5296_v11 = vsel %vm2250_vm2, %v5293_v38, %v5295_v2  ;;  %v4306_v38 = vrot.slane %v11958_v5, 1 }
 0x3f9   : > { %v5420_v41 = vpop.permute.xlu0 %5419  ;;  %9404 = vmatmul.mubr.msk.f32.vlgmr.msra.gmra.mxu1 %vm5934_vm7, %v5839_v34  ;;  %v4922_v16 = vpop.permute.xlu1 %4921  ;;  %6254 = vmatprep.mubr.f32.mxu0 %v14002_v61  ;;  %v4801_v34 = vrot.slane %v11909_v35, 2 }
 0x3fa   : > { %v5667_v50 = vadd.f32 %v5420_v41, %v5167_v26  ;;  %9406 = vmatprep.mubr.msk.f32.mxu1 %vm9694_vm8, %v14002_v61  ;;  %v5168_v28 = vadd.f32 %v4922_v16, %v4671_v55 }
 0x3fb   : > { %4959 = vrot.lane.b32.xlu0 %v4796_v30, %s9692_s28  ;;  %4464 = vrot.lane.b32.xlu1 %v4301_v3, %s9689_s20  ;;  %v5298_v30 = vsel %vm2250_vm2, %v5295_v2, %v5297_v60  ;;  %v4802_v3 = vsel %vm1746_vm5, %v4799_v48, %v4801_v34 }
 0x3fc   : > { %v5757_v23 = vadd.f32 %v11892_v44, %v5667_v50 }
 0x3fd   : > { %v4427_v58 = vpop.permute.xlu0 %4426  ;;  %v5422_v4 = vpop.permute.xlu1 %5421 }
 0x3fe   : > { %v5840_v31 = vmax.f32 %v5757_v23, 0.0  ;;  %v5668_v37 = vadd.f32 %v5422_v4, %v5168_v28  ;;  %v4672_v15 = vadd.f32 %v11527_v53, %v4427_v58 }
 0x3ff   : > { %5459 = vrot.lane.b32.xlu0 %v5294_v36, %s9693_s19  ;;  %4961 = vrot.lane.b32.xlu1 %v4798_v7, %s9692_s28  ;;  %v4803_v36 = vrot.slane %v11958_v5, 2  ;;  %v11981_v7 = vpop.f32.mrf.mxu1 }
 0x400   : > { %8714 = vmatmul.mubr.msk.f32.gmra.mxu0 %vm5934_vm7, %v5840_v31  ;;  %9407 = vmatmul.mubr.msk.f32.gmra.mxu1 %vm5934_vm7, %v5840_v31  ;;  %v5758_v20 = vadd.f32 %v11892_v44, %v5668_v37  ;;  %v4307_v31 = vsel %vm1242_vm3, %v4304_v13, %v4306_v38  ;;  %v4308_v37 = vrot.slane %v11945_v17, 1 }
 0x401   : > { %v4924_v12 = vpop.permute.xlu0 %4923  ;;  %6260 = vmatprep.mubr.f32.mxu0 %v14002_v61  ;;  %9409 = vmatprep.mubr.msk.f32.mxu1 %vm9694_vm8, %v14002_v61  ;;  %v4429_v18 = vpop.permute.xlu1 %4428 }
 0x402   : > { %v5841_v21 = vmax.f32 %v5758_v20, 0.0  ;;  %v5169_v25 = vadd.f32 %v4924_v12, %v4672_v15  ;;  %v4673_v8 = vadd.f32 %v4429_v18, %v11612_v63  ;;  %v5299_v63 = vrot.slane %v11909_v35, 3 }
 0x403   : > { %4466 = vrot.lane.b32.xlu0 %v4303_v45, %s9689_s20  ;;  %5461 = vrot.lane.b32.xlu1 %v5296_v11, %s9693_s19  ;;  %v4804_v15 = vsel %vm1746_vm5, %v4801_v34, %v4803_v36  ;;  %v4309_v18 = vsel %vm1242_vm3, %v4306_v38, %v4308_v37  ;;  %v5301_v45 = vrot.slane %v11958_v5, 3  ;;  %v11994_v11 = vpop.f32.mrf.mxu1 }
 0x404   : > { %8715 = vmatmul.mubr.msk.f32.gmra.mxu0 %vm5934_vm7, %v5841_v21  ;;  %9410 = vmatmul.mubr.msk.f32.gmra.mxu1 %vm5934_vm7, %v5841_v21  ;;  %v5300_v4 = vsel %vm2250_vm2, %v5297_v60, %v5299_v63  ;;  %v4805_v21 = vrot.slane %v11945_v17, 2  ;;  %v4310_v60 = vrot.slane %v11994_v11, 1 }
 0x405   : > { %v5424_v53 = vpop.permute.xlu0 %5423  ;;  %v4926_v6 = vpop.permute.xlu1 %4925  ;;  %6266 = vmatprep.mubr.f32.mxu0 %v14002_v61  ;;  %9412 = vmatprep.mubr.msk.f32.mxu1 %vm9694_vm8, %v14002_v61 }
 0x406   : > { %v5669_v10 = vadd.f32 %v5424_v53, %v5169_v25  ;;  %v5170_v26 = vadd.f32 %v4926_v6, %v4673_v8  ;;  %v12009_v34 = vpop.f32.mrf.mxu1 }
 0x407   : > { %4963 = vrot.lane.b32.xlu0 %v4800_v22, %s9692_s28  ;;  %4468 = vrot.lane.b32.xlu1 %v4305_v14, %s9689_s20  ;;  %v5302_v22 = vsel %vm2250_vm2, %v5299_v63, %v5301_v45  ;;  %v4806_v14 = vsel %vm1746_vm5, %v4803_v36, %v4805_v21 }
 0x408   : > { %v5759_v46 = vadd.f32 %v11892_v44, %v5669_v10 }
 0x409   : > { %v4431_v41 = vpop.permute.xlu0 %4430  ;;  %v5426_v16 = vpop.permute.xlu1 %5425 }
 0x40a   : > { %v5842_v50 = vmax.f32 %v5759_v46, 0.0  ;;  %v5670_v55 = vadd.f32 %v5426_v16, %v5170_v26  ;;  %v4674_v28 = vadd.f32 %v11601_v1, %v4431_v41  ;;  %v4311_v16 = vsel %vm1242_vm3, %v4308_v37, %v4310_v60 }
 0x40b   : > { %5463 = vrot.lane.b32.xlu0 %v5298_v30, %s9693_s19  ;;  %4965 = vrot.lane.b32.xlu1 %v4802_v3, %s9692_s28  ;;  %v4807_v3 = vrot.slane %v11994_v11, 2  ;;  %v4809_v37 = vrot.slane %v11981_v7, 2 }
 0x40c   : > { %8716 = vmatmul.mubr.msk.f32.gmra.mxu0 %vm5934_vm7, %v5842_v50  ;;  %9413 = vmatmul.mubr.msk.f32.gmra.mxu1 %vm5934_vm7, %v5842_v50  ;;  %v5760_v43 = vadd.f32 %v11892_v44, %v5670_v55  ;;  %v4312_v55 = vrot.slane %v11981_v7, 1 }
 0x40d   : > { %v4928_v23 = vpop.permute.xlu0 %4927  ;;  %6272 = vmatprep.mubr.f32.mxu0 %v14002_v61  ;;  %9415 = vmatprep.mubr.msk.f32.mxu1 %vm9694_vm8, %v14002_v61  ;;  %v4433_v58 = vpop.permute.xlu1 %4432 }
 0x40e   : > { %v5843_v56 = vmax.f32 %v5760_v43, 0.0  ;;  %v5171_v2 = vadd.f32 %v4928_v23, %v4674_v28  ;;  %v4675_v48 = vadd.f32 %v4433_v58, %v11642_v39  ;;  %v5303_v39 = vrot.slane %v11945_v17, 3  ;;  %v12022_v43 = vpop.f32.mrf.mxu1 }
 0x40f   : > { %4470 = vrot.lane.b32.xlu0 %v4307_v31, %s9689_s20  ;;  %5465 = vrot.lane.b32.xlu1 %v5300_v4, %s9693_s19  ;;  %v4808_v58 = vsel %vm1746_vm5, %v4805_v21, %v4807_v3  ;;  %v4313_v31 = vsel %vm1242_vm3, %v4310_v60, %v4312_v55  ;;  %v5305_v4 = vrot.slane %v11994_v11, 3 }
 0x410   : > { %8717 = vmatmul.mubr.msk.f32.gmra.mxu0 %vm5934_vm7, %v5843_v56  ;;  %9416 = vmatmul.mubr.msk.f32.gmra.mxu1 %vm5934_vm7, %v5843_v56  ;;  %v5304_v30 = vsel %vm2250_vm2, %v5301_v45, %v5303_v39  ;;  %v12032_v36 = vpop.f32.mrf.mxu1  ;;  %v4810_v45 = vsel %vm1746_vm5, %v4807_v3, %v4809_v37 }
 0x411   : > { %v5428_v1 = vpop.permute.xlu0 %5427  ;;  %v4930_v12 = vpop.permute.xlu1 %4929  ;;  %6278 = vmatprep.mubr.f32.mxu0 %v14002_v61  ;;  %9418 = vmatprep.mubr.msk.f32.mxu1 %vm9694_vm8, %v14002_v61 }
 0x412   : > { %v5671_v20 = vadd.f32 %v5428_v1, %v5171_v2  ;;  %v5172_v25 = vadd.f32 %v4930_v12, %v4675_v48  ;;  %v4314_v48 = vrot.slane %v12022_v43, 1  ;;  %v12042_v21 = vpop.f32.mrf.mxu1 }
 0x413   : > { %4967 = vrot.lane.b32.xlu0 %v4804_v15, %s9692_s28  ;;  %4472 = vrot.lane.b32.xlu1 %v4309_v18, %s9689_s20  ;;  %v5306_v18 = vsel %vm2250_vm2, %v5303_v39, %v5305_v4 }
 0x414   : > { %v5761_v13 = vadd.f32 %v11892_v44, %v5671_v20 }
 0x415   : > { %v4435_v53 = vpop.permute.xlu0 %4434  ;;  %v5430_v6 = vpop.permute.xlu1 %5429 }
 0x416   : > { %v5844_v10 = vmax.f32 %v5761_v13, 0.0  ;;  %v5672_v8 = vadd.f32 %v5430_v6, %v5172_v25  ;;  %v4676_v41 = vadd.f32 %v11633_v52, %v4435_v53  ;;  %v5307_v13 = vrot.slane %v11981_v7, 3  ;;  %v12049_v25 = vpop.f32.mrf.mxu1 }
 0x417   : > { %5467 = vrot.lane.b32.xlu0 %v5302_v22, %s9693_s19  ;;  %4969 = vrot.lane.b32.xlu1 %v4806_v14, %s9692_s28  ;;  %v4315_v14 = vsel %vm1242_vm3, %v4312_v55, %v4314_v48 }
 0x418   : > { %8718 = vmatmul.mubr.msk.f32.gmra.mxu0 %vm5934_vm7, %v5844_v10  ;;  %9419 = vmatmul.mubr.msk.f32.gmra.mxu1 %vm5934_vm7, %v5844_v10  ;;  %v5762_v46 = vadd.f32 %v11892_v44, %v5672_v8  ;;  %v5308_v60 = vsel %vm2250_vm2, %v5305_v4, %v5307_v13  ;;  %v4811_v8 = vrot.slane %v12022_v43, 2 }
 0x419   : > { %v4932_v26 = vpop.permute.xlu0 %4931  ;;  %6284 = vmatprep.mubr.f32.mxu0 %v14002_v61  ;;  %9421 = vmatprep.mubr.msk.f32.mxu1 %vm9694_vm8, %v14002_v61  ;;  %v4437_v50 = vpop.permute.xlu1 %4436 }
 0x41a   : > { %v5845_v38 = vmax.f32 %v5762_v46, 0.0  ;;  %v5173_v63 = vadd.f32 %v4932_v26, %v4676_v41  ;;  %v4677_v56 = vadd.f32 %v4437_v50, %v11672_v40  ;;  %v4316_v46 = vrot.slane %v12009_v34, 1  ;;  %v12062_v41 = vpop.f32.mrf.mxu1 }
 0x41b   : > { %4474 = vrot.lane.b32.xlu0 %v4311_v16, %s9689_s20  ;;  %5469 = vrot.lane.b32.xlu1 %v5304_v30, %s9693_s19  ;;  %v4812_v30 = vsel %vm1746_vm5, %v4809_v37, %v4811_v8 }
 0x41c   : > { %8719 = vmatmul.mubr.msk.f32.gmra.mxu0 %vm5934_vm7, %v5845_v38  ;;  %9422 = vmatmul.mubr.msk.f32.gmra.mxu1 %vm5934_vm7, %v5845_v38  ;;  %v4317_v3 = vsel %vm1242_vm3, %v4314_v48, %v4316_v46  ;;  %v5309_v38 = vrot.slane %v12022_v43, 3  ;;  %v12072_v55 = vpop.f32.mrf.mxu1 }
 0x41d   : > { %v5432_v52 = vpop.permute.xlu0 %5431  ;;  %v4934_v28 = vpop.permute.xlu1 %4933  ;;  %6290 = vmatprep.mubr.f32.mxu0 %v14002_v61  ;;  %9424 = vmatprep.mubr.msk.f32.mxu1 %vm9694_vm8, %v14002_v61 }
 0x41e   : > { %v5673_v23 = vadd.f32 %v5432_v52, %v5173_v63  ;;  %v5174_v1 = vadd.f32 %v4934_v28, %v4677_v56  ;;  %v4813_v52 = vrot.slane %v12009_v34, 2  ;;  %v5310_v56 = vsel %vm2250_vm2, %v5307_v13, %v5309_v38 }
 0x41f   : > { %4971 = vrot.lane.b32.xlu0 %v4808_v58, %s9692_s28  ;;  %4476 = vrot.lane.b32.xlu1 %v4313_v31, %s9689_s20 }
 0x420   : > { %v5763_v2 = vadd.f32 %v11892_v44, %v5673_v23  ;;  %v4814_v37 = vsel %vm1746_vm5, %v4811_v8, %v4813_v52 }
 0x421   : > { %v4439_v20 = vpop.permute.xlu0 %4438  ;;  %v5434_v15 = vpop.permute.xlu1 %5433 }
 0x422   : > { %v5846_v12 = vmax.f32 %v5763_v2, 0.0  ;;  %v5674_v40 = vadd.f32 %v5434_v15, %v5174_v1  ;;  %v4678_v6 = vadd.f32 %v11663_v32, %v4439_v20  ;;  %v4318_v2 = vrot.slane %v12042_v21, 1  ;;  %v12082_v1 = vpop.f32.mrf.mxu1 }
 0x423   : > { %5471 = vrot.lane.b32.xlu0 %v5306_v18, %s9693_s19  ;;  %4973 = vrot.lane.b32.xlu1 %v4810_v45, %s9692_s28  ;;  %v5311_v20 = vrot.slane %v12009_v34, 3 }
 0x424   : > { %8720 = vmatmul.mubr.msk.f32.gmra.mxu0 %vm5934_vm7, %v5846_v12  ;;  %9425 = vmatmul.mubr.msk.f32.gmra.mxu1 %vm5934_vm7, %v5846_v12  ;;  %v5764_v53 = vadd.f32 %v11892_v44, %v5674_v40  ;;  %v12089_v12 = vpop.f32.mrf.mxu1  ;;  %v4319_v40 = vsel %vm1242_vm3, %v4316_v46, %v4318_v2 }
 0x425   : > { %v4936_v10 = vpop.permute.xlu0 %4935  ;;  %6296 = vmatprep.mubr.f32.mxu0 %v14002_v61  ;;  %9427 = vmatprep.mubr.msk.f32.mxu1 %vm9694_vm8, %v14002_v61  ;;  %v4441_v22 = vpop.permute.xlu1 %4440  ;;  %v5312_v13 = vsel %vm2250_vm2, %v5309_v38, %v5311_v20 }
 0x426   : > { %v5847_v39 = vmax.f32 %v5764_v53, 0.0  ;;  %v5175_v26 = vadd.f32 %v4936_v10, %v4678_v6  ;;  %v4679_v63 = vadd.f32 %v4441_v22, %v11702_v47  ;;  %v4815_v53 = vrot.slane %v12042_v21, 2 }
 0x427   : > { %4478 = vrot.lane.b32.xlu0 %v4315_v14, %s9689_s20  ;;  %5473 = vrot.lane.b32.xlu1 %v5308_v60, %s9693_s19  ;;  %v4320_v6 = vrot.slane %v12032_v36, 1  ;;  %v12102_v14 = vpop.f32.mrf.mxu1 }
 0x428   : > { %8721 = vmatmul.mubr.msk.f32.gmra.mxu0 %vm5934_vm7, %v5847_v39  ;;  %9428 = vmatmul.mubr.msk.f32.gmra.mxu1 %vm5934_vm7, %v5847_v39  ;;  %v4816_v39 = vsel %vm1746_vm5, %v4813_v52, %v4815_v53 }
 0x429   : > { %v5436_v32 = vpop.permute.xlu0 %5435  ;;  %v4938_v16 = vpop.permute.xlu1 %4937  ;;  %6302 = vmatprep.mubr.f32.mxu0 %v14002_v61  ;;  %9430 = vmatprep.mubr.msk.f32.mxu1 %vm9694_vm8, %v14002_v61  ;;  %v4321_v46 = vsel %vm1242_vm3, %v4318_v2, %v4320_v6 }
 0x42a   : > { %v5675_v50 = vadd.f32 %v5436_v32, %v5175_v26  ;;  %v5176_v28 = vadd.f32 %v4938_v16, %v4679_v63  ;;  %v5313_v26 = vrot.slane %v12042_v21, 3  ;;  %v12112_v32 = vpop.f32.mrf.mxu1  ;;  %v4817_v16 = vrot.slane %v12032_v36, 2 }
 0x42b   : > { %4975 = vrot.lane.b32.xlu0 %v4812_v30, %s9692_s28  ;;  %4480 = vrot.lane.b32.xlu1 %v4317_v3, %s9689_s20 }
 0x42c   : > { %v5765_v23 = vadd.f32 %v11892_v44, %v5675_v50 }
 0x42d   : > { %v4443_v58 = vpop.permute.xlu0 %4442  ;;  %v5438_v4 = vpop.permute.xlu1 %5437 }
 0x42e   : > { %v5848_v31 = vmax.f32 %v5765_v23, 0.0  ;;  %v5676_v47 = vadd.f32 %v5438_v4, %v5176_v28  ;;  %v4680_v45 = vadd.f32 %v11693_v19, %v4443_v58  ;;  %v5314_v23 = vsel %vm2250_vm2, %v5311_v20, %v5313_v26 }
 0x42f   : > { %5475 = vrot.lane.b32.xlu0 %v5310_v56, %s9693_s19  ;;  %4977 = vrot.lane.b32.xlu1 %v4814_v37, %s9692_s28  ;;  %v4818_v28 = vsel %vm1746_vm5, %v4815_v53, %v4817_v16  ;;  %v4322_v58 = vrot.slane %v12062_v41, 1  ;;  %v5315_v4 = vrot.slane %v12032_v36, 3 }
 0x430   : > { %8722 = vmatmul.mubr.msk.f32.gmra.mxu0 %vm5934_vm7, %v5848_v31  ;;  %9431 = vmatmul.mubr.msk.f32.gmra.mxu1 %vm5934_vm7, %v5848_v31  ;;  %v5766_v15 = vadd.f32 %v11892_v44, %v5676_v47  ;;  %v12122_v31 = vpop.f32.mrf.mxu1 }
 0x431   : > { %v4940_v18 = vpop.permute.xlu0 %4939  ;;  %6308 = vmatprep.mubr.f32.mxu0 %v14002_v61  ;;  %9433 = vmatprep.mubr.msk.f32.mxu1 %vm9694_vm8, %v14002_v61  ;;  %v4445_v48 = vpop.permute.xlu1 %4444 }
 0x432   : > { %v5849_v10 = vmax.f32 %v5766_v15, 0.0  ;;  %v5177_v22 = vadd.f32 %v4940_v18, %v4680_v45  ;;  %v4681_v50 = vadd.f32 %v4445_v48, %v11732_v42  ;;  %v12129_v56 = vpop.f32.mrf.mxu1  ;;  %v4323_v15 = vsel %vm1242_vm3, %v4320_v6, %v4322_v58 }
 0x433   : > { %4482 = vrot.lane.b32.xlu0 %v4319_v40, %s9689_s20  ;;  %5477 = vrot.lane.b32.xlu1 %v5312_v13, %s9693_s19  ;;  %v5316_v18 = vsel %vm2250_vm2, %v5313_v26, %v5315_v4  ;;  %v4819_v45 = vrot.slane %v12062_v41, 2  ;;  %v4324_v40 = vrot.slane %v12049_v25, 1 }
 0x434   : > { %8723 = vmatmul.mubr.msk.f32.gmra.mxu0 %vm5934_vm7, %v5849_v10  ;;  %9434 = vmatmul.mubr.msk.f32.gmra.mxu1 %vm5934_vm7, %v5849_v10  ;;  %v12142_v53 = vpop.f32.mrf.mxu1 }
 0x435   : > { %v5440_v19 = vpop.permute.xlu0 %5439  ;;  %v4942_v8 = vpop.permute.xlu1 %4941  ;;  %6314 = vmatprep.mubr.f32.mxu0 %v14002_v61  ;;  %9436 = vmatprep.mubr.msk.f32.mxu1 %vm9694_vm8, %v14002_v61 }
 0x436   : > { %v5677_v60 = vadd.f32 %v5440_v19, %v5177_v22  ;;  %v5178_v3 = vadd.f32 %v4942_v8, %v4681_v50  ;;  %v4820_v22 = vsel %vm1746_vm5, %v4817_v16, %v4819_v45  ;;  %v4325_v19 = vsel %vm1242_vm3, %v4322_v58, %v4324_v40  ;;  %v12152_v8 = vpop.f32.mrf.mxu1 }
 0x437   : > { %4979 = vrot.lane.b32.xlu0 %v4816_v39, %s9692_s28  ;;  %4484 = vrot.lane.b32.xlu1 %v4321_v46, %s9689_s20  ;;  %v4821_v46 = vrot.slane %v12049_v25, 2 }
 0x438   : > { %v5767_v30 = vadd.f32 %v11892_v44, %v5677_v60  ;;  %v5317_v60 = vrot.slane %v12062_v41, 3 }
 0x439   : > { %v4447_v38 = vpop.permute.xlu0 %4446  ;;  %v5442_v52 = vpop.permute.xlu1 %5441 }
 0x43a   : > { %v5850_v63 = vmax.f32 %v5767_v30, 0.0  ;;  %v5678_v42 = vadd.f32 %v5442_v52, %v5178_v3  ;;  %v4682_v47 = vadd.f32 %v11723_v57, %v4447_v38  ;;  %v5318_v38 = vsel %vm2250_vm2, %v5315_v4, %v5317_v60 }
 0x43b   : > { %5479 = vrot.lane.b32.xlu0 %v5314_v23, %s9693_s19  ;;  %4981 = vrot.lane.b32.xlu1 %v4818_v28, %s9692_s28  ;;  %v4326_v52 = vrot.slane %v12082_v1, 1  ;;  %v12162_v23 = vpop.f32.mrf.mxu1  ;;  %v5319_v28 = vrot.slane %v12049_v25, 3 }
 0x43c   : > { %8724 = vmatmul.mubr.msk.f32.gmra.mxu0 %vm5934_vm7, %v5850_v63  ;;  %9437 = vmatmul.mubr.msk.f32.gmra.mxu1 %vm5934_vm7, %v5850_v63  ;;  %v5768_v37 = vadd.f32 %v11892_v44, %v5678_v42  ;;  %v4822_v63 = vsel %vm1746_vm5, %v4819_v45, %v4821_v46  ;;  %v4328_v45 = vrot.slane %v12072_v55, 1 }
 0x43d   : > { %v4944_v2 = vpop.permute.xlu0 %4943  ;;  %6320 = vmatprep.mubr.f32.mxu0 %v14002_v61  ;;  %9439 = vmatprep.mubr.msk.f32.mxu1 %vm9694_vm8, %v14002_v61  ;;  %v4449_v20 = vpop.permute.xlu1 %4448 }
 0x43e   : > { %v5851_v48 = vmax.f32 %v5768_v37, 0.0  ;;  %v5179_v13 = vadd.f32 %v4944_v2, %v4682_v47  ;;  %v4683_v39 = vadd.f32 %v4449_v20, %v11762_v33  ;;  %v12169_v58 = vpop.f32.mrf.mxu1  ;;  %v4327_v47 = vsel %vm1242_vm3, %v4324_v40, %v4326_v52 }
 0x43f   : > { %4486 = vrot.lane.b32.xlu0 %v4323_v15, %s9689_s20  ;;  %5481 = vrot.lane.b32.xlu1 %v5316_v18, %s9693_s19  ;;  %v5320_v20 = vsel %vm2250_vm2, %v5317_v60, %v5319_v28  ;;  %v4823_v15 = vrot.slane %v12082_v1, 2 }
 0x440   : > { %8725 = vmatmul.mubr.msk.f32.gmra.mxu0 %vm5934_vm7, %v5851_v48  ;;  %9440 = vmatmul.mubr.msk.f32.gmra.mxu1 %vm5934_vm7, %v5851_v48 }
 0x441   : > { %v5444_v57 = vpop.permute.xlu0 %5443  ;;  %v4946_v6 = vpop.permute.xlu1 %4945  ;;  %6326 = vmatprep.mubr.f32.mxu0 %v14002_v61  ;;  %9442 = vmatprep.mubr.msk.f32.mxu1 %vm9694_vm8, %v14002_v61 }
 0x442   : > { %v5679_v10 = vadd.f32 %v5444_v57, %v5179_v13  ;;  %v5180_v50 = vadd.f32 %v4946_v6, %v4683_v39  ;;  %v12182_v13 = vpop.f32.mrf.mxu1  ;;  %v4329_v6 = vsel %vm1242_vm3, %v4326_v52, %v4328_v45  ;;  %v4825_v39 = vrot.slane %v12072_v55, 2 }
 0x443   : > { %4983 = vrot.lane.b32.xlu0 %v4820_v22, %s9692_s28  ;;  %4488 = vrot.lane.b32.xlu1 %v4325_v19, %s9689_s20  ;;  %v5321_v22 = vrot.slane %v12082_v1, 3 }
 0x444   : > { %v5769_v26 = vadd.f32 %v11892_v44, %v5679_v10  ;;  %v4824_v10 = vsel %vm1746_vm5, %v4821_v46, %v4823_v15  ;;  %v12192_v19 = vpop.f32.mrf.mxu1 }
 0x445   : > { %v4451_v16 = vpop.permute.xlu0 %4450  ;;  %v5446_v3 = vpop.permute.xlu1 %5445 }
 0x446   : > { %v5852_v30 = vmax.f32 %v5769_v26, 0.0  ;;  %v5680_v33 = vadd.f32 %v5446_v3, %v5180_v50  ;;  %v4684_v37 = vadd.f32 %v11753_v49, %v4451_v16  ;;  %v5322_v3 = vsel %vm2250_vm2, %v5319_v28, %v5321_v22  ;;  %v12202_v52 = vpop.f32.mrf.mxu1 }
 0x447   : > { %5483 = vrot.lane.b32.xlu0 %v5318_v38, %s9693_s19  ;;  %4985 = vrot.lane.b32.xlu1 %v4822_v63, %s9692_s28  ;;  %v4826_v38 = vsel %vm1746_vm5, %v4823_v15, %v4825_v39  ;;  %v4330_v63 = vrot.slane %v12102_v14, 1  ;;  %v4827_v15 = vrot.slane %v12102_v14, 2 }
 0x448   : > { %8726 = vmatmul.mubr.msk.f32.gmra.mxu0 %vm5934_vm7, %v5852_v30  ;;  %9443 = vmatmul.mubr.msk.f32.gmra.mxu1 %vm5934_vm7, %v5852_v30  ;;  %v5770_v42 = vadd.f32 %v11892_v44, %v5680_v33  ;;  %v5323_v33 = vrot.slane %v12072_v55, 3 }
 0x449   : > { %v4948_v4 = vpop.permute.xlu0 %4947  ;;  %6332 = vmatprep.mubr.f32.mxu0 %v14002_v61  ;;  %9445 = vmatprep.mubr.msk.f32.mxu1 %vm9694_vm8, %v14002_v61  ;;  %v4453_v2 = vpop.permute.xlu1 %4452 }
 0x44a   : > { %v5853_v18 = vmax.f32 %v5770_v42, 0.0  ;;  %v5181_v48 = vadd.f32 %v4948_v4, %v4684_v37  ;;  %v4685_v60 = vadd.f32 %v4453_v2, %v11792_v51  ;;  %v12209_v42 = vpop.f32.mrf.mxu1 }
 0x44b   : > { %4490 = vrot.lane.b32.xlu0 %v4327_v47, %s9689_s20  ;;  %5485 = vrot.lane.b32.xlu1 %v5320_v20, %s9693_s19  ;;  %v4331_v47 = vsel %vm1242_vm3, %v4328_v45, %v4330_v63  ;;  %v5324_v20 = vsel %vm2250_vm2, %v5321_v22, %v5323_v33  ;;  %v5325_v22 = vrot.slane %v12102_v14, 3 }
 0x44c   : > { %8727 = vmatmul.mubr.msk.f32.gmra.mxu0 %vm5934_vm7, %v5853_v18  ;;  %9446 = vmatmul.mubr.msk.f32.gmra.mxu1 %vm5934_vm7, %v5853_v18 }
 0x44d   : > { %v5448_v49 = vpop.permute.xlu0 %5447  ;;  %v4950_v57 = vpop.permute.xlu1 %4949  ;;  %6338 = vmatprep.mubr.f32.mxu0 %v14002_v61  ;;  %9448 = vmatprep.mubr.msk.f32.mxu1 %vm9694_vm8, %v14002_v61 }
 0x44e   : > { %v5681_v40 = vadd.f32 %v5448_v49, %v5181_v48  ;;  %v5182_v26 = vadd.f32 %v4950_v57, %v4685_v60  ;;  %v4332_v48 = vrot.slane %v12089_v12, 1 }
 0x44f   : > { %4987 = vrot.lane.b32.xlu0 %v4824_v10, %s9692_s28  ;;  %4492 = vrot.lane.b32.xlu1 %v4329_v6, %s9689_s20  ;;  %v4828_v10 = vsel %vm1746_vm5, %v4825_v39, %v4827_v15 }
 0x450   : > { %v5771_v46 = vadd.f32 %v11892_v44, %v5681_v40  ;;  %v12222_v40 = vpop.f32.mrf.mxu1  ;;  %v4333_v6 = vsel %vm1242_vm3, %v4330_v63, %v4332_v48 }
 0x451   : > { %v4455_v50 = vpop.permute.xlu0 %4454  ;;  %v5450_v30 = vpop.permute.xlu1 %5449 }
 0x452   : > { %v5854_v16 = vmax.f32 %v5771_v46, 0.0  ;;  %v5682_v51 = vadd.f32 %v5450_v30, %v5182_v26  ;;  %v4686_v37 = vadd.f32 %v11783_v9, %v4455_v50  ;;  %v12232_v60 = vpop.f32.mrf.mxu1  ;;  %v4829_v26 = vrot.slane %v12089_v12, 2 }
 0x453   : > { %5487 = vrot.lane.b32.xlu0 %v5322_v3, %s9693_s19  ;;  %4989 = vrot.lane.b32.xlu1 %v4826_v38, %s9692_s28  ;;  %14144 = vst [vmem:[#allocation10_spill] sm:$0xff] %v12232_v60  ;;  %v5326_v38 = vsel %vm2250_vm2, %v5323_v33, %v5325_v22 }
 0x454   : > { %8728 = vmatmul.mubr.msk.f32.gmra.mxu0 %vm5934_vm7, %v5854_v16  ;;  %9449 = vmatmul.mubr.msk.f32.gmra.mxu1 %vm5934_vm7, %v5854_v16  ;;  %v5772_v28 = vadd.f32 %v11892_v44, %v5682_v51  ;;  %v4830_v63 = vsel %vm1746_vm5, %v4827_v15, %v4829_v26  ;;  %v4334_v51 = vrot.slane %v12122_v31, 1 }
 0x455   : > { %v4952_v4 = vpop.permute.xlu0 %4951  ;;  %6344 = vmatprep.mubr.f32.mxu0 %v14002_v61  ;;  %9451 = vmatprep.mubr.msk.f32.mxu1 %vm9694_vm8, %v14002_v61  ;;  %v4457_v2 = vpop.permute.xlu1 %4456 }
 0x456   : > { %v5855_v18 = vmax.f32 %v5772_v28, 0.0  ;;  %v5183_v49 = vadd.f32 %v4952_v4, %v4686_v37  ;;  %v4687_v46 = vadd.f32 %v4457_v2, %v11822_v0  ;;  %v12242_v28 = vpop.f32.mrf.mxu1  ;;  %v5327_v4 = vrot.slane %v12089_v12, 3 }
 0x457   : > { %4494 = vrot.lane.b32.xlu0 %v4331_v47, %s9689_s20  ;;  %5489 = vrot.lane.b32.xlu1 %v5324_v20, %s9693_s19  ;;  %v4335_v15 = vsel %vm1242_vm3, %v4332_v48, %v4334_v51 }
 0x458   : > { %8729 = vmatmul.mubr.msk.f32.gmra.mxu0 %vm5934_vm7, %v5855_v18  ;;  %9452 = vmatmul.mubr.msk.f32.gmra.mxu1 %vm5934_vm7, %v5855_v18  ;;  %v12249_v37 = vpop.f32.mrf.mxu1  ;;  %v5328_v18 = vsel %vm2250_vm2, %v5325_v22, %v5327_v4 }
 0x459   : > { %v5452_v9 = vpop.permute.xlu0 %5451  ;;  %v4954_v57 = vpop.permute.xlu1 %4953  ;;  %6350 = vmatprep.mubr.f32.mxu0 %v14002_v61  ;;  %9454 = vmatprep.mubr.msk.f32.mxu1 %vm9694_vm8, %v14002_v61  ;;  %14145 = vst [vmem:[#allocation11_spill] sm:$0xff] %v12249_v37 }
 0x45a   : > { %v5683_v45 = vadd.f32 %v5452_v9, %v5183_v49  ;;  %v5184_v50 = vadd.f32 %v4954_v57, %v4687_v46  ;;  %v4831_v49 = vrot.slane %v12122_v31, 2 }
 0x45b   : > { %4991 = vrot.lane.b32.xlu0 %v4828_v10, %s9692_s28  ;;  %4496 = vrot.lane.b32.xlu1 %v4333_v6, %s9689_s20  ;;  %v12262_v10 = vpop.f32.mrf.mxu1 }
 0x45c   : > { %v5773_v39 = vadd.f32 %v11892_v44, %v5683_v45  ;;  %v4336_v45 = vrot.slane %v12112_v32, 1  ;;  %14146 = vst [vmem:[#allocation12_spill] sm:$0xff] %v12262_v10  ;;  %v4832_v22 = vsel %vm1746_vm5, %v4829_v26, %v4831_v49 }
 0x45d   : > { %v4459_v16 = vpop.permute.xlu0 %4458  ;;  %v5454_v3 = vpop.permute.xlu1 %5453 }
 0x45e   : > { %v5856_v30 = vmax.f32 %v5773_v39, 0.0  ;;  %v5684_v0 = vadd.f32 %v5454_v3, %v5184_v50  ;;  %v4688_v47 = vadd.f32 %v11813_v24, %v4459_v16  ;;  %v4337_v46 = vsel %vm1242_vm3, %v4334_v51, %v4336_v45  ;;  %v12272_v50 = vpop.f32.mrf.mxu1 }
 0x45f   : > { %5491 = vrot.lane.b32.xlu0 %v5326_v38, %s9693_s19  ;;  %4993 = vrot.lane.b32.xlu1 %v4830_v63, %s9692_s28  ;;  %v5329_v39 = vrot.slane %v12122_v31, 3 }
 0x460   : > { %8730 = vmatmul.mubr.msk.f32.gmra.mxu0 %vm5934_vm7, %v5856_v30  ;;  %9455 = vmatmul.mubr.msk.f32.gmra.mxu1 %vm5934_vm7, %v5856_v30  ;;  %v5774_v33 = vadd.f32 %v11892_v44, %v5684_v0  ;;  %v4833_v30 = vrot.slane %v12112_v32, 2 }
 0x461   : > { %v4956_v2 = vpop.permute.xlu0 %4955  ;;  %6356 = vmatprep.mubr.f32.mxu0 %v14002_v61  ;;  %9457 = vmatprep.mubr.msk.f32.mxu1 %vm9694_vm8, %v14002_v61  ;;  %v4461_v20 = vpop.permute.xlu1 %4460  ;;  %v5330_v0 = vsel %vm2250_vm2, %v5327_v4, %v5329_v39 }
 0x462   : > { %v5857_v9 = vmax.f32 %v5774_v33, 0.0  ;;  %v5185_v57 = vadd.f32 %v4956_v2, %v4688_v47  ;;  %v4689_v16 = vadd.f32 %v4461_v20, %v11852_v62  ;;  %v4834_v33 = vsel %vm1746_vm5, %v4831_v49, %v4833_v30  ;;  %v12282_v47 = vpop.f32.mrf.mxu1 }
 0x463   : > { %4498 = vrot.lane.b32.xlu0 %v4335_v15, %s9689_s20  ;;  %5493 = vrot.lane.b32.xlu1 %v5328_v18, %s9693_s19  ;;  %v4338_v2 = vrot.slane %v12142_v53, 1  ;;  %14147 = vst [vmem:[#allocation14_spill] sm:$0xff] %v12282_v47  ;;  %v5331_v20 = vrot.slane %v12112_v32, 3 }
 0x464   : > { %8731 = vmatmul.mubr.msk.f32.gmra.mxu0 %vm5934_vm7, %v5857_v9  ;;  %9458 = vmatmul.mubr.msk.f32.gmra.mxu1 %vm5934_vm7, %v5857_v9  ;;  %v12289_v15 = vpop.f32.mrf.mxu1 }
 0x465   : > { %v5456_v24 = vpop.permute.xlu0 %5455  ;;  %v4958_v6 = vpop.permute.xlu1 %4957  ;;  %6362 = vmatprep.mubr.f32.mxu0 %v14002_v61  ;;  %9460 = vmatprep.mubr.msk.f32.mxu1 %vm9694_vm8, %v14002_v61 }
 0x466   : > { %v5685_v48 = vadd.f32 %v5456_v24, %v5185_v57  ;;  %v5186_v3 = vadd.f32 %v4958_v6, %v4689_v16  ;;  %v4339_v57 = vsel %vm1242_vm3, %v4336_v45, %v4338_v2  ;;  %v5332_v24 = vsel %vm2250_vm2, %v5329_v39, %v5331_v20  ;;  %v12302_v16 = vpop.f32.mrf.mxu1 }
 0x467   : > { %4995 = vrot.lane.b32.xlu0 %v4832_v22, %s9692_s28  ;;  %4500 = vrot.lane.b32.xlu1 %v4337_v46, %s9689_s20  ;;  %v4340_v22 = vrot.slane %v12129_v56, 1  ;;  %14148 = vst [vmem:[#allocation4_spill] sm:$0xff] %v12302_v16 }
 0x468   : > { %v5775_v26 = vadd.f32 %v11892_v44, %v5685_v48  ;;  %v4835_v48 = vrot.slane %v12142_v53, 2 }
 0x469   : > { %v4463_v38 = vpop.permute.xlu0 %4462  ;;  %v5458_v51 = vpop.permute.xlu1 %5457 }
 0x46a   : > { %v5858_v63 = vmax.f32 %v5775_v26, 0.0  ;;  %v5686_v62 = vadd.f32 %v5458_v51, %v5186_v3  ;;  %v4690_v49 = vadd.f32 %v11843_v59, %v4463_v38  ;;  %v4836_v39 = vsel %vm1746_vm5, %v4833_v30, %v4835_v48 }
 0x46b   : > { %5495 = vrot.lane.b32.xlu0 %v5330_v0, %s9693_s19  ;;  %4997 = vrot.lane.b32.xlu1 %v4834_v33, %s9692_s28  ;;  %v4341_v3 = vsel %vm1242_vm3, %v4338_v2, %v4340_v22  ;;  %v5333_v38 = vrot.slane %v12142_v53, 3  ;;  %v4837_v0 = vrot.slane %v12129_v56, 2 }
 0x46c   : > { %8732 = vmatmul.mubr.msk.f32.gmra.mxu0 %vm5934_vm7, %v5858_v63  ;;  %9461 = vmatmul.mubr.msk.f32.gmra.mxu1 %vm5934_vm7, %v5858_v63  ;;  %v5776_v4 = vadd.f32 %v11892_v44, %v5686_v62  ;;  %v12312_v63 = vpop.f32.mrf.mxu1 }
 0x46d   : > { %v4960_v18 = vpop.permute.xlu0 %4959  ;;  %6368 = vmatprep.mubr.f32.mxu0 %v14002_v61  ;;  %9463 = vmatprep.mubr.msk.f32.mxu1 %vm9694_vm8, %v14002_v61  ;;  %v4465_v9 = vpop.permute.xlu1 %4464 }
 0x46e   : > { %v5859_v6 = vmax.f32 %v5776_v4, 0.0  ;;  %v5187_v46 = vadd.f32 %v4960_v18, %v4690_v49  ;;  %v4691_v51 = vadd.f32 %v4465_v9, %v11881_v29  ;;  %v5334_v18 = vsel %vm2250_vm2, %v5331_v20, %v5333_v38  ;;  %v12334_v20 = vld [vmem:[%s13945_s4] ss:$0 sm:$0xff] }
 0x46f   : > { %4502 = vrot.lane.b32.xlu0 %v4339_v57, %s9689_s20  ;;  %5497 = vrot.lane.b32.xlu1 %v5332_v24, %s9693_s19  ;;  %v4838_v49 = vsel %vm1746_vm5, %v4835_v48, %v4837_v0  ;;  %v4342_v57 = vrot.slane %v12162_v23, 1  ;;  %v12322_v24 = vpop.f32.mrf.mxu1  ;;  %v5335_v9 = vrot.slane %v12129_v56, 3 }
 0x470   : > { %8733 = vmatmul.mubr.msk.f32.gmra.mxu0 %vm5934_vm7, %v5859_v6  ;;  %9464 = vmatmul.mubr.msk.f32.gmra.mxu1 %vm5934_vm7, %v5859_v6 }
 0x471   : > { %v5460_v59 = vpop.permute.xlu0 %5459  ;;  %v4962_v26 = vpop.permute.xlu1 %4961  ;;  %6374 = vmatprep.mubr.f32.mxu0 %v14002_v61  ;;  %9466 = vmatprep.mubr.msk.f32.mxu1 %vm9694_vm8, %v14002_v61 }
 0x472   : > { %v5687_v45 = vadd.f32 %v5460_v59, %v5187_v46  ;;  %v5188_v33 = vadd.f32 %v4962_v26, %v4691_v51  ;;  %v5336_v26 = vsel %vm2250_vm2, %v5333_v38, %v5335_v9  ;;  %v4344_v51 = vrot.slane %v12152_v8, 1 }
 0x473   : > { %4999 = vrot.lane.b32.xlu0 %v4836_v39, %s9692_s28  ;;  %4504 = vrot.lane.b32.xlu1 %v4341_v3, %s9689_s20  ;;  %v4839_v39 = vrot.slane %v12162_v23, 2 }
 0x474   : > { %v5777_v30 = vadd.f32 %v11892_v44, %v5687_v45  ;;  %v12329_v44 = vpop.f32.mrf.mxu1  ;;  %v4343_v45 = vsel %vm1242_vm3, %v4340_v22, %v4342_v57 }
 0x475   : > { %v4467_v2 = vpop.permute.xlu0 %4466  ;;  %v5462_v4 = vpop.permute.xlu1 %5461  ;;  %v4840_v38 = vsel %vm1746_vm5, %v4837_v0, %v4839_v39 }
 0x476   : > { %v5860_v62 = vmax.f32 %v5777_v30, 0.0  ;;  %v5688_v29 = vadd.f32 %v5462_v4, %v5188_v33  ;;  %v4692_v46 = vadd.f32 %v11873_v27, %v4467_v2  ;;  %v12347_v33 = vpop.f32.mrf.mxu1  ;;  %v5337_v4 = vrot.slane %v12162_v23, 3 }
 0x477   : > { %5499 = vrot.lane.b32.xlu0 %v5334_v18, %s9693_s19  ;;  %5001 = vrot.lane.b32.xlu1 %v4838_v49, %s9692_s28 }
 0x478   : > { %8734 = vmatmul.mubr.msk.f32.gmra.mxu0 %vm5934_vm7, %v5860_v62  ;;  %9467 = vmatmul.mubr.msk.f32.gmra.mxu1 %vm5934_vm7, %v5860_v62  ;;  %v5778_v48 = vadd.f32 %v12334_v20, %v5688_v29  ;;  %v4345_v62 = vsel %vm1242_vm3, %v4342_v57, %v4344_v51  ;;  %v12357_v18 = vpop.f32.mrf.mxu1  ;;  %v4841_v29 = vrot.slane %v12152_v8, 2 }
 0x479   : > { %v4964_v6 = vpop.permute.xlu0 %4963  ;;  %6380 = vmatprep.mubr.f32.mxu0 %v14002_v61  ;;  %9469 = vmatprep.mubr.msk.f32.mxu1 %vm9694_vm8, %v14002_v61  ;;  %v4469_v59 = vpop.permute.xlu1 %4468 }
 0x47a   : > { %v5861_v3 = vmax.f32 %v5778_v48, 0.0  ;;  %v5189_v30 = vadd.f32 %v4964_v6, %v4692_v46  ;;  %v4693_v49 = vadd.f32 %v4469_v59, %v11922_v54  ;;  %v5339_v59 = vrot.slane %v12152_v8, 3 }
 0x47b   : > { %4506 = vrot.lane.b32.xlu0 %v4343_v45, %s9689_s20  ;;  %5501 = vrot.lane.b32.xlu1 %v5336_v26, %s9693_s19  ;;  %v5338_v45 = vsel %vm2250_vm2, %v5335_v9, %v5337_v4  ;;  %v4842_v26 = vsel %vm1746_vm5, %v4839_v39, %v4841_v29 }
 0x47c   : > { %8735 = vmatmul.mubr.msk.f32.gmra.mxu0 %vm5934_vm7, %v5861_v3  ;;  %9470 = vmatmul.mubr.msk.f32.gmra.mxu1 %vm5934_vm7, %v5861_v3  ;;  %v4346_v3 = vrot.slane %v12182_v13, 1 }
 0x47d   : > { %v5464_v27 = vpop.permute.xlu0 %5463  ;;  %v4966_v2 = vpop.permute.xlu1 %4965  ;;  %6386 = vmatprep.mubr.f32.mxu0 %v14002_v61  ;;  %9472 = vmatprep.mubr.msk.f32.mxu1 %vm9694_vm8, %v14002_v61 }
 0x47e   : > { %v5689_v22 = vadd.f32 %v5464_v27, %v5189_v30  ;;  %v5190_v57 = vadd.f32 %v4966_v2, %v4693_v49  ;;  %v12367_v30 = vpop.f32.mrf.mxu1  ;;  %v4843_v49 = vrot.slane %v12182_v13, 2 }
 0x47f   : > { %5003 = vrot.lane.b32.xlu0 %v4840_v38, %s9692_s28  ;;  %4508 = vrot.lane.b32.xlu1 %v4345_v62, %s9689_s20  ;;  %v4347_v38 = vsel %vm1242_vm3, %v4344_v51, %v4346_v3  ;;  %v5340_v62 = vsel %vm2250_vm2, %v5337_v4, %v5339_v59 }
 0x480   : > { %v5779_v0 = vadd.f32 %v12334_v20, %v5689_v22  ;;  %v12374_v27 = vpop.f32.mrf.mxu1  ;;  %v4844_v4 = vsel %vm1746_vm5, %v4841_v29, %v4843_v49 }
 0x481   : > { %v4471_v48 = vpop.permute.xlu0 %4470  ;;  %v5466_v46 = vpop.permute.xlu1 %5465 }
 0x482   : > { %v5862_v6 = vmax.f32 %v5779_v0, 0.0  ;;  %v5690_v54 = vadd.f32 %v5466_v46, %v5190_v57  ;;  %v4694_v22 = vadd.f32 %v11909_v35, %v4471_v48  ;;  %v4348_v57 = vrot.slane %v12169_v58, 1  ;;  %v12387_v46 = vpop.f32.mrf.mxu1 }
 0x483   : > { %5503 = vrot.lane.b32.xlu0 %v5338_v45, %s9693_s19  ;;  %5005 = vrot.lane.b32.xlu1 %v4842_v26, %s9692_s28  ;;  %v5341_v26 = vrot.slane %v12182_v13, 3 }
 0x484   : > { %8736 = vmatmul.mubr.msk.f32.gmra.mxu0 %vm5934_vm7, %v5862_v6  ;;  %9473 = vmatmul.mubr.msk.f32.gmra.mxu1 %vm5934_vm7, %v5862_v6  ;;  %v5780_v9 = vadd.f32 %v12334_v20, %v5690_v54  ;;  %v4349_v45 = vsel %vm1242_vm3, %v4346_v3, %v4348_v57  ;;  %v12397_v54 = vpop.f32.mrf.mxu1 }
 0x485   : > { %v4968_v39 = vpop.permute.xlu0 %4967  ;;  %6392 = vmatprep.mubr.f32.mxu0 %v14002_v61  ;;  %9475 = vmatprep.mubr.msk.f32.mxu1 %vm9694_vm8, %v14002_v61  ;;  %v4473_v2 = vpop.permute.xlu1 %4472 }
 0x486   : > { %v5863_v0 = vmax.f32 %v5780_v9, 0.0  ;;  %v5191_v6 = vadd.f32 %v4968_v39, %v4694_v22  ;;  %v4695_v9 = vadd.f32 %v4473_v2, %v11958_v5  ;;  %v4845_v39 = vrot.slane %v12169_v58, 2 }
 0x487   : > { %4510 = vrot.lane.b32.xlu0 %v4347_v38, %s9689_s20  ;;  %5505 = vrot.lane.b32.xlu1 %v5340_v62, %s9693_s19  ;;  %v5343_v2 = vrot.slane %v12169_v58, 3 }
 0x488   : > { %8737 = vmatmul.mubr.msk.f32.gmra.mxu0 %vm5934_vm7, %v5863_v0  ;;  %9476 = vmatmul.mubr.msk.f32.gmra.mxu1 %vm5934_vm7, %v5863_v0  ;;  %v5342_v0 = vsel %vm2250_vm2, %v5339_v59, %v5341_v26 }
 0x489   : > { %v5468_v35 = vpop.permute.xlu0 %5467  ;;  %v4970_v48 = vpop.permute.xlu1 %4969  ;;  %6398 = vmatprep.mubr.f32.mxu0 %v14002_v61  ;;  %9478 = vmatprep.mubr.msk.f32.mxu1 %vm9694_vm8, %v14002_v61 }
 0x48a   : > { %v5691_v51 = vadd.f32 %v5468_v35, %v5191_v6  ;;  %v5192_v3 = vadd.f32 %v4970_v48, %v4695_v9  ;;  %v4846_v6 = vsel %vm1746_vm5, %v4843_v49, %v4845_v39  ;;  %v4350_v35 = vrot.slane %v12202_v52, 1  ;;  %v12407_v61 = vpop.f32.mrf.mxu1 }
 0x48b   : > { %5007 = vrot.lane.b32.xlu0 %v4844_v4, %s9692_s28  ;;  %4512 = vrot.lane.b32.xlu1 %v4349_v45, %s9689_s20  ;;  %v14150_v48 = vmov 0.0  }
 0x48c   : > { %v5781_v29 = vadd.f32 %v12334_v20, %v5691_v51  ;;  %v12414_v51 = vpop.f32.mrf.mxu1  ;;  %v4351_v9 = vsel %vm1242_vm3, %v4348_v57, %v4350_v35 }
 0x48d   : > { %v4475_v22 = vpop.permute.xlu0 %4474  ;;  %v5470_v62 = vpop.permute.xlu1 %5469  ;;  %14149 = vst [vmem:[#allocation13_spill] sm:$0xff] %v12414_v51 }
 0x48e   : > { %v5864_v38 = vmax.f32 %v5781_v29, 0.0  ;;  %v5692_v5 = vadd.f32 %v5470_v62, %v5192_v3  ;;  %v4696_v4 = vadd.f32 %v11945_v17, %v4475_v22  ;;  %v5344_v29 = vsel %vm2250_vm2, %v5341_v26, %v5343_v2 }
 0x48f   : > { %5507 = vrot.lane.b32.xlu0 %v5342_v0, %s9693_s19  ;;  %5009 = vrot.lane.b32.xlu1 %v4846_v6, %s9692_s28  ;;  %v4847_v3 = vrot.slane %v12202_v52, 2  ;;  %v4352_v62 = vrot.slane %v12192_v19, 1  ;;  %v12427_v6 = vpop.f32.mrf.mxu1 }
 0x490   : > { %8738 = vmatmul.mubr.msk.f32.gmra.mxu0 %vm5934_vm7, %v5864_v38  ;;  %9479 = vmatmul.mubr.msk.f32.gmra.mxu1 %vm5934_vm7, %v5864_v38  ;;  %v5782_v59 = vadd.f32 %v12334_v20, %v5692_v5  ;;  %14151 = vst [vmem:[#allocation16_spill] sm:$0xff] %v12427_v6 }
 0x491   : > { %v4972_v49 = vpop.permute.xlu0 %4971  ;;  %6404 = vmatprep.mubr.f32.mxu0 %v14150_v48  ;;  %9481 = vmatprep.mubr.msk.f32.mxu1 %vm9694_vm8, %v14150_v48  ;;  %v4477_v45 = vpop.permute.xlu1 %4476  ;;  %v4848_v26 = vsel %vm1746_vm5, %v4845_v39, %v4847_v3  ;;  %v4353_v5 = vsel %vm1242_vm3, %v4350_v35, %v4352_v62 }
 0x492   : > { %v5865_v38 = vmax.f32 %v5782_v59, 0.0  ;;  %v5193_v0 = vadd.f32 %v4972_v49, %v4696_v4  ;;  %v5345_v59 = vrot.slane %v12202_v52, 3  ;;  %v12437_v49 = vpop.f32.mrf.mxu1  ;;  %v4697_v4 = vadd.f32 %v4477_v45, %v11994_v11 }
 0x493   : > { %4514 = vrot.lane.b32.xlu0 %v4351_v9, %s9689_s20  ;;  %5509 = vrot.lane.b32.xlu1 %v5344_v29, %s9693_s19  ;;  %14152 = vst [vmem:[#allocation6_spill] sm:$0xff] %v12437_v49  ;;  %v4849_v9 = vrot.slane %v12192_v19, 2  ;;  %v4354_v49 = vrot.slane %v12222_v40, 1  ;;  %v5347_v45 = vrot.slane %v12192_v19, 3 }
 0x494   : > { %8739 = vmatmul.mubr.msk.f32.gmra.mxu0 %vm5934_vm7, %v5865_v38  ;;  %9482 = vmatmul.mubr.msk.f32.gmra.mxu1 %vm5934_vm7, %v5865_v38  ;;  %v12447_v6 = vpop.f32.mrf.mxu1 }
 0x495   : > { %v5472_v17 = vpop.permute.xlu0 %5471  ;;  %v4974_v22 = vpop.permute.xlu1 %4973  ;;  %6410 = vmatprep.mubr.f32.mxu0 %v14150_v48  ;;  %9484 = vmatprep.mubr.msk.f32.mxu1 %vm9694_vm8, %v14150_v48  ;;  %v4850_v51 = vsel %vm1746_vm5, %v4847_v3, %v4849_v9 }
 0x496   : > { %v5693_v57 = vadd.f32 %v5472_v17, %v5193_v0  ;;  %v5194_v35 = vadd.f32 %v4974_v22, %v4697_v4  ;;  %v5346_v17 = vsel %vm2250_vm2, %v5343_v2, %v5345_v59  ;;  %v4851_v4 = vrot.slane %v12222_v40, 2 }
 0x497   : > { %5011 = vrot.lane.b32.xlu0 %v4848_v26, %s9692_s28  ;;  %4516 = vrot.lane.b32.xlu1 %v4353_v5, %s9689_s20  ;;  %v5348_v5 = vsel %vm2250_vm2, %v5345_v59, %v5347_v45 }
 0x498   : > { %v5783_v39 = vadd.f32 %v12334_v20, %v5693_v57  ;;  %v12454_v57 = vpop.f32.mrf.mxu1  ;;  %v4852_v59 = vsel %vm1746_vm5, %v4849_v9, %v4851_v4 }
 0x499   : > { %v4479_v29 = vpop.permute.xlu0 %4478  ;;  %v5474_v0 = vpop.permute.xlu1 %5473  ;;  %14153 = vst [vmem:[#allocation27_spill] sm:$0xff] %v12454_v57 }
 0x49a   : > { %v5866_v38 = vmax.f32 %v5783_v39, 0.0  ;;  %v5694_v11 = vadd.f32 %v5474_v0, %v5194_v35  ;;  %v4698_v22 = vadd.f32 %v11981_v7, %v4479_v29  ;;  %v4356_v35 = vrot.slane %v12209_v42, 1  ;;  %v12467_v0 = vpop.f32.mrf.mxu1 }
 0x49b   : > { %5511 = vrot.lane.b32.xlu0 %v5346_v17, %s9693_s19  ;;  %5013 = vrot.lane.b32.xlu1 %v4850_v51, %s9692_s28  ;;  %v4355_v51 = vsel %vm1242_vm3, %v4352_v62, %v4354_v49  ;;  %14154 = vst [vmem:[#allocation28_spill] sm:$0xff] %v12467_v0 }
 0x49c   : > { %8740 = vmatmul.mubr.msk.f32.gmra.mxu0 %vm5934_vm7, %v5866_v38  ;;  %9485 = vmatmul.mubr.msk.f32.gmra.mxu1 %vm5934_vm7, %v5866_v38  ;;  %v5784_v2 = vadd.f32 %v12334_v20, %v5694_v11  ;;  %v4357_v17 = vsel %vm1242_vm3, %v4354_v49, %v4356_v35  ;;  %v5349_v11 = vrot.slane %v12222_v40, 3 }
 0x49d   : > { %v4976_v3 = vpop.permute.xlu0 %4975  ;;  %6416 = vmatprep.mubr.f32.mxu0 %v14150_v48  ;;  %9487 = vmatprep.mubr.msk.f32.mxu1 %vm9694_vm8, %v14150_v48  ;;  %v4481_v26 = vpop.permute.xlu1 %4480 }
 0x49e   : > { %v5867_v39 = vmax.f32 %v5784_v2, 0.0  ;;  %v5195_v38 = vadd.f32 %v4976_v3, %v4698_v22  ;;  %v12477_v2 = vpop.f32.mrf.mxu1  ;;  %v4699_v3 = vadd.f32 %v4481_v26, %v12022_v43  ;;  %v4853_v22 = vrot.slane %v12209_v42, 2 }
 0x49f   : > { %4518 = vrot.lane.b32.xlu0 %v4355_v51, %s9689_s20  ;;  %5513 = vrot.lane.b32.xlu1 %v5348_v5, %s9693_s19  ;;  %14155 = vst [vmem:[#allocation5_spill] sm:$0xff] %v12477_v2  ;;  %v4358_v2 = vrot.slane %v12242_v28, 1  ;;  %v5351_v26 = vrot.slane %v12209_v42, 3 }
 0x4a0   : > { %8741 = vmatmul.mubr.msk.f32.gmra.mxu0 %vm5934_vm7, %v5867_v39  ;;  %9488 = vmatmul.mubr.msk.f32.gmra.mxu1 %vm5934_vm7, %v5867_v39  ;;  %v12487_v57 = vpop.f32.mrf.mxu1 }
 0x4a1   : > { %v5476_v7 = vpop.permute.xlu0 %5475  ;;  %v4978_v29 = vpop.permute.xlu1 %4977  ;;  %6422 = vmatprep.mubr.f32.mxu0 %v14150_v48  ;;  %9490 = vmatprep.mubr.msk.f32.mxu1 %vm9694_vm8, %v14150_v48  ;;  %14156 = vst [vmem:[#allocation15_spill] sm:$0xff] %v12487_v57 }
 0x4a2   : > { %v5695_v62 = vadd.f32 %v5476_v7, %v5195_v38  ;;  %v5196_v49 = vadd.f32 %v4978_v29, %v4699_v3  ;;  %v5350_v38 = vsel %vm2250_vm2, %v5347_v45, %v5349_v11  ;;  %v4854_v7 = vsel %vm1746_vm5, %v4851_v4, %v4853_v22 }
 0x4a3   : > { %5015 = vrot.lane.b32.xlu0 %v4852_v59, %s9692_s28  ;;  %4520 = vrot.lane.b32.xlu1 %v4357_v17, %s9689_s20  ;;  %v4359_v17 = vsel %vm1242_vm3, %v4356_v35, %v4358_v2  ;;  %v5352_v3 = vsel %vm2250_vm2, %v5349_v11, %v5351_v26 }
 0x4a4   : > { %v5785_v9 = vadd.f32 %v12334_v20, %v5695_v62  ;;  %v12494_v62 = vpop.f32.mrf.mxu1 }
 0x4a5   : > { %v4483_v51 = vpop.permute.xlu0 %4482  ;;  %v5478_v39 = vpop.permute.xlu1 %5477  ;;  %14157 = vst [vmem:[#allocation18_spill] sm:$0xff] %v12494_v62 }
 0x4a6   : > { %v5868_v5 = vmax.f32 %v5785_v9, 0.0  ;;  %v5696_v43 = vadd.f32 %v5478_v39, %v5196_v49  ;;  %v4700_v29 = vadd.f32 %v12009_v34, %v4483_v51  ;;  %v4855_v9 = vrot.slane %v12242_v28, 2 }
 0x4a7   : > { %5515 = vrot.lane.b32.xlu0 %v5350_v38, %s9693_s19  ;;  %5017 = vrot.lane.b32.xlu1 %v4854_v7, %s9692_s28  ;;  %v12507_v38 = vpop.f32.mrf.mxu1 }
 0x4a8   : > { %8742 = vmatmul.mubr.msk.f32.gmra.mxu0 %vm5934_vm7, %v5868_v5  ;;  %9491 = vmatmul.mubr.msk.f32.gmra.mxu1 %vm5934_vm7, %v5868_v5  ;;  %v5786_v45 = vadd.f32 %v12334_v20, %v5696_v43  ;;  %v4360_v5 = vrot.slane %v12232_v60, 1  ;;  %14158 = vst [vmem:[#allocation8_spill] sm:$0xff] %v12507_v38  ;;  %v4856_v11 = vsel %vm1746_vm5, %v4853_v22, %v4855_v9  ;;  %v5353_v43 = vrot.slane %v12242_v28, 3 }
 0x4a9   : > { %v4980_v4 = vpop.permute.xlu0 %4979  ;;  %6428 = vmatprep.mubr.f32.mxu0 %v14150_v48  ;;  %9493 = vmatprep.mubr.msk.f32.mxu1 %vm9694_vm8, %v14150_v48  ;;  %v4485_v59 = vpop.permute.xlu1 %4484 }
 0x4aa   : > { %v5869_v49 = vmax.f32 %v5786_v45, 0.0  ;;  %v5197_v39 = vadd.f32 %v4980_v4, %v4700_v29  ;;  %v4361_v7 = vsel %vm1242_vm3, %v4358_v2, %v4360_v5  ;;  %v12517_v45 = vpop.f32.mrf.mxu1  ;;  %v4701_v4 = vadd.f32 %v4485_v59, %v12042_v21 }
 0x4ab   : > { %4522 = vrot.lane.b32.xlu0 %v4359_v17, %s9689_s20  ;;  %5517 = vrot.lane.b32.xlu1 %v5352_v3, %s9693_s19  ;;  %14159 = vst [vmem:[#allocation29_spill] sm:$0xff] %v12517_v45  ;;  %v4857_v29 = vrot.slane %v12232_v60, 2  ;;  %v4362_v45 = vrot.slane %v12262_v10, 1  ;;  %v5355_v59 = vrot.slane %v12232_v60, 3 }
 0x4ac   : > { %8743 = vmatmul.mubr.msk.f32.gmra.mxu0 %vm5934_vm7, %v5869_v49  ;;  %9494 = vmatmul.mubr.msk.f32.gmra.mxu1 %vm5934_vm7, %v5869_v49  ;;  %v12527_v62 = vpop.f32.mrf.mxu1 }
 0x4ad   : > { %v5480_v34 = vpop.permute.xlu0 %5479  ;;  %v4982_v51 = vpop.permute.xlu1 %4981  ;;  %6434 = vmatprep.mubr.f32.mxu0 %v14150_v48  ;;  %9496 = vmatprep.mubr.msk.f32.mxu1 %vm9694_vm8, %v14150_v48  ;;  %14160 = vst [vmem:[#allocation30_spill] sm:$0xff] %v12527_v62 }
 0x4ae   : > { %v5697_v35 = vadd.f32 %v5480_v34, %v5197_v39  ;;  %v5198_v2 = vadd.f32 %v4982_v51, %v4701_v4  ;;  %v5354_v39 = vsel %vm2250_vm2, %v5351_v26, %v5353_v43  ;;  %v4858_v34 = vsel %vm1746_vm5, %v4855_v9, %v4857_v29 }
 0x4af   : > { %5019 = vrot.lane.b32.xlu0 %v4856_v11, %s9692_s28  ;;  %4524 = vrot.lane.b32.xlu1 %v4361_v7, %s9689_s20  ;;  %v4363_v7 = vsel %vm1242_vm3, %v4360_v5, %v4362_v45  ;;  %v5356_v4 = vsel %vm2250_vm2, %v5353_v43, %v5355_v59 }
 0x4b0   : > { %v5787_v22 = vadd.f32 %v12334_v20, %v5697_v35 }
 0x4b1   : > { %v4487_v17 = vpop.permute.xlu0 %4486  ;;  %v5482_v49 = vpop.permute.xlu1 %5481 }
 0x4b2   : > { %v5870_v3 = vmax.f32 %v5787_v22, 0.0  ;;  %v5698_v21 = vadd.f32 %v5482_v49, %v5198_v2  ;;  %v4702_v9 = vadd.f32 %v12032_v36, %v4487_v17  ;;  %v4859_v22 = vrot.slane %v12262_v10, 2 }
 0x4b3   : > { %5519 = vrot.lane.b32.xlu0 %v5354_v39, %s9693_s19  ;;  %5021 = vrot.lane.b32.xlu1 %v4858_v34, %s9692_s28  ;;  %v4364_v49 = vrot.slane %v12249_v37, 1 }
 0x4b4   : > { %8744 = vmatmul.mubr.msk.f32.gmra.mxu0 %vm5934_vm7, %v5870_v3  ;;  %9497 = vmatmul.mubr.msk.f32.gmra.mxu1 %vm5934_vm7, %v5870_v3  ;;  %v5788_v35 = vadd.f32 %v12334_v20, %v5698_v21  ;;  %v4860_v21 = vsel %vm1746_vm5, %v4857_v29, %v4859_v22 }
 0x4b5   : > { %v4984_v26 = vpop.permute.xlu0 %4983  ;;  %v12535_v51 = vpop.f32.mrf.mxu1  ;;  %6440 = vmatprep.mubr.f32.mxu0 %v14150_v48  ;;  %9499 = vmatprep.mubr.msk.f32.mxu1 %vm9694_vm8, %v14150_v48 }
 0x4b6   : > { %14161 = vst [vmem:[#allocation7_spill] sm:$0xff] %v12535_v51  ;;  %v4489_v11 = vpop.permute.xlu1 %4488  ;;  %v5871_v2 = vmax.f32 %v5788_v35, 0.0  ;;  %v5199_v39 = vadd.f32 %v4984_v26, %v4702_v9  ;;  %v4365_v35 = vsel %vm1242_vm3, %v4362_v45, %v4364_v49  ;;  %v4861_v9 = vrot.slane %v12249_v37, 2 }
 0x4b7   : > { %4526 = vrot.lane.b32.xlu0 %v4363_v7, %s9689_s20  ;;  %v12545_v3 = vpop.f32.mrf.mxu1  ;;  %5521 = vrot.lane.b32.xlu1 %v5356_v4, %s9693_s19  ;;  %v5357_v7 = vrot.slane %v12262_v10, 3  ;;  %v4703_v26 = vadd.f32 %v4489_v11, %v12062_v41  ;;  %v4366_v41 = vrot.slane %v12282_v47, 1 }
 0x4b8   : > { %14162 = vst [vmem:[#allocation17_spill] sm:$0xff] %v12545_v3  ;;  %v6250_v34 = vpop.f32.mrf.mxu0  ;;  %8745 = vmatmul.mubr.msk.f32.gmra.mxu0 %vm5934_vm7, %v5871_v2  ;;  %9500 = vmatmul.mubr.msk.f32.gmra.mxu1 %vm5934_vm7, %v5871_v2  ;;  %v4862_v62 = vsel %vm1746_vm5, %v4859_v22, %v4861_v9 }
 0x4b9   : > { %v5484_v36 = vpop.permute.xlu0 %5483  ;;  %v6813_v43 = vpop.f32.mrf.mxu1  ;;  %6446 = vmatprep.mubr.f32.mxu0 %v14150_v48  ;;  %9502 = vmatprep.mubr.msk.f32.mxu1 %vm9694_vm8, %v14150_v48  ;;  %v5358_v3 = vsel %vm2250_vm2, %v5355_v59, %v5357_v7 }
 0x4ba   : > { %v5699_v5 = vadd.f32 %v5484_v36, %v5199_v39  ;;  %v4986_v17 = vpop.permute.xlu1 %4985  ;;  %v6252_v36 = vpop.f32.mrf.mxu0 }
 0x4bb   : > { %5023 = vrot.lane.b32.xlu0 %v4860_v21, %s9692_s28  ;;  %4528 = vrot.lane.b32.xlu1 %v4365_v35, %s9689_s20  ;;  %v9405_v29 = vpop.f32.mrf.mxu1  ;;  %v5200_v2 = vadd.f32 %v4986_v17, %v4703_v26  ;;  %v5359_v21 = vrot.slane %v12249_v37, 3  ;;  %v7724_v35 = vrot.slane %v6813_v43, 2 }
 0x4bc   : > { %v5789_v4 = vadd.f32 %v12334_v20, %v5699_v5 }
 0x4bd   : > { %v4491_v45 = vpop.permute.xlu0 %4490  ;;  %v5360_v29 = vsel %vm2250_vm2, %v5357_v7, %v5359_v21 }
 0x4be   : > { %v5872_v39 = vmax.f32 %v5789_v4, 0.0  ;;  %v5486_v51 = vpop.permute.xlu1 %5485  ;;  %v4367_v4 = vsel %vm1242_vm3, %v4364_v49, %v4366_v41  ;;  %v4704_v43 = vadd.f32 %v12049_v25, %v4491_v45  ;;  %v5361_v25 = vrot.slane %v12282_v47, 3 }
 0x4bf   : > { %v5700_v11 = vadd.f32 %v5486_v51, %v5200_v2  ;;  %5523 = vrot.lane.b32.xlu0 %v5358_v3, %s9693_s19  ;;  %5025 = vrot.lane.b32.xlu1 %v4862_v62, %s9692_s28  ;;  %v7310_v51 = vrot.slane %v6252_v36, 1  ;;  %v4863_v2 = vrot.slane %v12282_v47, 2  ;;  %v4368_v36 = vrot.slane %v12272_v50, 1 }
 0x4c0   : > { %v6256_v5 = vpop.f32.mrf.mxu0  ;;  %8746 = vmatmul.mubr.msk.f32.gmra.mxu0 %vm5934_vm7, %v5872_v39  ;;  %v6818_v17 = vpop.f32.mrf.mxu1  ;;  %9503 = vmatmul.mubr.msk.f32.gmra.mxu1 %vm5934_vm7, %v5872_v39 }
 0x4c1   : > { %v5790_v59 = vadd.f32 %v12334_v20, %v5700_v11  ;;  %v7725_v26 = vrot.slane %v6818_v17, 2  ;;  %v4988_v22 = vpop.permute.xlu0 %4987  ;;  %6452 = vmatprep.mubr.f32.mxu0 %v14150_v48  ;;  %9505 = vmatprep.mubr.msk.f32.mxu1 %vm9694_vm8, %v14150_v48 }
 0x4c2   : > { %v4493_v62 = vpop.permute.xlu1 %4492  ;;  %v6258_v3 = vpop.f32.mrf.mxu0  ;;  %v5201_v37 = vadd.f32 %v4988_v22, %v4704_v43 }
 0x4c3   : > { %v5873_v39 = vmax.f32 %v5790_v59, 0.0  ;;  %v7726_v11 = vsel %vm1746_vm5, %v7724_v35, %v7725_v26  ;;  %v7311_v17 = vrot.slane %v6258_v3, 1  ;;  %v9408_v38 = vpop.f32.mrf.mxu1  ;;  %4530 = vrot.lane.b32.xlu0 %v4367_v4, %s9689_s20  ;;  %5525 = vrot.lane.b32.xlu1 %v5360_v29, %s9693_s19  ;;  %v4864_v3 = vsel %vm1746_vm5, %v4861_v9, %v4863_v2  ;;  %v12600_v9 = vld [vmem:[%s13947_s6] ss:$0 sm:$0xff] }
 0x4c4   : > { %v12583_v57 = vpop.f32.mrf.mxu0  ;;  %v4369_v4 = vsel %vm1242_vm3, %v4366_v41, %v4368_v36  ;;  %v4705_v22 = vadd.f32 %v4493_v62, %v12082_v1 }
 0x4c5   : > { %v7312_v49 = vsel %vm1242_vm3, %v7310_v51, %v7311_v17  ;;  %8747 = vmatmul.mubr.msk.f32.gmra.mxu0 %vm5934_vm7, %v5873_v39  ;;  %v6823_v7 = vpop.f32.mrf.mxu1  ;;  %9506 = vmatmul.mubr.msk.f32.gmra.mxu1 %vm5934_vm7, %v5873_v39  ;;  %v5488_v35 = vpop.permute.xlu0 %5487 }
 0x4c6   : > { %v7558_v45 = vadd.f32 %v7312_v49, %v6250_v34  ;;  %v7727_v38 = vrot.slane %v6823_v7, 2  ;;  %v4990_v59 = vpop.permute.xlu1 %4989  ;;  %6458 = vmatprep.mubr.f32.mxu0 %v14150_v48  ;;  %9508 = vmatprep.mubr.msk.f32.mxu1 %vm9694_vm8, %v14150_v48  ;;  %v5701_v51 = vadd.f32 %v5488_v35, %v5201_v37  ;;  %v6264_v29 = vpop.f32.mrf.mxu0  ;;  %v4865_v34 = vrot.slane %v12272_v50, 2 }
 0x4c7   : > { %v9411_v43 = vpop.f32.mrf.mxu1  ;;  %5027 = vrot.lane.b32.xlu0 %v4864_v3, %s9692_s28  ;;  %4532 = vrot.lane.b32.xlu1 %v4369_v4, %s9689_s20  ;;  %v7313_v49 = vrot.slane %v6264_v29, 1  ;;  %v5202_v37 = vadd.f32 %v4990_v59, %v4705_v22  ;;  %v5362_v3 = vsel %vm2250_vm2, %v5359_v21, %v5361_v25 }
 0x4c8   : > { %v7972_v39 = vadd.f32 %v7726_v11, %v7558_v45  ;;  %v7728_v41 = vsel %vm1746_vm5, %v7725_v26, %v7727_v38  ;;  %v5791_v1 = vadd.f32 %v12334_v20, %v5701_v51  ;;  %v4866_v4 = vsel %vm1746_vm5, %v4863_v2, %v4865_v34 }
 0x4c9   : > { %v7314_v62 = vsel %vm1242_vm3, %v7311_v17, %v7313_v49  ;;  %v4495_v7 = vpop.permute.xlu0 %4494  ;;  %v4370_v11 = vrot.slane %v12302_v16, 1  ;;  %v14018_v26 = vrot.slane %v12272_v50, 3 }
 0x4ca   : > { %v5490_v35 = vpop.permute.xlu1 %5489  ;;  %v8062_v45 = vadd.f32 %v12600_v9, %v7972_v39  ;;  %v5874_v43 = vmax.f32 %v5791_v1, 0.0  ;;  %v7559_v47 = vadd.f32 %v7314_v62, %v6256_v5  ;;  %v4706_v5 = vadd.f32 %v12072_v55, %v4495_v7 }
 0x4cb   : > { %v5702_v10 = vadd.f32 %v5490_v35, %v5202_v37  ;;  %5527 = vrot.lane.b32.xlu0 %v5362_v3, %s9693_s19  ;;  %5029 = vrot.lane.b32.xlu1 %v4866_v4, %s9692_s28  ;;  %v4371_v39 = vsel %vm1242_vm3, %v4368_v36, %v4370_v11  ;;  %v5364_v1 = vsel %vm2250_vm2, %v5361_v25, %v14018_v26  ;;  %v4372_v36 = vrot.slane %v12289_v15, 1  ;;  %v8228_v25 = vld [vmem:[%s13948_s7] sm:$0xff]  ;;  %v8229_v35 = vld [vmem:[%s13948_s7 + $0x8] sm:$0xff] }
 0x4cc   : > { %v12612_v17 = vpop.f32.mrf.mxu0  ;;  %v6828_v59 = vpop.f32.mrf.mxu1  ;;  %v7973_v22 = vadd.f32 %v7728_v41, %v7559_v47  ;;  %8748 = vmatmul.mubr.msk.f32.gmra.mxu0 %vm5934_vm7, %v5874_v43  ;;  %9509 = vmatmul.mubr.msk.f32.gmra.mxu1 %vm5934_vm7, %v5874_v43  ;;  %v8145_v47 = vmax.f32 %v8062_v45, 0.0 }
 0x4cd   : > { %v5792_v21 = vadd.f32 %v12334_v20, %v5702_v10  ;;  %v7729_v2 = vrot.slane %v6828_v59, 2  ;;  %v4992_v51 = vpop.permute.xlu0 %4991  ;;  %6464 = vmatprep.mubr.f32.mxu0 %v14150_v48  ;;  %9511 = vmatprep.mubr.msk.f32.mxu1 %vm9694_vm8, %v14150_v48  ;;  %v4867_v10 = vrot.slane %v12302_v16, 2  ;;  %v5365_v59 = vrot.slane %v12302_v16, 3 }
 0x4ce   : > { %v4497_v29 = vpop.permute.xlu1 %4496  ;;  %v8063_v41 = vadd.f32 %v12600_v9, %v7973_v22  ;;  %v6270_v62 = vpop.f32.mrf.mxu0  ;;  %v5203_v45 = vadd.f32 %v4992_v51, %v4706_v5  ;;  %v8311_v5 = vmul.f32 %v8228_v25, %v8145_v47 }
 0x4cf   : > { %v5875_v37 = vmax.f32 %v5792_v21, 0.0  ;;  %v7730_v55 = vsel %vm1746_vm5, %v7727_v38, %v7729_v2  ;;  %v9414_v7 = vpop.f32.mrf.mxu1  ;;  %4534 = vrot.lane.b32.xlu0 %v4371_v39, %s9689_s20  ;;  %5529 = vrot.lane.b32.xlu1 %v5364_v1, %s9693_s19  ;;  %v7315_v3 = vrot.slane %v6270_v62, 1  ;;  %v4373_v62 = vsel %vm1242_vm3, %v4370_v11, %v4372_v36 }
 0x4d0   : > { %v8146_v4 = vmax.f32 %v8063_v41, 0.0  ;;  %v12637_v38 = vpop.f32.mrf.mxu0  ;;  %v4868_v7 = vsel %vm1746_vm5, %v4865_v34, %v4867_v10  ;;  %v4869_v11 = vrot.slane %v12289_v15, 2 }
 0x4d1   : > { %8749 = vmatmul.mubr.msk.f32.gmra.mxu0 %vm5934_vm7, %v5875_v37  ;;  %v6833_v43 = vpop.f32.mrf.mxu1  ;;  %9512 = vmatmul.mubr.msk.f32.gmra.mxu1 %vm5934_vm7, %v5875_v37  ;;  %v7316_v22 = vsel %vm1242_vm3, %v7313_v49, %v7315_v3  ;;  %v5492_v39 = vpop.permute.xlu0 %5491  ;;  %v4707_v49 = vadd.f32 %v4497_v29, %v12102_v14 }
 0x4d2   : > { %v7731_v21 = vrot.slane %v6833_v43, 2  ;;  %v4994_v1 = vpop.permute.xlu1 %4993  ;;  %6470 = vmatprep.mubr.f32.mxu0 %v14150_v48  ;;  %9514 = vmatprep.mubr.msk.f32.mxu1 %vm9694_vm8, %v14150_v48  ;;  %v8312_v51 = vmul.f32 %v8229_v35, %v8146_v4  ;;  %v7560_v41 = vadd.f32 %v7316_v22, %v12583_v57  ;;  %v5703_v37 = vadd.f32 %v5492_v39, %v5203_v45  ;;  %v6276_v26 = vpop.f32.mrf.mxu0 }
 0x4d3   : > { %v9417_v16 = vpop.f32.mrf.mxu1  ;;  %5031 = vrot.lane.b32.xlu0 %v4868_v7, %s9692_s28  ;;  %v7317_v43 = vrot.slane %v6276_v26, 1  ;;  %4536 = vrot.lane.b32.xlu1 %v4373_v62, %s9689_s20  ;;  %v5204_v25 = vadd.f32 %v4994_v1, %v4707_v49  ;;  %v14163_v4 = vrot.slane %v12272_v50, 3  ;;  %v5367_v22 = vrot.slane %v12289_v15, 3 }
 0x4d4   : > { %v7732_v34 = vsel %vm1746_vm5, %v7729_v2, %v7731_v21  ;;  %v8394_v60 = vadd.f32 %v8312_v51, %v8311_v5  ;;  %v7974_v0 = vadd.f32 %v7730_v55, %v7560_v41  ;;  %v5793_v47 = vadd.f32 %v12334_v20, %v5703_v37 }
 0x4d5   : > { %v7318_v57 = vsel %vm1242_vm3, %v7315_v3, %v7317_v43  ;;  %v4499_v35 = vpop.permute.xlu0 %4498  ;;  %v5366_v14 = vsel %vm2250_vm2, %v14163_v4, %v5365_v59  ;;  %v4374_v2 = vrot.slane %v12322_v24, 1  ;;  %v4870_v55 = vsel %vm1746_vm5, %v4867_v10, %v4869_v11  ;;  %v8230_v3 = vld [vmem:[%s13948_s7 + $0x10] sm:$0xff] }
 0x4d6   : > { %v5494_v16 = vpop.permute.xlu1 %5493  ;;  %v8064_v26 = vadd.f32 %v12600_v9, %v7974_v0  ;;  %v5876_v29 = vmax.f32 %v5793_v47, 0.0  ;;  %v7561_v45 = vadd.f32 %v7318_v57, %v12612_v17  ;;  %v5368_v37 = vsel %vm2250_vm2, %v5365_v59, %v5367_v22  ;;  %v8231_v59 = vld [vmem:[%s13948_s7 + $0x18] sm:$0xff] }
 0x4d7   : > { %5531 = vrot.lane.b32.xlu0 %v5366_v14, %s9693_s19  ;;  %v5704_v39 = vadd.f32 %v5494_v16, %v5204_v25  ;;  %5033 = vrot.lane.b32.xlu1 %v4870_v55, %s9692_s28  ;;  %v4375_v41 = vsel %vm1242_vm3, %v4372_v36, %v4374_v2  ;;  %v4871_v49 = vrot.slane %v12322_v24, 2  ;;  %v4708_v25 = vadd.f32 %v12089_v12, %v4499_v35 }
 0x4d8   : > { %v12669_v1 = vpop.f32.mrf.mxu0  ;;  %v6838_v7 = vpop.f32.mrf.mxu1  ;;  %v8147_v0 = vmax.f32 %v8064_v26, 0.0  ;;  %v7975_v62 = vadd.f32 %v7732_v34, %v7561_v45  ;;  %8750 = vmatmul.mubr.msk.f32.gmra.mxu0 %vm5934_vm7, %v5876_v29  ;;  %9515 = vmatmul.mubr.msk.f32.gmra.mxu1 %vm5934_vm7, %v5876_v29  ;;  %v4376_v26 = vrot.slane %v12312_v63, 1 }
 0x4d9   : > { %v7733_v17 = vrot.slane %v6838_v7, 2  ;;  %v5794_v10 = vadd.f32 %v12334_v20, %v5704_v39  ;;  %v4996_v5 = vpop.permute.xlu0 %4995  ;;  %6476 = vmatprep.mubr.f32.mxu0 %v14150_v48  ;;  %9517 = vmatprep.mubr.msk.f32.mxu1 %vm9694_vm8, %v14150_v48 }
 0x4da   : > { %v4501_v51 = vpop.permute.xlu1 %4500  ;;  %v8313_v34 = vmul.f32 %v8230_v3, %v8147_v0  ;;  %v8065_v47 = vadd.f32 %v12600_v9, %v7975_v62  ;;  %v6282_v16 = vpop.f32.mrf.mxu0  ;;  %v5205_v55 = vadd.f32 %v4996_v5, %v4708_v25  ;;  %v4872_v0 = vsel %vm1746_vm5, %v4869_v11, %v4871_v49 }
 0x4db   : > { %v7734_v57 = vsel %vm1746_vm5, %v7731_v21, %v7733_v17  ;;  %v9420_v36 = vpop.f32.mrf.mxu1  ;;  %4538 = vrot.lane.b32.xlu0 %v4375_v41, %s9689_s20  ;;  %v5877_v4 = vmax.f32 %v5794_v10, 0.0  ;;  %v7319_v14 = vrot.slane %v6282_v16, 1  ;;  %5533 = vrot.lane.b32.xlu1 %v5368_v37, %s9693_s19  ;;  %v5369_v62 = vrot.slane %v12322_v24, 3 }
 0x4dc   : > { %v8395_v29 = vadd.f32 %v8394_v60, %v8313_v34  ;;  %v8148_v45 = vmax.f32 %v8065_v47, 0.0  ;;  %v12691_v12 = vpop.f32.mrf.mxu0  ;;  %v4709_v34 = vadd.f32 %v4501_v51, %v12122_v31 }
 0x4dd   : > { %v6843_v21 = vpop.f32.mrf.mxu1  ;;  %v7320_v35 = vsel %vm1242_vm3, %v7317_v43, %v7319_v14  ;;  %8751 = vmatmul.mubr.msk.f32.gmra.mxu0 %vm5934_vm7, %v5877_v4  ;;  %9518 = vmatmul.mubr.msk.f32.gmra.mxu1 %vm5934_vm7, %v5877_v4  ;;  %v5496_v39 = vpop.permute.xlu0 %5495  ;;  %v4377_v43 = vsel %vm1242_vm3, %v4374_v2, %v4376_v26  ;;  %v4378_v4 = vrot.slane %v12347_v33, 1 }
 0x4de   : > { %v7735_v3 = vrot.slane %v6843_v21, 2  ;;  %v4998_v7 = vpop.permute.xlu1 %4997  ;;  %v8314_v10 = vmul.f32 %v8231_v59, %v8148_v45  ;;  %v7562_v60 = vadd.f32 %v7320_v35, %v12637_v38  ;;  %v5705_v5 = vadd.f32 %v5496_v39, %v5205_v55  ;;  %v12699_v41 = vpop.f32.mrf.mxu0  ;;  %6482 = vmatprep.mubr.f32.mxu0 %v14150_v48  ;;  %9520 = vmatprep.mubr.msk.f32.mxu1 %vm9694_vm8, %v14150_v48 }
 0x4df   : > { %v9423_v37 = vpop.f32.mrf.mxu1  ;;  %5035 = vrot.lane.b32.xlu0 %v4872_v0, %s9692_s28  ;;  %v7321_v25 = vrot.slane %v12699_v41, 1  ;;  %4540 = vrot.lane.b32.xlu1 %v4377_v43, %s9689_s20  ;;  %v4873_v38 = vrot.slane %v12312_v63, 2  ;;  %v5206_v2 = vadd.f32 %v4998_v7, %v4709_v34  ;;  %v5370_v59 = vsel %vm2250_vm2, %v5367_v22, %v5369_v62 }
 0x4e0   : > { %v7736_v47 = vsel %vm1746_vm5, %v7733_v17, %v7735_v3  ;;  %v8396_v11 = vadd.f32 %v8395_v29, %v8314_v10  ;;  %v7976_v16 = vadd.f32 %v7734_v57, %v7562_v60  ;;  %v5795_v36 = vadd.f32 %v12334_v20, %v5705_v5 }
 0x4e1   : > { %v7322_v31 = vsel %vm1242_vm3, %v7319_v14, %v7321_v25  ;;  %v4503_v51 = vpop.permute.xlu0 %4502  ;;  %v4874_v55 = vsel %vm1746_vm5, %v4871_v49, %v4873_v38  ;;  %v5371_v21 = vrot.slane %v12312_v63, 3  ;;  %v8232_v14 = vld [vmem:[%s13948_s7 + $0x20] sm:$0xff]  ;;  %v4379_v5 = vsel %vm1242_vm3, %v4376_v26, %v4378_v4 }
 0x4e2   : > { %v5498_v17 = vpop.permute.xlu1 %5497  ;;  %v8066_v45 = vadd.f32 %v12600_v9, %v7976_v16  ;;  %v5878_v29 = vmax.f32 %v5795_v36, 0.0  ;;  %v7563_v57 = vadd.f32 %v7322_v31, %v12669_v1  ;;  %v4875_v37 = vrot.slane %v12347_v33, 2 }
 0x4e3   : > { %5535 = vrot.lane.b32.xlu0 %v5370_v59, %s9693_s19  ;;  %v5706_v35 = vadd.f32 %v5498_v17, %v5206_v2  ;;  %5037 = vrot.lane.b32.xlu1 %v4874_v55, %s9692_s28  ;;  %v5372_v41 = vsel %vm2250_vm2, %v5369_v62, %v5371_v21  ;;  %v8233_v62 = vld [vmem:[%s13948_s7 + $0x28] sm:$0xff]  ;;  %v4380_v31 = vrot.slane %v12329_v44, 1 }
 0x4e4   : > { %v12726_v22 = vpop.f32.mrf.mxu0  ;;  %v6848_v39 = vpop.f32.mrf.mxu1  ;;  %v8149_v7 = vmax.f32 %v8066_v45, 0.0  ;;  %v7977_v0 = vadd.f32 %v7736_v47, %v7563_v57  ;;  %8752 = vmatmul.mubr.msk.f32.gmra.mxu0 %vm5934_vm7, %v5878_v29  ;;  %9521 = vmatmul.mubr.msk.f32.gmra.mxu1 %vm5934_vm7, %v5878_v29 }
 0x4e5   : > { %v7737_v1 = vrot.slane %v6848_v39, 2  ;;  %v5796_v49 = vadd.f32 %v12334_v20, %v5706_v35  ;;  %v5000_v10 = vpop.permute.xlu0 %4999  ;;  %6488 = vmatprep.mubr.f32.mxu0 %v14150_v48  ;;  %9523 = vmatprep.mubr.msk.f32.mxu1 %vm9694_vm8, %v14150_v48  ;;  %v4710_v20 = vadd.f32 %v12112_v32, %v4503_v51  ;;  %v5373_v35 = vrot.slane %v12347_v33, 3 }
 0x4e6   : > { %v4505_v60 = vpop.permute.xlu1 %4504  ;;  %v8315_v43 = vmul.f32 %v8232_v14, %v8149_v7  ;;  %v8067_v34 = vadd.f32 %v12600_v9, %v7977_v0  ;;  %v6294_v16 = vpop.f32.mrf.mxu0  ;;  %v4876_v14 = vsel %vm1746_vm5, %v4873_v38, %v4875_v37 }
 0x4e7   : > { %v7738_v47 = vsel %vm1746_vm5, %v7735_v3, %v7737_v1  ;;  %v9426_v26 = vpop.f32.mrf.mxu1  ;;  %4542 = vrot.lane.b32.xlu0 %v4379_v5, %s9689_s20  ;;  %v5879_v36 = vmax.f32 %v5796_v49, 0.0  ;;  %v7323_v2 = vrot.slane %v6294_v16, 1  ;;  %5537 = vrot.lane.b32.xlu1 %v5372_v41, %s9693_s19  ;;  %v5207_v45 = vadd.f32 %v5000_v10, %v4710_v20 }
 0x4e8   : > { %v8397_v17 = vadd.f32 %v8396_v11, %v8315_v43  ;;  %v8150_v59 = vmax.f32 %v8067_v34, 0.0  ;;  %v12748_v32 = vpop.f32.mrf.mxu0  ;;  %v4711_v10 = vadd.f32 %v4505_v60, %v12142_v53  ;;  %v12769_v34 = vld [vmem:[%s13945_s4] ss:$0 sm:$0xff]  ;;  %v5374_v16 = vsel %vm2250_vm2, %v5371_v21, %v5373_v35 }
 0x4e9   : > { %v6853_v3 = vpop.f32.mrf.mxu1  ;;  %v7324_v51 = vsel %vm1242_vm3, %v7321_v25, %v7323_v2  ;;  %8753 = vmatmul.mubr.msk.f32.gmra.mxu0 %vm5934_vm7, %v5879_v36  ;;  %9524 = vmatmul.mubr.msk.f32.gmra.mxu1 %vm5934_vm7, %v5879_v36  ;;  %v5500_v57 = vpop.permute.xlu0 %5499  ;;  %v4381_v25 = vsel %vm1242_vm3, %v4378_v4, %v4380_v31 }
 0x4ea   : > { %v7739_v29 = vrot.slane %v6853_v3, 2  ;;  %v5002_v55 = vpop.permute.xlu1 %5001  ;;  %v8316_v39 = vmul.f32 %v8233_v62, %v8150_v59  ;;  %v7564_v11 = vadd.f32 %v7324_v51, %v12691_v12  ;;  %v5707_v7 = vadd.f32 %v5500_v57, %v5207_v45  ;;  %v12756_v0 = vpop.f32.mrf.mxu0  ;;  %6494 = vmatprep.mubr.f32.mxu0 %v14150_v48  ;;  %9526 = vmatprep.mubr.msk.f32.mxu1 %vm9694_vm8, %v14150_v48 }
 0x4eb   : > { %v9429_v49 = vpop.f32.mrf.mxu1  ;;  %5039 = vrot.lane.b32.xlu0 %v4876_v14, %s9692_s28  ;;  %v7325_v41 = vrot.slane %v12756_v0, 1  ;;  %4544 = vrot.lane.b32.xlu1 %v4381_v25, %s9689_s20  ;;  %v4877_v12 = vrot.slane %v12329_v44, 2  ;;  %v5208_v53 = vadd.f32 %v5002_v55, %v4711_v10  ;;  %v5375_v59 = vrot.slane %v12329_v44, 3 }
 0x4ec   : > { %v7740_v5 = vsel %vm1746_vm5, %v7737_v1, %v7739_v29  ;;  %v8398_v38 = vadd.f32 %v8397_v17, %v8316_v39  ;;  %v7978_v43 = vadd.f32 %v7738_v47, %v7564_v11  ;;  %v5797_v4 = vadd.f32 %v12769_v34, %v5707_v7 }
 0x4ed   : > { %v7326_v1 = vsel %vm1242_vm3, %v7323_v2, %v7325_v41  ;;  %v4507_v60 = vpop.permute.xlu0 %4506  ;;  %v4382_v47 = vrot.slane %v12367_v30, 1  ;;  %v4878_v17 = vsel %vm1746_vm5, %v4875_v37, %v4877_v12  ;;  %v8234_v2 = vld [vmem:[%s13948_s7 + $0x30] sm:$0xff]  ;;  %v5376_v11 = vsel %vm2250_vm2, %v5373_v35, %v5375_v59  ;;  %v8235_v35 = vld [vmem:[%s13948_s7 + $0x38] sm:$0xff] }
 0x4ee   : > { %v5502_v20 = vpop.permute.xlu1 %5501  ;;  %v8068_v26 = vadd.f32 %v12600_v9, %v7978_v43  ;;  %v5880_v62 = vmax.f32 %v5797_v4, 0.0  ;;  %v7565_v36 = vadd.f32 %v7326_v1, %v12726_v22  ;;  %v4879_v7 = vrot.slane %v12367_v30, 2 }
 0x4ef   : > { %5539 = vrot.lane.b32.xlu0 %v5374_v16, %s9693_s19  ;;  %v5708_v45 = vadd.f32 %v5502_v20, %v5208_v53  ;;  %5041 = vrot.lane.b32.xlu1 %v4878_v17, %s9692_s28  ;;  %v4383_v39 = vsel %vm1242_vm3, %v4380_v31, %v4382_v47  ;;  %v4712_v25 = vadd.f32 %v12129_v56, %v4507_v60  ;;  %v4384_v53 = vrot.slane %v12357_v18, 1 }
 0x4f0   : > { %v12788_v21 = vpop.f32.mrf.mxu0  ;;  %v6858_v3 = vpop.f32.mrf.mxu1  ;;  %v8151_v51 = vmax.f32 %v8068_v26, 0.0  ;;  %v7979_v57 = vadd.f32 %v7740_v5, %v7565_v36  ;;  %8754 = vmatmul.mubr.msk.f32.gmra.mxu0 %vm5934_vm7, %v5880_v62  ;;  %9527 = vmatmul.mubr.msk.f32.gmra.mxu1 %vm5934_vm7, %v5880_v62  ;;  %v4880_v17 = vsel %vm1746_vm5, %v4877_v12, %v4879_v7 }
 0x4f1   : > { %v7741_v22 = vrot.slane %v6858_v3, 2  ;;  %v5798_v37 = vadd.f32 %v12769_v34, %v5708_v45  ;;  %v5004_v55 = vpop.permute.xlu0 %5003  ;;  %6500 = vmatprep.mubr.f32.mxu0 %v14150_v48  ;;  %9529 = vmatprep.mubr.msk.f32.mxu1 %vm9694_vm8, %v14150_v48 }
 0x4f2   : > { %v4509_v14 = vpop.permute.xlu1 %4508  ;;  %v8317_v0 = vmul.f32 %v8234_v2, %v8151_v51  ;;  %v8069_v49 = vadd.f32 %v12600_v9, %v7979_v57  ;;  %v6306_v5 = vpop.f32.mrf.mxu0  ;;  %v5209_v16 = vadd.f32 %v5004_v55, %v4712_v25  ;;  %v5377_v2 = vrot.slane %v12367_v30, 3 }
 0x4f3   : > { %v7742_v10 = vsel %vm1746_vm5, %v7739_v29, %v7741_v22  ;;  %v9432_v31 = vpop.f32.mrf.mxu1  ;;  %4546 = vrot.lane.b32.xlu0 %v4383_v39, %s9689_s20  ;;  %v5881_v43 = vmax.f32 %v5798_v37, 0.0  ;;  %v7327_v4 = vrot.slane %v6306_v5, 1  ;;  %5541 = vrot.lane.b32.xlu1 %v5376_v11, %s9693_s19  ;;  %v4713_v37 = vadd.f32 %v4509_v14, %v12162_v23 }
 0x4f4   : > { %v8399_v1 = vadd.f32 %v8398_v38, %v8317_v0  ;;  %v8152_v20 = vmax.f32 %v8069_v49, 0.0  ;;  %v12810_v56 = vpop.f32.mrf.mxu0  ;;  %v5378_v49 = vsel %vm2250_vm2, %v5375_v59, %v5377_v2  ;;  %v4386_v25 = vrot.slane %v12387_v46, 1 }
 0x4f5   : > { %v6863_v29 = vpop.f32.mrf.mxu1  ;;  %v7328_v60 = vsel %vm1242_vm3, %v7325_v41, %v7327_v4  ;;  %8755 = vmatmul.mubr.msk.f32.gmra.mxu0 %vm5934_vm7, %v5881_v43  ;;  %9530 = vmatmul.mubr.msk.f32.gmra.mxu1 %vm5934_vm7, %v5881_v43  ;;  %v5504_v62 = vpop.permute.xlu0 %5503  ;;  %v4385_v41 = vsel %vm1242_vm3, %v4382_v47, %v4384_v53  ;;  %v5379_v43 = vrot.slane %v12357_v18, 3 }
 0x4f6   : > { %v7743_v26 = vrot.slane %v6863_v29, 2  ;;  %v5006_v36 = vpop.permute.xlu1 %5005  ;;  %v8318_v45 = vmul.f32 %v8235_v35, %v8152_v20  ;;  %v7566_v38 = vadd.f32 %v7328_v60, %v12748_v32  ;;  %v5709_v3 = vadd.f32 %v5504_v62, %v5209_v16  ;;  %v12818_v51 = vpop.f32.mrf.mxu0  ;;  %6506 = vmatprep.mubr.f32.mxu0 %v14150_v48  ;;  %9532 = vmatprep.mubr.msk.f32.mxu1 %vm9694_vm8, %v14150_v48 }
 0x4f7   : > { %v9435_v57 = vpop.f32.mrf.mxu1  ;;  %5043 = vrot.lane.b32.xlu0 %v4880_v17, %s9692_s28  ;;  %v7329_v39 = vrot.slane %v12818_v51, 1  ;;  %4548 = vrot.lane.b32.xlu1 %v4385_v41, %s9689_s20  ;;  %v4881_v32 = vrot.slane %v12357_v18, 2  ;;  %v5210_v47 = vadd.f32 %v5006_v36, %v4713_v37  ;;  %v4387_v36 = vsel %vm1242_vm3, %v4384_v53, %v4386_v25 }
 0x4f8   : > { %v7744_v55 = vsel %vm1746_vm5, %v7741_v22, %v7743_v26  ;;  %v8400_v12 = vadd.f32 %v8399_v1, %v8318_v45  ;;  %v7980_v11 = vadd.f32 %v7742_v10, %v7566_v38  ;;  %v5799_v0 = vadd.f32 %v12769_v34, %v5709_v3 }
 0x4f9   : > { %v7330_v23 = vsel %vm1242_vm3, %v7327_v4, %v7329_v39  ;;  %v4511_v14 = vpop.permute.xlu0 %4510  ;;  %v4882_v35 = vsel %vm1746_vm5, %v4879_v7, %v4881_v32  ;;  %v8236_v4 = vld [vmem:[%s13948_s7 + $0x40] sm:$0xff]  ;;  %v5380_v17 = vsel %vm2250_vm2, %v5377_v2, %v5379_v43  ;;  %v4883_v45 = vrot.slane %v12387_v46, 2  ;;  %v8237_v2 = vld [vmem:[%s13948_s7 + $0x48] sm:$0xff] }
 0x4fa   : > { %v5506_v22 = vpop.permute.xlu1 %5505  ;;  %v8070_v5 = vadd.f32 %v12600_v9, %v7980_v11  ;;  %v5882_v31 = vmax.f32 %v5799_v0, 0.0  ;;  %v7567_v10 = vadd.f32 %v7330_v23, %v12788_v21  ;;  %v4714_v51 = vadd.f32 %v12152_v8, %v4511_v14 }
 0x4fb   : > { %5543 = vrot.lane.b32.xlu0 %v5378_v49, %s9693_s19  ;;  %v5710_v1 = vadd.f32 %v5506_v22, %v5210_v47  ;;  %5045 = vrot.lane.b32.xlu1 %v4882_v35, %s9692_s28  ;;  %v4388_v11 = vrot.slane %v12374_v27, 1 }
 0x4fc   : > { %v12845_v59 = vpop.f32.mrf.mxu0  ;;  %v6868_v20 = vpop.f32.mrf.mxu1  ;;  %v8153_v16 = vmax.f32 %v8070_v5, 0.0  ;;  %v7981_v29 = vadd.f32 %v7744_v55, %v7567_v10  ;;  %8756 = vmatmul.mubr.msk.f32.gmra.mxu0 %vm5934_vm7, %v5882_v31  ;;  %9533 = vmatmul.mubr.msk.f32.gmra.mxu1 %vm5934_vm7, %v5882_v31  ;;  %v4884_v31 = vsel %vm1746_vm5, %v4881_v32, %v4883_v45  ;;  %v5381_v10 = vrot.slane %v12387_v46, 3 }
 0x4fd   : > { %v7745_v21 = vrot.slane %v6868_v20, 2  ;;  %v5800_v7 = vadd.f32 %v12769_v34, %v5710_v1  ;;  %v5008_v60 = vpop.permute.xlu0 %5007  ;;  %6512 = vmatprep.mubr.f32.mxu0 %v14150_v48  ;;  %9535 = vmatprep.mubr.msk.f32.mxu1 %vm9694_vm8, %v14150_v48 }
 0x4fe   : > { %v4513_v62 = vpop.permute.xlu1 %4512  ;;  %v8319_v38 = vmul.f32 %v8236_v4, %v8153_v16  ;;  %v8071_v3 = vadd.f32 %v12600_v9, %v7981_v29  ;;  %v6318_v41 = vpop.f32.mrf.mxu0  ;;  %v5211_v23 = vadd.f32 %v5008_v60, %v4714_v51 }
 0x4ff   : > { %v7746_v57 = vsel %vm1746_vm5, %v7743_v26, %v7745_v21  ;;  %v9438_v53 = vpop.f32.mrf.mxu1  ;;  %4550 = vrot.lane.b32.xlu0 %v4387_v36, %s9689_s20  ;;  %v5883_v37 = vmax.f32 %v5800_v7, 0.0  ;;  %v7331_v55 = vrot.slane %v6318_v41, 1  ;;  %5545 = vrot.lane.b32.xlu1 %v5380_v17, %s9693_s19  ;;  %v4715_v16 = vadd.f32 %v4513_v62, %v12182_v13 }
 0x500   : > { %v8401_v0 = vadd.f32 %v8400_v12, %v8319_v38  ;;  %v8154_v47 = vmax.f32 %v8071_v3, 0.0  ;;  %v12867_v8 = vpop.f32.mrf.mxu0  ;;  %v5382_v17 = vsel %vm2250_vm2, %v5379_v43, %v5381_v10  ;;  %v4390_v38 = vrot.slane %v12407_v61, 1 }
 0x501   : > { %v6873_v26 = vpop.f32.mrf.mxu1  ;;  %v7332_v14 = vsel %vm1242_vm3, %v7329_v39, %v7331_v55  ;;  %8757 = vmatmul.mubr.msk.f32.gmra.mxu0 %vm5934_vm7, %v5883_v37  ;;  %9536 = vmatmul.mubr.msk.f32.gmra.mxu1 %vm5934_vm7, %v5883_v37  ;;  %v5508_v49 = vpop.permute.xlu0 %5507  ;;  %v4389_v39 = vsel %vm1242_vm3, %v4386_v25, %v4388_v11  ;;  %v5383_v53 = vrot.slane %v12374_v27, 3 }
 0x502   : > { %v7747_v22 = vrot.slane %v6873_v26, 2  ;;  %v5010_v5 = vpop.permute.xlu1 %5009  ;;  %v8320_v35 = vmul.f32 %v8237_v2, %v8154_v47  ;;  %v7568_v12 = vadd.f32 %v7332_v14, %v12810_v56  ;;  %v5711_v4 = vadd.f32 %v5508_v49, %v5211_v23  ;;  %v12875_v1 = vpop.f32.mrf.mxu0  ;;  %6518 = vmatprep.mubr.f32.mxu0 %v14150_v48  ;;  %9538 = vmatprep.mubr.msk.f32.mxu1 %vm9694_vm8, %v14150_v48  ;;  %v8238_v2 = vld [vmem:[%s13948_s7 + $0x50] sm:$0xff] }
 0x503   : > { %v9441_v20 = vpop.f32.mrf.mxu1  ;;  %5047 = vrot.lane.b32.xlu0 %v4884_v31, %s9692_s28  ;;  %v7333_v7 = vrot.slane %v12875_v1, 1  ;;  %4552 = vrot.lane.b32.xlu1 %v4389_v39, %s9689_s20  ;;  %v4885_v56 = vrot.slane %v12374_v27, 2  ;;  %v5212_v25 = vadd.f32 %v5010_v5, %v4715_v16  ;;  %v4391_v14 = vsel %vm1242_vm3, %v4388_v11, %v4390_v38 }
 0x504   : > { %v7748_v29 = vsel %vm1746_vm5, %v7745_v21, %v7747_v22  ;;  %v8402_v32 = vadd.f32 %v8401_v0, %v8320_v35  ;;  %v7982_v60 = vadd.f32 %v7746_v57, %v7568_v12  ;;  %v5801_v36 = vadd.f32 %v12769_v34, %v5711_v4 }
 0x505   : > { %v7334_v13 = vsel %vm1242_vm3, %v7331_v55, %v7333_v7  ;;  %v4515_v62 = vpop.permute.xlu0 %4514  ;;  %v4886_v41 = vsel %vm1746_vm5, %v4883_v45, %v4885_v56  ;;  %v5384_v49 = vsel %vm2250_vm2, %v5381_v10, %v5383_v53  ;;  %v4887_v5 = vrot.slane %v12407_v61, 2  ;;  %v8239_v10 = vld [vmem:[%s13948_s7 + $0x58] sm:$0xff] }
 0x506   : > { %v5510_v21 = vpop.permute.xlu1 %5509  ;;  %v8072_v3 = vadd.f32 %v12600_v9, %v7982_v60  ;;  %v5884_v51 = vmax.f32 %v5801_v36, 0.0  ;;  %v7569_v57 = vadd.f32 %v7334_v13, %v12845_v59  ;;  %v4716_v12 = vadd.f32 %v12169_v58, %v4515_v62 }
 0x507   : > { %5547 = vrot.lane.b32.xlu0 %v5382_v17, %s9693_s19  ;;  %v5712_v37 = vadd.f32 %v5510_v21, %v5212_v25  ;;  %5049 = vrot.lane.b32.xlu1 %v4886_v41, %s9692_s28  ;;  %v4392_v16 = vrot.slane %v12397_v54, 1  ;;  %v4888_v17 = vsel %vm1746_vm5, %v4885_v56, %v4887_v5 }
 0x508   : > { %v12902_v43 = vpop.f32.mrf.mxu0  ;;  %v6878_v55 = vpop.f32.mrf.mxu1  ;;  %v8155_v0 = vmax.f32 %v8072_v3, 0.0  ;;  %v7983_v47 = vadd.f32 %v7748_v29, %v7569_v57  ;;  %8758 = vmatmul.mubr.msk.f32.gmra.mxu0 %vm5934_vm7, %v5884_v51  ;;  %9539 = vmatmul.mubr.msk.f32.gmra.mxu1 %vm5934_vm7, %v5884_v51  ;;  %v5385_v3 = vrot.slane %v12407_v61, 3 }
 0x509   : > { %v7749_v59 = vrot.slane %v6878_v55, 2  ;;  %v5802_v45 = vadd.f32 %v12769_v34, %v5712_v37  ;;  %v5012_v23 = vpop.permute.xlu0 %5011  ;;  %6524 = vmatprep.mubr.f32.mxu0 %v14150_v48  ;;  %9541 = vmatprep.mubr.msk.f32.mxu1 %vm9694_vm8, %v14150_v48 }
 0x50a   : > { %v4517_v26 = vpop.permute.xlu1 %4516  ;;  %v8321_v31 = vmul.f32 %v8238_v2, %v8155_v0  ;;  %v8073_v35 = vadd.f32 %v12600_v9, %v7983_v47  ;;  %v6330_v1 = vpop.f32.mrf.mxu0  ;;  %v5213_v36 = vadd.f32 %v5012_v23, %v4716_v12 }
 0x50b   : > { %v7750_v4 = vsel %vm1746_vm5, %v7747_v22, %v7749_v59  ;;  %v9444_v11 = vpop.f32.mrf.mxu1  ;;  %4554 = vrot.lane.b32.xlu0 %v4391_v14, %s9689_s20  ;;  %v5885_v20 = vmax.f32 %v5802_v45, 0.0  ;;  %v7335_v39 = vrot.slane %v6330_v1, 1  ;;  %5549 = vrot.lane.b32.xlu1 %v5384_v49, %s9693_s19  ;;  %v4717_v37 = vadd.f32 %v4517_v26, %v12202_v52  ;;  %v14164_v14 = vld [vmem:[#allocation16_spill] sm:$0xff] }
 0x50c   : > { %v8403_v29 = vadd.f32 %v8402_v32, %v8321_v31  ;;  %v8156_v60 = vmax.f32 %v8073_v35, 0.0  ;;  %v12924_v58 = vpop.f32.mrf.mxu0  ;;  %v5386_v26 = vsel %vm2250_vm2, %v5383_v53, %v5385_v3  ;;  %v4394_v49 = vrot.slane %v14164_v14, 1  ;;  %v8240_v11 = vld [vmem:[%s13948_s7 + $0x60] sm:$0xff] }
 0x50d   : > { %v6883_v22 = vpop.f32.mrf.mxu1  ;;  %v7336_v25 = vsel %vm1242_vm3, %v7333_v7, %v7335_v39  ;;  %8759 = vmatmul.mubr.msk.f32.gmra.mxu0 %vm5934_vm7, %v5885_v20  ;;  %9542 = vmatmul.mubr.msk.f32.gmra.mxu1 %vm5934_vm7, %v5885_v20  ;;  %v5512_v62 = vpop.permute.xlu0 %5511  ;;  %v4393_v7 = vsel %vm1242_vm3, %v4390_v38, %v4392_v16  ;;  %v5387_v1 = vrot.slane %v12397_v54, 3 }
 0x50e   : > { %v7751_v13 = vrot.slane %v6883_v22, 2  ;;  %v5014_v21 = vpop.permute.xlu1 %5013  ;;  %v8322_v51 = vmul.f32 %v8239_v10, %v8156_v60  ;;  %v7570_v32 = vadd.f32 %v7336_v25, %v12867_v8  ;;  %v5713_v57 = vadd.f32 %v5512_v62, %v5213_v36  ;;  %v12932_v41 = vpop.f32.mrf.mxu0  ;;  %6530 = vmatprep.mubr.f32.mxu0 %v14150_v48  ;;  %9544 = vmatprep.mubr.msk.f32.mxu1 %vm9694_vm8, %v14150_v48 }
 0x50f   : > { %v9447_v2 = vpop.f32.mrf.mxu1  ;;  %5051 = vrot.lane.b32.xlu0 %v4888_v17, %s9692_s28  ;;  %v7337_v0 = vrot.slane %v12932_v41, 1  ;;  %4556 = vrot.lane.b32.xlu1 %v4393_v7, %s9689_s20  ;;  %v4889_v8 = vrot.slane %v12397_v54, 2  ;;  %v5214_v38 = vadd.f32 %v5014_v21, %v4717_v37  ;;  %v4395_v22 = vsel %vm1242_vm3, %v4392_v16, %v4394_v49  ;;  %v14165_v7 = vld [vmem:[#allocation13_spill] sm:$0xff] }
 0x510   : > { %v7752_v55 = vsel %vm1746_vm5, %v7749_v59, %v7751_v13  ;;  %v8404_v56 = vadd.f32 %v8403_v29, %v8322_v51  ;;  %v7984_v47 = vadd.f32 %v7750_v4, %v7570_v32  ;;  %v5803_v45 = vadd.f32 %v12769_v34, %v5713_v57 }
 0x511   : > { %v7338_v52 = vsel %vm1242_vm3, %v7335_v39, %v7337_v0  ;;  %v4519_v23 = vpop.permute.xlu0 %4518  ;;  %v4890_v4 = vsel %vm1746_vm5, %v4887_v5, %v4889_v8  ;;  %v5388_v25 = vsel %vm2250_vm2, %v5385_v3, %v5387_v1  ;;  %v4891_v62 = vrot.slane %v14164_v14, 2  ;;  %v8241_v3 = vld [vmem:[%s13948_s7 + $0x68] sm:$0xff] }
 0x512   : > { %v5514_v59 = vpop.permute.xlu1 %5513  ;;  %v8074_v31 = vadd.f32 %v12600_v9, %v7984_v47  ;;  %v5886_v35 = vmax.f32 %v5803_v45, 0.0  ;;  %v7571_v12 = vadd.f32 %v7338_v52, %v12902_v43  ;;  %v4718_v51 = vadd.f32 %v12192_v19, %v4519_v23 }
 0x513   : > { %5551 = vrot.lane.b32.xlu0 %v5386_v26, %s9693_s19  ;;  %v5714_v10 = vadd.f32 %v5514_v59, %v5214_v38  ;;  %5053 = vrot.lane.b32.xlu1 %v4890_v4, %s9692_s28  ;;  %v4396_v37 = vrot.slane %v14165_v7, 1  ;;  %v4892_v59 = vsel %vm1746_vm5, %v4889_v8, %v4891_v62  ;;  %v5389_v26 = vrot.slane %v14164_v14, 3 }
 0x514   : > { %v12959_v53 = vpop.f32.mrf.mxu0  ;;  %v6888_v20 = vpop.f32.mrf.mxu1  ;;  %v8157_v39 = vmax.f32 %v8074_v31, 0.0  ;;  %v7985_v29 = vadd.f32 %v7752_v55, %v7571_v12  ;;  %8760 = vmatmul.mubr.msk.f32.gmra.mxu0 %vm5934_vm7, %v5886_v35  ;;  %9545 = vmatmul.mubr.msk.f32.gmra.mxu1 %vm5934_vm7, %v5886_v35 }
 0x515   : > { %v7753_v43 = vrot.slane %v6888_v20, 2  ;;  %v5804_v5 = vadd.f32 %v12769_v34, %v5714_v10  ;;  %v5016_v60 = vpop.permute.xlu0 %5015  ;;  %6536 = vmatprep.mubr.f32.mxu0 %v14150_v48  ;;  %9547 = vmatprep.mubr.msk.f32.mxu1 %vm9694_vm8, %v14150_v48 }
 0x516   : > { %v4521_v36 = vpop.permute.xlu1 %4520  ;;  %v8323_v21 = vmul.f32 %v8240_v11, %v8157_v39  ;;  %v8075_v17 = vadd.f32 %v12600_v9, %v7985_v29  ;;  %v6342_v57 = vpop.f32.mrf.mxu0  ;;  %v5215_v47 = vadd.f32 %v5016_v60, %v4718_v51  ;;  %v5390_v60 = vsel %vm2250_vm2, %v5387_v1, %v5389_v26  ;;  %v8242_v1 = vld [vmem:[%s13948_s7 + $0x70] sm:$0xff] }
 0x517   : > { %v7754_v32 = vsel %vm1746_vm5, %v7751_v13, %v7753_v43  ;;  %v9450_v16 = vpop.f32.mrf.mxu1  ;;  %4558 = vrot.lane.b32.xlu0 %v4395_v22, %s9689_s20  ;;  %v5887_v41 = vmax.f32 %v5804_v5, 0.0  ;;  %v7339_v2 = vrot.slane %v6342_v57, 1  ;;  %5553 = vrot.lane.b32.xlu1 %v5388_v25, %s9693_s19  ;;  %v4719_v11 = vadd.f32 %v4521_v36, %v12222_v40  ;;  %v13010_v22 = vld [vmem:[%s13947_s6] ss:$0 sm:$0xff] }
 0x518   : > { %v8405_v55 = vadd.f32 %v8404_v56, %v8323_v21  ;;  %v8158_v9 = vmax.f32 %v8075_v17, 0.0  ;;  %v12981_v19 = vpop.f32.mrf.mxu0  ;;  %v4398_v36 = vrot.slane %v12447_v6, 1 }
 0x519   : > { %v6893_v13 = vpop.f32.mrf.mxu1  ;;  %v7340_v45 = vsel %vm1242_vm3, %v7337_v0, %v7339_v2  ;;  %8761 = vmatmul.mubr.msk.f32.gmra.mxu0 %vm5934_vm7, %v5887_v41  ;;  %9548 = vmatmul.mubr.msk.f32.gmra.mxu1 %vm5934_vm7, %v5887_v41  ;;  %v5516_v52 = vpop.permute.xlu0 %5515  ;;  %v4397_v0 = vsel %vm1242_vm3, %v4394_v49, %v4396_v37 }
 0x51a   : > { %v7755_v38 = vrot.slane %v6893_v13, 2  ;;  %v5018_v23 = vpop.permute.xlu1 %5017  ;;  %v8324_v31 = vmul.f32 %v8241_v3, %v8158_v9  ;;  %v7572_v56 = vadd.f32 %v7340_v45, %v12924_v58  ;;  %v5715_v35 = vadd.f32 %v5516_v52, %v5215_v47  ;;  %v12989_v12 = vpop.f32.mrf.mxu0  ;;  %6542 = vmatprep.mubr.f32.mxu0 %v14150_v48  ;;  %9550 = vmatprep.mubr.msk.f32.mxu1 %vm9694_vm8, %v14150_v48 }
 0x51b   : > { %v9453_v4 = vpop.f32.mrf.mxu1  ;;  %5055 = vrot.lane.b32.xlu0 %v4892_v59, %s9692_s28  ;;  %v7341_v20 = vrot.slane %v12989_v12, 1  ;;  %4560 = vrot.lane.b32.xlu1 %v4397_v0, %s9689_s20  ;;  %v4893_v58 = vrot.slane %v14165_v7, 2  ;;  %v5216_v49 = vadd.f32 %v5018_v23, %v4719_v11  ;;  %v4399_v47 = vsel %vm1242_vm3, %v4396_v37, %v4398_v36 }
 0x51c   : > { %v7756_v10 = vsel %vm1746_vm5, %v7753_v43, %v7755_v38  ;;  %v8406_v8 = vadd.f32 %v8405_v55, %v8324_v31  ;;  %v7986_v39 = vadd.f32 %v7754_v32, %v7572_v56  ;;  %v5805_v29 = vadd.f32 %v12769_v34, %v5715_v35  ;;  %v14166_v4 = vld [vmem:[#allocation6_spill] sm:$0xff] }
 0x51d   : > { %v7342_v40 = vsel %vm1242_vm3, %v7339_v2, %v7341_v20  ;;  %v4523_v5 = vpop.permute.xlu0 %4522  ;;  %v4894_v51 = vsel %vm1746_vm5, %v4891_v62, %v4893_v58  ;;  %v5391_v32 = vrot.slane %v14165_v7, 3  ;;  %v4895_v45 = vrot.slane %v12447_v6, 2 }
 0x51e   : > { %v5518_v43 = vpop.permute.xlu1 %5517  ;;  %v8076_v25 = vadd.f32 %v13010_v22, %v7986_v39  ;;  %v5888_v21 = vmax.f32 %v5805_v29, 0.0  ;;  %v7573_v17 = vadd.f32 %v7342_v40, %v12959_v53  ;;  %v4720_v59 = vadd.f32 %v12209_v42, %v4523_v5 }
 0x51f   : > { %5555 = vrot.lane.b32.xlu0 %v5390_v60, %s9693_s19  ;;  %v5716_v57 = vadd.f32 %v5518_v43, %v5216_v49  ;;  %5057 = vrot.lane.b32.xlu1 %v4894_v51, %s9692_s28  ;;  %v5392_v13 = vsel %vm2250_vm2, %v5389_v26, %v5391_v32  ;;  %v8243_v26 = vld [vmem:[%s13948_s7 + $0x78] sm:$0xff]  ;;  %v4400_v0 = vrot.slane %v14166_v4, 1  ;;  %v4896_v43 = vsel %vm1746_vm5, %v4893_v58, %v4895_v45 }
 0x520   : > { %v13021_v16 = vpop.f32.mrf.mxu0  ;;  %v6898_v3 = vpop.f32.mrf.mxu1  ;;  %v8159_v41 = vmax.f32 %v8076_v25, 0.0  ;;  %v7987_v2 = vadd.f32 %v7756_v10, %v7573_v17  ;;  %8762 = vmatmul.mubr.msk.f32.gmra.mxu0 %vm5934_vm7, %v5888_v21  ;;  %9551 = vmatmul.mubr.msk.f32.gmra.mxu1 %vm5934_vm7, %v5888_v21  ;;  %v5393_v60 = vrot.slane %v12447_v6, 3 }
 0x521   : > { %v7757_v53 = vrot.slane %v6898_v3, 2  ;;  %v5806_v62 = vadd.f32 %v12769_v34, %v5716_v57  ;;  %v5020_v55 = vpop.permute.xlu0 %5019  ;;  %6548 = vmatprep.mubr.f32.mxu0 %v14150_v48  ;;  %9553 = vmatprep.mubr.msk.f32.mxu1 %vm9694_vm8, %v14150_v48 }
 0x522   : > { %v4525_v9 = vpop.permute.xlu1 %4524  ;;  %v8325_v52 = vmul.f32 %v8242_v1, %v8159_v41  ;;  %v8077_v23 = vadd.f32 %v13010_v22, %v7987_v2  ;;  %v6354_v56 = vpop.f32.mrf.mxu0  ;;  %v5217_v39 = vadd.f32 %v5020_v55, %v4720_v59  ;;  %v5394_v55 = vsel %vm2250_vm2, %v5391_v32, %v5393_v60 }
 0x523   : > { %v7758_v31 = vsel %vm1746_vm5, %v7755_v38, %v7757_v53  ;;  %v9456_v37 = vpop.f32.mrf.mxu1  ;;  %4562 = vrot.lane.b32.xlu0 %v4399_v47, %s9689_s20  ;;  %v5889_v35 = vmax.f32 %v5806_v62, 0.0  ;;  %v7343_v12 = vrot.slane %v6354_v56, 1  ;;  %5557 = vrot.lane.b32.xlu1 %v5392_v13, %s9693_s19  ;;  %v4721_v1 = vadd.f32 %v4525_v9, %v12242_v28  ;;  %v14167_v9 = vld [vmem:[#allocation28_spill] sm:$0xff]  ;;  %v8244_v56 = vld [vmem:[%s13948_s7 + $0x80] sm:$0xff] }
 0x524   : > { %v8407_v11 = vadd.f32 %v8406_v8, %v8325_v52  ;;  %v8160_v10 = vmax.f32 %v8077_v23, 0.0  ;;  %v13043_v42 = vpop.f32.mrf.mxu0  ;;  %v4402_v47 = vrot.slane %v14167_v9, 1 }
 0x525   : > { %v6903_v38 = vpop.f32.mrf.mxu1  ;;  %v7344_v29 = vsel %vm1242_vm3, %v7341_v20, %v7343_v12  ;;  %8763 = vmatmul.mubr.msk.f32.gmra.mxu0 %vm5934_vm7, %v5889_v35  ;;  %9554 = vmatmul.mubr.msk.f32.gmra.mxu1 %vm5934_vm7, %v5889_v35  ;;  %v5520_v40 = vpop.permute.xlu0 %5519  ;;  %v4401_v20 = vsel %vm1242_vm3, %v4398_v36, %v4400_v0 }
 0x526   : > { %v7759_v49 = vrot.slane %v6903_v38, 2  ;;  %v5022_v5 = vpop.permute.xlu1 %5021  ;;  %v8326_v25 = vmul.f32 %v8243_v26, %v8160_v10  ;;  %v7574_v8 = vadd.f32 %v7344_v29, %v12981_v19  ;;  %v5717_v21 = vadd.f32 %v5520_v40, %v5217_v39  ;;  %v13051_v17 = vpop.f32.mrf.mxu0  ;;  %6554 = vmatprep.mubr.f32.mxu0 %v14150_v48  ;;  %9556 = vmatprep.mubr.msk.f32.mxu1 %vm9694_vm8, %v14150_v48 }
 0x527   : > { %v9459_v51 = vpop.f32.mrf.mxu1  ;;  %5059 = vrot.lane.b32.xlu0 %v4896_v43, %s9692_s28  ;;  %v7345_v3 = vrot.slane %v13051_v17, 1  ;;  %4564 = vrot.lane.b32.xlu1 %v4401_v20, %s9689_s20  ;;  %v4897_v19 = vrot.slane %v14166_v4, 2  ;;  %v5218_v36 = vadd.f32 %v5022_v5, %v4721_v1  ;;  %v4403_v39 = vsel %vm1242_vm3, %v4400_v0, %v4402_v47  ;;  %v14168_v43 = vld [vmem:[#allocation10_spill] sm:$0xff]  ;;  %v14169_v20 = vld [vmem:[#allocation27_spill] sm:$0xff] }
 0x528   : > { %v7760_v57 = vsel %vm1746_vm5, %v7757_v53, %v7759_v49  ;;  %v8408_v58 = vadd.f32 %v8407_v11, %v8326_v25  ;;  %v7988_v41 = vadd.f32 %v7758_v31, %v7574_v8  ;;  %v5807_v2 = vadd.f32 %v12769_v34, %v5717_v21 }
 0x529   : > { %v7346_v28 = vsel %vm1242_vm3, %v7343_v12, %v7345_v3  ;;  %v4527_v62 = vpop.permute.xlu0 %4526  ;;  %v4898_v59 = vsel %vm1746_vm5, %v4895_v45, %v4897_v19  ;;  %v5395_v31 = vrot.slane %v14166_v4, 3  ;;  %v4899_v29 = vrot.slane %v14167_v9, 2 }
 0x52a   : > { %v5522_v53 = vpop.permute.xlu1 %5521  ;;  %v8078_v13 = vadd.f32 %v13010_v22, %v7988_v41  ;;  %v5890_v52 = vmax.f32 %v5807_v2, 0.0  ;;  %v7575_v23 = vadd.f32 %v7346_v28, %v13021_v16  ;;  %v4722_v25 = vadd.f32 %v14168_v43, %v4527_v62 }
 0x52b   : > { %5559 = vrot.lane.b32.xlu0 %v5394_v55, %s9693_s19  ;;  %v5718_v37 = vadd.f32 %v5522_v53, %v5218_v36  ;;  %5061 = vrot.lane.b32.xlu1 %v4898_v59, %s9692_s28  ;;  %v5396_v38 = vsel %vm2250_vm2, %v5393_v60, %v5395_v31  ;;  %v8245_v60 = vld [vmem:[%s13948_s7 + $0x88] sm:$0xff]  ;;  %v4404_v1 = vrot.slane %v14169_v20, 1 }
 0x52c   : > { %v13078_v32 = vpop.f32.mrf.mxu0  ;;  %v6908_v26 = vpop.f32.mrf.mxu1  ;;  %v8161_v35 = vmax.f32 %v8078_v13, 0.0  ;;  %v7989_v12 = vadd.f32 %v7760_v57, %v7575_v23  ;;  %8764 = vmatmul.mubr.msk.f32.gmra.mxu0 %vm5934_vm7, %v5890_v52  ;;  %9557 = vmatmul.mubr.msk.f32.gmra.mxu1 %vm5934_vm7, %v5890_v52  ;;  %v4900_v13 = vsel %vm1746_vm5, %v4897_v19, %v4899_v29  ;;  %v5397_v52 = vrot.slane %v14167_v9, 3 }
 0x52d   : > { %v7761_v16 = vrot.slane %v6908_v26, 2  ;;  %v5808_v45 = vadd.f32 %v12769_v34, %v5718_v37  ;;  %v5024_v11 = vpop.permute.xlu0 %5023  ;;  %6560 = vmatprep.mubr.f32.mxu0 %v14150_v48  ;;  %9559 = vmatprep.mubr.msk.f32.mxu1 %vm9694_vm8, %v14150_v48  ;;  %v14170_v26 = vld [vmem:[#allocation12_spill] sm:$0xff] }
 0x52e   : > { %v4529_v10 = vpop.permute.xlu1 %4528  ;;  %v8327_v40 = vmul.f32 %v8244_v56, %v8161_v35  ;;  %v8079_v5 = vadd.f32 %v13010_v22, %v7989_v12  ;;  %v6366_v21 = vpop.f32.mrf.mxu0  ;;  %v5219_v2 = vadd.f32 %v5024_v11, %v4722_v25 }
 0x52f   : > { %v7762_v8 = vsel %vm1746_vm5, %v7759_v49, %v7761_v16  ;;  %v9462_v0 = vpop.f32.mrf.mxu1  ;;  %4566 = vrot.lane.b32.xlu0 %v4403_v39, %s9689_s20  ;;  %v5891_v17 = vmax.f32 %v5808_v45, 0.0  ;;  %v7347_v51 = vrot.slane %v6366_v21, 1  ;;  %5561 = vrot.lane.b32.xlu1 %v5396_v38, %s9693_s19  ;;  %v4723_v35 = vadd.f32 %v4529_v10, %v14170_v26 }
 0x530   : > { %v8409_v57 = vadd.f32 %v8408_v58, %v8327_v40  ;;  %v8162_v41 = vmax.f32 %v8079_v5, 0.0  ;;  %v13100_v36 = vpop.f32.mrf.mxu0  ;;  %v5398_v40 = vsel %vm2250_vm2, %v5395_v31, %v5397_v52  ;;  %v14171_v5 = vld [vmem:[#allocation15_spill] sm:$0xff] }
 0x531   : > { %v6913_v49 = vpop.f32.mrf.mxu1  ;;  %v7348_v28 = vsel %vm1242_vm3, %v7345_v3, %v7347_v51  ;;  %8765 = vmatmul.mubr.msk.f32.gmra.mxu0 %vm5934_vm7, %v5891_v17  ;;  %9560 = vmatmul.mubr.msk.f32.gmra.mxu1 %vm5934_vm7, %v5891_v17  ;;  %v5524_v53 = vpop.permute.xlu0 %5523  ;;  %v4405_v3 = vsel %vm1242_vm3, %v4402_v47, %v4404_v1  ;;  %v4406_v43 = vrot.slane %v14171_v5, 1  ;;  %v8246_v17 = vld [vmem:[%s13948_s7 + $0x90] sm:$0xff] }
 0x532   : > { %v7763_v62 = vrot.slane %v6913_v49, 2  ;;  %v5026_v55 = vpop.permute.xlu1 %5025  ;;  %v8328_v23 = vmul.f32 %v8245_v60, %v8162_v41  ;;  %v7576_v58 = vadd.f32 %v7348_v28, %v13043_v42  ;;  %v5719_v59 = vadd.f32 %v5524_v53, %v5219_v2  ;;  %v13108_v56 = vpop.f32.mrf.mxu0  ;;  %6566 = vmatprep.mubr.f32.mxu0 %v14150_v48  ;;  %9562 = vmatprep.mubr.msk.f32.mxu1 %vm9694_vm8, %v14150_v48 }
 0x533   : > { %v9465_v37 = vpop.f32.mrf.mxu1  ;;  %5063 = vrot.lane.b32.xlu0 %v4900_v13, %s9692_s28  ;;  %v7349_v45 = vrot.slane %v13108_v56, 1  ;;  %4568 = vrot.lane.b32.xlu1 %v4405_v3, %s9689_s20  ;;  %v4901_v42 = vrot.slane %v14169_v20, 2  ;;  %v5220_v47 = vadd.f32 %v5026_v55, %v4723_v35  ;;  %v5399_v60 = vrot.slane %v14169_v20, 3 }
 0x534   : > { %v7764_v12 = vsel %vm1746_vm5, %v7761_v16, %v7763_v62  ;;  %v8410_v19 = vadd.f32 %v8409_v57, %v8328_v23  ;;  %v7990_v11 = vadd.f32 %v7762_v8, %v7576_v58  ;;  %v5809_v39 = vadd.f32 %v12769_v34, %v5719_v59  ;;  %v14172_v59 = vld [vmem:[#allocation11_spill] sm:$0xff] }
 0x535   : > { %v7350_v10 = vsel %vm1242_vm3, %v7347_v51, %v7349_v45  ;;  %v4531_v38 = vpop.permute.xlu0 %4530  ;;  %v4902_v0 = vsel %vm1746_vm5, %v4899_v29, %v4901_v42  ;;  %v4407_v53 = vsel %vm1242_vm3, %v4404_v1, %v4406_v43  ;;  %v5400_v55 = vsel %vm2250_vm2, %v5397_v52, %v5399_v60  ;;  %v8247_v52 = vld [vmem:[%s13948_s7 + $0x98] sm:$0xff] }
 0x536   : > { %v5526_v16 = vpop.permute.xlu1 %5525  ;;  %v8080_v25 = vadd.f32 %v13010_v22, %v7990_v11  ;;  %v5892_v21 = vmax.f32 %v5809_v39, 0.0  ;;  %v7577_v8 = vadd.f32 %v7350_v10, %v13078_v32  ;;  %v4903_v13 = vrot.slane %v14171_v5, 2 }
 0x537   : > { %5563 = vrot.lane.b32.xlu0 %v5398_v40, %s9693_s19  ;;  %v5720_v51 = vadd.f32 %v5526_v16, %v5220_v47  ;;  %5065 = vrot.lane.b32.xlu1 %v4902_v0, %s9692_s28  ;;  %v4724_v56 = vadd.f32 %v14172_v59, %v4531_v38  ;;  %v5401_v0 = vrot.slane %v14171_v5, 3 }
 0x538   : > { %v13135_v31 = vpop.f32.mrf.mxu0  ;;  %v6918_v57 = vpop.f32.mrf.mxu1  ;;  %v8163_v41 = vmax.f32 %v8080_v25, 0.0  ;;  %v7991_v2 = vadd.f32 %v7764_v12, %v7577_v8  ;;  %8766 = vmatmul.mubr.msk.f32.gmra.mxu0 %vm5934_vm7, %v5892_v21  ;;  %9563 = vmatmul.mubr.msk.f32.gmra.mxu1 %vm5934_vm7, %v5892_v21  ;;  %v14173_v12 = vld [vmem:[#allocation5_spill] sm:$0xff]  ;;  %v4904_v8 = vsel %vm1746_vm5, %v4901_v42, %v4903_v13 }
 0x539   : > { %v7765_v32 = vrot.slane %v6918_v57, 2  ;;  %v5810_v29 = vadd.f32 %v12769_v34, %v5720_v51  ;;  %v5028_v49 = vpop.permute.xlu0 %5027  ;;  %6572 = vmatprep.mubr.f32.mxu0 %v14150_v48  ;;  %9565 = vmatprep.mubr.msk.f32.mxu1 %vm9694_vm8, %v14150_v48  ;;  %v4408_v11 = vrot.slane %v14173_v12, 1  ;;  %v5402_v59 = vsel %vm2250_vm2, %v5399_v60, %v5401_v0 }
 0x53a   : > { %v4533_v28 = vpop.permute.xlu1 %4532  ;;  %v8329_v23 = vmul.f32 %v8246_v17, %v8163_v41  ;;  %v8081_v58 = vadd.f32 %v13010_v22, %v7991_v2  ;;  %v6378_v3 = vpop.f32.mrf.mxu0  ;;  %v5221_v10 = vadd.f32 %v5028_v49, %v4724_v56  ;;  %v14174_v2 = vld [vmem:[#allocation14_spill] sm:$0xff]  ;;  %v14175_v56 = vld [vmem:[#allocation8_spill] sm:$0xff] }
 0x53b   : > { %v7766_v37 = vsel %vm1746_vm5, %v7763_v62, %v7765_v32  ;;  %v9468_v1 = vpop.f32.mrf.mxu1  ;;  %4570 = vrot.lane.b32.xlu0 %v4407_v53, %s9689_s20  ;;  %v5893_v26 = vmax.f32 %v5810_v29, 0.0  ;;  %v7351_v35 = vrot.slane %v6378_v3, 1  ;;  %5565 = vrot.lane.b32.xlu1 %v5400_v55, %s9693_s19  ;;  %v4725_v29 = vadd.f32 %v4533_v28, %v14174_v2 }
 0x53c   : > { %v8411_v39 = vadd.f32 %v8410_v19, %v8329_v23  ;;  %v8164_v47 = vmax.f32 %v8081_v58, 0.0  ;;  %v13157_v38 = vpop.f32.mrf.mxu0  ;;  %v4410_v3 = vrot.slane %v14175_v56, 1 }
 0x53d   : > { %v6923_v62 = vpop.f32.mrf.mxu1  ;;  %v7352_v16 = vsel %vm1242_vm3, %v7349_v45, %v7351_v35  ;;  %8767 = vmatmul.mubr.msk.f32.gmra.mxu0 %vm5934_vm7, %v5893_v26  ;;  %9566 = vmatmul.mubr.msk.f32.gmra.mxu1 %vm5934_vm7, %v5893_v26  ;;  %v5528_v25 = vpop.permute.xlu0 %5527  ;;  %v4409_v45 = vsel %vm1242_vm3, %v4406_v43, %v4408_v11  ;;  %v5403_v26 = vrot.slane %v14173_v12, 3 }
 0x53e   : > { %v7767_v40 = vrot.slane %v6923_v62, 2  ;;  %v5030_v21 = vpop.permute.xlu1 %5029  ;;  %v8330_v17 = vmul.f32 %v8247_v52, %v8164_v47  ;;  %v7578_v19 = vadd.f32 %v7352_v16, %v13100_v36  ;;  %v5721_v51 = vadd.f32 %v5528_v25, %v5221_v10  ;;  %v13165_v57 = vpop.f32.mrf.mxu0  ;;  %6578 = vmatprep.mubr.f32.mxu0 %v14150_v48  ;;  %9568 = vmatprep.mubr.msk.f32.mxu1 %vm9694_vm8, %v14150_v48 }
 0x53f   : > { %v9471_v41 = vpop.f32.mrf.mxu1  ;;  %5067 = vrot.lane.b32.xlu0 %v4904_v8, %s9692_s28  ;;  %v7353_v53 = vrot.slane %v13165_v57, 1  ;;  %4572 = vrot.lane.b32.xlu1 %v4409_v45, %s9689_s20  ;;  %v4905_v36 = vrot.slane %v14173_v12, 2  ;;  %v5222_v43 = vadd.f32 %v5030_v21, %v4725_v29  ;;  %v4411_v8 = vsel %vm1242_vm3, %v4408_v11, %v4410_v3 }
 0x540   : > { %v7768_v49 = vsel %vm1746_vm5, %v7765_v32, %v7767_v40  ;;  %v8412_v42 = vadd.f32 %v8411_v39, %v8330_v17  ;;  %v7992_v55 = vadd.f32 %v7766_v37, %v7578_v19  ;;  %v5811_v23 = vadd.f32 %v12769_v34, %v5721_v51 }
 0x541   : > { %v7354_v28 = vsel %vm1242_vm3, %v7351_v35, %v7353_v53  ;;  %v4535_v58 = vpop.permute.xlu0 %4534  ;;  %v4906_v34 = vsel %vm1746_vm5, %v4903_v13, %v4905_v36  ;;  %v8248_v35 = vld [vmem:[%s13948_s7 + $0xa0] sm:$0xff]  ;;  %v5404_v17 = vsel %vm2250_vm2, %v5401_v0, %v5403_v26  ;;  %v4907_v19 = vrot.slane %v14175_v56, 2  ;;  %v8249_v0 = vld [vmem:[%s13948_s7 + $0xa8] sm:$0xff] }
 0x542   : > { %v5530_v32 = vpop.permute.xlu1 %5529  ;;  %v8082_v1 = vadd.f32 %v13010_v22, %v7992_v55  ;;  %v5894_v52 = vmax.f32 %v5811_v23, 0.0  ;;  %v7579_v37 = vadd.f32 %v7354_v28, %v13135_v31  ;;  %v13199_v13 = vld [vmem:[%s13945_s4] ss:$0 sm:$0xff]  ;;  %v4726_v41 = vadd.f32 %v12272_v50, %v4535_v58 }
 0x543   : > { %5567 = vrot.lane.b32.xlu0 %v5402_v59, %s9693_s19  ;;  %v5722_v39 = vadd.f32 %v5530_v32, %v5222_v43  ;;  %5069 = vrot.lane.b32.xlu1 %v4906_v34, %s9692_s28  ;;  %v14176_v55 = vld [vmem:[#allocation18_spill] sm:$0xff]  ;;  %v5405_v34 = vrot.slane %v14175_v56, 3 }
 0x544   : > { %v13192_v60 = vpop.f32.mrf.mxu0  ;;  %v6928_v47 = vpop.f32.mrf.mxu1  ;;  %v8165_v10 = vmax.f32 %v8082_v1, 0.0  ;;  %v7993_v62 = vadd.f32 %v7768_v49, %v7579_v37  ;;  %8768 = vmatmul.mubr.msk.f32.gmra.mxu0 %vm5934_vm7, %v5894_v52  ;;  %9569 = vmatmul.mubr.msk.f32.gmra.mxu1 %vm5934_vm7, %v5894_v52  ;;  %v4412_v23 = vrot.slane %v14176_v55, 1  ;;  %v4908_v37 = vsel %vm1746_vm5, %v4905_v36, %v4907_v19 }
 0x545   : > { %v7769_v31 = vrot.slane %v6928_v47, 2  ;;  %v5812_v16 = vadd.f32 %v13199_v13, %v5722_v39  ;;  %v5032_v25 = vpop.permute.xlu0 %5031  ;;  %6584 = vmatprep.mubr.f32.mxu0 %v14150_v48  ;;  %9571 = vmatprep.mubr.msk.f32.mxu1 %vm9694_vm8, %v14150_v48 }
 0x546   : > { %v4537_v21 = vpop.permute.xlu1 %4536  ;;  %v8331_v51 = vmul.f32 %v8248_v35, %v8165_v10  ;;  %v8083_v57 = vadd.f32 %v13010_v22, %v7993_v62  ;;  %v6390_v2 = vpop.f32.mrf.mxu0  ;;  %v5223_v32 = vadd.f32 %v5032_v25, %v4726_v41  ;;  %v14177_v62 = vld [vmem:[#allocation4_spill] sm:$0xff]  ;;  %v5406_v41 = vsel %vm2250_vm2, %v5403_v26, %v5405_v34 }
 0x547   : > { %v7770_v45 = vsel %vm1746_vm5, %v7767_v40, %v7769_v31  ;;  %v9474_v11 = vpop.f32.mrf.mxu1  ;;  %4574 = vrot.lane.b32.xlu0 %v4411_v8, %s9689_s20  ;;  %v5895_v29 = vmax.f32 %v5812_v16, 0.0  ;;  %v7355_v49 = vrot.slane %v6390_v2, 1  ;;  %5569 = vrot.lane.b32.xlu1 %v5404_v17, %s9693_s19  ;;  %v4727_v16 = vadd.f32 %v4537_v21, %v14177_v62  ;;  %v14178_v2 = vld [vmem:[#allocation30_spill] sm:$0xff] }
 0x548   : > { %v8413_v43 = vadd.f32 %v8412_v42, %v8331_v51  ;;  %v8166_v28 = vmax.f32 %v8083_v57, 0.0  ;;  %v13219_v50 = vpop.f32.mrf.mxu0  ;;  %v4414_v11 = vrot.slane %v14178_v2, 1 }
 0x549   : > { %v6933_v40 = vpop.f32.mrf.mxu1  ;;  %v7356_v58 = vsel %vm1242_vm3, %v7353_v53, %v7355_v49  ;;  %8769 = vmatmul.mubr.msk.f32.gmra.mxu0 %vm5934_vm7, %v5895_v29  ;;  %9572 = vmatmul.mubr.msk.f32.gmra.mxu1 %vm5934_vm7, %v5895_v29  ;;  %v5532_v1 = vpop.permute.xlu0 %5531  ;;  %v4413_v53 = vsel %vm1242_vm3, %v4410_v3, %v4412_v23 }
 0x54a   : > { %v7771_v59 = vrot.slane %v6933_v40, 2  ;;  %v5034_v52 = vpop.permute.xlu1 %5033  ;;  %v8332_v35 = vmul.f32 %v8249_v0, %v8166_v28  ;;  %v7580_v42 = vadd.f32 %v7356_v58, %v13157_v38  ;;  %v5723_v39 = vadd.f32 %v5532_v1, %v5223_v32  ;;  %v13227_v47 = vpop.f32.mrf.mxu0  ;;  %6590 = vmatprep.mubr.f32.mxu0 %v14150_v48  ;;  %9574 = vmatprep.mubr.msk.f32.mxu1 %vm9694_vm8, %v14150_v48 }
 0x54b   : > { %v9477_v10 = vpop.f32.mrf.mxu1  ;;  %5071 = vrot.lane.b32.xlu0 %v4908_v37, %s9692_s28  ;;  %v7357_v8 = vrot.slane %v13227_v47, 1  ;;  %4576 = vrot.lane.b32.xlu1 %v4413_v53, %s9689_s20  ;;  %v4909_v38 = vrot.slane %v14176_v55, 2  ;;  %v5224_v3 = vadd.f32 %v5034_v52, %v4727_v16  ;;  %v5407_v28 = vrot.slane %v14176_v55, 3 }
 0x54c   : > { %v7772_v25 = vsel %vm1746_vm5, %v7769_v31, %v7771_v59  ;;  %v8414_v36 = vadd.f32 %v8413_v43, %v8332_v35  ;;  %v7994_v17 = vadd.f32 %v7770_v45, %v7580_v42  ;;  %v5813_v51 = vadd.f32 %v13199_v13, %v5723_v39 }
 0x54d   : > { %v7358_v21 = vsel %vm1242_vm3, %v7355_v49, %v7357_v8  ;;  %v4539_v57 = vpop.permute.xlu0 %4538  ;;  %v4910_v43 = vsel %vm1746_vm5, %v4907_v19, %v4909_v38  ;;  %v8250_v49 = vld [vmem:[%s13948_s7 + $0xb0] sm:$0xff]  ;;  %v4415_v35 = vsel %vm1242_vm3, %v4412_v23, %v4414_v11  ;;  %v5408_v42 = vsel %vm2250_vm2, %v5405_v34, %v5407_v28  ;;  %v8251_v34 = vld [vmem:[%s13948_s7 + $0xb8] sm:$0xff] }
 0x54e   : > { %v5534_v31 = vpop.permute.xlu1 %5533  ;;  %v8084_v0 = vadd.f32 %v13010_v22, %v7994_v17  ;;  %v5896_v29 = vmax.f32 %v5813_v51, 0.0  ;;  %v7581_v45 = vadd.f32 %v7358_v21, %v13192_v60  ;;  %v4911_v39 = vrot.slane %v14178_v2, 2  ;;  %v14179_v51 = vld [vmem:[#allocation29_spill] sm:$0xff] }
 0x54f   : > { %5571 = vrot.lane.b32.xlu0 %v5406_v41, %s9693_s19  ;;  %v5724_v32 = vadd.f32 %v5534_v31, %v5224_v3  ;;  %5073 = vrot.lane.b32.xlu1 %v4910_v43, %s9692_s28  ;;  %v4728_v53 = vadd.f32 %v12289_v15, %v4539_v57  ;;  %v4416_v3 = vrot.slane %v14179_v51, 1 }
 0x550   : > { %v13254_v26 = vpop.f32.mrf.mxu0  ;;  %v6938_v40 = vpop.f32.mrf.mxu1  ;;  %v8167_v58 = vmax.f32 %v8084_v0, 0.0  ;;  %v7995_v1 = vadd.f32 %v7772_v25, %v7581_v45  ;;  %8770 = vmatmul.mubr.msk.f32.gmra.mxu0 %vm5934_vm7, %v5896_v29  ;;  %9575 = vmatmul.mubr.msk.f32.gmra.mxu1 %vm5934_vm7, %v5896_v29  ;;  %v4912_v43 = vsel %vm1746_vm5, %v4909_v38, %v4911_v39  ;;  %v4913_v38 = vrot.slane %v14179_v51, 2 }
 0x551   : > { %v7773_v60 = vrot.slane %v6938_v40, 2  ;;  %v5814_v19 = vadd.f32 %v13199_v13, %v5724_v32  ;;  %v5036_v52 = vpop.permute.xlu0 %5035  ;;  %6596 = vmatprep.mubr.f32.mxu0 %v14150_v48  ;;  %9577 = vmatprep.mubr.msk.f32.mxu1 %vm9694_vm8, %v14150_v48 }
 0x552   : > { %v4541_v37 = vpop.permute.xlu1 %4540  ;;  %v8333_v47 = vmul.f32 %v8250_v49, %v8167_v58  ;;  %v8085_v10 = vadd.f32 %v13010_v22, %v7995_v1  ;;  %v6402_v16 = vpop.f32.mrf.mxu0  ;;  %v5225_v41 = vadd.f32 %v5036_v52, %v4728_v53  ;;  %v5409_v49 = vrot.slane %v14178_v2, 3  ;;  %v14180_v53 = vld [vmem:[#allocation17_spill] sm:$0xff] }
 0x553   : > { %v7774_v62 = vsel %vm1746_vm5, %v7771_v59, %v7773_v60  ;;  %v9480_v23 = vpop.f32.mrf.mxu1  ;;  %4578 = vrot.lane.b32.xlu0 %v4415_v35, %s9689_s20  ;;  %v5897_v25 = vmax.f32 %v5814_v19, 0.0  ;;  %v7359_v17 = vrot.slane %v6402_v16, 1  ;;  %5573 = vrot.lane.b32.xlu1 %v5408_v42, %s9693_s19  ;;  %v4729_v19 = vadd.f32 %v4541_v37, %v12322_v24 }
 0x554   : > { %v8415_v21 = vadd.f32 %v8414_v36, %v8333_v47  ;;  %v8168_v31 = vmax.f32 %v8085_v10, 0.0  ;;  %v13276_v15 = vpop.f32.mrf.mxu0  ;;  %v4418_v16 = vrot.slane %v14180_v53, 1 }
 0x555   : > { %v6943_v59 = vpop.f32.mrf.mxu1  ;;  %v7360_v57 = vsel %vm1242_vm3, %v7357_v8, %v7359_v17  ;;  %8771 = vmatmul.mubr.msk.f32.gmra.mxu0 %vm5934_vm7, %v5897_v25  ;;  %9578 = vmatmul.mubr.msk.f32.gmra.mxu1 %vm5934_vm7, %v5897_v25  ;;  %v5536_v29 = vpop.permute.xlu0 %5535  ;;  %v4417_v8 = vsel %vm1242_vm3, %v4414_v11, %v4416_v3  ;;  %v4914_v25 = vsel %vm1746_vm5, %v4911_v39, %v4913_v38 }
 0x556   : > { %v7775_v0 = vrot.slane %v6943_v59, 2  ;;  %v5038_v45 = vpop.permute.xlu1 %5037  ;;  %v8334_v32 = vmul.f32 %v8251_v34, %v8168_v31  ;;  %v7582_v36 = vadd.f32 %v7360_v57, %v13219_v50  ;;  %v5725_v40 = vadd.f32 %v5536_v29, %v5225_v41  ;;  %v6408_v58 = vpop.f32.mrf.mxu0  ;;  %6602 = vmatprep.mubr.f32.mxu0 %v14150_v48  ;;  %9580 = vmatprep.mubr.msk.f32.mxu1 %vm9694_vm8, %v14150_v48 }
 0x557   : > { %v9483_v1 = vpop.f32.mrf.mxu1  ;;  %5075 = vrot.lane.b32.xlu0 %v4912_v43, %s9692_s28  ;;  %v7361_v35 = vrot.slane %v6408_v58, 1  ;;  %4580 = vrot.lane.b32.xlu1 %v4417_v8, %s9689_s20  ;;  %v5226_v10 = vadd.f32 %v5038_v45, %v4729_v19  ;;  %v4419_v43 = vsel %vm1242_vm3, %v4416_v3, %v4418_v16 }
 0x558   : > { %v7776_v52 = vsel %vm1746_vm5, %v7773_v60, %v7775_v0  ;;  %v8416_v42 = vadd.f32 %v8415_v21, %v8334_v32  ;;  %v7996_v50 = vadd.f32 %v7774_v62, %v7582_v36  ;;  %v5815_v47 = vadd.f32 %v13199_v13, %v5725_v40 }
 0x559   : > { %v7362_v11 = vsel %vm1242_vm3, %v7359_v17, %v7361_v35  ;;  %v4543_v24 = vpop.permute.xlu0 %4542  ;;  %v5410_v60 = vsel %vm2250_vm2, %v5407_v28, %v5409_v49  ;;  %v5411_v21 = vrot.slane %v14179_v51, 3  ;;  %v8252_v17 = vld [vmem:[%s13948_s7 + $0xc0] sm:$0xff]  ;;  %v4915_v36 = vrot.slane %v14180_v53, 2 }
 0x55a   : > { %v5538_v37 = vpop.permute.xlu1 %5537  ;;  %v8086_v23 = vadd.f32 %v13010_v22, %v7996_v50  ;;  %v5898_v34 = vmax.f32 %v5815_v47, 0.0  ;;  %v7583_v62 = vadd.f32 %v7362_v11, %v13254_v26  ;;  %v4730_v1 = vadd.f32 %v12312_v63, %v4543_v24 }
 0x55b   : > { %5575 = vrot.lane.b32.xlu0 %v5410_v60, %s9693_s19  ;;  %v5726_v31 = vadd.f32 %v5538_v37, %v5226_v10  ;;  %5077 = vrot.lane.b32.xlu1 %v4914_v25, %s9692_s28  ;;  %v5412_v32 = vsel %vm2250_vm2, %v5409_v49, %v5411_v21  ;;  %v8253_v49 = vld [vmem:[%s13948_s7 + $0xc8] sm:$0xff] }
 0x55c   : > { %v6412_v28 = vpop.f32.mrf.mxu0  ;;  %v6948_v41 = vpop.f32.mrf.mxu1  ;;  %v8169_v59 = vmax.f32 %v8086_v23, 0.0  ;;  %v7997_v57 = vadd.f32 %v7776_v52, %v7583_v62  ;;  %8772 = vmatmul.mubr.msk.f32.gmra.mxu0 %vm5934_vm7, %v5898_v34  ;;  %9581 = vmatmul.mubr.msk.f32.gmra.mxu1 %vm5934_vm7, %v5898_v34  ;;  %v4916_v34 = vsel %vm1746_vm5, %v4913_v38, %v4915_v36  ;;  %v5413_v62 = vrot.slane %v14180_v53, 3 }
 0x55d   : > { %v7777_v26 = vrot.slane %v6948_v41, 2  ;;  %v5816_v39 = vadd.f32 %v13199_v13, %v5726_v31  ;;  %v5040_v29 = vpop.permute.xlu0 %5039  ;;  %6608 = vmatprep.mubr.f32.mxu0 %v14150_v48  ;;  %9583 = vmatprep.mubr.msk.f32.mxu1 %vm9694_vm8, %v14150_v48 }
 0x55e   : > { %v4545_v45 = vpop.permute.xlu1 %4544  ;;  %v8335_v40 = vmul.f32 %v8252_v17, %v8169_v59  ;;  %v8087_v58 = vadd.f32 %v13010_v22, %v7997_v57  ;;  %v6414_v19 = vpop.f32.mrf.mxu0  ;;  %v5227_v11 = vadd.f32 %v5040_v29, %v4730_v1 }
 0x55f   : > { %v7778_v8 = vsel %vm1746_vm5, %v7775_v0, %v7777_v26  ;;  %v9486_v3 = vpop.f32.mrf.mxu1  ;;  %4582 = vrot.lane.b32.xlu0 %v4419_v43, %s9689_s20  ;;  %v5899_v52 = vmax.f32 %v5816_v39, 0.0  ;;  %v7363_v50 = vrot.slane %v6414_v19, 1  ;;  %5577 = vrot.lane.b32.xlu1 %v5412_v32, %s9693_s19 }
 0x560   : > { %v8417_v47 = vadd.f32 %v8416_v42, %v8335_v40  ;;  %v8170_v10 = vmax.f32 %v8087_v58, 0.0  ;;  %v13327_v37 = vpop.f32.mrf.mxu0  ;;  %v14181_v58 = vld [vmem:[#allocation7_spill] sm:$0xff] }
 0x561   : > { %v6953_v63 = vpop.f32.mrf.mxu1  ;;  %v7364_v0 = vsel %vm1242_vm3, %v7361_v35, %v7363_v50  ;;  %8773 = vmatmul.mubr.msk.f32.gmra.mxu0 %vm5934_vm7, %v5899_v52  ;;  %9584 = vmatmul.mubr.msk.f32.gmra.mxu1 %vm5934_vm7, %v5899_v52  ;;  %v5540_v60 = vpop.permute.xlu0 %5539  ;;  %v4731_v35 = vadd.f32 %v4545_v45, %v12347_v33  ;;  %v5414_v33 = vsel %vm2250_vm2, %v5411_v21, %v5413_v62  ;;  %v5415_v1 = vrot.slane %v14181_v58, 3 }
 0x562   : > { %v7779_v24 = vrot.slane %v6953_v63, 2  ;;  %v5042_v23 = vpop.permute.xlu1 %5041  ;;  %v8336_v25 = vmul.f32 %v8253_v49, %v8170_v10  ;;  %v7584_v42 = vadd.f32 %v7364_v0, %v13276_v15  ;;  %v5727_v17 = vadd.f32 %v5540_v60, %v5227_v11  ;;  %v6420_v31 = vpop.f32.mrf.mxu0  ;;  %6614 = vmatprep.mubr.f32.mxu0 %v14150_v48  ;;  %9586 = vmatprep.mubr.msk.f32.mxu1 %vm9694_vm8, %v14150_v48 }
 0x563   : > { %v9489_v41 = vpop.f32.mrf.mxu1  ;;  %5079 = vrot.lane.b32.xlu0 %v4916_v34, %s9692_s28  ;;  %v7365_v57 = vrot.slane %v6420_v31, 1  ;;  %4584 = vrot.lane.b32.xlu1 %v4418_v16, %s9689_s20  ;;  %v5228_v15 = vadd.f32 %v5042_v23, %v4731_v35  ;;  %v5416_v11 = vsel %vm2250_vm2, %v5413_v62, %v5415_v1  ;;  %v8255_v62 = vld [vmem:[%s13948_s7 + $0xd8] sm:$0xff] }
 0x564   : > { %v7780_v59 = vsel %vm1746_vm5, %v7777_v26, %v7779_v24  ;;  %v8418_v38 = vadd.f32 %v8417_v47, %v8336_v25  ;;  %v7998_v39 = vadd.f32 %v7778_v8, %v7584_v42  ;;  %v5817_v29 = vadd.f32 %v13199_v13, %v5727_v17  ;;  %v8254_v8 = vld [vmem:[%s13948_s7 + $0xd0] sm:$0xff] }
 0x565   : > { %v7366_v43 = vsel %vm1242_vm3, %v7363_v50, %v7365_v57  ;;  %v4547_v32 = vpop.permute.xlu0 %4546 }
 0x566   : > { %v5542_v40 = vpop.permute.xlu1 %5541  ;;  %v8088_v16 = vadd.f32 %v13010_v22, %v7998_v39  ;;  %v5900_v26 = vmax.f32 %v5817_v29, 0.0  ;;  %v7585_v45 = vadd.f32 %v7366_v43, %v6412_v28  ;;  %v4732_v0 = vadd.f32 %v12329_v44, %v4547_v32 }
 0x567   : > { %5579 = vrot.lane.b32.xlu0 %v5414_v33, %s9693_s19  ;;  %v5728_v19 = vadd.f32 %v5542_v40, %v5228_v15  ;;  %5081 = vrot.lane.b32.xlu1 %v4915_v36, %s9692_s28  ;;  %s330_s28 = scalar_lea.vmem %s13950_s9, %s14183_s12 }
 0x568   : > { %v6424_v3 = vpop.f32.mrf.mxu0  ;;  %v6958_v49 = vpop.f32.mrf.mxu1  ;;  %v8171_v52 = vmax.f32 %v8088_v16, 0.0  ;;  %v7999_v50 = vadd.f32 %v7780_v59, %v7585_v45  ;;  %8774 = vmatmul.mubr.msk.f32.gmra.mxu0 %vm5934_vm7, %v5900_v26  ;;  %9587 = vmatmul.mubr.msk.f32.gmra.mxu1 %vm5934_vm7, %v5900_v26 }
 0x569   : > { %v7781_v21 = vrot.slane %v6958_v49, 2  ;;  %v5818_v28 = vadd.f32 %v13199_v13, %v5728_v19  ;;  %v5044_v47 = vpop.permute.xlu0 %5043  ;;  %6620 = vmatprep.mubr.f32.mxu0 %v14150_v48  ;;  %9589 = vmatprep.mubr.msk.f32.mxu1 %vm9694_vm8, %v14150_v48 }
 0x56a   : > { %v4549_v10 = vpop.permute.xlu1 %4548  ;;  %v8337_v36 = vmul.f32 %v8254_v8, %v8171_v52  ;;  %v8089_v63 = vadd.f32 %v13010_v22, %v7999_v50  ;;  %v6426_v23 = vpop.f32.mrf.mxu0  ;;  %v5229_v41 = vadd.f32 %v5044_v47, %v4732_v0 }
 0x56b   : > { %v7782_v60 = vsel %vm1746_vm5, %v7779_v24, %v7781_v21  ;;  %v9492_v34 = vpop.f32.mrf.mxu1  ;;  %5581 = vrot.lane.b32.xlu0 %v5416_v11, %s9693_s19  ;;  %v5901_v25 = vmax.f32 %v5818_v28, 0.0  ;;  %v7367_v42 = vrot.slane %v6426_v23, 1  ;;  %v4733_v33 = vadd.f32 %v4549_v10, %v12367_v30  ;;  %v8256_v30 = vld [vmem:[%s13948_s7 + $0xe0] sm:$0xff] }
 0x56c   : > { %v8419_v17 = vadd.f32 %v8418_v38, %v8337_v36  ;;  %v8172_v31 = vmax.f32 %v8089_v63, 0.0  ;;  %v13368_v35 = vpop.f32.mrf.mxu0 }
 0x56d   : > { %v6963_v59 = vpop.f32.mrf.mxu1  ;;  %v7368_v44 = vsel %vm1242_vm3, %v7365_v57, %v7367_v42  ;;  %8775 = vmatmul.mubr.msk.f32.gmra.mxu0 %vm5934_vm7, %v5901_v25  ;;  %9590 = vmatmul.mubr.msk.f32.gmra.mxu1 %vm5934_vm7, %v5901_v25  ;;  %v5544_v39 = vpop.permute.xlu0 %5543 }
 0x56e   : > { %v7783_v24 = vrot.slane %v6963_v59, 2  ;;  %v5046_v29 = vpop.permute.xlu1 %5045  ;;  %v8338_v15 = vmul.f32 %v8255_v62, %v8172_v31  ;;  %v7586_v43 = vadd.f32 %v7368_v44, %v13327_v37  ;;  %v5729_v32 = vadd.f32 %v5544_v39, %v5229_v41  ;;  %v6432_v40 = vpop.f32.mrf.mxu0  ;;  %6626 = vmatprep.mubr.f32.mxu0 %v14150_v48  ;;  %9592 = vmatprep.mubr.msk.f32.mxu1 %vm9694_vm8, %v14150_v48 }
 0x56f   : > { %v9495_v38 = vpop.f32.mrf.mxu1  ;;  %v7369_v57 = vrot.slane %v6432_v40, 1  ;;  %v5230_v1 = vadd.f32 %v5046_v29, %v4733_v33 }
 0x570   : > { %v7784_v16 = vsel %vm1746_vm5, %v7781_v21, %v7783_v24  ;;  %v8420_v26 = vadd.f32 %v8419_v17, %v8338_v15  ;;  %v8000_v45 = vadd.f32 %v7782_v60, %v7586_v43  ;;  %v5819_v58 = vadd.f32 %v13199_v13, %v5729_v32  ;;  %v8257_v17 = vld [vmem:[%s13948_s7 + $0xe8] sm:$0xff] }
 0x571   : > { %v7370_v37 = vsel %vm1242_vm3, %v7367_v42, %v7369_v57  ;;  %v4551_v8 = vpop.permute.xlu0 %4550 }
 0x572   : > { %v5546_v19 = vpop.permute.xlu1 %5545  ;;  %v8090_v49 = vadd.f32 %v13010_v22, %v8000_v45  ;;  %v5902_v52 = vmax.f32 %v5819_v58, 0.0  ;;  %v7587_v50 = vadd.f32 %v7370_v37, %v6424_v3  ;;  %v4734_v34 = vadd.f32 %v12357_v18, %v4551_v8 }
 0x573   : > { %v5730_v21 = vadd.f32 %v5546_v19, %v5230_v1 }
 0x574   : > { %v6436_v28 = vpop.f32.mrf.mxu0  ;;  %v6968_v47 = vpop.f32.mrf.mxu1  ;;  %v8173_v10 = vmax.f32 %v8090_v49, 0.0  ;;  %v8001_v11 = vadd.f32 %v7784_v16, %v7587_v50  ;;  %8776 = vmatmul.mubr.msk.f32.gmra.mxu0 %vm5934_vm7, %v5902_v52  ;;  %9593 = vmatmul.mubr.msk.f32.gmra.mxu1 %vm5934_vm7, %v5902_v52  ;;  %v13413_v52 = vld [vmem:[%s13947_s6] ss:$0 sm:$0xff] }
 0x575   : > { %v7785_v36 = vrot.slane %v6968_v47, 2  ;;  %v5820_v63 = vadd.f32 %v13199_v13, %v5730_v21  ;;  %v5048_v0 = vpop.permute.xlu0 %5047  ;;  %6632 = vmatprep.mubr.f32.mxu0 %v14150_v48  ;;  %9595 = vmatprep.mubr.msk.f32.mxu1 %vm9694_vm8, %v14150_v48  ;;  %v8258_v21 = vld [vmem:[%s13948_s7 + $0xf0] sm:$0xff] }
 0x576   : > { %v4553_v60 = vpop.permute.xlu1 %4552  ;;  %v8339_v3 = vmul.f32 %v8256_v30, %v8173_v10  ;;  %v8091_v23 = vadd.f32 %v13010_v22, %v8001_v11  ;;  %v6438_v25 = vpop.f32.mrf.mxu0  ;;  %v5231_v39 = vadd.f32 %v5048_v0, %v4734_v34 }
 0x577   : > { %v7786_v62 = vsel %vm1746_vm5, %v7783_v24, %v7785_v36  ;;  %v9498_v42 = vpop.f32.mrf.mxu1  ;;  %v5903_v31 = vmax.f32 %v5820_v63, 0.0  ;;  %v7371_v41 = vrot.slane %v6438_v25, 1 }
 0x578   : > { %v8421_v59 = vadd.f32 %v8420_v26, %v8339_v3  ;;  %v8174_v44 = vmax.f32 %v8091_v23, 0.0  ;;  %v13397_v29 = vpop.f32.mrf.mxu0  ;;  %v4735_v26 = vadd.f32 %v4553_v60, %v12387_v46 }
 0x579   : > { %v6973_v15 = vpop.f32.mrf.mxu1  ;;  %v7372_v22 = vsel %vm1242_vm3, %v7369_v57, %v7371_v41  ;;  %8777 = vmatmul.mubr.msk.f32.gmra.mxu0 %vm5934_vm7, %v5903_v31  ;;  %9596 = vmatmul.mubr.msk.f32.gmra.mxu1 %vm5934_vm7, %v5903_v31  ;;  %v5548_v24 = vpop.permute.xlu0 %5547  ;;  %v8259_v31 = vld [vmem:[%s13948_s7 + $0xf8] sm:$0xff] }
 0x57a   : > { %v7787_v18 = vrot.slane %v6973_v15, 2  ;;  %v5050_v43 = vpop.permute.xlu1 %5049  ;;  %v8340_v32 = vmul.f32 %v8257_v17, %v8174_v44  ;;  %v7588_v40 = vadd.f32 %v7372_v22, %v13368_v35  ;;  %v5731_v38 = vadd.f32 %v5548_v24, %v5231_v39  ;;  %v6444_v33 = vpop.f32.mrf.mxu0  ;;  %6638 = vmatprep.mubr.f32.mxu0 %v14150_v48  ;;  %9598 = vmatprep.mubr.msk.f32.mxu1 %vm9694_vm8, %v14150_v48 }
 0x57b   : > { %v9501_v16 = vpop.f32.mrf.mxu1  ;;  %v7373_v57 = vrot.slane %v6444_v33, 1  ;;  %v5232_v8 = vadd.f32 %v5050_v43, %v4735_v26 }
 0x57c   : > { %v7788_v45 = vsel %vm1746_vm5, %v7785_v36, %v7787_v18  ;;  %v8422_v58 = vadd.f32 %v8421_v59, %v8340_v32  ;;  %v8002_v1 = vadd.f32 %v7786_v62, %v7588_v40  ;;  %v5821_v37 = vadd.f32 %v13199_v13, %v5731_v38 }
 0x57d   : > { %v7374_v35 = vsel %vm1242_vm3, %v7371_v41, %v7373_v57  ;;  %v4555_v19 = vpop.permute.xlu0 %4554 }
 0x57e   : > { %v5550_v49 = vpop.permute.xlu1 %5549  ;;  %v8092_v46 = vadd.f32 %v13413_v52, %v8002_v1  ;;  %v5904_v50 = vmax.f32 %v5821_v37, 0.0  ;;  %v7589_v30 = vadd.f32 %v7374_v35, %v6436_v28  ;;  %v4736_v62 = vadd.f32 %v12374_v27, %v4555_v19 }
 0x57f   : > { %v5732_v47 = vadd.f32 %v5550_v49, %v5232_v8 }
 0x580   : > { %v6448_v10 = vpop.f32.mrf.mxu0  ;;  %v6978_v11 = vpop.f32.mrf.mxu1  ;;  %v8175_v36 = vmax.f32 %v8092_v46, 0.0  ;;  %v8003_v63 = vadd.f32 %v7788_v45, %v7589_v30  ;;  %8778 = vmatmul.mubr.msk.f32.gmra.mxu0 %vm5934_vm7, %v5904_v50  ;;  %9599 = vmatmul.mubr.msk.f32.gmra.mxu1 %vm5934_vm7, %v5904_v50 }
 0x581   : > { %v7789_v0 = vrot.slane %v6978_v11, 2  ;;  %v5822_v60 = vadd.f32 %v13199_v13, %v5732_v47  ;;  %v5052_v3 = vpop.permute.xlu0 %5051  ;;  %6644 = vmatprep.mubr.f32.mxu0 %v14150_v48  ;;  %9601 = vmatprep.mubr.msk.f32.mxu1 %vm9694_vm8, %v14150_v48 }
 0x582   : > { %v4557_v23 = vpop.permute.xlu1 %4556  ;;  %v8341_v28 = vmul.f32 %v8258_v21, %v8175_v36  ;;  %v8093_v34 = vadd.f32 %v13413_v52, %v8003_v63  ;;  %v6450_v42 = vpop.f32.mrf.mxu0  ;;  %v5233_v15 = vadd.f32 %v5052_v3, %v4736_v62 }
 0x583   : > { %v7790_v25 = vsel %vm1746_vm5, %v7787_v18, %v7789_v0  ;;  %v9504_v17 = vpop.f32.mrf.mxu1  ;;  %v5905_v41 = vmax.f32 %v5822_v60, 0.0  ;;  %v7375_v59 = vrot.slane %v6450_v42, 1  ;;  %v4737_v45 = vadd.f32 %v4557_v23, %v12407_v61  ;;  %v8260_v61 = vld [vmem:[%s13948_s7 + $0x100] sm:$0xff]  ;;  %v8261_v42 = vld [vmem:[%s13948_s7 + $0x108] sm:$0xff] }
 0x584   : > { %v8423_v44 = vadd.f32 %v8422_v58, %v8341_v28  ;;  %v8176_v39 = vmax.f32 %v8093_v34, 0.0 }
 0x585   : > { %v13431_v22 = vpop.f32.mrf.mxu0  ;;  %v6983_v24 = vpop.f32.mrf.mxu1  ;;  %v7376_v43 = vsel %vm1242_vm3, %v7373_v57, %v7375_v59  ;;  %8779 = vmatmul.mubr.msk.f32.gmra.mxu0 %vm5934_vm7, %v5905_v41  ;;  %9602 = vmatmul.mubr.msk.f32.gmra.mxu1 %vm5934_vm7, %v5905_v41 }
 0x586   : > { %v7791_v27 = vrot.slane %v6983_v24, 2  ;;  %v5552_v18 = vpop.permute.xlu0 %5551  ;;  %v5054_v32 = vpop.permute.xlu1 %5053  ;;  %v8342_v40 = vmul.f32 %v8259_v31, %v8176_v39  ;;  %v7590_v38 = vadd.f32 %v7376_v43, %v13397_v29  ;;  %6650 = vmatprep.mubr.f32.mxu0 %v14150_v48  ;;  %9604 = vmatprep.mubr.msk.f32.mxu1 %vm9694_vm8, %v14150_v48 }
 0x587   : > { %v5733_v33 = vadd.f32 %v5552_v18, %v5233_v15  ;;  %v6456_v16 = vpop.f32.mrf.mxu0  ;;  %v9507_v26 = vpop.f32.mrf.mxu1  ;;  %v5234_v35 = vadd.f32 %v5054_v32, %v4737_v45 }
 0x588   : > { %v7792_v58 = vsel %vm1746_vm5, %v7789_v0, %v7791_v27  ;;  %v7377_v57 = vrot.slane %v6456_v16, 1  ;;  %v8424_v1 = vadd.f32 %v8423_v44, %v8342_v40  ;;  %v8004_v37 = vadd.f32 %v7790_v25, %v7590_v38 }
 0x589   : > { %v5823_v8 = vadd.f32 %v13199_v13, %v5733_v33 }
 0x58a   : > { %v7378_v29 = vsel %vm1242_vm3, %v7375_v59, %v7377_v57  ;;  %v4559_v19 = vpop.permute.xlu0 %4558  ;;  %v5554_v49 = vpop.permute.xlu1 %5553  ;;  %v8094_v46 = vadd.f32 %v13413_v52, %v8004_v37 }
 0x58b   : > { %v5906_v50 = vmax.f32 %v5823_v8, 0.0  ;;  %v7591_v30 = vadd.f32 %v7378_v29, %v6448_v10  ;;  %v5734_v21 = vadd.f32 %v5554_v49, %v5234_v35  ;;  %v4738_v34 = vadd.f32 %v12397_v54, %v4559_v19 }
 0x58c   : > { %v8177_v47 = vmax.f32 %v8094_v46, 0.0  ;;  %v6460_v36 = vpop.f32.mrf.mxu0  ;;  %v6988_v63 = vpop.f32.mrf.mxu1 }
 0x58d   : > { %v8005_v11 = vadd.f32 %v7792_v58, %v7591_v30  ;;  %8780 = vmatmul.mubr.msk.f32.gmra.mxu0 %vm5934_vm7, %v5906_v50  ;;  %9605 = vmatmul.mubr.msk.f32.gmra.mxu1 %vm5934_vm7, %v5906_v50  ;;  %v5824_v0 = vadd.f32 %v13199_v13, %v5734_v21  ;;  %v7793_v60 = vrot.slane %v6988_v63, 2 }
 0x58e   : > { %v5056_v3 = vpop.permute.xlu0 %5055  ;;  %v4561_v23 = vpop.permute.xlu1 %4560  ;;  %6656 = vmatprep.mubr.f32.mxu0 %v14150_v48  ;;  %9607 = vmatprep.mubr.msk.f32.mxu1 %vm9694_vm8, %v14150_v48  ;;  %v8343_v10 = vmul.f32 %v8260_v61, %v8177_v47 }
 0x58f   : > { %v8095_v28 = vadd.f32 %v13413_v52, %v8005_v11  ;;  %v6462_v62 = vpop.f32.mrf.mxu0  ;;  %v9510_v25 = vpop.f32.mrf.mxu1  ;;  %v5907_v17 = vmax.f32 %v5824_v0, 0.0  ;;  %v7794_v31 = vsel %vm1746_vm5, %v7791_v27, %v7793_v60  ;;  %v5235_v39 = vadd.f32 %v5056_v3, %v4738_v34 }
 0x590   : > { %v7379_v41 = vrot.slane %v6462_v62, 1  ;;  %v8425_v59 = vadd.f32 %v8424_v1, %v8343_v10  ;;  %v4739_v26 = vadd.f32 %v4561_v23, %v14164_v14  ;;  %v8262_v14 = vld [vmem:[%s13948_s7 + $0x110] sm:$0xff] }
 0x591   : > { %v8178_v44 = vmax.f32 %v8095_v28, 0.0  ;;  %v6466_v15 = vpop.f32.mrf.mxu0  ;;  %v6993_v24 = vpop.f32.mrf.mxu1  ;;  %8781 = vmatmul.mubr.msk.f32.gmra.mxu0 %vm5934_vm7, %v5907_v17  ;;  %9608 = vmatmul.mubr.msk.f32.gmra.mxu1 %vm5934_vm7, %v5907_v17  ;;  %v8263_v28 = vld [vmem:[%s13948_s7 + $0x118] sm:$0xff] }
 0x592   : > { %v7380_v43 = vsel %vm1242_vm3, %v7377_v57, %v7379_v41  ;;  %v7795_v54 = vrot.slane %v6993_v24, 2  ;;  %v5556_v18 = vpop.permute.xlu0 %5555  ;;  %v5058_v32 = vpop.permute.xlu1 %5057  ;;  %6662 = vmatprep.mubr.f32.mxu0 %v14150_v48  ;;  %9610 = vmatprep.mubr.msk.f32.mxu1 %vm9694_vm8, %v14150_v48 }
 0x593   : > { %v8344_v40 = vmul.f32 %v8261_v42, %v8178_v44  ;;  %v7592_v38 = vadd.f32 %v7380_v43, %v13431_v22  ;;  %v5735_v33 = vadd.f32 %v5556_v18, %v5235_v39  ;;  %v6468_v27 = vpop.f32.mrf.mxu0  ;;  %v9513_v16 = vpop.f32.mrf.mxu1  ;;  %v5236_v8 = vadd.f32 %v5058_v32, %v4739_v26 }
 0x594   : > { %v7796_v45 = vsel %vm1746_vm5, %v7793_v60, %v7795_v54  ;;  %v7381_v58 = vrot.slane %v6468_v27, 1 }
 0x595   : > { %v8426_v57 = vadd.f32 %v8425_v59, %v8344_v40  ;;  %v8006_v1 = vadd.f32 %v7794_v31, %v7592_v38  ;;  %v5825_v37 = vadd.f32 %v13199_v13, %v5735_v33 }
 0x596   : > { %v7382_v22 = vsel %vm1242_vm3, %v7379_v41, %v7381_v58  ;;  %v4563_v35 = vpop.permute.xlu0 %4562  ;;  %v5558_v29 = vpop.permute.xlu1 %5557 }
 0x597   : > { %v8096_v19 = vadd.f32 %v13413_v52, %v8006_v1  ;;  %v5908_v49 = vmax.f32 %v5825_v37, 0.0  ;;  %v7593_v46 = vadd.f32 %v7382_v22, %v6460_v36  ;;  %v5736_v50 = vadd.f32 %v5558_v29, %v5236_v8 }
 0x598   : > { %v6472_v21 = vpop.f32.mrf.mxu0  ;;  %v6998_v47 = vpop.f32.mrf.mxu1  ;;  %v4740_v34 = vadd.f32 %v14165_v7, %v4563_v35 }
 0x599   : > { %v8179_v30 = vmax.f32 %v8096_v19, 0.0  ;;  %v8007_v61 = vadd.f32 %v7796_v45, %v7593_v46  ;;  %8782 = vmatmul.mubr.msk.f32.gmra.mxu0 %vm5934_vm7, %v5908_v49  ;;  %9611 = vmatmul.mubr.msk.f32.gmra.mxu1 %vm5934_vm7, %v5908_v49  ;;  %v5826_v11 = vadd.f32 %v13199_v13, %v5736_v50  ;;  %v7797_v63 = vrot.slane %v6998_v47, 2 }
 0x59a   : > { %v5060_v0 = vpop.permute.xlu0 %5059  ;;  %v4565_v60 = vpop.permute.xlu1 %4564  ;;  %6668 = vmatprep.mubr.f32.mxu0 %v14150_v48  ;;  %9613 = vmatprep.mubr.msk.f32.mxu1 %vm9694_vm8, %v14150_v48 }
 0x59b   : > { %v8345_v36 = vmul.f32 %v8262_v14, %v8179_v30  ;;  %v8097_v3 = vadd.f32 %v13413_v52, %v8007_v61  ;;  %v6474_v23 = vpop.f32.mrf.mxu0  ;;  %v9516_v10 = vpop.f32.mrf.mxu1  ;;  %v5909_v62 = vmax.f32 %v5826_v11, 0.0  ;;  %v7798_v25 = vsel %vm1746_vm5, %v7795_v54, %v7797_v63 }
 0x59c   : > { %v7383_v42 = vrot.slane %v6474_v23, 1  ;;  %v5237_v41 = vadd.f32 %v5060_v0, %v4740_v34  ;;  %v4741_v54 = vadd.f32 %v4565_v60, %v12447_v6  ;;  %v8264_v6 = vld [vmem:[%s13948_s7 + $0x120] sm:$0xff]  ;;  %v8265_v23 = vld [vmem:[%s13948_s7 + $0x128] sm:$0xff] }
 0x59d   : > { %v8427_v17 = vadd.f32 %v8426_v57, %v8345_v36  ;;  %v8180_v31 = vmax.f32 %v8097_v3, 0.0  ;;  %v13488_v44 = vpop.f32.mrf.mxu0  ;;  %8783 = vmatmul.mubr.msk.f32.gmra.mxu0 %vm5934_vm7, %v5909_v62  ;;  %v7003_v39 = vpop.f32.mrf.mxu1  ;;  %9614 = vmatmul.mubr.msk.f32.gmra.mxu1 %vm5934_vm7, %v5909_v62 }
 0x59e   : > { %v7384_v59 = vsel %vm1242_vm3, %v7381_v58, %v7383_v42  ;;  %v7799_v18 = vrot.slane %v7003_v39, 2  ;;  %v5560_v7 = vpop.permute.xlu0 %5559  ;;  %v5062_v32 = vpop.permute.xlu1 %5061  ;;  %6674 = vmatprep.mubr.f32.mxu0 %v14150_v48  ;;  %9616 = vmatprep.mubr.msk.f32.mxu1 %vm9694_vm8, %v14150_v48 }
 0x59f   : > { %v8346_v24 = vmul.f32 %v8263_v28, %v8180_v31  ;;  %v7594_v43 = vadd.f32 %v7384_v59, %v6466_v15  ;;  %v5737_v40 = vadd.f32 %v5560_v7, %v5237_v41  ;;  %v6480_v38 = vpop.f32.mrf.mxu0  ;;  %v9519_v33 = vpop.f32.mrf.mxu1  ;;  %v5238_v58 = vadd.f32 %v5062_v32, %v4741_v54 }
 0x5a0   : > { %v7800_v26 = vsel %vm1746_vm5, %v7797_v63, %v7799_v18  ;;  %v7385_v45 = vrot.slane %v6480_v38, 1  ;;  %v13529_v38 = vld [vmem:[%s13945_s4] ss:$0 sm:$0xff] }
 0x5a1   : > { %v8428_v27 = vadd.f32 %v8427_v17, %v8346_v24  ;;  %v8008_v16 = vadd.f32 %v7798_v25, %v7594_v43  ;;  %v5827_v15 = vadd.f32 %v13199_v13, %v5737_v40 }
 0x5a2   : > { %v7386_v1 = vsel %vm1242_vm3, %v7383_v42, %v7385_v45  ;;  %v4567_v37 = vpop.permute.xlu0 %4566  ;;  %v5562_v8 = vpop.permute.xlu1 %5561 }
 0x5a3   : > { %v8098_v57 = vadd.f32 %v13413_v52, %v8008_v16  ;;  %v5910_v22 = vmax.f32 %v5827_v15, 0.0  ;;  %v7595_v35 = vadd.f32 %v7386_v1, %v6472_v21  ;;  %v5738_v29 = vadd.f32 %v5562_v8, %v5238_v58  ;;  %v8266_v58 = vld [vmem:[%s13948_s7 + $0x130] sm:$0xff] }
 0x5a4   : > { %v6484_v49 = vpop.f32.mrf.mxu0  ;;  %v7008_v46 = vpop.f32.mrf.mxu1  ;;  %v4742_v63 = vadd.f32 %v14166_v4, %v4567_v37 }
 0x5a5   : > { %v8181_v19 = vmax.f32 %v8098_v57, 0.0  ;;  %v8009_v14 = vadd.f32 %v7800_v26, %v7595_v35  ;;  %v5828_v50 = vadd.f32 %v13199_v13, %v5738_v29  ;;  %8784 = vmatmul.mubr.msk.f32.gmra.mxu0 %vm5934_vm7, %v5910_v22  ;;  %v7801_v30 = vrot.slane %v7008_v46, 2  ;;  %9617 = vmatmul.mubr.msk.f32.gmra.mxu1 %vm5934_vm7, %v5910_v22 }
 0x5a6   : > { %v5064_v47 = vpop.permute.xlu0 %5063  ;;  %v4569_v11 = vpop.permute.xlu1 %4568  ;;  %6680 = vmatprep.mubr.f32.mxu0 %v14150_v48  ;;  %9619 = vmatprep.mubr.msk.f32.mxu1 %vm9694_vm8, %v14150_v48 }
 0x5a7   : > { %v8347_v61 = vmul.f32 %v8264_v6, %v8181_v19  ;;  %v8099_v21 = vadd.f32 %v13413_v52, %v8009_v14  ;;  %v5911_v0 = vmax.f32 %v5828_v50, 0.0  ;;  %v7802_v13 = vsel %vm1746_vm5, %v7799_v18, %v7801_v30  ;;  %v6486_v60 = vpop.f32.mrf.mxu0  ;;  %v9522_v36 = vpop.f32.mrf.mxu1 }
 0x5a8   : > { %v7387_v10 = vrot.slane %v6486_v60, 1  ;;  %v5239_v34 = vadd.f32 %v5064_v47, %v4742_v63  ;;  %v4743_v18 = vadd.f32 %v4569_v11, %v14167_v9  ;;  %v8267_v47 = vld [vmem:[%s13948_s7 + $0x138] sm:$0xff] }
 0x5a9   : > { %v8429_v3 = vadd.f32 %v8428_v27, %v8347_v61  ;;  %v8182_v28 = vmax.f32 %v8099_v21, 0.0  ;;  %v13515_v62 = vpop.f32.mrf.mxu0  ;;  %8785 = vmatmul.mubr.msk.f32.gmra.mxu0 %vm5934_vm7, %v5911_v0  ;;  %v7013_v25 = vpop.f32.mrf.mxu1  ;;  %9620 = vmatmul.mubr.msk.f32.gmra.mxu1 %vm5934_vm7, %v5911_v0 }
 0x5aa   : > { %v7388_v4 = vsel %vm1242_vm3, %v7385_v45, %v7387_v10  ;;  %v7803_v42 = vrot.slane %v7013_v25, 2  ;;  %v5564_v17 = vpop.permute.xlu0 %5563  ;;  %v5066_v31 = vpop.permute.xlu1 %5065  ;;  %6686 = vmatprep.mubr.f32.mxu0 %v14150_v48  ;;  %9622 = vmatprep.mubr.msk.f32.mxu1 %vm9694_vm8, %v14150_v48 }
 0x5ab   : > { %v8348_v41 = vmul.f32 %v8265_v23, %v8182_v28  ;;  %v7596_v59 = vadd.f32 %v7388_v4, %v13488_v44  ;;  %v5739_v39 = vadd.f32 %v5564_v17, %v5239_v34  ;;  %v6492_v24 = vpop.f32.mrf.mxu0  ;;  %v9525_v43 = vpop.f32.mrf.mxu1  ;;  %v5240_v27 = vadd.f32 %v5066_v31, %v4743_v18 }
 0x5ac   : > { %v7804_v7 = vsel %vm1746_vm5, %v7801_v30, %v7803_v42  ;;  %v7389_v32 = vrot.slane %v6492_v24, 1 }
 0x5ad   : > { %v8430_v54 = vadd.f32 %v8429_v3, %v8348_v41  ;;  %v8010_v40 = vadd.f32 %v7802_v13, %v7596_v59  ;;  %v5829_v33 = vadd.f32 %v13529_v38, %v5739_v39 }
 0x5ae   : > { %v7390_v44 = vsel %vm1242_vm3, %v7387_v10, %v7389_v32  ;;  %v4571_v16 = vpop.permute.xlu0 %4570  ;;  %v5566_v26 = vpop.permute.xlu1 %5565 }
 0x5af   : > { %v8100_v45 = vadd.f32 %v13413_v52, %v8010_v40  ;;  %v5912_v9 = vmax.f32 %v5829_v33, 0.0  ;;  %v7597_v15 = vadd.f32 %v7390_v44, %v6484_v49  ;;  %v5740_v57 = vadd.f32 %v5566_v26, %v5240_v27 }
 0x5b0   : > { %v6496_v1 = vpop.f32.mrf.mxu0  ;;  %v7018_v37 = vpop.f32.mrf.mxu1  ;;  %v4744_v14 = vadd.f32 %v14169_v20, %v4571_v16 }
 0x5b1   : > { %v8183_v8 = vmax.f32 %v8100_v45, 0.0  ;;  %v8011_v6 = vadd.f32 %v7804_v7, %v7597_v15  ;;  %8786 = vmatmul.mubr.msk.f32.gmra.mxu0 %vm5934_vm7, %v5912_v9  ;;  %v7805_v22 = vrot.slane %v7018_v37, 2  ;;  %9623 = vmatmul.mubr.msk.f32.gmra.mxu1 %vm5934_vm7, %v5912_v9  ;;  %v5830_v35 = vadd.f32 %v13529_v38, %v5740_v57 }
 0x5b2   : > { %v5068_v29 = vpop.permute.xlu0 %5067  ;;  %v4573_v19 = vpop.permute.xlu1 %4572  ;;  %6692 = vmatprep.mubr.f32.mxu0 %v14150_v48  ;;  %9625 = vmatprep.mubr.msk.f32.mxu1 %vm9694_vm8, %v14150_v48 }
 0x5b3   : > { %v8349_v49 = vmul.f32 %v8266_v58, %v8183_v8  ;;  %v8101_v46 = vadd.f32 %v13413_v52, %v8011_v6  ;;  %v7806_v50 = vsel %vm1746_vm5, %v7803_v42, %v7805_v22  ;;  %v6498_v30 = vpop.f32.mrf.mxu0  ;;  %v9528_v61 = vpop.f32.mrf.mxu1  ;;  %v5913_v11 = vmax.f32 %v5830_v35, 0.0  ;;  %v8269_v35 = vld [vmem:[%s13948_s7 + $0x148] sm:$0xff] }
 0x5b4   : > { %v7391_v21 = vrot.slane %v6498_v30, 1  ;;  %v5241_v13 = vadd.f32 %v5068_v29, %v4744_v14  ;;  %v4745_v17 = vadd.f32 %v4573_v19, %v14171_v5  ;;  %v8268_v5 = vld [vmem:[%s13948_s7 + $0x140] sm:$0xff] }
 0x5b5   : > { %v8431_v63 = vadd.f32 %v8430_v54, %v8349_v49  ;;  %v8184_v0 = vmax.f32 %v8101_v46, 0.0  ;;  %v13549_v60 = vpop.f32.mrf.mxu0  ;;  %v7023_v36 = vpop.f32.mrf.mxu1  ;;  %8787 = vmatmul.mubr.msk.f32.gmra.mxu0 %vm5934_vm7, %v5913_v11  ;;  %9626 = vmatmul.mubr.msk.f32.gmra.mxu1 %vm5934_vm7, %v5913_v11 }
 0x5b6   : > { %v7392_v3 = vsel %vm1242_vm3, %v7389_v32, %v7391_v21  ;;  %v7807_v20 = vrot.slane %v7023_v36, 2  ;;  %v5568_v23 = vpop.permute.xlu0 %5567  ;;  %v5070_v10 = vpop.permute.xlu1 %5069  ;;  %6698 = vmatprep.mubr.f32.mxu0 %v14150_v48  ;;  %9628 = vmatprep.mubr.msk.f32.mxu1 %vm9694_vm8, %v14150_v48 }
 0x5b7   : > { %v8350_v28 = vmul.f32 %v8267_v47, %v8184_v0  ;;  %v7598_v34 = vadd.f32 %v7392_v3, %v13515_v62  ;;  %v5741_v25 = vadd.f32 %v5568_v23, %v5241_v13  ;;  %v6504_v4 = vpop.f32.mrf.mxu0  ;;  %v9531_v42 = vpop.f32.mrf.mxu1  ;;  %v5242_v43 = vadd.f32 %v5070_v10, %v4745_v17 }
 0x5b8   : > { %v7808_v31 = vsel %vm1746_vm5, %v7805_v22, %v7807_v20  ;;  %v7393_v41 = vrot.slane %v6504_v4, 1 }
 0x5b9   : > { %v8432_v59 = vadd.f32 %v8431_v63, %v8350_v28  ;;  %v8012_v39 = vadd.f32 %v7806_v50, %v7598_v34  ;;  %v5831_v24 = vadd.f32 %v13529_v38, %v5741_v25 }
 0x5ba   : > { %v7394_v62 = vsel %vm1242_vm3, %v7391_v21, %v7393_v41  ;;  %v4575_v18 = vpop.permute.xlu0 %4574  ;;  %v5570_v7 = vpop.permute.xlu1 %5569 }
 0x5bb   : > { %v8102_v32 = vadd.f32 %v13413_v52, %v8012_v39  ;;  %v5914_v54 = vmax.f32 %v5831_v24, 0.0  ;;  %v7599_v40 = vadd.f32 %v7394_v62, %v6496_v1  ;;  %v5742_v33 = vadd.f32 %v5570_v7, %v5242_v43 }
 0x5bc   : > { %v6508_v27 = vpop.f32.mrf.mxu0  ;;  %v7028_v44 = vpop.f32.mrf.mxu1  ;;  %v4746_v37 = vadd.f32 %v14173_v12, %v4575_v18 }
 0x5bd   : > { %v8185_v16 = vmax.f32 %v8102_v32, 0.0  ;;  %v8013_v26 = vadd.f32 %v7808_v31, %v7599_v40  ;;  %8788 = vmatmul.mubr.msk.f32.gmra.mxu0 %vm5934_vm7, %v5914_v54  ;;  %v7809_v45 = vrot.slane %v7028_v44, 2  ;;  %9629 = vmatmul.mubr.msk.f32.gmra.mxu1 %vm5934_vm7, %v5914_v54  ;;  %v5832_v9 = vadd.f32 %v13529_v38, %v5742_v33 }
 0x5be   : > { %v5072_v15 = vpop.permute.xlu0 %5071  ;;  %v4577_v58 = vpop.permute.xlu1 %4576  ;;  %6704 = vmatprep.mubr.f32.mxu0 %v14150_v48  ;;  %9631 = vmatprep.mubr.msk.f32.mxu1 %vm9694_vm8, %v14150_v48 }
 0x5bf   : > { %v8351_v57 = vmul.f32 %v8268_v5, %v8185_v16  ;;  %v8103_v1 = vadd.f32 %v13413_v52, %v8013_v26  ;;  %v7810_v8 = vsel %vm1746_vm5, %v7807_v20, %v7809_v45  ;;  %v6510_v6 = vpop.f32.mrf.mxu0  ;;  %v9534_v22 = vpop.f32.mrf.mxu1  ;;  %v5915_v29 = vmax.f32 %v5832_v9, 0.0  ;;  %v8271_v26 = vld [vmem:[%s13948_s7 + $0x158] sm:$0xff] }
 0x5c0   : > { %v7395_v19 = vrot.slane %v6510_v6, 1  ;;  %v5243_v14 = vadd.f32 %v5072_v15, %v4746_v37  ;;  %v4747_v3 = vadd.f32 %v4577_v58, %v14175_v56  ;;  %v8270_v56 = vld [vmem:[%s13948_s7 + $0x150] sm:$0xff] }
 0x5c1   : > { %v8433_v49 = vadd.f32 %v8432_v59, %v8351_v57  ;;  %v8186_v46 = vmax.f32 %v8103_v1, 0.0  ;;  %v13578_v50 = vpop.f32.mrf.mxu0  ;;  %v7033_v30 = vpop.f32.mrf.mxu1  ;;  %8789 = vmatmul.mubr.msk.f32.gmra.mxu0 %vm5934_vm7, %v5915_v29  ;;  %9632 = vmatmul.mubr.msk.f32.gmra.mxu1 %vm5934_vm7, %v5915_v29 }
 0x5c2   : > { %v7396_v61 = vsel %vm1242_vm3, %v7393_v41, %v7395_v19  ;;  %v7811_v12 = vrot.slane %v7033_v30, 2  ;;  %v5572_v47 = vpop.permute.xlu0 %5571  ;;  %v5074_v11 = vpop.permute.xlu1 %5073  ;;  %6710 = vmatprep.mubr.f32.mxu0 %v14150_v48  ;;  %9634 = vmatprep.mubr.msk.f32.mxu1 %vm9694_vm8, %v14150_v48 }
 0x5c3   : > { %v8352_v21 = vmul.f32 %v8269_v35, %v8186_v46  ;;  %v7600_v63 = vadd.f32 %v7396_v61, %v13549_v60  ;;  %v5743_v0 = vadd.f32 %v5572_v47, %v5243_v14  ;;  %v6516_v13 = vpop.f32.mrf.mxu0  ;;  %v9537_v36 = vpop.f32.mrf.mxu1  ;;  %v5244_v25 = vadd.f32 %v5074_v11, %v4747_v3 }
 0x5c4   : > { %v7812_v20 = vsel %vm1746_vm5, %v7809_v45, %v7811_v12  ;;  %v7397_v23 = vrot.slane %v6516_v13, 1 }
 0x5c5   : > { %v8434_v10 = vadd.f32 %v8433_v49, %v8352_v21  ;;  %v8014_v28 = vadd.f32 %v7810_v8, %v7600_v63  ;;  %v5833_v34 = vadd.f32 %v13529_v38, %v5743_v0 }
 0x5c6   : > { %v7398_v60 = vsel %vm1242_vm3, %v7395_v19, %v7397_v23  ;;  %v4579_v4 = vpop.permute.xlu0 %4578  ;;  %v5574_v42 = vpop.permute.xlu1 %5573 }
 0x5c7   : > { %v8104_v17 = vadd.f32 %v13413_v52, %v8014_v28  ;;  %v5916_v31 = vmax.f32 %v5833_v34, 0.0  ;;  %v7601_v41 = vadd.f32 %v7398_v60, %v6508_v27  ;;  %v5744_v59 = vadd.f32 %v5574_v42, %v5244_v25 }
 0x5c8   : > { %v6520_v39 = vpop.f32.mrf.mxu0  ;;  %v7038_v24 = vpop.f32.mrf.mxu1  ;;  %v4748_v33 = vadd.f32 %v14176_v55, %v4579_v4 }
 0x5c9   : > { %v8187_v43 = vmax.f32 %v8104_v17, 0.0  ;;  %v8015_v62 = vadd.f32 %v7812_v20, %v7601_v41  ;;  %8790 = vmatmul.mubr.msk.f32.gmra.mxu0 %vm5934_vm7, %v5916_v31  ;;  %v7813_v18 = vrot.slane %v7038_v24, 2  ;;  %9635 = vmatmul.mubr.msk.f32.gmra.mxu1 %vm5934_vm7, %v5916_v31  ;;  %v5834_v7 = vadd.f32 %v13529_v38, %v5744_v59  ;;  %v8273_v24 = vld [vmem:[%s13948_s7 + $0x168] sm:$0xff] }
 0x5ca   : > { %v5076_v32 = vpop.permute.xlu0 %5075  ;;  %v4581_v54 = vpop.permute.xlu1 %4580  ;;  %6716 = vmatprep.mubr.f32.mxu0 %v14150_v48  ;;  %9637 = vmatprep.mubr.msk.f32.mxu1 %vm9694_vm8, %v14150_v48 }
 0x5cb   : > { %v8353_v40 = vmul.f32 %v8270_v56, %v8187_v43  ;;  %v8105_v5 = vadd.f32 %v13413_v52, %v8015_v62  ;;  %v7814_v27 = vsel %vm1746_vm5, %v7811_v12, %v7813_v18  ;;  %v6522_v44 = vpop.f32.mrf.mxu0  ;;  %v9540_v16 = vpop.f32.mrf.mxu1  ;;  %v5917_v45 = vmax.f32 %v5834_v7, 0.0 }
 0x5cc   : > { %v7399_v9 = vrot.slane %v6522_v44, 1  ;;  %v5245_v57 = vadd.f32 %v5076_v32, %v4748_v33  ;;  %v4749_v14 = vadd.f32 %v4581_v54, %v14178_v2  ;;  %v8272_v2 = vld [vmem:[%s13948_s7 + $0x160] sm:$0xff] }
 0x5cd   : > { %v8435_v15 = vadd.f32 %v8434_v10, %v8353_v40  ;;  %v8188_v58 = vmax.f32 %v8105_v5, 0.0  ;;  %v13607_v1 = vpop.f32.mrf.mxu0  ;;  %v7043_v37 = vpop.f32.mrf.mxu1  ;;  %8791 = vmatmul.mubr.msk.f32.gmra.mxu0 %vm5934_vm7, %v5917_v45  ;;  %9638 = vmatmul.mubr.msk.f32.gmra.mxu1 %vm5934_vm7, %v5917_v45 }
 0x5ce   : > { %v7400_v8 = vsel %vm1242_vm3, %v7397_v23, %v7399_v9  ;;  %v7815_v55 = vrot.slane %v7043_v37, 2  ;;  %v5576_v6 = vpop.permute.xlu0 %5575  ;;  %v5078_v22 = vpop.permute.xlu1 %5077  ;;  %6722 = vmatprep.mubr.f32.mxu0 %v14150_v48  ;;  %9640 = vmatprep.mubr.msk.f32.mxu1 %vm9694_vm8, %v14150_v48 }
 0x5cf   : > { %v8354_v35 = vmul.f32 %v8271_v26, %v8188_v58  ;;  %v7602_v29 = vadd.f32 %v7400_v8, %v13578_v50  ;;  %v5745_v19 = vadd.f32 %v5576_v6, %v5245_v57  ;;  %v6528_v49 = vpop.f32.mrf.mxu0  ;;  %v9543_v46 = vpop.f32.mrf.mxu1  ;;  %v5246_v21 = vadd.f32 %v5078_v22, %v4749_v14 }
 0x5d0   : > { %v7816_v30 = vsel %vm1746_vm5, %v7813_v18, %v7815_v55  ;;  %v7401_v61 = vrot.slane %v6528_v49, 1  ;;  %v8274_v49 = vld [vmem:[%s13948_s7 + $0x170] sm:$0xff] }
 0x5d1   : > { %v8436_v12 = vadd.f32 %v8435_v15, %v8354_v35  ;;  %v8016_v47 = vadd.f32 %v7814_v27, %v7602_v29  ;;  %v5835_v11 = vadd.f32 %v13529_v38, %v5745_v19 }
 0x5d2   : > { %v7402_v50 = vsel %vm1242_vm3, %v7399_v9, %v7401_v61  ;;  %v4583_v63 = vpop.permute.xlu0 %4582  ;;  %v5578_v0 = vpop.permute.xlu1 %5577 }
 0x5d3   : > { %v8106_v13 = vadd.f32 %v13413_v52, %v8016_v47  ;;  %v5918_v36 = vmax.f32 %v5835_v11, 0.0  ;;  %v7603_v3 = vadd.f32 %v7402_v50, %v6520_v39  ;;  %v5746_v20 = vadd.f32 %v5578_v0, %v5246_v21 }
 0x5d4   : > { %v6532_v23 = vpop.f32.mrf.mxu0  ;;  %v7048_v10 = vpop.f32.mrf.mxu1  ;;  %v4750_v41 = vadd.f32 %v14179_v51, %v4583_v63 }
 0x5d5   : > { %v8189_v28 = vmax.f32 %v8106_v13, 0.0  ;;  %v8017_v34 = vadd.f32 %v7816_v30, %v7603_v3  ;;  %8792 = vmatmul.mubr.msk.f32.gmra.mxu0 %vm5934_vm7, %v5918_v36  ;;  %v7817_v25 = vrot.slane %v7048_v10, 2  ;;  %9641 = vmatmul.mubr.msk.f32.gmra.mxu1 %vm5934_vm7, %v5918_v36  ;;  %v5836_v60 = vadd.f32 %v13529_v38, %v5746_v20 }
 0x5d6   : > { %v5080_v4 = vpop.permute.xlu0 %5079  ;;  %v4585_v42 = vpop.permute.xlu1 %4584  ;;  %6728 = vmatprep.mubr.f32.mxu0 %v14150_v48  ;;  %9643 = vmatprep.mubr.msk.f32.mxu1 %vm9694_vm8, %v14150_v48 }
 0x5d7   : > { %v8355_v17 = vmul.f32 %v8272_v2, %v8189_v28  ;;  %v8107_v31 = vadd.f32 %v13413_v52, %v8017_v34  ;;  %v7818_v56 = vsel %vm1746_vm5, %v7815_v55, %v7817_v25  ;;  %v6534_v59 = vpop.f32.mrf.mxu0  ;;  %v9546_v39 = vpop.f32.mrf.mxu1  ;;  %v5919_v43 = vmax.f32 %v5836_v60, 0.0 }
 0x5d8   : > { %v7403_v62 = vrot.slane %v6534_v59, 1  ;;  %v5247_v32 = vadd.f32 %v5080_v4, %v4750_v41  ;;  %v4751_v16 = vadd.f32 %v4585_v42, %v14180_v53  ;;  %v8276_v39 = vld [vmem:[%s13948_s7 + $0x180] sm:$0xff] }
 0x5d9   : > { %v8437_v18 = vadd.f32 %v8436_v12, %v8355_v17  ;;  %v8190_v7 = vmax.f32 %v8107_v31, 0.0  ;;  %v6538_v54 = vpop.f32.mrf.mxu0  ;;  %v7053_v40 = vpop.f32.mrf.mxu1  ;;  %8793 = vmatmul.mubr.msk.f32.gmra.mxu0 %vm5934_vm7, %v5919_v43  ;;  %9644 = vmatmul.mubr.msk.f32.gmra.mxu1 %vm5934_vm7, %v5919_v43 }
 0x5da   : > { %v7404_v5 = vsel %vm1242_vm3, %v7401_v61, %v7403_v62  ;;  %v7819_v51 = vrot.slane %v7053_v40, 2  ;;  %v5580_v33 = vpop.permute.xlu0 %5579  ;;  %v5082_v27 = vpop.permute.xlu1 %5081  ;;  %6734 = vmatprep.mubr.f32.mxu0 %v14150_v48  ;;  %9646 = vmatprep.mubr.msk.f32.mxu1 %vm9694_vm8, %v14150_v48 }
 0x5db   : > { %v8356_v44 = vmul.f32 %v8273_v24, %v8190_v7  ;;  %v7604_v26 = vadd.f32 %v7404_v5, %v13607_v1  ;;  %v5747_v45 = vadd.f32 %v5580_v33, %v5247_v32  ;;  %v6540_v9 = vpop.f32.mrf.mxu0  ;;  %v9549_v15 = vpop.f32.mrf.mxu1  ;;  %v5248_v6 = vadd.f32 %v5082_v27, %v4751_v16  ;;  %v8277_v27 = vld [vmem:[%s13948_s7 + $0x188] sm:$0xff] }
 0x5dc   : > { %v7820_v58 = vsel %vm1746_vm5, %v7817_v25, %v7819_v51  ;;  %v7405_v57 = vrot.slane %v6540_v9, 1 }
 0x5dd   : > { %v8438_v37 = vadd.f32 %v8437_v18, %v8356_v44  ;;  %v8018_v8 = vadd.f32 %v7818_v56, %v7604_v26  ;;  %v5837_v55 = vadd.f32 %v13529_v38, %v5747_v45 }
 0x5de   : > { %v7406_v53 = vsel %vm1242_vm3, %v7403_v62, %v7405_v57  ;;  %v5582_v22 = vpop.permute.xlu0 %5581 }
 0x5df   : > { %v8108_v1 = vadd.f32 %v13413_v52, %v8018_v8  ;;  %v5920_v35 = vmax.f32 %v5837_v55, 0.0  ;;  %v7605_v29 = vadd.f32 %v7406_v53, %v6532_v23  ;;  %v5748_v19 = vadd.f32 %v5582_v22, %v5248_v6 }
 0x5e0   : > { %v6544_v46 = vpop.f32.mrf.mxu0  ;;  %v7058_v14 = vpop.f32.mrf.mxu1 }
 0x5e1   : > { %v8191_v30 = vmax.f32 %v8108_v1, 0.0  ;;  %v8019_v61 = vadd.f32 %v7820_v58, %v7605_v29  ;;  %v5838_v12 = vadd.f32 %v13529_v38, %v5748_v19  ;;  %8794 = vmatmul.mubr.msk.f32.gmra.mxu0 %vm5934_vm7, %v5920_v35  ;;  %v7821_v47 = vrot.slane %v7058_v14, 2  ;;  %9647 = vmatmul.mubr.msk.f32.gmra.mxu1 %vm5934_vm7, %v5920_v35  ;;  %v8275_v38 = vld [vmem:[%s13948_s7 + $0x178] sm:$0xff]  ;;  %v8278_v29 = vld [vmem:[%s13948_s7 + $0x190] sm:$0xff] }
 0x5e2   : > { %v6546_v11 = vpop.f32.mrf.mxu0  ;;  %v9552_v21 = vpop.f32.mrf.mxu1  ;;  %6740 = vmatprep.mubr.f32.mxu0 %v14150_v48  ;;  %9649 = vmatprep.mubr.msk.f32.mxu1 %vm9694_vm8, %v14150_v48 }
 0x5e3   : > { %v8357_v50 = vmul.f32 %v8274_v49, %v8191_v30  ;;  %v8109_v63 = vadd.f32 %v13413_v52, %v8019_v61  ;;  %v5921_v0 = vmax.f32 %v5838_v12, 0.0  ;;  %v7822_v13 = vsel %vm1746_vm5, %v7819_v51, %v7821_v47  ;;  %v13686_v21 = vld [vmem:[%s13947_s6] ss:$0 sm:$0xff] }
 0x5e4   : > { %v7407_v36 = vrot.slane %v6546_v11, 1 }
 0x5e5   : > { %v8439_v3 = vadd.f32 %v8438_v37, %v8357_v50  ;;  %v8192_v2 = vmax.f32 %v8109_v63, 0.0  ;;  %v6550_v20 = vpop.f32.mrf.mxu0  ;;  %8795 = vmatmul.mubr.msk.f32.gmra.mxu0 %vm5934_vm7, %v5921_v0  ;;  %v7063_v23 = vpop.f32.mrf.mxu1  ;;  %9650 = vmatmul.mubr.msk.f32.gmra.mxu1 %vm5934_vm7, %v5921_v0 }
 0x5e6   : > { %v7408_v48 = vsel %vm1242_vm3, %v7405_v57, %v7407_v36  ;;  %v7823_v10 = vrot.slane %v7063_v23, 2 }
 0x5e7   : > { %v8358_v28 = vmul.f32 %v8275_v38, %v8192_v2  ;;  %v7606_v34 = vadd.f32 %v7408_v48, %v6538_v54  ;;  %v6552_v25 = vpop.f32.mrf.mxu0  ;;  %v9555_v60 = vpop.f32.mrf.mxu1 }
 0x5e8   : > { %v7824_v4 = vsel %vm1746_vm5, %v7821_v47, %v7823_v10  ;;  %v7409_v42 = vrot.slane %v6552_v25, 1 }
 0x5e9   : > { %v8440_v17 = vadd.f32 %v8439_v3, %v8358_v28  ;;  %v8020_v31 = vadd.f32 %v7822_v13, %v7606_v34  ;;  %v8279_v13 = vld [vmem:[%s13948_s7 + $0x198] sm:$0xff] }
 0x5ea   : > { %v7410_v41 = vsel %vm1242_vm3, %v7407_v36, %v7409_v42 }
 0x5eb   : > { %v8110_v56 = vadd.f32 %v13413_v52, %v8020_v31  ;;  %v7607_v59 = vadd.f32 %v7410_v41, %v6544_v46  ;;  %v8280_v31 = vld [vmem:[%s13948_s7 + $0x1a0] sm:$0xff] }
 0x5ec   : > { %v6556_v24 = vpop.f32.mrf.mxu0  ;;  %v7068_v43 = vpop.f32.mrf.mxu1 }
 0x5ed   : > { %v8193_v62 = vmax.f32 %v8110_v56, 0.0  ;;  %v8021_v18 = vadd.f32 %v7824_v4, %v7607_v59  ;;  %v7825_v7 = vrot.slane %v7068_v43, 2 }
 0x5ee   : > { %v6558_v32 = vpop.f32.mrf.mxu0  ;;  %v9558_v54 = vpop.f32.mrf.mxu1 }
 0x5ef   : > { %v8359_v40 = vmul.f32 %v8276_v39, %v8193_v62  ;;  %v8111_v5 = vadd.f32 %v13413_v52, %v8021_v18  ;;  %v7826_v51 = vsel %vm1746_vm5, %v7823_v10, %v7825_v7  ;;  %v7411_v33 = vrot.slane %v6558_v32, 1 }
 0x5f1   : > { %v8441_v44 = vadd.f32 %v8440_v17, %v8359_v40  ;;  %v8194_v16 = vmax.f32 %v8111_v5, 0.0  ;;  %v7412_v26 = vsel %vm1242_vm3, %v7409_v42, %v7411_v33  ;;  %v6562_v45 = vpop.f32.mrf.mxu0  ;;  %v7073_v9 = vpop.f32.mrf.mxu1 }
 0x5f2   : > { %v7608_v15 = vadd.f32 %v7412_v26, %v6550_v20  ;;  %v7827_v58 = vrot.slane %v7073_v9, 2 }
 0x5f3   : > { %v8360_v57 = vmul.f32 %v8277_v27, %v8194_v16  ;;  %v6564_v37 = vpop.f32.mrf.mxu0  ;;  %v9561_v8 = vpop.f32.mrf.mxu1 }
 0x5f4   : > { %v8022_v55 = vadd.f32 %v7826_v51, %v7608_v15  ;;  %v7828_v6 = vsel %vm1746_vm5, %v7825_v7, %v7827_v58  ;;  %v7413_v53 = vrot.slane %v6564_v37, 1  ;;  %v8281_v51 = vld [vmem:[%s13948_s7 + $0x1a8] sm:$0xff] }
 0x5f5   : > { %v8442_v22 = vadd.f32 %v8441_v44, %v8360_v57 }
 0x5f6   : > { %v8112_v1 = vadd.f32 %v13413_v52, %v8022_v55  ;;  %v7414_v35 = vsel %vm1242_vm3, %v7411_v33, %v7413_v53 }
 0x5f7   : > { %v7609_v19 = vadd.f32 %v7414_v35, %v6556_v24 }
 0x5f8   : > { %v8195_v49 = vmax.f32 %v8112_v1, 0.0  ;;  %v6568_v46 = vpop.f32.mrf.mxu0  ;;  %v7078_v14 = vpop.f32.mrf.mxu1 }
 0x5f9   : > { %v8023_v30 = vadd.f32 %v7828_v6, %v7609_v19  ;;  %v7829_v61 = vrot.slane %v7078_v14, 2 }
 0x5fa   : > { %v8361_v12 = vmul.f32 %v8278_v29, %v8195_v49  ;;  %v6570_v47 = vpop.f32.mrf.mxu0  ;;  %v9564_v11 = vpop.f32.mrf.mxu1 }
 0x5fb   : > { %v8113_v52 = vadd.f32 %v13686_v21, %v8023_v30  ;;  %v7830_v50 = vsel %vm1746_vm5, %v7827_v58, %v7829_v61  ;;  %v7415_v63 = vrot.slane %v6570_v47, 1 }
 0x5fc   : > { %v8443_v0 = vadd.f32 %v8442_v22, %v8361_v12  ;;  %v8282_v22 = vld [vmem:[%s13948_s7 + $0x1b0] sm:$0xff] }
 0x5fd   : > { %v8196_v38 = vmax.f32 %v8113_v52, 0.0  ;;  %v7416_v36 = vsel %vm1242_vm3, %v7413_v53, %v7415_v63  ;;  %v6574_v3 = vpop.f32.mrf.mxu0  ;;  %v7083_v2 = vpop.f32.mrf.mxu1 }
 0x5fe   : > { %v7610_v20 = vadd.f32 %v7416_v36, %v6562_v45  ;;  %v7831_v23 = vrot.slane %v7083_v2, 2 }
 0x5ff   : > { %v8362_v48 = vmul.f32 %v8279_v13, %v8196_v38  ;;  %v6576_v10 = vpop.f32.mrf.mxu0  ;;  %v9567_v28 = vpop.f32.mrf.mxu1 }
 0x600   : > { %v8024_v34 = vadd.f32 %v7830_v50, %v7610_v20  ;;  %v7832_v25 = vsel %vm1746_vm5, %v7829_v61, %v7831_v23  ;;  %v7417_v60 = vrot.slane %v6576_v10, 1  ;;  %v8283_v50 = vld [vmem:[%s13948_s7 + $0x1b8] sm:$0xff] }
 0x601   : > { %v8444_v4 = vadd.f32 %v8443_v0, %v8362_v48 }
 0x602   : > { %v8114_v42 = vadd.f32 %v13686_v21, %v8024_v34  ;;  %v7418_v17 = vsel %vm1242_vm3, %v7415_v63, %v7417_v60 }
 0x603   : > { %v7611_v41 = vadd.f32 %v7418_v17, %v6568_v46 }
 0x604   : > { %v8197_v56 = vmax.f32 %v8114_v42, 0.0  ;;  %v6580_v59 = vpop.f32.mrf.mxu0  ;;  %v7088_v39 = vpop.f32.mrf.mxu1 }
 0x605   : > { %v8025_v24 = vadd.f32 %v7832_v25, %v7611_v41  ;;  %v7833_v43 = vrot.slane %v7088_v39, 2 }
 0x606   : > { %v8363_v62 = vmul.f32 %v8280_v31, %v8197_v56  ;;  %v6582_v18 = vpop.f32.mrf.mxu0  ;;  %v9570_v7 = vpop.f32.mrf.mxu1 }
 0x607   : > { %v8115_v32 = vadd.f32 %v13686_v21, %v8025_v24  ;;  %v7834_v54 = vsel %vm1746_vm5, %v7831_v23, %v7833_v43  ;;  %v7419_v40 = vrot.slane %v6582_v18, 1 }
 0x608   : > { %v8445_v5 = vadd.f32 %v8444_v4, %v8363_v62  ;;  %v8284_v4 = vld [vmem:[%s13948_s7 + $0x1c0] sm:$0xff] }
 0x609   : > { %v8198_v33 = vmax.f32 %v8115_v32, 0.0  ;;  %v7420_v27 = vsel %vm1242_vm3, %v7417_v60, %v7419_v40  ;;  %v6586_v44 = vpop.f32.mrf.mxu0  ;;  %v7093_v16 = vpop.f32.mrf.mxu1 }
 0x60a   : > { %v7612_v26 = vadd.f32 %v7420_v27, %v6574_v3  ;;  %v7835_v45 = vrot.slane %v7093_v16, 2 }
 0x60b   : > { %v8364_v9 = vmul.f32 %v8281_v51, %v8198_v33  ;;  %v6588_v15 = vpop.f32.mrf.mxu0  ;;  %v9573_v58 = vpop.f32.mrf.mxu1 }
 0x60c   : > { %v8026_v57 = vadd.f32 %v7834_v54, %v7612_v26  ;;  %v7836_v37 = vsel %vm1746_vm5, %v7833_v43, %v7835_v45  ;;  %v7421_v8 = vrot.slane %v6588_v15, 1  ;;  %v8285_v54 = vld [vmem:[%s13948_s7 + $0x1c8] sm:$0xff] }
 0x60d   : > { %v8446_v55 = vadd.f32 %v8445_v5, %v8364_v9 }
 0x60e   : > { %v8116_v6 = vadd.f32 %v13686_v21, %v8026_v57  ;;  %v7422_v53 = vsel %vm1242_vm3, %v7419_v40, %v7421_v8 }
 0x60f   : > { %v7613_v1 = vadd.f32 %v7422_v53, %v6580_v59 }
 0x610   : > { %v8199_v35 = vmax.f32 %v8116_v6, 0.0  ;;  %v6592_v29 = vpop.f32.mrf.mxu0  ;;  %v7098_v19 = vpop.f32.mrf.mxu1 }
 0x611   : > { %v8027_v49 = vadd.f32 %v7836_v37, %v7613_v1  ;;  %v7837_v46 = vrot.slane %v7098_v19, 2 }
 0x612   : > { %v8365_v14 = vmul.f32 %v8282_v22, %v8199_v35  ;;  %v6594_v30 = vpop.f32.mrf.mxu0  ;;  %v9576_v61 = vpop.f32.mrf.mxu1 }
 0x613   : > { %v8117_v12 = vadd.f32 %v13686_v21, %v8027_v49  ;;  %v7838_v47 = vsel %vm1746_vm5, %v7835_v45, %v7837_v46  ;;  %v7423_v11 = vrot.slane %v6594_v30, 1 }
 0x614   : > { %v8447_v52 = vadd.f32 %v8446_v55, %v8365_v14  ;;  %v8286_v55 = vld [vmem:[%s13948_s7 + $0x1d0] sm:$0xff] }
 0x615   : > { %v8200_v63 = vmax.f32 %v8117_v12, 0.0  ;;  %v7424_v0 = vsel %vm1242_vm3, %v7421_v8, %v7423_v11  ;;  %v6598_v13 = vpop.f32.mrf.mxu0  ;;  %v7103_v38 = vpop.f32.mrf.mxu1 }
 0x616   : > { %v7614_v36 = vadd.f32 %v7424_v0, %v6586_v44  ;;  %v7839_v3 = vrot.slane %v7103_v38, 2 }
 0x617   : > { %v8366_v2 = vmul.f32 %v8283_v50, %v8200_v63  ;;  %v6600_v20 = vpop.f32.mrf.mxu0  ;;  %v9579_v23 = vpop.f32.mrf.mxu1 }
 0x618   : > { %v8028_v48 = vadd.f32 %v7838_v47, %v7614_v36  ;;  %v7840_v10 = vsel %vm1746_vm5, %v7837_v46, %v7839_v3  ;;  %v7425_v28 = vrot.slane %v6600_v20, 1  ;;  %v8287_v47 = vld [vmem:[%s13948_s7 + $0x1d8] sm:$0xff] }
 0x619   : > { %v8448_v34 = vadd.f32 %v8447_v52, %v8366_v2 }
 0x61a   : > { %v8118_v25 = vadd.f32 %v13686_v21, %v8028_v48  ;;  %v7426_v60 = vsel %vm1242_vm3, %v7423_v11, %v7425_v28 }
 0x61b   : > { %v7615_v42 = vadd.f32 %v7426_v60, %v6592_v29 }
 0x61c   : > { %v8201_v17 = vmax.f32 %v8118_v25, 0.0  ;;  %v6604_v31 = vpop.f32.mrf.mxu0  ;;  %v7108_v41 = vpop.f32.mrf.mxu1 }
 0x61d   : > { %v8029_v56 = vadd.f32 %v7840_v10, %v7615_v42  ;;  %v7841_v59 = vrot.slane %v7108_v41, 2 }
 0x61e   : > { %v8367_v39 = vmul.f32 %v8284_v4, %v8201_v17  ;;  %v6606_v24 = vpop.f32.mrf.mxu0  ;;  %v9582_v43 = vpop.f32.mrf.mxu1 }
 0x61f   : > { %v8119_v62 = vadd.f32 %v13686_v21, %v8029_v56  ;;  %v7842_v18 = vsel %vm1746_vm5, %v7839_v3, %v7841_v59  ;;  %v7427_v7 = vrot.slane %v6606_v24, 1 }
 0x620   : > { %v8449_v32 = vadd.f32 %v8448_v34, %v8367_v39  ;;  %v8288_v34 = vld [vmem:[%s13948_s7 + $0x1e0] sm:$0xff] }
 0x621   : > { %v8202_v40 = vmax.f32 %v8119_v62, 0.0  ;;  %v7428_v5 = vsel %vm1242_vm3, %v7425_v28, %v7427_v7  ;;  %v6610_v51 = vpop.f32.mrf.mxu0  ;;  %v7113_v33 = vpop.f32.mrf.mxu1 }
 0x622   : > { %v7616_v27 = vadd.f32 %v7428_v5, %v6598_v13  ;;  %v7843_v44 = vrot.slane %v7113_v33, 2 }
 0x623   : > { %v8368_v16 = vmul.f32 %v8285_v54, %v8202_v40  ;;  %v6612_v26 = vpop.f32.mrf.mxu0  ;;  %v9585_v45 = vpop.f32.mrf.mxu1 }
 0x624   : > { %v8030_v9 = vadd.f32 %v7842_v18, %v7616_v27  ;;  %v7844_v15 = vsel %vm1746_vm5, %v7841_v59, %v7843_v44  ;;  %v7429_v58 = vrot.slane %v6612_v26, 1  ;;  %v8289_v18 = vld [vmem:[%s13948_s7 + $0x1e8] sm:$0xff] }
 0x625   : > { %v8450_v57 = vadd.f32 %v8449_v32, %v8368_v16 }
 0x626   : > { %v8120_v37 = vadd.f32 %v13686_v21, %v8030_v9  ;;  %v7430_v8 = vsel %vm1242_vm3, %v7427_v7, %v7429_v58 }
 0x627   : > { %v7617_v6 = vadd.f32 %v7430_v8, %v6604_v31 }
 0x628   : > { %v8203_v53 = vmax.f32 %v8120_v37, 0.0  ;;  %v6616_v22 = vpop.f32.mrf.mxu0  ;;  %v7118_v1 = vpop.f32.mrf.mxu1 }
 0x629   : > { %v8031_v35 = vadd.f32 %v7844_v15, %v7617_v6  ;;  %v7845_v29 = vrot.slane %v7118_v1, 2 }
 0x62a   : > { %v8369_v19 = vmul.f32 %v8286_v55, %v8203_v53  ;;  %v6618_v49 = vpop.f32.mrf.mxu0  ;;  %v9588_v46 = vpop.f32.mrf.mxu1 }
 0x62b   : > { %v8121_v14 = vadd.f32 %v13686_v21, %v8031_v35  ;;  %v7846_v30 = vsel %vm1746_vm5, %v7843_v44, %v7845_v29  ;;  %v7431_v61 = vrot.slane %v6618_v49, 1 }
 0x62c   : > { %v8451_v12 = vadd.f32 %v8450_v57, %v8369_v19  ;;  %v8290_v57 = vld [vmem:[%s13948_s7 + $0x1f0] sm:$0xff] }
 0x62d   : > { %v8204_v11 = vmax.f32 %v8121_v14, 0.0  ;;  %v7432_v52 = vsel %vm1242_vm3, %v7429_v58, %v7431_v61  ;;  %v6622_v50 = vpop.f32.mrf.mxu0  ;;  %v7123_v63 = vpop.f32.mrf.mxu1 }
 0x62e   : > { %v7618_v0 = vadd.f32 %v7432_v52, %v6610_v51  ;;  %v7847_v13 = vrot.slane %v7123_v63, 2 }
 0x62f   : > { %v8370_v38 = vmul.f32 %v8287_v47, %v8204_v11  ;;  %v6624_v36 = vpop.f32.mrf.mxu0  ;;  %v9591_v3 = vpop.f32.mrf.mxu1 }
 0x630   : > { %v8032_v2 = vadd.f32 %v7846_v30, %v7618_v0  ;;  %v7848_v20 = vsel %vm1746_vm5, %v7845_v29, %v7847_v13  ;;  %v7433_v23 = vrot.slane %v6624_v36, 1  ;;  %v8291_v30 = vld [vmem:[%s13948_s7 + $0x1f8] sm:$0xff] }
 0x631   : > { %v8452_v48 = vadd.f32 %v8451_v12, %v8370_v38 }
 0x632   : > { %v8122_v10 = vadd.f32 %v13686_v21, %v8032_v2  ;;  %v7434_v28 = vsel %vm1242_vm3, %v7431_v61, %v7433_v23 }
 0x633   : > { %v7619_v25 = vadd.f32 %v7434_v28, %v6616_v22 }
 0x634   : > { %v8205_v60 = vmax.f32 %v8122_v10, 0.0  ;;  %v6628_v4 = vpop.f32.mrf.mxu0  ;;  %v7128_v42 = vpop.f32.mrf.mxu1 }
 0x635   : > { %v8033_v17 = vadd.f32 %v7848_v20, %v7619_v25  ;;  %v7849_v31 = vrot.slane %v7128_v42, 2 }
 0x636   : > { %v8371_v41 = vmul.f32 %v8288_v34, %v8205_v60  ;;  %v6630_v56 = vpop.f32.mrf.mxu0  ;;  %v9594_v59 = vpop.f32.mrf.mxu1 }
 0x637   : > { %v8123_v39 = vadd.f32 %v13686_v21, %v8033_v17  ;;  %v7850_v24 = vsel %vm1746_vm5, %v7847_v13, %v7849_v31  ;;  %v7435_v43 = vrot.slane %v6630_v56, 1 }
 0x638   : > { %v8453_v62 = vadd.f32 %v8452_v48, %v8371_v41  ;;  %v8292_v48 = vld [vmem:[%s13948_s7 + $0x200] sm:$0xff] }
 0x639   : > { %v8206_v7 = vmax.f32 %v8123_v39, 0.0  ;;  %v7436_v32 = vsel %vm1242_vm3, %v7433_v23, %v7435_v43  ;;  %v6634_v54 = vpop.f32.mrf.mxu0  ;;  %v7133_v40 = vpop.f32.mrf.mxu1  ;;  %v8293_v39 = vld [vmem:[%s13948_s7 + $0x208] sm:$0xff] }
 0x63a   : > { %v7620_v5 = vadd.f32 %v7436_v32, %v6622_v50  ;;  %v7851_v51 = vrot.slane %v7133_v40, 2 }
 0x63b   : > { %v8372_v33 = vmul.f32 %v8289_v18, %v8206_v7  ;;  %v6636_v27 = vpop.f32.mrf.mxu0  ;;  %v9597_v44 = vpop.f32.mrf.mxu1 }
 0x63c   : > { %v8034_v16 = vadd.f32 %v7850_v24, %v7620_v5  ;;  %v7852_v26 = vsel %vm1746_vm5, %v7849_v31, %v7851_v51  ;;  %v7437_v45 = vrot.slane %v6636_v27, 1  ;;  %v8294_v44 = vld [vmem:[%s13948_s7 + $0x210] sm:$0xff] }
 0x63d   : > { %v8454_v9 = vadd.f32 %v8453_v62, %v8372_v33 }
 0x63e   : > { %v8124_v15 = vadd.f32 %v13686_v21, %v8034_v16  ;;  %v7438_v58 = vsel %vm1242_vm3, %v7435_v43, %v7437_v45 }
 0x63f   : > { %v7621_v37 = vadd.f32 %v7438_v58, %v6628_v4 }
 0x640   : > { %v8207_v8 = vmax.f32 %v8124_v15, 0.0  ;;  %v6640_v55 = vpop.f32.mrf.mxu0  ;;  %v7138_v6 = vpop.f32.mrf.mxu1 }
 0x641   : > { %v8035_v53 = vadd.f32 %v7852_v26, %v7621_v37  ;;  %v7853_v22 = vrot.slane %v7138_v6, 2 }
 0x642   : > { %v8373_v1 = vmul.f32 %v8290_v57, %v8207_v8  ;;  %v6642_v35 = vpop.f32.mrf.mxu0  ;;  %v9600_v29 = vpop.f32.mrf.mxu1 }
 0x643   : > { %v8125_v19 = vadd.f32 %v13686_v21, %v8035_v53  ;;  %v7854_v49 = vsel %vm1746_vm5, %v7851_v51, %v7853_v22  ;;  %v7439_v46 = vrot.slane %v6642_v35, 1 }
 0x644   : > { %v8455_v14 = vadd.f32 %v8454_v9, %v8373_v1 }
 0x645   : > { %v8208_v61 = vmax.f32 %v8125_v19, 0.0  ;;  %v7440_v12 = vsel %vm1242_vm3, %v7437_v45, %v7439_v46  ;;  %v6646_v47 = vpop.f32.mrf.mxu0  ;;  %v7143_v11 = vpop.f32.mrf.mxu1 }
 0x646   : > { %v7622_v52 = vadd.f32 %v7440_v12, %v6634_v54  ;;  %v7855_v50 = vrot.slane %v7143_v11, 2 }
 0x647   : > { %v8374_v63 = vmul.f32 %v8291_v30, %v8208_v61  ;;  %v6648_v0 = vpop.f32.mrf.mxu0  ;;  %v9603_v13 = vpop.f32.mrf.mxu1 }
 0x648   : > { %v8036_v38 = vadd.f32 %v7854_v49, %v7622_v52  ;;  %v7856_v36 = vsel %vm1746_vm5, %v7853_v22, %v7855_v50  ;;  %v7441_v3 = vrot.slane %v6648_v0, 1 }
 0x649   : > { %v8456_v2 = vadd.f32 %v8455_v14, %v8374_v63 }
 0x64a   : > { %v8126_v20 = vadd.f32 %v13686_v21, %v8036_v38  ;;  %v7442_v23 = vsel %vm1242_vm3, %v7439_v46, %v7441_v3 }
 0x64b   : > { %v7623_v10 = vadd.f32 %v7442_v23, %v6640_v55 }
 0x64c   : > { %v8209_v28 = vmax.f32 %v8126_v20, 0.0 }
 0x64d   : > { %v6652_v34 = vpop.f32.mrf.mxu0  ;;  %v13772_v25 = vpop.f32.mrf.mxu1  ;;  %v8037_v60 = vadd.f32 %v7856_v36, %v7623_v10 }
 0x64e   : > { %v8375_v4 = vmul.f32 %v8292_v48, %v8209_v28  ;;  %v7857_v41 = vrot.slane %v13772_v25, 2 }
 0x64f   : > { %v6654_v42 = vpop.f32.mrf.mxu0  ;;  %v9606_v17 = vpop.f32.mrf.mxu1  ;;  %v8127_v31 = vadd.f32 %v13686_v21, %v8037_v60 }
 0x650   : > { %v7443_v56 = vrot.slane %v6654_v42, 1  ;;  %v8457_v59 = vadd.f32 %v8456_v2, %v8375_v4  ;;  %v7858_v54 = vsel %vm1746_vm5, %v7855_v50, %v7857_v41 }
 0x651   : > { %v8210_v24 = vmax.f32 %v8127_v31, 0.0  ;;  %v13780_v62 = vpop.f32.mrf.mxu1  ;;  %v6658_v7 = vpop.f32.mrf.mxu0 }
 0x652   : > { %v7444_v43 = vsel %vm1242_vm3, %v7441_v3, %v7443_v56  ;;  %v7859_v3 = vrot.slane %v13780_v62, 2 }
 0x653   : > { %v7624_v18 = vadd.f32 %v7444_v43, %v6646_v47  ;;  %v8376_v32 = vmul.f32 %v8293_v39, %v8210_v24  ;;  %v9609_v40 = vpop.f32.mrf.mxu1  ;;  %v6660_v27 = vpop.f32.mrf.mxu0 }
 0x654   : > { %v7445_v50 = vrot.slane %v6660_v27, 1  ;;  %v7860_v60 = vsel %vm1746_vm5, %v7857_v41, %v7859_v3 }
 0x655   : > { %v8038_v5 = vadd.f32 %v7858_v54, %v7624_v18  ;;  %v8458_v51 = vadd.f32 %v8457_v59, %v8376_v32 }
 0x656   : > { %v7446_v0 = vsel %vm1242_vm3, %v7443_v56, %v7445_v50 }
 0x657   : > { %v8128_v33 = vadd.f32 %v13686_v21, %v8038_v5  ;;  %v7625_v23 = vadd.f32 %v7446_v0, %v6652_v34 }
 0x659   : > { %v8211_v16 = vmax.f32 %v8128_v33, 0.0  ;;  %v6664_v26 = vpop.f32.mrf.mxu0  ;;  %v7158_v45 = vpop.f32.mrf.mxu1  ;;  %v8039_v42 = vadd.f32 %v7860_v60, %v7625_v23 }
 0x65a   : > { %v7861_v17 = vrot.slane %v7158_v45, 2 }
 0x65b   : > { %v8377_v9 = vmul.f32 %v8294_v44, %v8211_v16  ;;  %v9612_v15 = vpop.f32.mrf.mxu1  ;;  %v6666_v58 = vpop.f32.mrf.mxu0  ;;  %v8129_v32 = vadd.f32 %v13686_v21, %v8039_v42 }
 0x65c   : > { %v7447_v36 = vrot.slane %v6666_v58, 1  ;;  %v7862_v41 = vsel %vm1746_vm5, %v7859_v3, %v7861_v17 }
 0x65d   : > { %v13787_v57 = vadd.f32 %v8458_v51, %v8377_v9  ;;  %v13789_v37 = vpop.f32.mrf.mxu1  ;;  %v6670_v8 = vpop.f32.mrf.mxu0 }
 0x65e   : > { %v7448_v10 = vsel %vm1242_vm3, %v7445_v50, %v7447_v36  ;;  %v7863_v24 = vrot.slane %v13789_v37, 2  ;;  %v8212_v37 = vmax.f32 %v8129_v32, 0.0 }
 0x65f   : > { %v9615_v55 = vpop.f32.mrf.mxu1  ;;  %v6672_v6 = vpop.f32.mrf.mxu0  ;;  %v7626_v39 = vadd.f32 %v7448_v10, %v6658_v7  ;;  %v8296_v10 = vld [vmem:[%s13948_s7 + $0x220] sm:$0xff] }
 0x660   : > { %v7449_v48 = vrot.slane %v6672_v6, 1  ;;  %v7864_v44 = vsel %vm1746_vm5, %v7861_v17, %v7863_v24 }
 0x661   : > { %v8040_v5 = vadd.f32 %v7862_v41, %v7626_v39 }
 0x662   : > { %v7450_v31 = vsel %vm1242_vm3, %v7447_v36, %v7449_v48 }
 0x663   : > { %v7627_v43 = vadd.f32 %v7450_v31, %v6664_v26  ;;  %v8130_v6 = vadd.f32 %v13686_v21, %v8040_v5 }
 0x665   : > { %v6676_v53 = vpop.f32.mrf.mxu0  ;;  %v13791_v22 = vpop.f32.mrf.mxu1  ;;  %v8041_v26 = vadd.f32 %v7864_v44, %v7627_v43  ;;  %v8213_v23 = vmax.f32 %v8130_v6, 0.0 }
 0x666   : > { %v7865_v54 = vrot.slane %v13791_v22, 2 }
 0x667   : > { %v6678_v1 = vpop.f32.mrf.mxu0  ;;  %v9618_v35 = vpop.f32.mrf.mxu1  ;;  %v8379_v43 = vmul.f32 %v8296_v10, %v8213_v23 }
 0x668   : > { %v7451_v28 = vrot.slane %v6678_v1, 1  ;;  %v7866_v55 = vsel %vm1746_vm5, %v7863_v24, %v7865_v54 }
 0x669   : > { %v13793_v29 = vpop.f32.mrf.mxu1  ;;  %v13795_v19 = vpop.f32.mrf.mxu0 }
 0x66a   : > { %v7452_v34 = vsel %vm1242_vm3, %v7449_v48, %v7451_v28  ;;  %v7867_v16 = vrot.slane %v13793_v29, 2 }
 0x66b   : > { %v9621_v49 = vpop.f32.mrf.mxu1  ;;  %v6684_v46 = vpop.f32.mrf.mxu0  ;;  %v7628_v51 = vadd.f32 %v7452_v34, %v6670_v8 }
 0x66c   : > { %v7453_v56 = vrot.slane %v6684_v46, 1  ;;  %v7868_v29 = vsel %vm1746_vm5, %v7865_v54, %v7867_v16 }
 0x66d   : > { %v8042_v22 = vadd.f32 %v7866_v55, %v7628_v51 }
 0x66e   : > { %v7454_v40 = vsel %vm1242_vm3, %v7451_v28, %v7453_v56 }
 0x66f   : > { %v7629_v45 = vadd.f32 %v7454_v40, %v6676_v53  ;;  %v8295_v53 = vld [vmem:[%s13948_s7 + $0x218] sm:$0xff] }
 0x671   : > { %v13797_v14 = vpop.f32.mrf.mxu0  ;;  %v13799_v30 = vpop.f32.mrf.mxu1  ;;  %v8043_v50 = vadd.f32 %v7868_v29, %v7629_v45  ;;  %v8300_v29 = vld [vmem:[%s13948_s7 + $0x240] sm:$0xff] }
 0x672   : > { %v7869_v1 = vrot.slane %v13799_v30, 2 }
 0x673   : > { %v6690_v61 = vpop.f32.mrf.mxu0  ;;  %v9624_v12 = vpop.f32.mrf.mxu1  ;;  %v8133_v17 = vadd.f32 %v13686_v21, %v8043_v50 }
 0x674   : > { %v7455_v62 = vrot.slane %v6690_v61, 1  ;;  %v7870_v48 = vsel %vm1746_vm5, %v7867_v16, %v7869_v1 }
 0x675   : > { %v13801_v47 = vpop.f32.mrf.mxu1  ;;  %v13803_v11 = vpop.f32.mrf.mxu0 }
 0x676   : > { %v7456_v9 = vsel %vm1242_vm3, %v7453_v56, %v7455_v62 }
 0x677   : > { %v9627_v52 = vpop.f32.mrf.mxu1  ;;  %v6696_v63 = vpop.f32.mrf.mxu0  ;;  %v7630_v49 = vadd.f32 %v7456_v9, %v13795_v19  ;;  %v8132_v19 = vadd.f32 %v13686_v21, %v8042_v22 }
 0x678   : > { %v7457_v33 = vrot.slane %v6696_v63, 1  ;;  %v8131_v52 = vadd.f32 %v13686_v21, %v8041_v26  ;;  %v7871_v63 = vrot.slane %v13801_v47, 2 }
 0x679   : > { %v8044_v28 = vadd.f32 %v7870_v48, %v7630_v49  ;;  %v8301_v48 = vld [vmem:[%s13948_s7 + $0x248] sm:$0xff] }
 0x67a   : > { %v7458_v35 = vsel %vm1242_vm3, %v7455_v62, %v7457_v33  ;;  %v8214_v42 = vmax.f32 %v8131_v52, 0.0  ;;  %v7872_v31 = vsel %vm1746_vm5, %v7869_v1, %v7871_v63  ;;  %v8215_v62 = vmax.f32 %v8132_v19, 0.0 }
 0x67b   : > { %v7631_v30 = vadd.f32 %v7458_v35, %v13797_v14  ;;  %v8134_v54 = vadd.f32 %v13686_v21, %v8044_v28 }
 0x67d   : > { %v13806_v13 = vpop.f32.mrf.mxu0  ;;  %v13808_v38 = vpop.f32.mrf.mxu1  ;;  %v8045_v39 = vadd.f32 %v7872_v31, %v7631_v30  ;;  %v8217_v6 = vmax.f32 %v8134_v54, 0.0 }
 0x67e   : > { %v7873_v47 = vrot.slane %v13808_v38, 2 }
 0x67f   : > { %v13811_v2 = vpop.f32.mrf.mxu0  ;;  %v9630_v20 = vpop.f32.mrf.mxu1  ;;  %v8135_v26 = vadd.f32 %v13686_v21, %v8045_v39  ;;  %v8383_v19 = vmul.f32 %v8300_v29, %v8217_v6 }
 0x680   : > { %v7459_v8 = vrot.slane %v13811_v2, 1  ;;  %v8378_v20 = vmul.f32 %v8295_v53, %v8212_v37  ;;  %v7874_v40 = vsel %vm1746_vm5, %v7871_v63, %v7873_v47 }
 0x681   : > { %v13814_v25 = vpop.f32.mrf.mxu1  ;;  %v13817_v4 = vpop.f32.mrf.mxu0  ;;  %v8218_v63 = vmax.f32 %v8135_v26, 0.0  ;;  %v8305_v26 = vld [vmem:[%s13948_s7 + $0x268] sm:$0xff] }
 0x682   : > { %v7460_v0 = vsel %vm1242_vm3, %v7457_v33, %v7459_v8  ;;  %v7875_v24 = vrot.slane %v13814_v25, 2  ;;  %v8460_v38 = vadd.f32 %v13787_v57, %v8378_v20  ;;  %v8216_v57 = vmax.f32 %v8133_v17, 0.0 }
 0x683   : > { %v9633_v59 = vpop.f32.mrf.mxu1  ;;  %v6708_v18 = vpop.f32.mrf.mxu0  ;;  %v7632_v56 = vadd.f32 %v7460_v0, %v13803_v11  ;;  %v8298_v11 = vld [vmem:[%s13948_s7 + $0x230] sm:$0xff]  ;;  %v8384_v31 = vmul.f32 %v8301_v48, %v8218_v63 }
 0x684   : > { %v7461_v46 = vrot.slane %v6708_v18, 1  ;;  %v8297_v59 = vld [vmem:[%s13948_s7 + $0x228] sm:$0xff]  ;;  %v7876_v45 = vsel %vm1746_vm5, %v7873_v47, %v7875_v24  ;;  %v8381_v37 = vmul.f32 %v8298_v11, %v8215_v62 }
 0x685   : > { %v8380_v51 = vmul.f32 %v8297_v59, %v8214_v42  ;;  %v8046_v33 = vadd.f32 %v7874_v40, %v7632_v56  ;;  %v8302_v42 = vld [vmem:[%s13948_s7 + $0x250] sm:$0xff]  ;;  %v8304_v40 = vld [vmem:[%s13948_s7 + $0x260] sm:$0xff] }
 0x686   : > { %v7462_v14 = vsel %vm1242_vm3, %v7459_v8, %v7461_v46 }
 0x687   : > { %v7633_v18 = vadd.f32 %v7462_v14, %v13806_v13  ;;  %v8136_v49 = vadd.f32 %v13686_v21, %v8046_v33 }
 0x689   : > { %v13826_v27 = vpop.f32.mrf.mxu0  ;;  %v13828_v7 = vpop.f32.mrf.mxu1  ;;  %v8047_v55 = vadd.f32 %v7876_v45, %v7633_v18  ;;  %v8219_v10 = vmax.f32 %v8136_v49, 0.0 }
 0x68a   : > { %v7877_v25 = vrot.slane %v13828_v7, 2  ;;  %v8299_v7 = vld [vmem:[%s13948_s7 + $0x238] sm:$0xff] }
 0x68b   : > { %v6714_v15 = vpop.f32.mrf.mxu0  ;;  %v9636_v58 = vpop.f32.mrf.mxu1  ;;  %v8382_v50 = vmul.f32 %v8299_v7, %v8216_v57  ;;  %v8385_v18 = vmul.f32 %v8302_v42, %v8219_v10 }
 0x68c   : > { %v7463_v36 = vrot.slane %v6714_v15, 1  ;;  %v8461_v58 = vadd.f32 %v8460_v38, %v8379_v43  ;;  %v8303_v38 = vld [vmem:[%s13948_s7 + $0x258] sm:$0xff] }
 0x68d   : > { %v6718_v61 = vpop.f32.mrf.mxu0  ;;  %v13843_v12 = vpop.f32.mrf.mxu1 }
 0x68e   : > { %v7464_v34 = vsel %vm1242_vm3, %v7461_v46, %v7463_v36  ;;  %v7879_v9 = vrot.slane %v13843_v12, 2  ;;  %v8462_v52 = vadd.f32 %v8461_v58, %v8380_v51 }
 0x68f   : > { %v6720_v3 = vpop.f32.mrf.mxu0  ;;  %v9639_v2 = vpop.f32.mrf.mxu1  ;;  %v7634_v44 = vadd.f32 %v7464_v34, %v13817_v4  ;;  %v7878_v4 = vsel %vm1746_vm5, %v7875_v24, %v7877_v25 }
 0x690   : > { %v7465_v60 = vrot.slane %v6720_v3, 1  ;;  %v8463_v23 = vadd.f32 %v8462_v52, %v8381_v37 }
 0x691   : > { %v8048_v46 = vadd.f32 %v7878_v4, %v7634_v44 }
 0x692   : > { %v7466_v5 = vsel %vm1242_vm3, %v7463_v36, %v7465_v60  ;;  %v8137_v36 = vadd.f32 %v13686_v21, %v8047_v55 }
 0x693   : > { %v7635_v8 = vadd.f32 %v7466_v5, %v13826_v27  ;;  %v7880_v27 = vsel %vm1746_vm5, %v7877_v25, %v7879_v9  ;;  %v8138_v28 = vadd.f32 %v13686_v21, %v8048_v46  ;;  %v8307_v46 = vld [vmem:[%s13948_s7 + $0x278] sm:$0xff] }
 0x694   : > { %v8220_v56 = vmax.f32 %v8137_v36, 0.0 }
 0x695   : > { %v6724_v32 = vpop.f32.mrf.mxu0  ;;  %v7208_v41 = vpop.f32.mrf.mxu1  ;;  %v8049_v3 = vadd.f32 %v7880_v27, %v7635_v8  ;;  %v8306_v8 = vld [vmem:[%s13948_s7 + $0x270] sm:$0xff] }
 0x696   : > { %v7881_v22 = vrot.slane %v7208_v41, 2  ;;  %v8221_v41 = vmax.f32 %v8138_v28, 0.0  ;;  %v8386_v57 = vmul.f32 %v8303_v38, %v8220_v56  ;;  %v8310_v28 = vld [vmem:[%s13948_s7 + $0x290] sm:$0xf] }
 0x697   : > { %v6726_v13 = vpop.f32.mrf.mxu0  ;;  %v9642_v16 = vpop.f32.mrf.mxu1  ;;  %v8139_v59 = vadd.f32 %v13686_v21, %v8049_v3 }
 0x698   : > { %v7467_v15 = vrot.slane %v6726_v13, 1 }
 0x699   : > { %v6730_v35 = vpop.f32.mrf.mxu0  ;;  %v7213_v53 = vpop.f32.mrf.mxu1  ;;  %v8222_v33 = vmax.f32 %v8139_v59, 0.0 }
 0x69a   : > { %v7468_v1 = vsel %vm1242_vm3, %v7465_v60, %v7467_v15  ;;  %v7883_v2 = vrot.slane %v7213_v53, 2  ;;  %v8464_v60 = vadd.f32 %v8463_v23, %v8382_v50 }
 0x69b   : > { %v7636_v12 = vadd.f32 %v7468_v1, %v6718_v61  ;;  %v6732_v30 = vpop.f32.mrf.mxu0  ;;  %v9645_v0 = vpop.f32.mrf.mxu1  ;;  %v7882_v61 = vsel %vm1746_vm5, %v7879_v9, %v7881_v22  ;;  %v8388_v53 = vmul.f32 %v8305_v26, %v8222_v33 }
 0x69c   : > { %v7469_v20 = vrot.slane %v6732_v30, 1  ;;  %v7884_v39 = vsel %vm1746_vm5, %v7881_v22, %v7883_v2  ;;  %v8465_v62 = vadd.f32 %v8464_v60, %v8383_v19  ;;  %v8308_v30 = vld [vmem:[%s13948_s7 + $0x280] sm:$0xff] }
 0x69d   : > { %v8050_v47 = vadd.f32 %v7882_v61, %v7636_v12 }
 0x69e   : > { %v7470_v14 = vsel %vm1242_vm3, %v7467_v15, %v7469_v20  ;;  %v8466_v51 = vadd.f32 %v8465_v62, %v8384_v31  ;;  %v8387_v15 = vmul.f32 %v8304_v40, %v8221_v41  ;;  %v8485_v41 = vld [vmem:[#allocation2] sm:$0x1] }
 0x69f   : > { %v7637_v17 = vadd.f32 %v7470_v14, %v6724_v32  ;;  %v8140_v11 = vadd.f32 %v13686_v21, %v8050_v47  ;;  %v8309_v14 = vld [vmem:[%s13948_s7 + $0x288] sm:$0xff] }
 0x6a0   : > { %v8467_v9 = vadd.f32 %v8466_v51, %v8385_v18 }
 0x6a1   : > { %v6736_v24 = vpop.f32.mrf.mxu0  ;;  %v7218_v34 = vpop.f32.mrf.mxu1  ;;  %v8051_v43 = vadd.f32 %v7884_v39, %v7637_v17  ;;  %v8223_v58 = vmax.f32 %v8140_v11, 0.0 }
 0x6a2   : > { %v7885_v25 = vrot.slane %v7218_v34, 2  ;;  %v8468_v1 = vadd.f32 %v8467_v9, %v8386_v57 }
 0x6a3   : > { %v6738_v54 = vpop.f32.mrf.mxu0  ;;  %v9648_v32 = vpop.f32.mrf.mxu1  ;;  %v8141_v44 = vadd.f32 %v13686_v21, %v8051_v43  ;;  %v8389_v50 = vmul.f32 %v8306_v8, %v8223_v58 }
 0x6a4   : > { %v7471_v5 = vrot.slane %v6738_v54, 1  ;;  %v7886_v6 = vsel %vm1746_vm5, %v7883_v2, %v7885_v25  ;;  %v8469_v52 = vadd.f32 %v8468_v1, %v8387_v15 }
 0x6a5   : > { %v6742_v13 = vpop.f32.mrf.mxu0  ;;  %v7223_v16 = vpop.f32.mrf.mxu1  ;;  %v8224_v29 = vmax.f32 %v8141_v44, 0.0 }
 0x6a6   : > { %v7472_v45 = vsel %vm1242_vm3, %v7469_v20, %v7471_v5  ;;  %v7887_v4 = vrot.slane %v7223_v16, 2  ;;  %v8470_v3 = vadd.f32 %v8469_v52, %v8388_v53 }
 0x6a7   : > { %v7638_v37 = vadd.f32 %v7472_v45, %v6730_v35  ;;  %v6744_v7 = vpop.f32.mrf.mxu0  ;;  %v9651_v55 = vpop.f32.mrf.mxu1  ;;  %v8390_v2 = vmul.f32 %v8307_v46, %v8224_v29 }
 0x6a8   : > { %v7473_v22 = vrot.slane %v6744_v7, 1  ;;  %v7888_v0 = vsel %vm1746_vm5, %v7885_v25, %v7887_v4  ;;  %v8471_v48 = vadd.f32 %v8470_v3, %v8389_v50 }
 0x6a9   : > { %v8052_v49 = vadd.f32 %v7886_v6, %v7638_v37 }
 0x6aa   : > { %v7474_v35 = vsel %vm1242_vm3, %v7471_v5, %v7473_v22  ;;  %v7640_v12 = vadd.f32 %v7473_v22, %v6742_v13  ;;  %v8472_v60 = vadd.f32 %v8471_v48, %v8390_v2 }
 0x6ab   : > { %v8142_v63 = vadd.f32 %v13686_v21, %v8052_v49  ;;  %v7639_v27 = vadd.f32 %v7474_v35, %v6736_v24 }
 0x6ac   : > { %v8054_v36 = vadd.f32 %v7887_v4, %v7640_v12 }
 0x6ad   : > { %v8225_v20 = vmax.f32 %v8142_v63, 0.0  ;;  %v8053_v23 = vadd.f32 %v7888_v0, %v7639_v27 }
 0x6ae   : > { %v8144_v19 = vadd.f32 %v13686_v21, %v8054_v36 }
 0x6af   : > { %v8391_v61 = vmul.f32 %v8308_v30, %v8225_v20  ;;  %v8143_v10 = vadd.f32 %v13686_v21, %v8053_v23 }
 0x6b0   : > { %v8227_v47 = vmax.f32 %v8144_v19, 0.0 }
 0x6b1   : > { %v8226_v42 = vmax.f32 %v8143_v10, 0.0  ;;  %v8473_v56 = vadd.f32 %v8472_v60, %v8391_v61 }
 0x6b2   : > { %v8393_v17 = vmul.f32 %v8310_v28, %v8227_v47 }
 0x6b3   : > { %v8392_v31 = vmul.f32 %v8309_v14, %v8226_v42 }
 0x6b4   : > { %v8475_v39 = vsel %vm2754_vm4, %v8393_v17, 0.0 }
 0x6b5   : > { %v8474_v59 = vadd.f32 %v8473_v56, %v8392_v31 }
 0x6b7   : > { %v8476_v24 = vadd.f32 %v8475_v39, %v8474_v59 }
 0x6b9   : > { %v8477_v21 = vrot.slane %v8476_v24, 4 }
 0x6bb   : > { %v8478_v34 = vadd.f32 %v8477_v21, %v8476_v24 }
 0x6bd   : > { %v8479_v38 = vrot.slane %v8478_v34, 2 }
 0x6bf   : > { %v8480_v43 = vadd.f32 %v8479_v38, %v8478_v34 }
 0x6c1   : > { %v8481_v62 = vrot.slane %v8480_v43, 1 }
 0x6c3   : > { %v8482_v18 = vadd.f32 %v8481_v62, %v8480_v43 }
 0x6c5   : > { %8483 = vadd.xlane.f32.xlu1 %v8482_v18 }
 0x74e   : > { %v8484_v11 = vpop.xlane.xlu1 %8483 }
 0x74f   : > { %v8486_v54 = vadd.f32 %v8485_v41, %v8484_v11 }
 0x751   : > { %8488 = vst.msk [vmem:[%s330_s28] sm:$0x1] %vm8487_vm9, %v8486_v54 }
 0x752 PF: > { %s21_s11 = sadd.s32 1, %s9685_s11  }
 0x753   : > { %p18_p4 = scmp.ge.s32.totalorder %s21_s11, 4  }
 0x755   :  { %20 = sbr.rel (!%p18_p4) target bundleno = 3 (0x3), region = 86 }

</bundles_post_ra>
